<compile_context>
chip_gen: v7x
topology: tpu7x:2x2x1
jax: 0.10.0
libtpu: 0.0.40
codegen_flags: <defaults>
</compile_context>

<pallas_src>
import functools

import jax
import jax.numpy as jnp
from jax.experimental import pallas as pl
from jax.experimental.pallas import tpu as pltpu

BN_EPS = 1e-5

# --- sub-pixel decomposition tables for ConvTranspose2d(k=4, stride=2, pad=1) ---
# For output-phase bit r (0/1) and tap bit d (0/1):
#   _K4[r][d]  : index into the 4-wide transposed-conv kernel
#   _OFF[r][d] : window offset into the 1-zero-padded half-res input
_K4 = ((1, 3), (0, 2))
_OFF = ((1, 0), (2, 1))
_PHASES = ((0, 0), (0, 1), (1, 0), (1, 1))
_TAPS = ((0, 0), (0, 1), (1, 0), (1, 1))


def _compiler_params():
    return pltpu.CompilerParams(
        dimension_semantics=("parallel",),
        vmem_limit_bytes=32 * 1024 * 1024,
    )


# ---------------------------------------------------------------------------
# Fused Linear -> BatchNorm1d (batch stats) -> ReLU, column-tiled
# ---------------------------------------------------------------------------
def _fc_bn_relu_kernel(x_ref, w_ref, g_ref, b_ref, o_ref):
    # x: (B, K); w: (K, TN) bf16; g,b: (1, TN) f32; o: (B, TN) bf16
    x = x_ref[...].astype(jnp.bfloat16)
    y = jnp.dot(x, w_ref[...], preferred_element_type=jnp.float32)
    # BN1d over the batch, per column (Linear bias cancels -> omitted).
    mean = jnp.mean(y, axis=0, keepdims=True)
    var = jnp.maximum(jnp.mean(y * y, axis=0, keepdims=True) - mean * mean, 0.0)
    scale = g_ref[...] * jax.lax.rsqrt(var + BN_EPS)
    shift = b_ref[...] - mean * scale
    o_ref[...] = jnp.maximum(y * scale + shift, 0.0).astype(o_ref.dtype)


def fc_bn_relu(x, w_bf16, gamma, beta):
    B, K = x.shape
    N = w_bf16.shape[1]
    if N % 512 == 0:
        TN = 512
    elif N % 256 == 0:
        TN = 256
    elif N % 128 == 0:
        TN = 128
    else:
        TN = N
    grid = (N // TN,)
    return pl.pallas_call(
        _fc_bn_relu_kernel,
        out_shape=jax.ShapeDtypeStruct((B, N), jnp.bfloat16),
        grid_spec=pltpu.PrefetchScalarGridSpec(
            num_scalar_prefetch=0,
            grid=grid,
            in_specs=[
                pl.BlockSpec((B, K), lambda j: (0, 0)),     # activations (resident)
                pl.BlockSpec((K, TN), lambda j: (0, j)),    # streamed weight columns
                pl.BlockSpec((1, TN), lambda j: (0, j)),    # gamma
                pl.BlockSpec((1, TN), lambda j: (0, j)),    # beta
            ],
            out_specs=pl.BlockSpec((B, TN), lambda j: (0, j)),
        ),
        compiler_params=_compiler_params(),
    )(x, w_bf16, gamma.astype(jnp.float32).reshape(1, -1),
      beta.astype(jnp.float32).reshape(1, -1))


# ---------------------------------------------------------------------------
# ConvTranspose2d(128,64,k=4,s=2,p=1) via sub-pixel phases + BN2d partial stats
# ---------------------------------------------------------------------------
def _make_conv1_kernel(h2, w2):
    hw = h2 * w2

    def kernel(x_ref, w_ref, y_ref, s_ref, xp_ref):
        # x_ref : (1, h2, w2, 128) bf16  channel-last half-res activation
        # w_ref : (4, 4, 128, 64)  bf16  [phase, tap, cin, cout]
        # y_ref : (1, 4*h2, w2, 64) f32  phase-major raw conv1 output
        # s_ref : (1, 2, 64) f32         per-batch [sum, sumsq] over phases+space
        # xp_ref: (h2+2, w2+2, 128) bf16 zero-padded input scratch
        xp_ref[...] = jnp.zeros_like(xp_ref)
        xp_ref[1:h2 + 1, 1:w2 + 1, :] = x_ref[0]

        ssum = jnp.zeros((1, 64), jnp.float32)
        ssq = jnp.zeros((1, 64), jnp.float32)
        for p, (ry, rx) in enumerate(_PHASES):
            acc = jnp.zeros((hw, 64), jnp.float32)
            for t, (dy, dx) in enumerate(_TAPS):
                ro = _OFF[ry][dy]
                co = _OFF[rx][dx]
                win = xp_ref[ro:ro + h2, co:co + w2, :].reshape(hw, 128)
                acc = acc + jnp.dot(win, w_ref[p, t],
                                    preferred_element_type=jnp.float32)
            y_ref[0, p * h2:(p + 1) * h2] = acc.reshape(h2, w2, 64)
            ssum = ssum + jnp.sum(acc, axis=0, keepdims=True)
            ssq = ssq + jnp.sum(acc * acc, axis=0, keepdims=True)
        s_ref[0, 0:1] = ssum
        s_ref[0, 1:2] = ssq

    return kernel


def conv1_phases(x4, w_sub):
    B, h2, w2, _ = x4.shape
    return pl.pallas_call(
        _make_conv1_kernel(h2, w2),
        out_shape=(
            jax.ShapeDtypeStruct((B, 4 * h2, w2, 64), jnp.float32),
            jax.ShapeDtypeStruct((B, 2, 64), jnp.float32),
        ),
        grid_spec=pltpu.PrefetchScalarGridSpec(
            num_scalar_prefetch=0,
            grid=(B,),
            in_specs=[
                pl.BlockSpec((1, h2, w2, 128), lambda b: (b, 0, 0, 0)),
                pl.BlockSpec((4, 4, 128, 64), lambda b: (0, 0, 0, 0)),
            ],
            out_specs=(
                pl.BlockSpec((1, 4 * h2, w2, 64), lambda b: (b, 0, 0, 0)),
                pl.BlockSpec((1, 2, 64), lambda b: (b, 0, 0)),
            ),
            scratch_shapes=[pltpu.VMEM((h2 + 2, w2 + 2, 128), jnp.bfloat16)],
        ),
        compiler_params=_compiler_params(),
    )(x4, w_sub)


# ---------------------------------------------------------------------------
# BN2d (global batch stats) + ReLU + ConvTranspose2d(64,1,k=3,p=1), fused
# ---------------------------------------------------------------------------
def _make_conv2_kernel(h2, w2, batch):
    H, W = 2 * h2, 2 * w2
    count = float(batch * H * W)

    def kernel(y_ref, s_ref, gb_ref, wt_ref, b2_ref, o_ref, pp_ref):
        # y_ref : (1, 4*h2, w2, 64) f32  raw conv1 phases for this batch element
        # s_ref : (B, 2, 64) f32         all per-batch partial BN stats
        # gb_ref: (2, 64) f32            bn3 gamma / beta
        # wt_ref: (9, 64) f32            flipped 3x3 conv2 kernel, tap-major
        # b2_ref: (1,) f32 in SMEM       conv2 bias
        # o_ref : (1, 4, h2, w2) f32     output in phase domain
        # pp_ref: (4, h2+2, w2+2, 64)    BN+ReLU'd, zero-padded phases (scratch)
        ssum = jnp.sum(s_ref[:, 0, :], axis=0)
        ssq = jnp.sum(s_ref[:, 1, :], axis=0)
        mean = ssum / count
        var = jnp.maximum(ssq / count - mean * mean, 0.0)
        scale = gb_ref[0] * jax.lax.rsqrt(var + BN_EPS)
        shift = gb_ref[1] - mean * scale

        pp_ref[...] = jnp.zeros_like(pp_ref)
        for p in range(4):
            ph = y_ref[0, p * h2:(p + 1) * h2]               # (h2, w2, 64)
            pp_ref[p, 1:h2 + 1, 1:w2 + 1, :] = jnp.maximum(ph * scale + shift, 0.0)

        # 3x3 stride-1 transposed conv with Cout=1, evaluated in phase domain:
        # each of the 9 kernel taps maps to (source phase, +-1 half-res offset).
        b2 = b2_ref[0]
        for ry in range(2):
            for rx in range(2):
                acc = jnp.zeros((h2, w2), jnp.float32) + b2
                for ky in range(3):
                    ay = ry - 1 + ky
                    sy, dy = ay % 2, ay // 2
                    for kx in range(3):
                        ax = rx - 1 + kx
                        sx, dx = ax % 2, ax // 2
                        src = 2 * sy + sx
                        win = pp_ref[src,
                                     1 + dy:1 + dy + h2,
                                     1 + dx:1 + dx + w2, :]
                        acc = acc + jnp.sum(win * wt_ref[3 * ky + kx], axis=-1)
                o_ref[0, 2 * ry + rx] = acc

    return kernel


def conv2_apply(y1p, stats, gb3, w_taps, bias2, h2, w2):
    B = stats.shape[0]
    H, W = 2 * h2, 2 * w2
    return pl.pallas_call(
        _make_conv2_kernel(h2, w2, B),
        out_shape=jax.ShapeDtypeStruct((B, 4, h2, w2), jnp.float32),
        grid_spec=pltpu.PrefetchScalarGridSpec(
            num_scalar_prefetch=0,
            grid=(B,),
            in_specs=[
                pl.BlockSpec((1, 4 * h2, w2, 64), lambda b: (b, 0, 0, 0)),
                pl.BlockSpec((B, 2, 64), lambda b: (0, 0, 0)),
                pl.BlockSpec((2, 64), lambda b: (0, 0)),
                pl.BlockSpec((9, 64), lambda b: (0, 0)),
                pl.BlockSpec(memory_space=pltpu.MemorySpace.SMEM),
            ],
            out_specs=pl.BlockSpec((1, 4, h2, w2), lambda b: (b, 0, 0, 0)),
            scratch_shapes=[pltpu.VMEM((4, h2 + 2, w2 + 2, 64), jnp.float32)],
        ),
        compiler_params=_compiler_params(),
    )(y1p, stats, gb3, w_taps, bias2)


# ---------------------------------------------------------------------------
# Parameters
# ---------------------------------------------------------------------------
def init_generator_params(key, input_dim, output_shape):
    h2, w2 = output_shape[0] // 2, output_shape[1] // 2
    fc2_out = 128 * h2 * w2
    ks = jax.random.split(key, 8)
    s = 0.02

    def nrm(k, shape):
        return s * jax.random.normal(k, shape, dtype=jnp.float32)

    return {
        # Linear weights stored as (in, out) (PyTorch stores (out, in))
        "w1": nrm(ks[0], (input_dim, 1024)),
        "b1": nrm(ks[1], (1024,)),        # cancels under BN1d
        "bn1_g": jnp.ones((1024,), jnp.float32),
        "bn1_b": jnp.zeros((1024,), jnp.float32),
        "w2": nrm(ks[2], (1024, fc2_out)),
        "b2": nrm(ks[3], (fc2_out,)),     # cancels under BN1d
        "bn2_g": jnp.ones((fc2_out,), jnp.float32),
        "bn2_b": jnp.zeros((fc2_out,), jnp.float32),
        # ConvTranspose2d weights, PyTorch layout (Cin, Cout, K, K)
        "ct1_w": nrm(ks[4], (128, 64, 4, 4)),
        "ct1_b": nrm(ks[5], (64,)),       # cancels under BN2d
        "bn3_g": jnp.ones((64,), jnp.float32),
        "bn3_b": jnp.zeros((64,), jnp.float32),
        "ct2_w": nrm(ks[6], (64, 1, 3, 3)),
        "ct2_b": nrm(ks[7], (1,)),
    }


def prepare_params(params, output_shape):
    """One-time re-layout of the PyTorch-style parameters into kernel form."""
    h2, w2 = output_shape[0] // 2, output_shape[1] // 2
    hw = h2 * w2

    # fc1 (bias cancels under BN)
    w1 = params["w1"].astype(jnp.bfloat16)

    # fc2: permute output features from channel-major (c*hw + s) to
    # spatial-major (s*128 + c) so the conv stage reads channel-last data
    # without any activation transpose (layout plumbing folded into weights).
    w2 = params["w2"].reshape(-1, 128, hw).transpose(0, 2, 1).reshape(-1, 128 * hw)
    w2 = w2.astype(jnp.bfloat16)
    g2 = params["bn2_g"].reshape(128, hw).T.reshape(-1)
    b2 = params["bn2_b"].reshape(128, hw).T.reshape(-1)

    # conv1: sub-pixel decomposition of the stride-2, k=4 transposed conv
    # (bias cancels under BN2d).
    ct1 = params["ct1_w"]                                     # (128, 64, 4, 4)
    wsub = jnp.stack([
        jnp.stack([ct1[:, :, _K4[ry][dy], _K4[rx][dx]] for (dy, dx) in _TAPS],
                  axis=0)
        for (ry, rx) in _PHASES], axis=0).astype(jnp.bfloat16)  # (4,4,128,64)

    gb3 = jnp.stack([params["bn3_g"], params["bn3_b"]], axis=0)  # (2, 64)

    # conv2: stride-1 transposed conv == correlation with the flipped kernel.
    w2t = jnp.flip(params["ct2_w"][:, 0], axis=(1, 2))           # (64, 3, 3)
    w2t = w2t.transpose(1, 2, 0).reshape(9, 64)

    return {
        "w1": w1, "g1": params["bn1_g"], "b1": params["bn1_b"],
        "w2": w2, "g2": g2, "b2": b2,
        "wsub": wsub, "gb3": gb3,
        "w2taps": w2t, "ct2_b": params["ct2_b"],
    }


# ---------------------------------------------------------------------------
# Generator forward
# ---------------------------------------------------------------------------
def generator_forward(kp, X, output_shape):
    B = X.shape[0]
    h2, w2 = output_shape[0] // 2, output_shape[1] // 2
    H, W = 2 * h2, 2 * w2

    # fc: Linear -> BN1d -> ReLU, twice (fused, column-tiled Pallas kernels)
    h1 = fc_bn_relu(X, kp["w1"], kp["g1"], kp["b1"])          # (B, 1024) bf16
    hfc = fc_bn_relu(h1, kp["w2"], kp["g2"], kp["b2"])        # (B, hw*128) bf16

    # view(-1,128,h2,w2) in channel-last form (free reshape; permutation was
    # folded into the fc2 weight columns).
    x4 = hfc.reshape(B, h2, w2, 128)

    # ConvTranspose2d(128,64,4,s=2,p=1) as 4 sub-pixel phases + BN2d stats
    y1p, stats = conv1_phases(x4, kp["wsub"])                 # (B,4*h2,w2,64), (B,2,64)

    # BN2d + ReLU + ConvTranspose2d(64,1,3,p=1), fused (output in phase domain)
    outp = conv2_apply(y1p, stats, kp["gb3"], kp["w2taps"], kp["ct2_b"], h2, w2)

    # Final pixel-shuffle of the tiny (B,4,h2,w2) result back to NCHW.
    out = outp.reshape(B, 2, 2, h2, w2).transpose(0, 3, 1, 4, 2).reshape(B, H, W)
    return out.reshape(B, 1, H, W)


if __name__ == "__main__":
    # Small, module-consistent shapes: latent dim 32, 8x8 grayscale output.
    input_dim = 32
    output_shape = (8, 8)
    batch = 4

    key = jax.random.PRNGKey(0)
    k_param, k_x = jax.random.split(key)
    params = init_generator_params(k_param, input_dim, output_shape)
    kparams = prepare_params(params, output_shape)
    X = jax.random.normal(k_x, (batch, input_dim), dtype=jnp.float32)

    fwd = jax.jit(functools.partial(generator_forward, output_shape=output_shape))
    out = jax.block_until_ready(fwd(kparams, X))

    assert out.shape == (batch, 1, output_shape[0], output_shape[1]), out.shape
    assert bool(jnp.all(jnp.isfinite(out)))
    print("KERNEL_OK")
</pallas_src>

<mosaic_0001>
module attributes {stable_mosaic.version = 11 : i64} {
  func.func @_fc_bn_relu_kernel(%arg0: i32, %arg1: memref<4x32xf32, #tpu.memory_space<vmem>>, %arg2: memref<32x512xbf16, #tpu.memory_space<vmem>>, %arg3: memref<1x512xf32, #tpu.memory_space<vmem>>, %arg4: memref<1x512xf32, #tpu.memory_space<vmem>>, %arg5: memref<4x512xbf16, #tpu.memory_space<vmem>>) attributes {dimension_semantics = [#tpu.dimension_semantics<parallel>], iteration_bounds = array<i64: 2>, scalar_prefetch = 0 : i64, scratch_operands = 0 : i64, tpu.core_type = #tpu.core_type<tc>, window_params = [{pipeline_mode = #tpu.pipeline_mode<synchronous>, transform_indices = @transform_0, window_bounds = array<i64: 4, 32>}, {transform_indices = @transform_1, window_bounds = array<i64: 32, 512>}, {transform_indices = @transform_2, window_bounds = array<i64: 1, 512>}, {transform_indices = @transform_3, window_bounds = array<i64: 1, 512>}, {transform_indices = @transform_4, window_bounds = array<i64: 4, 512>}]} {
    %c0 = arith.constant 0 : index
    %c0_0 = arith.constant 0 : index
    %0 = vector.load %arg1[%c0, %c0_0] : memref<4x32xf32, #tpu.memory_space<vmem>>, vector<4x32xf32>
    %1 = arith.truncf %0 : vector<4x32xf32> to vector<4x32xbf16>
    %c0_1 = arith.constant 0 : index
    %c0_2 = arith.constant 0 : index
    %2 = vector.load %arg2[%c0_1, %c0_2] : memref<32x512xbf16, #tpu.memory_space<vmem>>, vector<32x512xbf16>
    %cst = arith.constant dense<0.000000e+00> : vector<4x512xf32>
    %3 = tpu.matmul %1, %2, %cst {dimension_numbers = #tpu.dot_dimension_numbers<[1], [0], [0], [1], [0, 0, 1, 1], [], []>} : vector<4x32xbf16>, vector<32x512xbf16>, vector<4x512xf32> -> vector<4x512xf32>
    %cst_3 = arith.constant dense<0.000000e+00> : vector<512xf32>
    %4 = vector.multi_reduction <add>, %3, %cst_3 [0] : vector<4x512xf32> to vector<512xf32>
    %5 = vector.shape_cast %4 : vector<512xf32> to vector<1x512xf32>
    %cst_4 = arith.constant 4.000000e+00 : f32
    %6 = vector.broadcast %cst_4 : f32 to vector<1x512xf32>
    %7 = arith.divf %5, %6 : vector<1x512xf32>
    %8 = arith.mulf %3, %3 : vector<4x512xf32>
    %cst_5 = arith.constant dense<0.000000e+00> : vector<512xf32>
    %9 = vector.multi_reduction <add>, %8, %cst_5 [0] : vector<4x512xf32> to vector<512xf32>
    %10 = vector.shape_cast %9 : vector<512xf32> to vector<1x512xf32>
    %cst_6 = arith.constant 4.000000e+00 : f32
    %11 = vector.broadcast %cst_6 : f32 to vector<1x512xf32>
    %12 = arith.divf %10, %11 : vector<1x512xf32>
    %13 = arith.mulf %7, %7 : vector<1x512xf32>
    %14 = arith.subf %12, %13 : vector<1x512xf32>
    %cst_7 = arith.constant 0.000000e+00 : f32
    %15 = vector.broadcast %cst_7 : f32 to vector<1x512xf32>
    %16 = arith.maximumf %14, %15 : vector<1x512xf32>
    %c0_8 = arith.constant 0 : index
    %c0_9 = arith.constant 0 : index
    %17 = vector.load %arg3[%c0_8, %c0_9] : memref<1x512xf32, #tpu.memory_space<vmem>>, vector<1x512xf32>
    %cst_10 = arith.constant 9.99999974E-6 : f32
    %18 = vector.broadcast %cst_10 : f32 to vector<1x512xf32>
    %19 = arith.addf %16, %18 : vector<1x512xf32>
    %20 = math.rsqrt %19 : vector<1x512xf32>
    %21 = arith.mulf %17, %20 : vector<1x512xf32>
    %c0_11 = arith.constant 0 : index
    %c0_12 = arith.constant 0 : index
    %22 = vector.load %arg4[%c0_11, %c0_12] : memref<1x512xf32, #tpu.memory_space<vmem>>, vector<1x512xf32>
    %23 = arith.mulf %7, %21 : vector<1x512xf32>
    %24 = arith.subf %22, %23 : vector<1x512xf32>
    %25 = vector.broadcast %21 : vector<1x512xf32> to vector<4x512xf32>
    %26 = arith.mulf %3, %25 : vector<4x512xf32>
    %27 = vector.broadcast %24 : vector<1x512xf32> to vector<4x512xf32>
    %28 = arith.addf %26, %27 : vector<4x512xf32>
    %cst_13 = arith.constant 0.000000e+00 : f32
    %29 = vector.broadcast %cst_13 : f32 to vector<4x512xf32>
    %30 = arith.maximumf %28, %29 : vector<4x512xf32>
    %31 = arith.truncf %30 : vector<4x512xf32> to vector<4x512xbf16>
    %c0_14 = arith.constant 0 : index
    %c0_15 = arith.constant 0 : index
    %32 = vector.load %arg5[%c0_14, %c0_15] : memref<4x512xbf16, #tpu.memory_space<vmem>>, vector<4x512xbf16>
    tpu.vector_store %arg5[%c0_14, %c0_15], %31 {strides = array<i32>} : memref<4x512xbf16, #tpu.memory_space<vmem>>, vector<4x512xbf16>,
    return
  }
  func.func @transform_0(%arg0: i32) -> (i32, i32) {
    %c0_i32 = arith.constant 0 : i32
    %c0_i32_0 = arith.constant 0 : i32
    %c0_i32_1 = arith.constant 0 : i32
    return %c0_i32, %c0_i32_0 : i32, i32
  }
  func.func @transform_1(%arg0: i32) -> (i32, i32) {
    %c0_i32 = arith.constant 0 : i32
    %c0_i32_0 = arith.constant 0 : i32
    return %c0_i32, %arg0 : i32, i32
  }
  func.func @transform_2(%arg0: i32) -> (i32, i32) {
    %c0_i32 = arith.constant 0 : i32
    %c0_i32_0 = arith.constant 0 : i32
    return %c0_i32, %arg0 : i32, i32
  }
  func.func @transform_3(%arg0: i32) -> (i32, i32) {
    %c0_i32 = arith.constant 0 : i32
    %c0_i32_0 = arith.constant 0 : i32
    return %c0_i32, %arg0 : i32, i32
  }
  func.func @transform_4(%arg0: i32) -> (i32, i32) {
    %c0_i32 = arith.constant 0 : i32
    %c0_i32_0 = arith.constant 0 : i32
    return %c0_i32, %arg0 : i32, i32
  }
}

module attributes {stable_mosaic.version = 11 : i64} {
  func.func @_fc_bn_relu_kernel(%arg0: i32, %arg1: memref<4x1024xbf16, #tpu.memory_space<vmem>>, %arg2: memref<1024x512xbf16, #tpu.memory_space<vmem>>, %arg3: memref<1x512xf32, #tpu.memory_space<vmem>>, %arg4: memref<1x512xf32, #tpu.memory_space<vmem>>, %arg5: memref<4x512xbf16, #tpu.memory_space<vmem>>) attributes {dimension_semantics = [#tpu.dimension_semantics<parallel>], iteration_bounds = array<i64: 4>, scalar_prefetch = 0 : i64, scratch_operands = 0 : i64, tpu.core_type = #tpu.core_type<tc>, window_params = [{pipeline_mode = #tpu.pipeline_mode<synchronous>, transform_indices = @transform_0, window_bounds = array<i64: 4, 1024>}, {transform_indices = @transform_1, window_bounds = array<i64: 1024, 512>}, {transform_indices = @transform_2, window_bounds = array<i64: 1, 512>}, {transform_indices = @transform_3, window_bounds = array<i64: 1, 512>}, {transform_indices = @transform_4, window_bounds = array<i64: 4, 512>}]} {
    %c0 = arith.constant 0 : index
    %c0_0 = arith.constant 0 : index
    %0 = vector.load %arg1[%c0, %c0_0] : memref<4x1024xbf16, #tpu.memory_space<vmem>>, vector<4x1024xbf16>
    %c0_1 = arith.constant 0 : index
    %c0_2 = arith.constant 0 : index
    %1 = vector.load %arg2[%c0_1, %c0_2] : memref<1024x512xbf16, #tpu.memory_space<vmem>>, vector<1024x512xbf16>
    %cst = arith.constant dense<0.000000e+00> : vector<4x512xf32>
    %2 = tpu.matmul %0, %1, %cst {dimension_numbers = #tpu.dot_dimension_numbers<[1], [0], [0], [1], [0, 0, 1, 1], [], []>} : vector<4x1024xbf16>, vector<1024x512xbf16>, vector<4x512xf32> -> vector<4x512xf32>
    %cst_3 = arith.constant dense<0.000000e+00> : vector<512xf32>
    %3 = vector.multi_reduction <add>, %2, %cst_3 [0] : vector<4x512xf32> to vector<512xf32>
    %4 = vector.shape_cast %3 : vector<512xf32> to vector<1x512xf32>
    %cst_4 = arith.constant 4.000000e+00 : f32
    %5 = vector.broadcast %cst_4 : f32 to vector<1x512xf32>
    %6 = arith.divf %4, %5 : vector<1x512xf32>
    %7 = arith.mulf %2, %2 : vector<4x512xf32>
    %cst_5 = arith.constant dense<0.000000e+00> : vector<512xf32>
    %8 = vector.multi_reduction <add>, %7, %cst_5 [0] : vector<4x512xf32> to vector<512xf32>
    %9 = vector.shape_cast %8 : vector<512xf32> to vector<1x512xf32>
    %cst_6 = arith.constant 4.000000e+00 : f32
    %10 = vector.broadcast %cst_6 : f32 to vector<1x512xf32>
    %11 = arith.divf %9, %10 : vector<1x512xf32>
    %12 = arith.mulf %6, %6 : vector<1x512xf32>
    %13 = arith.subf %11, %12 : vector<1x512xf32>
    %cst_7 = arith.constant 0.000000e+00 : f32
    %14 = vector.broadcast %cst_7 : f32 to vector<1x512xf32>
    %15 = arith.maximumf %13, %14 : vector<1x512xf32>
    %c0_8 = arith.constant 0 : index
    %c0_9 = arith.constant 0 : index
    %16 = vector.load %arg3[%c0_8, %c0_9] : memref<1x512xf32, #tpu.memory_space<vmem>>, vector<1x512xf32>
    %cst_10 = arith.constant 9.99999974E-6 : f32
    %17 = vector.broadcast %cst_10 : f32 to vector<1x512xf32>
    %18 = arith.addf %15, %17 : vector<1x512xf32>
    %19 = math.rsqrt %18 : vector<1x512xf32>
    %20 = arith.mulf %16, %19 : vector<1x512xf32>
    %c0_11 = arith.constant 0 : index
    %c0_12 = arith.constant 0 : index
    %21 = vector.load %arg4[%c0_11, %c0_12] : memref<1x512xf32, #tpu.memory_space<vmem>>, vector<1x512xf32>
    %22 = arith.mulf %6, %20 : vector<1x512xf32>
    %23 = arith.subf %21, %22 : vector<1x512xf32>
    %24 = vector.broadcast %20 : vector<1x512xf32> to vector<4x512xf32>
    %25 = arith.mulf %2, %24 : vector<4x512xf32>
    %26 = vector.broadcast %23 : vector<1x512xf32> to vector<4x512xf32>
    %27 = arith.addf %25, %26 : vector<4x512xf32>
    %cst_13 = arith.constant 0.000000e+00 : f32
    %28 = vector.broadcast %cst_13 : f32 to vector<4x512xf32>
    %29 = arith.maximumf %27, %28 : vector<4x512xf32>
    %30 = arith.truncf %29 : vector<4x512xf32> to vector<4x512xbf16>
    %c0_14 = arith.constant 0 : index
    %c0_15 = arith.constant 0 : index
    %31 = vector.load %arg5[%c0_14, %c0_15] : memref<4x512xbf16, #tpu.memory_space<vmem>>, vector<4x512xbf16>
    tpu.vector_store %arg5[%c0_14, %c0_15], %30 {strides = array<i32>} : memref<4x512xbf16, #tpu.memory_space<vmem>>, vector<4x512xbf16>,
    return
  }
  func.func @transform_0(%arg0: i32) -> (i32, i32) {
    %c0_i32 = arith.constant 0 : i32
    %c0_i32_0 = arith.constant 0 : i32
    %c0_i32_1 = arith.constant 0 : i32
    return %c0_i32, %c0_i32_0 : i32, i32
  }
  func.func @transform_1(%arg0: i32) -> (i32, i32) {
    %c0_i32 = arith.constant 0 : i32
    %c0_i32_0 = arith.constant 0 : i32
    return %c0_i32, %arg0 : i32, i32
  }
  func.func @transform_2(%arg0: i32) -> (i32, i32) {
    %c0_i32 = arith.constant 0 : i32
    %c0_i32_0 = arith.constant 0 : i32
    return %c0_i32, %arg0 : i32, i32
  }
  func.func @transform_3(%arg0: i32) -> (i32, i32) {
    %c0_i32 = arith.constant 0 : i32
    %c0_i32_0 = arith.constant 0 : i32
    return %c0_i32, %arg0 : i32, i32
  }
  func.func @transform_4(%arg0: i32) -> (i32, i32) {
    %c0_i32 = arith.constant 0 : i32
    %c0_i32_0 = arith.constant 0 : i32
    return %c0_i32, %arg0 : i32, i32
  }
}

module attributes {stable_mosaic.version = 11 : i64} {
  func.func @kernel(%arg0: i32, %arg1: memref<1x4x4x128xbf16, #tpu.memory_space<vmem>>, %arg2: memref<4x4x128x64xbf16, #tpu.memory_space<vmem>>, %arg3: memref<1x16x4x64xf32, #tpu.memory_space<vmem>>, %arg4: memref<1x2x64xf32, #tpu.memory_space<vmem>>, %arg5: memref<6x6x128xbf16, #tpu.memory_space<vmem>>) attributes {dimension_semantics = [#tpu.dimension_semantics<parallel>], iteration_bounds = array<i64: 4>, scalar_prefetch = 0 : i64, scratch_operands = 1 : i64, tpu.core_type = #tpu.core_type<tc>, window_params = [{transform_indices = @transform_0, window_bounds = array<i64: 1, 4, 4, 128>}, {pipeline_mode = #tpu.pipeline_mode<synchronous>, transform_indices = @transform_1, window_bounds = array<i64: 4, 4, 128, 64>}, {transform_indices = @transform_2, window_bounds = array<i64: 1, 16, 4, 64>}, {transform_indices = @transform_3, window_bounds = array<i64: 1, 2, 64>}]} {
    %cst = arith.constant 0.000000e+00 : bf16
    %0 = vector.broadcast %cst : bf16 to vector<6x6x128xbf16>
    %c0 = arith.constant 0 : index
    %c0_0 = arith.constant 0 : index
    %c0_1 = arith.constant 0 : index
    %1 = vector.load %arg5[%c0, %c0_0, %c0_1] : memref<6x6x128xbf16, #tpu.memory_space<vmem>>, vector<6x6x128xbf16>
    tpu.vector_store %arg5[%c0, %c0_0, %c0_1], %0 {strides = array<i32>} : memref<6x6x128xbf16, #tpu.memory_space<vmem>>, vector<6x6x128xbf16>,
    %c0_2 = arith.constant 0 : index
    %c0_3 = arith.constant 0 : index
    %c0_4 = arith.constant 0 : index
    %c0_5 = arith.constant 0 : index
    %2 = vector.load %arg1[%c0_2, %c0_3, %c0_4, %c0_5] : memref<1x4x4x128xbf16, #tpu.memory_space<vmem>>, vector<1x4x4x128xbf16>
    %3 = vector.shape_cast %2 : vector<1x4x4x128xbf16> to vector<4x4x128xbf16>
    %c1 = arith.constant 1 : index
    %c1_6 = arith.constant 1 : index
    %c0_7 = arith.constant 0 : index
    %4 = vector.load %arg5[%c1, %c1_6, %c0_7] : memref<6x6x128xbf16, #tpu.memory_space<vmem>>, vector<4x4x128xbf16>
    tpu.vector_store %arg5[%c1, %c1_6, %c0_7], %3 {strides = array<i32>} : memref<6x6x128xbf16, #tpu.memory_space<vmem>>, vector<4x4x128xbf16>,
    %cst_8 = arith.constant 0.000000e+00 : f32
    %5 = vector.broadcast %cst_8 : f32 to vector<1x64xf32>
    %cst_9 = arith.constant 0.000000e+00 : f32
    %6 = vector.broadcast %cst_9 : f32 to vector<1x64xf32>
    %cst_10 = arith.constant 0.000000e+00 : f32
    %7 = vector.broadcast %cst_10 : f32 to vector<16x64xf32>
    %c1_11 = arith.constant 1 : index
    %c1_12 = arith.constant 1 : index
    %c0_13 = arith.constant 0 : index
    %8 = vector.load %arg5[%c1_11, %c1_12, %c0_13] : memref<6x6x128xbf16, #tpu.memory_space<vmem>>, vector<4x4x128xbf16>
    %9 = vector.shape_cast %8 : vector<4x4x128xbf16> to vector<16x128xbf16>
    %c0_14 = arith.constant 0 : index
    %c0_15 = arith.constant 0 : index
    %c0_16 = arith.constant 0 : index
    %c0_17 = arith.constant 0 : index
    %10 = vector.load %arg2[%c0_14, %c0_15, %c0_16, %c0_17] : memref<4x4x128x64xbf16, #tpu.memory_space<vmem>>, vector<1x1x128x64xbf16>
    %11 = vector.shape_cast %10 : vector<1x1x128x64xbf16> to vector<128x64xbf16>
    %cst_18 = arith.constant dense<0.000000e+00> : vector<16x64xf32>
    %12 = tpu.matmul %9, %11, %cst_18 {dimension_numbers = #tpu.dot_dimension_numbers<[1], [0], [0], [1], [0, 0, 1, 1], [], []>} : vector<16x128xbf16>, vector<128x64xbf16>, vector<16x64xf32> -> vector<16x64xf32>
    %13 = arith.addf %7, %12 : vector<16x64xf32>
    %c1_19 = arith.constant 1 : index
    %c0_20 = arith.constant 0 : index
    %c0_21 = arith.constant 0 : index
    %14 = vector.load %arg5[%c1_19, %c0_20, %c0_21] : memref<6x6x128xbf16, #tpu.memory_space<vmem>>, vector<4x4x128xbf16>
    %15 = vector.shape_cast %14 : vector<4x4x128xbf16> to vector<16x128xbf16>
    %c0_22 = arith.constant 0 : index
    %c1_23 = arith.constant 1 : index
    %c0_24 = arith.constant 0 : index
    %c0_25 = arith.constant 0 : index
    %16 = vector.load %arg2[%c0_22, %c1_23, %c0_24, %c0_25] : memref<4x4x128x64xbf16, #tpu.memory_space<vmem>>, vector<1x1x128x64xbf16>
    %17 = vector.shape_cast %16 : vector<1x1x128x64xbf16> to vector<128x64xbf16>
    %cst_26 = arith.constant dense<0.000000e+00> : vector<16x64xf32>
    %18 = tpu.matmul %15, %17, %cst_26 {dimension_numbers = #tpu.dot_dimension_numbers<[1], [0], [0], [1], [0, 0, 1, 1], [], []>} : vector<16x128xbf16>, vector<128x64xbf16>, vector<16x64xf32> -> vector<16x64xf32>
    %19 = arith.addf %13, %18 : vector<16x64xf32>
    %c0_27 = arith.constant 0 : index
    %c1_28 = arith.constant 1 : index
    %c0_29 = arith.constant 0 : index
    %20 = vector.load %arg5[%c0_27, %c1_28, %c0_29] : memref<6x6x128xbf16, #tpu.memory_space<vmem>>, vector<4x4x128xbf16>
    %21 = vector.shape_cast %20 : vector<4x4x128xbf16> to vector<16x128xbf16>
    %c0_30 = arith.constant 0 : index
    %c2 = arith.constant 2 : index
    %c0_31 = arith.constant 0 : index
    %c0_32 = arith.constant 0 : index
    %22 = vector.load %arg2[%c0_30, %c2, %c0_31, %c0_32] : memref<4x4x128x64xbf16, #tpu.memory_space<vmem>>, vector<1x1x128x64xbf16>
    %23 = vector.shape_cast %22 : vector<1x1x128x64xbf16> to vector<128x64xbf16>
    %cst_33 = arith.constant dense<0.000000e+00> : vector<16x64xf32>
    %24 = tpu.matmul %21, %23, %cst_33 {dimension_numbers = #tpu.dot_dimension_numbers<[1], [0], [0], [1], [0, 0, 1, 1], [], []>} : vector<16x128xbf16>, vector<128x64xbf16>, vector<16x64xf32> -> vector<16x64xf32>
    %25 = arith.addf %19, %24 : vector<16x64xf32>
    %c0_34 = arith.constant 0 : index
    %c0_35 = arith.constant 0 : index
    %c0_36 = arith.constant 0 : index
    %26 = vector.load %arg5[%c0_34, %c0_35, %c0_36] : memref<6x6x128xbf16, #tpu.memory_space<vmem>>, vector<4x4x128xbf16>
    %27 = vector.shape_cast %26 : vector<4x4x128xbf16> to vector<16x128xbf16>
    %c0_37 = arith.constant 0 : index
    %c3 = arith.constant 3 : index
    %c0_38 = arith.constant 0 : index
    %c0_39 = arith.constant 0 : index
    %28 = vector.load %arg2[%c0_37, %c3, %c0_38, %c0_39] : memref<4x4x128x64xbf16, #tpu.memory_space<vmem>>, vector<1x1x128x64xbf16>
    %29 = vector.shape_cast %28 : vector<1x1x128x64xbf16> to vector<128x64xbf16>
    %cst_40 = arith.constant dense<0.000000e+00> : vector<16x64xf32>
    %30 = tpu.matmul %27, %29, %cst_40 {dimension_numbers = #tpu.dot_dimension_numbers<[1], [0], [0], [1], [0, 0, 1, 1], [], []>} : vector<16x128xbf16>, vector<128x64xbf16>, vector<16x64xf32> -> vector<16x64xf32>
    %31 = arith.addf %25, %30 : vector<16x64xf32>
    %32 = vector.shape_cast %31 : vector<16x64xf32> to vector<4x4x64xf32>
    %c0_41 = arith.constant 0 : index
    %c0_42 = arith.constant 0 : index
    %c0_43 = arith.constant 0 : index
    %c0_44 = arith.constant 0 : index
    %33 = vector.load %arg3[%c0_41, %c0_42, %c0_43, %c0_44] : memref<1x16x4x64xf32, #tpu.memory_space<vmem>>, vector<1x4x4x64xf32>
    %34 = vector.shape_cast %33 : vector<1x4x4x64xf32> to vector<4x4x64xf32>
    %35 = vector.shape_cast %32 : vector<4x4x64xf32> to vector<1x4x4x64xf32>
    tpu.vector_store %arg3[%c0_41, %c0_42, %c0_43, %c0_44], %35 {strides = array<i32>} : memref<1x16x4x64xf32, #tpu.memory_space<vmem>>, vector<1x4x4x64xf32>,
    %cst_45 = arith.constant dense<0.000000e+00> : vector<64xf32>
    %36 = vector.multi_reduction <add>, %31, %cst_45 [0] : vector<16x64xf32> to vector<64xf32>
    %37 = vector.shape_cast %36 : vector<64xf32> to vector<1x64xf32>
    %38 = arith.addf %5, %37 : vector<1x64xf32>
    %39 = arith.mulf %31, %31 : vector<16x64xf32>
    %cst_46 = arith.constant dense<0.000000e+00> : vector<64xf32>
    %40 = vector.multi_reduction <add>, %39, %cst_46 [0] : vector<16x64xf32> to vector<64xf32>
    %41 = vector.shape_cast %40 : vector<64xf32> to vector<1x64xf32>
    %42 = arith.addf %6, %41 : vector<1x64xf32>
    %cst_47 = arith.constant 0.000000e+00 : f32
    %43 = vector.broadcast %cst_47 : f32 to vector<16x64xf32>
    %c1_48 = arith.constant 1 : index
    %c2_49 = arith.constant 2 : index
    %c0_50 = arith.constant 0 : index
    %44 = vector.load %arg5[%c1_48, %c2_49, %c0_50] : memref<6x6x128xbf16, #tpu.memory_space<vmem>>, vector<4x4x128xbf16>
    %45 = vector.shape_cast %44 : vector<4x4x128xbf16> to vector<16x128xbf16>
    %c1_51 = arith.constant 1 : index
    %c0_52 = arith.constant 0 : index
    %c0_53 = arith.constant 0 : index
    %c0_54 = arith.constant 0 : index
    %46 = vector.load %arg2[%c1_51, %c0_52, %c0_53, %c0_54] : memref<4x4x128x64xbf16, #tpu.memory_space<vmem>>, vector<1x1x128x64xbf16>
    %47 = vector.shape_cast %46 : vector<1x1x128x64xbf16> to vector<128x64xbf16>
    %cst_55 = arith.constant dense<0.000000e+00> : vector<16x64xf32>
    %48 = tpu.matmul %45, %47, %cst_55 {dimension_numbers = #tpu.dot_dimension_numbers<[1], [0], [0], [1], [0, 0, 1, 1], [], []>} : vector<16x128xbf16>, vector<128x64xbf16>, vector<16x64xf32> -> vector<16x64xf32>
    %49 = arith.addf %43, %48 : vector<16x64xf32>
    %c1_56 = arith.constant 1 : index
    %c1_57 = arith.constant 1 : index
    %c0_58 = arith.constant 0 : index
    %50 = vector.load %arg5[%c1_56, %c1_57, %c0_58] : memref<6x6x128xbf16, #tpu.memory_space<vmem>>, vector<4x4x128xbf16>
    %51 = vector.shape_cast %50 : vector<4x4x128xbf16> to vector<16x128xbf16>
    %c1_59 = arith.constant 1 : index
    %c1_60 = arith.constant 1 : index
    %c0_61 = arith.constant 0 : index
    %c0_62 = arith.constant 0 : index
    %52 = vector.load %arg2[%c1_59, %c1_60, %c0_61, %c0_62] : memref<4x4x128x64xbf16, #tpu.memory_space<vmem>>, vector<1x1x128x64xbf16>
    %53 = vector.shape_cast %52 : vector<1x1x128x64xbf16> to vector<128x64xbf16>
    %cst_63 = arith.constant dense<0.000000e+00> : vector<16x64xf32>
    %54 = tpu.matmul %51, %53, %cst_63 {dimension_numbers = #tpu.dot_dimension_numbers<[1], [0], [0], [1], [0, 0, 1, 1], [], []>} : vector<16x128xbf16>, vector<128x64xbf16>, vector<16x64xf32> -> vector<16x64xf32>
    %55 = arith.addf %49, %54 : vector<16x64xf32>
    %c0_64 = arith.constant 0 : index
    %c2_65 = arith.constant 2 : index
    %c0_66 = arith.constant 0 : index
    %56 = vector.load %arg5[%c0_64, %c2_65, %c0_66] : memref<6x6x128xbf16, #tpu.memory_space<vmem>>, vector<4x4x128xbf16>
    %57 = vector.shape_cast %56 : vector<4x4x128xbf16> to vector<16x128xbf16>
    %c1_67 = arith.constant 1 : index
    %c2_68 = arith.constant 2 : index
    %c0_69 = arith.constant 0 : index
    %c0_70 = arith.constant 0 : index
    %58 = vector.load %arg2[%c1_67, %c2_68, %c0_69, %c0_70] : memref<4x4x128x64xbf16, #tpu.memory_space<vmem>>, vector<1x1x128x64xbf16>
    %59 = vector.shape_cast %58 : vector<1x1x128x64xbf16> to vector<128x64xbf16>
    %cst_71 = arith.constant dense<0.000000e+00> : vector<16x64xf32>
    %60 = tpu.matmul %57, %59, %cst_71 {dimension_numbers = #tpu.dot_dimension_numbers<[1], [0], [0], [1], [0, 0, 1, 1], [], []>} : vector<16x128xbf16>, vector<128x64xbf16>, vector<16x64xf32> -> vector<16x64xf32>
    %61 = arith.addf %55, %60 : vector<16x64xf32>
    %c0_72 = arith.constant 0 : index
    %c1_73 = arith.constant 1 : index
    %c0_74 = arith.constant 0 : index
    %62 = vector.load %arg5[%c0_72, %c1_73, %c0_74] : memref<6x6x128xbf16, #tpu.memory_space<vmem>>, vector<4x4x128xbf16>
    %63 = vector.shape_cast %62 : vector<4x4x128xbf16> to vector<16x128xbf16>
    %c1_75 = arith.constant 1 : index
    %c3_76 = arith.constant 3 : index
    %c0_77 = arith.constant 0 : index
    %c0_78 = arith.constant 0 : index
    %64 = vector.load %arg2[%c1_75, %c3_76, %c0_77, %c0_78] : memref<4x4x128x64xbf16, #tpu.memory_space<vmem>>, vector<1x1x128x64xbf16>
    %65 = vector.shape_cast %64 : vector<1x1x128x64xbf16> to vector<128x64xbf16>
    %cst_79 = arith.constant dense<0.000000e+00> : vector<16x64xf32>
    %66 = tpu.matmul %63, %65, %cst_79 {dimension_numbers = #tpu.dot_dimension_numbers<[1], [0], [0], [1], [0, 0, 1, 1], [], []>} : vector<16x128xbf16>, vector<128x64xbf16>, vector<16x64xf32> -> vector<16x64xf32>
    %67 = arith.addf %61, %66 : vector<16x64xf32>
    %68 = vector.shape_cast %67 : vector<16x64xf32> to vector<4x4x64xf32>
    %c0_80 = arith.constant 0 : index
    %c4 = arith.constant 4 : index
    %c0_81 = arith.constant 0 : index
    %c0_82 = arith.constant 0 : index
    %69 = vector.load %arg3[%c0_80, %c4, %c0_81, %c0_82] : memref<1x16x4x64xf32, #tpu.memory_space<vmem>>, vector<1x4x4x64xf32>
    %70 = vector.shape_cast %69 : vector<1x4x4x64xf32> to vector<4x4x64xf32>
    %71 = vector.shape_cast %68 : vector<4x4x64xf32> to vector<1x4x4x64xf32>
    tpu.vector_store %arg3[%c0_80, %c4, %c0_81, %c0_82], %71 {strides = array<i32>} : memref<1x16x4x64xf32, #tpu.memory_space<vmem>>, vector<1x4x4x64xf32>,
    %cst_83 = arith.constant dense<0.000000e+00> : vector<64xf32>
    %72 = vector.multi_reduction <add>, %67, %cst_83 [0] : vector<16x64xf32> to vector<64xf32>
    %73 = vector.shape_cast %72 : vector<64xf32> to vector<1x64xf32>
    %74 = arith.addf %38, %73 : vector<1x64xf32>
    %75 = arith.mulf %67, %67 : vector<16x64xf32>
    %cst_84 = arith.constant dense<0.000000e+00> : vector<64xf32>
    %76 = vector.multi_reduction <add>, %75, %cst_84 [0] : vector<16x64xf32> to vector<64xf32>
    %77 = vector.shape_cast %76 : vector<64xf32> to vector<1x64xf32>
    %78 = arith.addf %42, %77 : vector<1x64xf32>
    %cst_85 = arith.constant 0.000000e+00 : f32
    %79 = vector.broadcast %cst_85 : f32 to vector<16x64xf32>
    %c2_86 = arith.constant 2 : index
    %c1_87 = arith.constant 1 : index
    %c0_88 = arith.constant 0 : index
    %80 = vector.load %arg5[%c2_86, %c1_87, %c0_88] : memref<6x6x128xbf16, #tpu.memory_space<vmem>>, vector<4x4x128xbf16>
    %81 = vector.shape_cast %80 : vector<4x4x128xbf16> to vector<16x128xbf16>
    %c2_89 = arith.constant 2 : index
    %c0_90 = arith.constant 0 : index
    %c0_91 = arith.constant 0 : index
    %c0_92 = arith.constant 0 : index
    %82 = vector.load %arg2[%c2_89, %c0_90, %c0_91, %c0_92] : memref<4x4x128x64xbf16, #tpu.memory_space<vmem>>, vector<1x1x128x64xbf16>
    %83 = vector.shape_cast %82 : vector<1x1x128x64xbf16> to vector<128x64xbf16>
    %cst_93 = arith.constant dense<0.000000e+00> : vector<16x64xf32>
    %84 = tpu.matmul %81, %83, %cst_93 {dimension_numbers = #tpu.dot_dimension_numbers<[1], [0], [0], [1], [0, 0, 1, 1], [], []>} : vector<16x128xbf16>, vector<128x64xbf16>, vector<16x64xf32> -> vector<16x64xf32>
    %85 = arith.addf %79, %84 : vector<16x64xf32>
    %c2_94 = arith.constant 2 : index
    %c0_95 = arith.constant 0 : index
    %c0_96 = arith.constant 0 : index
    %86 = vector.load %arg5[%c2_94, %c0_95, %c0_96] : memref<6x6x128xbf16, #tpu.memory_space<vmem>>, vector<4x4x128xbf16>
    %87 = vector.shape_cast %86 : vector<4x4x128xbf16> to vector<16x128xbf16>
    %c2_97 = arith.constant 2 : index
    %c1_98 = arith.constant 1 : index
    %c0_99 = arith.constant 0 : index
    %c0_100 = arith.constant 0 : index
    %88 = vector.load %arg2[%c2_97, %c1_98, %c0_99, %c0_100] : memref<4x4x128x64xbf16, #tpu.memory_space<vmem>>, vector<1x1x128x64xbf16>
    %89 = vector.shape_cast %88 : vector<1x1x128x64xbf16> to vector<128x64xbf16>
    %cst_101 = arith.constant dense<0.000000e+00> : vector<16x64xf32>
    %90 = tpu.matmul %87, %89, %cst_101 {dimension_numbers = #tpu.dot_dimension_numbers<[1], [0], [0], [1], [0, 0, 1, 1], [], []>} : vector<16x128xbf16>, vector<128x64xbf16>, vector<16x64xf32> -> vector<16x64xf32>
    %91 = arith.addf %85, %90 : vector<16x64xf32>
    %c1_102 = arith.constant 1 : index
    %c1_103 = arith.constant 1 : index
    %c0_104 = arith.constant 0 : index
    %92 = vector.load %arg5[%c1_102, %c1_103, %c0_104] : memref<6x6x128xbf16, #tpu.memory_space<vmem>>, vector<4x4x128xbf16>
    %93 = vector.shape_cast %92 : vector<4x4x128xbf16> to vector<16x128xbf16>
    %c2_105 = arith.constant 2 : index
    %c2_106 = arith.constant 2 : index
    %c0_107 = arith.constant 0 : index
    %c0_108 = arith.constant 0 : index
    %94 = vector.load %arg2[%c2_105, %c2_106, %c0_107, %c0_108] : memref<4x4x128x64xbf16, #tpu.memory_space<vmem>>, vector<1x1x128x64xbf16>
    %95 = vector.shape_cast %94 : vector<1x1x128x64xbf16> to vector<128x64xbf16>
    %cst_109 = arith.constant dense<0.000000e+00> : vector<16x64xf32>
    %96 = tpu.matmul %93, %95, %cst_109 {dimension_numbers = #tpu.dot_dimension_numbers<[1], [0], [0], [1], [0, 0, 1, 1], [], []>} : vector<16x128xbf16>, vector<128x64xbf16>, vector<16x64xf32> -> vector<16x64xf32>
    %97 = arith.addf %91, %96 : vector<16x64xf32>
    %c1_110 = arith.constant 1 : index
    %c0_111 = arith.constant 0 : index
    %c0_112 = arith.constant 0 : index
    %98 = vector.load %arg5[%c1_110, %c0_111, %c0_112] : memref<6x6x128xbf16, #tpu.memory_space<vmem>>, vector<4x4x128xbf16>
    %99 = vector.shape_cast %98 : vector<4x4x128xbf16> to vector<16x128xbf16>
    %c2_113 = arith.constant 2 : index
    %c3_114 = arith.constant 3 : index
    %c0_115 = arith.constant 0 : index
    %c0_116 = arith.constant 0 : index
    %100 = vector.load %arg2[%c2_113, %c3_114, %c0_115, %c0_116] : memref<4x4x128x64xbf16, #tpu.memory_space<vmem>>, vector<1x1x128x64xbf16>
    %101 = vector.shape_cast %100 : vector<1x1x128x64xbf16> to vector<128x64xbf16>
    %cst_117 = arith.constant dense<0.000000e+00> : vector<16x64xf32>
    %102 = tpu.matmul %99, %101, %cst_117 {dimension_numbers = #tpu.dot_dimension_numbers<[1], [0], [0], [1], [0, 0, 1, 1], [], []>} : vector<16x128xbf16>, vector<128x64xbf16>, vector<16x64xf32> -> vector<16x64xf32>
    %103 = arith.addf %97, %102 : vector<16x64xf32>
    %104 = vector.shape_cast %103 : vector<16x64xf32> to vector<4x4x64xf32>
    %c0_118 = arith.constant 0 : index
    %c8 = arith.constant 8 : index
    %c0_119 = arith.constant 0 : index
    %c0_120 = arith.constant 0 : index
    %105 = vector.load %arg3[%c0_118, %c8, %c0_119, %c0_120] : memref<1x16x4x64xf32, #tpu.memory_space<vmem>>, vector<1x4x4x64xf32>
    %106 = vector.shape_cast %105 : vector<1x4x4x64xf32> to vector<4x4x64xf32>
    %107 = vector.shape_cast %104 : vector<4x4x64xf32> to vector<1x4x4x64xf32>
    tpu.vector_store %arg3[%c0_118, %c8, %c0_119, %c0_120], %107 {strides = array<i32>} : memref<1x16x4x64xf32, #tpu.memory_space<vmem>>, vector<1x4x4x64xf32>,
    %cst_121 = arith.constant dense<0.000000e+00> : vector<64xf32>
    %108 = vector.multi_reduction <add>, %103, %cst_121 [0] : vector<16x64xf32> to vector<64xf32>
    %109 = vector.shape_cast %108 : vector<64xf32> to vector<1x64xf32>
    %110 = arith.addf %74, %109 : vector<1x64xf32>
    %111 = arith.mulf %103, %103 : vector<16x64xf32>
    %cst_122 = arith.constant dense<0.000000e+00> : vector<64xf32>
    %112 = vector.multi_reduction <add>, %111, %cst_122 [0] : vector<16x64xf32> to vector<64xf32>
    %113 = vector.shape_cast %112 : vector<64xf32> to vector<1x64xf32>
    %114 = arith.addf %78, %113 : vector<1x64xf32>
    %cst_123 = arith.constant 0.000000e+00 : f32
    %115 = vector.broadcast %cst_123 : f32 to vector<16x64xf32>
    %c2_124 = arith.constant 2 : index
    %c2_125 = arith.constant 2 : index
    %c0_126 = arith.constant 0 : index
    %116 = vector.load %arg5[%c2_124, %c2_125, %c0_126] : memref<6x6x128xbf16, #tpu.memory_space<vmem>>, vector<4x4x128xbf16>
    %117 = vector.shape_cast %116 : vector<4x4x128xbf16> to vector<16x128xbf16>
    %c3_127 = arith.constant 3 : index
    %c0_128 = arith.constant 0 : index
    %c0_129 = arith.constant 0 : index
    %c0_130 = arith.constant 0 : index
    %118 = vector.load %arg2[%c3_127, %c0_128, %c0_129, %c0_130] : memref<4x4x128x64xbf16, #tpu.memory_space<vmem>>, vector<1x1x128x64xbf16>
    %119 = vector.shape_cast %118 : vector<1x1x128x64xbf16> to vector<128x64xbf16>
    %cst_131 = arith.constant dense<0.000000e+00> : vector<16x64xf32>
    %120 = tpu.matmul %117, %119, %cst_131 {dimension_numbers = #tpu.dot_dimension_numbers<[1], [0], [0], [1], [0, 0, 1, 1], [], []>} : vector<16x128xbf16>, vector<128x64xbf16>, vector<16x64xf32> -> vector<16x64xf32>
    %121 = arith.addf %115, %120 : vector<16x64xf32>
    %c2_132 = arith.constant 2 : index
    %c1_133 = arith.constant 1 : index
    %c0_134 = arith.constant 0 : index
    %122 = vector.load %arg5[%c2_132, %c1_133, %c0_134] : memref<6x6x128xbf16, #tpu.memory_space<vmem>>, vector<4x4x128xbf16>
    %123 = vector.shape_cast %122 : vector<4x4x128xbf16> to vector<16x128xbf16>
    %c3_135 = arith.constant 3 : index
    %c1_136 = arith.constant 1 : index
    %c0_137 = arith.constant 0 : index
    %c0_138 = arith.constant 0 : index
    %124 = vector.load %arg2[%c3_135, %c1_136, %c0_137, %c0_138] : memref<4x4x128x64xbf16, #tpu.memory_space<vmem>>, vector<1x1x128x64xbf16>
    %125 = vector.shape_cast %124 : vector<1x1x128x64xbf16> to vector<128x64xbf16>
    %cst_139 = arith.constant dense<0.000000e+00> : vector<16x64xf32>
    %126 = tpu.matmul %123, %125, %cst_139 {dimension_numbers = #tpu.dot_dimension_numbers<[1], [0], [0], [1], [0, 0, 1, 1], [], []>} : vector<16x128xbf16>, vector<128x64xbf16>, vector<16x64xf32> -> vector<16x64xf32>
    %127 = arith.addf %121, %126 : vector<16x64xf32>
    %c1_140 = arith.constant 1 : index
    %c2_141 = arith.constant 2 : index
    %c0_142 = arith.constant 0 : index
    %128 = vector.load %arg5[%c1_140, %c2_141, %c0_142] : memref<6x6x128xbf16, #tpu.memory_space<vmem>>, vector<4x4x128xbf16>
    %129 = vector.shape_cast %128 : vector<4x4x128xbf16> to vector<16x128xbf16>
    %c3_143 = arith.constant 3 : index
    %c2_144 = arith.constant 2 : index
    %c0_145 = arith.constant 0 : index
    %c0_146 = arith.constant 0 : index
    %130 = vector.load %arg2[%c3_143, %c2_144, %c0_145, %c0_146] : memref<4x4x128x64xbf16, #tpu.memory_space<vmem>>, vector<1x1x128x64xbf16>
    %131 = vector.shape_cast %130 : vector<1x1x128x64xbf16> to vector<128x64xbf16>
    %cst_147 = arith.constant dense<0.000000e+00> : vector<16x64xf32>
    %132 = tpu.matmul %129, %131, %cst_147 {dimension_numbers = #tpu.dot_dimension_numbers<[1], [0], [0], [1], [0, 0, 1, 1], [], []>} : vector<16x128xbf16>, vector<128x64xbf16>, vector<16x64xf32> -> vector<16x64xf32>
    %133 = arith.addf %127, %132 : vector<16x64xf32>
    %c1_148 = arith.constant 1 : index
    %c1_149 = arith.constant 1 : index
    %c0_150 = arith.constant 0 : index
    %134 = vector.load %arg5[%c1_148, %c1_149, %c0_150] : memref<6x6x128xbf16, #tpu.memory_space<vmem>>, vector<4x4x128xbf16>
    %135 = vector.shape_cast %134 : vector<4x4x128xbf16> to vector<16x128xbf16>
    %c3_151 = arith.constant 3 : index
    %c3_152 = arith.constant 3 : index
    %c0_153 = arith.constant 0 : index
    %c0_154 = arith.constant 0 : index
    %136 = vector.load %arg2[%c3_151, %c3_152, %c0_153, %c0_154] : memref<4x4x128x64xbf16, #tpu.memory_space<vmem>>, vector<1x1x128x64xbf16>
    %137 = vector.shape_cast %136 : vector<1x1x128x64xbf16> to vector<128x64xbf16>
    %cst_155 = arith.constant dense<0.000000e+00> : vector<16x64xf32>
    %138 = tpu.matmul %135, %137, %cst_155 {dimension_numbers = #tpu.dot_dimension_numbers<[1], [0], [0], [1], [0, 0, 1, 1], [], []>} : vector<16x128xbf16>, vector<128x64xbf16>, vector<16x64xf32> -> vector<16x64xf32>
    %139 = arith.addf %133, %138 : vector<16x64xf32>
    %140 = vector.shape_cast %139 : vector<16x64xf32> to vector<4x4x64xf32>
    %c0_156 = arith.constant 0 : index
    %c12 = arith.constant 12 : index
    %c0_157 = arith.constant 0 : index
    %c0_158 = arith.constant 0 : index
    %141 = vector.load %arg3[%c0_156, %c12, %c0_157, %c0_158] : memref<1x16x4x64xf32, #tpu.memory_space<vmem>>, vector<1x4x4x64xf32>
    %142 = vector.shape_cast %141 : vector<1x4x4x64xf32> to vector<4x4x64xf32>
    %143 = vector.shape_cast %140 : vector<4x4x64xf32> to vector<1x4x4x64xf32>
    tpu.vector_store %arg3[%c0_156, %c12, %c0_157, %c0_158], %143 {strides = array<i32>} : memref<1x16x4x64xf32, #tpu.memory_space<vmem>>, vector<1x4x4x64xf32>,
    %cst_159 = arith.constant dense<0.000000e+00> : vector<64xf32>
    %144 = vector.multi_reduction <add>, %139, %cst_159 [0] : vector<16x64xf32> to vector<64xf32>
    %145 = vector.shape_cast %144 : vector<64xf32> to vector<1x64xf32>
    %146 = arith.addf %110, %145 : vector<1x64xf32>
    %147 = arith.mulf %139, %139 : vector<16x64xf32>
    %cst_160 = arith.constant dense<0.000000e+00> : vector<64xf32>
    %148 = vector.multi_reduction <add>, %147, %cst_160 [0] : vector<16x64xf32> to vector<64xf32>
    %149 = vector.shape_cast %148 : vector<64xf32> to vector<1x64xf32>
    %150 = arith.addf %114, %149 : vector<1x64xf32>
    %c0_161 = arith.constant 0 : index
    %c0_162 = arith.constant 0 : index
    %c0_163 = arith.constant 0 : index
    %151 = vector.load %arg4[%c0_161, %c0_162, %c0_163] : memref<1x2x64xf32, #tpu.memory_space<vmem>>, vector<1x1x64xf32>
    %152 = vector.shape_cast %151 : vector<1x1x64xf32> to vector<1x64xf32>
    %153 = vector.shape_cast %146 : vector<1x64xf32> to vector<1x1x64xf32>
    tpu.vector_store %arg4[%c0_161, %c0_162, %c0_163], %153 {strides = array<i32>} : memref<1x2x64xf32, #tpu.memory_space<vmem>>, vector<1x1x64xf32>,
    %c0_164 = arith.constant 0 : index
    %c1_165 = arith.constant 1 : index
    %c0_166 = arith.constant 0 : index
    %154 = vector.load %arg4[%c0_164, %c1_165, %c0_166] : memref<1x2x64xf32, #tpu.memory_space<vmem>>, vector<1x1x64xf32>
    %155 = vector.shape_cast %154 : vector<1x1x64xf32> to vector<1x64xf32>
    %156 = vector.shape_cast %150 : vector<1x64xf32> to vector<1x1x64xf32>
    tpu.vector_store %arg4[%c0_164, %c1_165, %c0_166], %156 {strides = array<i32>} : memref<1x2x64xf32, #tpu.memory_space<vmem>>, vector<1x1x64xf32>,
    return
  }
  func.func @transform_0(%arg0: i32) -> (i32, i32, i32, i32) {
    %c0_i32 = arith.constant 0 : i32
    %c0_i32_0 = arith.constant 0 : i32
    %c0_i32_1 = arith.constant 0 : i32
    %c0_i32_2 = arith.constant 0 : i32
    return %arg0, %c0_i32, %c0_i32_0, %c0_i32_1 : i32, i32, i32, i32
  }
  func.func @transform_1(%arg0: i32) -> (i32, i32, i32, i32) {
    %c0_i32 = arith.constant 0 : i32
    %c0_i32_0 = arith.constant 0 : i32
    %c0_i32_1 = arith.constant 0 : i32
    %c0_i32_2 = arith.constant 0 : i32
    %c0_i32_3 = arith.constant 0 : i32
    return %c0_i32, %c0_i32_0, %c0_i32_1, %c0_i32_2 : i32, i32, i32, i32
  }
  func.func @transform_2(%arg0: i32) -> (i32, i32, i32, i32) {
    %c0_i32 = arith.constant 0 : i32
    %c0_i32_0 = arith.constant 0 : i32
    %c0_i32_1 = arith.constant 0 : i32
    %c0_i32_2 = arith.constant 0 : i32
    return %arg0, %c0_i32, %c0_i32_0, %c0_i32_1 : i32, i32, i32, i32
  }
  func.func @transform_3(%arg0: i32) -> (i32, i32, i32) {
    %c0_i32 = arith.constant 0 : i32
    %c0_i32_0 = arith.constant 0 : i32
    %c0_i32_1 = arith.constant 0 : i32
    return %arg0, %c0_i32, %c0_i32_0 : i32, i32, i32
  }
}

module attributes {stable_mosaic.version = 11 : i64} {
  func.func @kernel(%arg0: i32, %arg1: memref<1x16x4x64xf32, #tpu.memory_space<vmem>>, %arg2: memref<4x2x64xf32, #tpu.memory_space<vmem>>, %arg3: memref<2x64xf32, #tpu.memory_space<vmem>>, %arg4: memref<9x64xf32, #tpu.memory_space<vmem>>, %arg5: memref<1xf32, #tpu.memory_space<smem>>, %arg6: memref<1x4x4x4xf32, #tpu.memory_space<vmem>>, %arg7: memref<4x6x6x64xf32, #tpu.memory_space<vmem>>) attributes {dimension_semantics = [#tpu.dimension_semantics<parallel>], iteration_bounds = array<i64: 4>, scalar_prefetch = 0 : i64, scratch_operands = 1 : i64, tpu.core_type = #tpu.core_type<tc>, window_params = [{transform_indices = @transform_0, window_bounds = array<i64: 1, 16, 4, 64>}, {pipeline_mode = #tpu.pipeline_mode<synchronous>, transform_indices = @transform_1, window_bounds = array<i64: 4, 2, 64>}, {pipeline_mode = #tpu.pipeline_mode<synchronous>, transform_indices = @transform_2, window_bounds = array<i64: 2, 64>}, {pipeline_mode = #tpu.pipeline_mode<synchronous>, transform_indices = @transform_3, window_bounds = array<i64: 9, 64>}, {transform_indices = @transform_4, window_bounds = array<i64: 1>}, {transform_indices = @transform_5, window_bounds = array<i64: 1, 4, 4, 4>}]} {
    %c0 = arith.constant 0 : index
    %c0_0 = arith.constant 0 : index
    %c0_1 = arith.constant 0 : index
    %0 = vector.load %arg2[%c0, %c0_0, %c0_1] : memref<4x2x64xf32, #tpu.memory_space<vmem>>, vector<4x1x64xf32>
    %1 = vector.shape_cast %0 : vector<4x1x64xf32> to vector<4x64xf32>
    %cst = arith.constant dense<0.000000e+00> : vector<64xf32>
    %2 = vector.multi_reduction <add>, %1, %cst [0] : vector<4x64xf32> to vector<64xf32>
    %c0_2 = arith.constant 0 : index
    %c1 = arith.constant 1 : index
    %c0_3 = arith.constant 0 : index
    %3 = vector.load %arg2[%c0_2, %c1, %c0_3] : memref<4x2x64xf32, #tpu.memory_space<vmem>>, vector<4x1x64xf32>
    %4 = vector.shape_cast %3 : vector<4x1x64xf32> to vector<4x64xf32>
    %cst_4 = arith.constant dense<0.000000e+00> : vector<64xf32>
    %5 = vector.multi_reduction <add>, %4, %cst_4 [0] : vector<4x64xf32> to vector<64xf32>
    %cst_5 = arith.constant 2.560000e+02 : f32
    %6 = vector.broadcast %cst_5 : f32 to vector<64xf32>
    %7 = arith.divf %2, %6 : vector<64xf32>
    %cst_6 = arith.constant 2.560000e+02 : f32
    %8 = vector.broadcast %cst_6 : f32 to vector<64xf32>
    %9 = arith.divf %5, %8 : vector<64xf32>
    %10 = arith.mulf %7, %7 : vector<64xf32>
    %11 = arith.subf %9, %10 : vector<64xf32>
    %cst_7 = arith.constant 0.000000e+00 : f32
    %12 = vector.broadcast %cst_7 : f32 to vector<64xf32>
    %13 = arith.maximumf %11, %12 : vector<64xf32>
    %c0_8 = arith.constant 0 : index
    %c0_9 = arith.constant 0 : index
    %14 = vector.load %arg3[%c0_8, %c0_9] : memref<2x64xf32, #tpu.memory_space<vmem>>, vector<1x64xf32>
    %15 = vector.shape_cast %14 : vector<1x64xf32> to vector<64xf32>
    %cst_10 = arith.constant 9.99999974E-6 : f32
    %16 = vector.broadcast %cst_10 : f32 to vector<64xf32>
    %17 = arith.addf %13, %16 : vector<64xf32>
    %18 = math.rsqrt %17 : vector<64xf32>
    %19 = arith.mulf %15, %18 : vector<64xf32>
    %c1_11 = arith.constant 1 : index
    %c0_12 = arith.constant 0 : index
    %20 = vector.load %arg3[%c1_11, %c0_12] : memref<2x64xf32, #tpu.memory_space<vmem>>, vector<1x64xf32>
    %21 = vector.shape_cast %20 : vector<1x64xf32> to vector<64xf32>
    %22 = arith.mulf %7, %19 : vector<64xf32>
    %23 = arith.subf %21, %22 : vector<64xf32>
    %cst_13 = arith.constant 0.000000e+00 : f32
    %24 = vector.broadcast %cst_13 : f32 to vector<4x6x6x64xf32>
    %c0_14 = arith.constant 0 : index
    %c0_15 = arith.constant 0 : index
    %c0_16 = arith.constant 0 : index
    %c0_17 = arith.constant 0 : index
    %25 = vector.load %arg7[%c0_14, %c0_15, %c0_16, %c0_17] : memref<4x6x6x64xf32, #tpu.memory_space<vmem>>, vector<4x6x6x64xf32>
    tpu.vector_store %arg7[%c0_14, %c0_15, %c0_16, %c0_17], %24 {strides = array<i32>} : memref<4x6x6x64xf32, #tpu.memory_space<vmem>>, vector<4x6x6x64xf32>,
    %c0_18 = arith.constant 0 : index
    %c0_19 = arith.constant 0 : index
    %c0_20 = arith.constant 0 : index
    %c0_21 = arith.constant 0 : index
    %26 = vector.load %arg1[%c0_18, %c0_19, %c0_20, %c0_21] : memref<1x16x4x64xf32, #tpu.memory_space<vmem>>, vector<1x4x4x64xf32>
    %27 = vector.shape_cast %26 : vector<1x4x4x64xf32> to vector<4x4x64xf32>
    %28 = vector.shape_cast %19 : vector<64xf32> to vector<1x1x64xf32>
    %29 = vector.broadcast %28 : vector<1x1x64xf32> to vector<4x4x64xf32>
    %30 = arith.mulf %27, %29 : vector<4x4x64xf32>
    %31 = vector.shape_cast %23 : vector<64xf32> to vector<1x1x64xf32>
    %32 = vector.broadcast %31 : vector<1x1x64xf32> to vector<4x4x64xf32>
    %33 = arith.addf %30, %32 : vector<4x4x64xf32>
    %cst_22 = arith.constant 0.000000e+00 : f32
    %34 = vector.broadcast %cst_22 : f32 to vector<4x4x64xf32>
    %35 = arith.maximumf %33, %34 : vector<4x4x64xf32>
    %c0_23 = arith.constant 0 : index
    %c1_24 = arith.constant 1 : index
    %c1_25 = arith.constant 1 : index
    %c0_26 = arith.constant 0 : index
    %36 = vector.load %arg7[%c0_23, %c1_24, %c1_25, %c0_26] : memref<4x6x6x64xf32, #tpu.memory_space<vmem>>, vector<1x4x4x64xf32>
    %37 = vector.shape_cast %36 : vector<1x4x4x64xf32> to vector<4x4x64xf32>
    %38 = vector.shape_cast %35 : vector<4x4x64xf32> to vector<1x4x4x64xf32>
    tpu.vector_store %arg7[%c0_23, %c1_24, %c1_25, %c0_26], %38 {strides = array<i32>} : memref<4x6x6x64xf32, #tpu.memory_space<vmem>>, vector<1x4x4x64xf32>,
    %c0_27 = arith.constant 0 : index
    %c4 = arith.constant 4 : index
    %c0_28 = arith.constant 0 : index
    %c0_29 = arith.constant 0 : index
    %39 = vector.load %arg1[%c0_27, %c4, %c0_28, %c0_29] : memref<1x16x4x64xf32, #tpu.memory_space<vmem>>, vector<1x4x4x64xf32>
    %40 = vector.shape_cast %39 : vector<1x4x4x64xf32> to vector<4x4x64xf32>
    %41 = vector.shape_cast %19 : vector<64xf32> to vector<1x1x64xf32>
    %42 = vector.broadcast %41 : vector<1x1x64xf32> to vector<4x4x64xf32>
    %43 = arith.mulf %40, %42 : vector<4x4x64xf32>
    %44 = vector.shape_cast %23 : vector<64xf32> to vector<1x1x64xf32>
    %45 = vector.broadcast %44 : vector<1x1x64xf32> to vector<4x4x64xf32>
    %46 = arith.addf %43, %45 : vector<4x4x64xf32>
    %cst_30 = arith.constant 0.000000e+00 : f32
    %47 = vector.broadcast %cst_30 : f32 to vector<4x4x64xf32>
    %48 = arith.maximumf %46, %47 : vector<4x4x64xf32>
    %c1_31 = arith.constant 1 : index
    %c1_32 = arith.constant 1 : index
    %c1_33 = arith.constant 1 : index
    %c0_34 = arith.constant 0 : index
    %49 = vector.load %arg7[%c1_31, %c1_32, %c1_33, %c0_34] : memref<4x6x6x64xf32, #tpu.memory_space<vmem>>, vector<1x4x4x64xf32>
    %50 = vector.shape_cast %49 : vector<1x4x4x64xf32> to vector<4x4x64xf32>
    %51 = vector.shape_cast %48 : vector<4x4x64xf32> to vector<1x4x4x64xf32>
    tpu.vector_store %arg7[%c1_31, %c1_32, %c1_33, %c0_34], %51 {strides = array<i32>} : memref<4x6x6x64xf32, #tpu.memory_space<vmem>>, vector<1x4x4x64xf32>,
    %c0_35 = arith.constant 0 : index
    %c8 = arith.constant 8 : index
    %c0_36 = arith.constant 0 : index
    %c0_37 = arith.constant 0 : index
    %52 = vector.load %arg1[%c0_35, %c8, %c0_36, %c0_37] : memref<1x16x4x64xf32, #tpu.memory_space<vmem>>, vector<1x4x4x64xf32>
    %53 = vector.shape_cast %52 : vector<1x4x4x64xf32> to vector<4x4x64xf32>
    %54 = vector.shape_cast %19 : vector<64xf32> to vector<1x1x64xf32>
    %55 = vector.broadcast %54 : vector<1x1x64xf32> to vector<4x4x64xf32>
    %56 = arith.mulf %53, %55 : vector<4x4x64xf32>
    %57 = vector.shape_cast %23 : vector<64xf32> to vector<1x1x64xf32>
    %58 = vector.broadcast %57 : vector<1x1x64xf32> to vector<4x4x64xf32>
    %59 = arith.addf %56, %58 : vector<4x4x64xf32>
    %cst_38 = arith.constant 0.000000e+00 : f32
    %60 = vector.broadcast %cst_38 : f32 to vector<4x4x64xf32>
    %61 = arith.maximumf %59, %60 : vector<4x4x64xf32>
    %c2 = arith.constant 2 : index
    %c1_39 = arith.constant 1 : index
    %c1_40 = arith.constant 1 : index
    %c0_41 = arith.constant 0 : index
    %62 = vector.load %arg7[%c2, %c1_39, %c1_40, %c0_41] : memref<4x6x6x64xf32, #tpu.memory_space<vmem>>, vector<1x4x4x64xf32>
    %63 = vector.shape_cast %62 : vector<1x4x4x64xf32> to vector<4x4x64xf32>
    %64 = vector.shape_cast %61 : vector<4x4x64xf32> to vector<1x4x4x64xf32>
    tpu.vector_store %arg7[%c2, %c1_39, %c1_40, %c0_41], %64 {strides = array<i32>} : memref<4x6x6x64xf32, #tpu.memory_space<vmem>>, vector<1x4x4x64xf32>,
    %c0_42 = arith.constant 0 : index
    %c12 = arith.constant 12 : index
    %c0_43 = arith.constant 0 : index
    %c0_44 = arith.constant 0 : index
    %65 = vector.load %arg1[%c0_42, %c12, %c0_43, %c0_44] : memref<1x16x4x64xf32, #tpu.memory_space<vmem>>, vector<1x4x4x64xf32>
    %66 = vector.shape_cast %65 : vector<1x4x4x64xf32> to vector<4x4x64xf32>
    %67 = vector.shape_cast %19 : vector<64xf32> to vector<1x1x64xf32>
    %68 = vector.broadcast %67 : vector<1x1x64xf32> to vector<4x4x64xf32>
    %69 = arith.mulf %66, %68 : vector<4x4x64xf32>
    %70 = vector.shape_cast %23 : vector<64xf32> to vector<1x1x64xf32>
    %71 = vector.broadcast %70 : vector<1x1x64xf32> to vector<4x4x64xf32>
    %72 = arith.addf %69, %71 : vector<4x4x64xf32>
    %cst_45 = arith.constant 0.000000e+00 : f32
    %73 = vector.broadcast %cst_45 : f32 to vector<4x4x64xf32>
    %74 = arith.maximumf %72, %73 : vector<4x4x64xf32>
    %c3 = arith.constant 3 : index
    %c1_46 = arith.constant 1 : index
    %c1_47 = arith.constant 1 : index
    %c0_48 = arith.constant 0 : index
    %75 = vector.load %arg7[%c3, %c1_46, %c1_47, %c0_48] : memref<4x6x6x64xf32, #tpu.memory_space<vmem>>, vector<1x4x4x64xf32>
    %76 = vector.shape_cast %75 : vector<1x4x4x64xf32> to vector<4x4x64xf32>
    %77 = vector.shape_cast %74 : vector<4x4x64xf32> to vector<1x4x4x64xf32>
    tpu.vector_store %arg7[%c3, %c1_46, %c1_47, %c0_48], %77 {strides = array<i32>} : memref<4x6x6x64xf32, #tpu.memory_space<vmem>>, vector<1x4x4x64xf32>,
    %c0_49 = arith.constant 0 : index
    %78 = memref.load %arg5[%c0_49] : memref<1xf32, #tpu.memory_space<smem>>
    %cst_50 = arith.constant 0.000000e+00 : f32
    %79 = vector.broadcast %cst_50 : f32 to vector<4x4xf32>
    %80 = vector.broadcast %78 : f32 to vector<4x4xf32>
    %81 = arith.addf %79, %80 : vector<4x4xf32>
    %c3_51 = arith.constant 3 : index
    %c0_52 = arith.constant 0 : index
    %c0_53 = arith.constant 0 : index
    %c0_54 = arith.constant 0 : index
    %82 = vector.load %arg7[%c3_51, %c0_52, %c0_53, %c0_54] : memref<4x6x6x64xf32, #tpu.memory_space<vmem>>, vector<1x4x4x64xf32>
    %83 = vector.shape_cast %82 : vector<1x4x4x64xf32> to vector<4x4x64xf32>
    %c0_55 = arith.constant 0 : index
    %c0_56 = arith.constant 0 : index
    %84 = vector.load %arg4[%c0_55, %c0_56] : memref<9x64xf32, #tpu.memory_space<vmem>>, vector<1x64xf32>
    %85 = vector.shape_cast %84 : vector<1x64xf32> to vector<64xf32>
    %86 = vector.shape_cast %85 : vector<64xf32> to vector<1x1x64xf32>
    %87 = vector.broadcast %86 : vector<1x1x64xf32> to vector<4x4x64xf32>
    %88 = arith.mulf %83, %87 : vector<4x4x64xf32>
    %cst_57 = arith.constant dense<0.000000e+00> : vector<4x4xf32>
    %89 = vector.multi_reduction <add>, %88, %cst_57 [2] : vector<4x4x64xf32> to vector<4x4xf32>
    %90 = arith.addf %81, %89 : vector<4x4xf32>
    %c2_58 = arith.constant 2 : index
    %c0_59 = arith.constant 0 : index
    %c1_60 = arith.constant 1 : index
    %c0_61 = arith.constant 0 : index
    %91 = vector.load %arg7[%c2_58, %c0_59, %c1_60, %c0_61] : memref<4x6x6x64xf32, #tpu.memory_space<vmem>>, vector<1x4x4x64xf32>
    %92 = vector.shape_cast %91 : vector<1x4x4x64xf32> to vector<4x4x64xf32>
    %c1_62 = arith.constant 1 : index
    %c0_63 = arith.constant 0 : index
    %93 = vector.load %arg4[%c1_62, %c0_63] : memref<9x64xf32, #tpu.memory_space<vmem>>, vector<1x64xf32>
    %94 = vector.shape_cast %93 : vector<1x64xf32> to vector<64xf32>
    %95 = vector.shape_cast %94 : vector<64xf32> to vector<1x1x64xf32>
    %96 = vector.broadcast %95 : vector<1x1x64xf32> to vector<4x4x64xf32>
    %97 = arith.mulf %92, %96 : vector<4x4x64xf32>
    %cst_64 = arith.constant dense<0.000000e+00> : vector<4x4xf32>
    %98 = vector.multi_reduction <add>, %97, %cst_64 [2] : vector<4x4x64xf32> to vector<4x4xf32>
    %99 = arith.addf %90, %98 : vector<4x4xf32>
    %c3_65 = arith.constant 3 : index
    %c0_66 = arith.constant 0 : index
    %c1_67 = arith.constant 1 : index
    %c0_68 = arith.constant 0 : index
    %100 = vector.load %arg7[%c3_65, %c0_66, %c1_67, %c0_68] : memref<4x6x6x64xf32, #tpu.memory_space<vmem>>, vector<1x4x4x64xf32>
    %101 = vector.shape_cast %100 : vector<1x4x4x64xf32> to vector<4x4x64xf32>
    %c2_69 = arith.constant 2 : index
    %c0_70 = arith.constant 0 : index
    %102 = vector.load %arg4[%c2_69, %c0_70] : memref<9x64xf32, #tpu.memory_space<vmem>>, vector<1x64xf32>
    %103 = vector.shape_cast %102 : vector<1x64xf32> to vector<64xf32>
    %104 = vector.shape_cast %103 : vector<64xf32> to vector<1x1x64xf32>
    %105 = vector.broadcast %104 : vector<1x1x64xf32> to vector<4x4x64xf32>
    %106 = arith.mulf %101, %105 : vector<4x4x64xf32>
    %cst_71 = arith.constant dense<0.000000e+00> : vector<4x4xf32>
    %107 = vector.multi_reduction <add>, %106, %cst_71 [2] : vector<4x4x64xf32> to vector<4x4xf32>
    %108 = arith.addf %99, %107 : vector<4x4xf32>
    %c1_72 = arith.constant 1 : index
    %c1_73 = arith.constant 1 : index
    %c0_74 = arith.constant 0 : index
    %c0_75 = arith.constant 0 : index
    %109 = vector.load %arg7[%c1_72, %c1_73, %c0_74, %c0_75] : memref<4x6x6x64xf32, #tpu.memory_space<vmem>>, vector<1x4x4x64xf32>
    %110 = vector.shape_cast %109 : vector<1x4x4x64xf32> to vector<4x4x64xf32>
    %c3_76 = arith.constant 3 : index
    %c0_77 = arith.constant 0 : index
    %111 = vector.load %arg4[%c3_76, %c0_77] : memref<9x64xf32, #tpu.memory_space<vmem>>, vector<1x64xf32>
    %112 = vector.shape_cast %111 : vector<1x64xf32> to vector<64xf32>
    %113 = vector.shape_cast %112 : vector<64xf32> to vector<1x1x64xf32>
    %114 = vector.broadcast %113 : vector<1x1x64xf32> to vector<4x4x64xf32>
    %115 = arith.mulf %110, %114 : vector<4x4x64xf32>
    %cst_78 = arith.constant dense<0.000000e+00> : vector<4x4xf32>
    %116 = vector.multi_reduction <add>, %115, %cst_78 [2] : vector<4x4x64xf32> to vector<4x4xf32>
    %117 = arith.addf %108, %116 : vector<4x4xf32>
    %c0_79 = arith.constant 0 : index
    %c1_80 = arith.constant 1 : index
    %c1_81 = arith.constant 1 : index
    %c0_82 = arith.constant 0 : index
    %118 = vector.load %arg7[%c0_79, %c1_80, %c1_81, %c0_82] : memref<4x6x6x64xf32, #tpu.memory_space<vmem>>, vector<1x4x4x64xf32>
    %119 = vector.shape_cast %118 : vector<1x4x4x64xf32> to vector<4x4x64xf32>
    %c4_83 = arith.constant 4 : index
    %c0_84 = arith.constant 0 : index
    %120 = vector.load %arg4[%c4_83, %c0_84] : memref<9x64xf32, #tpu.memory_space<vmem>>, vector<1x64xf32>
    %121 = vector.shape_cast %120 : vector<1x64xf32> to vector<64xf32>
    %122 = vector.shape_cast %121 : vector<64xf32> to vector<1x1x64xf32>
    %123 = vector.broadcast %122 : vector<1x1x64xf32> to vector<4x4x64xf32>
    %124 = arith.mulf %119, %123 : vector<4x4x64xf32>
    %cst_85 = arith.constant dense<0.000000e+00> : vector<4x4xf32>
    %125 = vector.multi_reduction <add>, %124, %cst_85 [2] : vector<4x4x64xf32> to vector<4x4xf32>
    %126 = arith.addf %117, %125 : vector<4x4xf32>
    %c1_86 = arith.constant 1 : index
    %c1_87 = arith.constant 1 : index
    %c1_88 = arith.constant 1 : index
    %c0_89 = arith.constant 0 : index
    %127 = vector.load %arg7[%c1_86, %c1_87, %c1_88, %c0_89] : memref<4x6x6x64xf32, #tpu.memory_space<vmem>>, vector<1x4x4x64xf32>
    %128 = vector.shape_cast %127 : vector<1x4x4x64xf32> to vector<4x4x64xf32>
    %c5 = arith.constant 5 : index
    %c0_90 = arith.constant 0 : index
    %129 = vector.load %arg4[%c5, %c0_90] : memref<9x64xf32, #tpu.memory_space<vmem>>, vector<1x64xf32>
    %130 = vector.shape_cast %129 : vector<1x64xf32> to vector<64xf32>
    %131 = vector.shape_cast %130 : vector<64xf32> to vector<1x1x64xf32>
    %132 = vector.broadcast %131 : vector<1x1x64xf32> to vector<4x4x64xf32>
    %133 = arith.mulf %128, %132 : vector<4x4x64xf32>
    %cst_91 = arith.constant dense<0.000000e+00> : vector<4x4xf32>
    %134 = vector.multi_reduction <add>, %133, %cst_91 [2] : vector<4x4x64xf32> to vector<4x4xf32>
    %135 = arith.addf %126, %134 : vector<4x4xf32>
    %c3_92 = arith.constant 3 : index
    %c1_93 = arith.constant 1 : index
    %c0_94 = arith.constant 0 : index
    %c0_95 = arith.constant 0 : index
    %136 = vector.load %arg7[%c3_92, %c1_93, %c0_94, %c0_95] : memref<4x6x6x64xf32, #tpu.memory_space<vmem>>, vector<1x4x4x64xf32>
    %137 = vector.shape_cast %136 : vector<1x4x4x64xf32> to vector<4x4x64xf32>
    %c6 = arith.constant 6 : index
    %c0_96 = arith.constant 0 : index
    %138 = vector.load %arg4[%c6, %c0_96] : memref<9x64xf32, #tpu.memory_space<vmem>>, vector<1x64xf32>
    %139 = vector.shape_cast %138 : vector<1x64xf32> to vector<64xf32>
    %140 = vector.shape_cast %139 : vector<64xf32> to vector<1x1x64xf32>
    %141 = vector.broadcast %140 : vector<1x1x64xf32> to vector<4x4x64xf32>
    %142 = arith.mulf %137, %141 : vector<4x4x64xf32>
    %cst_97 = arith.constant dense<0.000000e+00> : vector<4x4xf32>
    %143 = vector.multi_reduction <add>, %142, %cst_97 [2] : vector<4x4x64xf32> to vector<4x4xf32>
    %144 = arith.addf %135, %143 : vector<4x4xf32>
    %c2_98 = arith.constant 2 : index
    %c1_99 = arith.constant 1 : index
    %c1_100 = arith.constant 1 : index
    %c0_101 = arith.constant 0 : index
    %145 = vector.load %arg7[%c2_98, %c1_99, %c1_100, %c0_101] : memref<4x6x6x64xf32, #tpu.memory_space<vmem>>, vector<1x4x4x64xf32>
    %146 = vector.shape_cast %145 : vector<1x4x4x64xf32> to vector<4x4x64xf32>
    %c7 = arith.constant 7 : index
    %c0_102 = arith.constant 0 : index
    %147 = vector.load %arg4[%c7, %c0_102] : memref<9x64xf32, #tpu.memory_space<vmem>>, vector<1x64xf32>
    %148 = vector.shape_cast %147 : vector<1x64xf32> to vector<64xf32>
    %149 = vector.shape_cast %148 : vector<64xf32> to vector<1x1x64xf32>
    %150 = vector.broadcast %149 : vector<1x1x64xf32> to vector<4x4x64xf32>
    %151 = arith.mulf %146, %150 : vector<4x4x64xf32>
    %cst_103 = arith.constant dense<0.000000e+00> : vector<4x4xf32>
    %152 = vector.multi_reduction <add>, %151, %cst_103 [2] : vector<4x4x64xf32> to vector<4x4xf32>
    %153 = arith.addf %144, %152 : vector<4x4xf32>
    %c3_104 = arith.constant 3 : index
    %c1_105 = arith.constant 1 : index
    %c1_106 = arith.constant 1 : index
    %c0_107 = arith.constant 0 : index
    %154 = vector.load %arg7[%c3_104, %c1_105, %c1_106, %c0_107] : memref<4x6x6x64xf32, #tpu.memory_space<vmem>>, vector<1x4x4x64xf32>
    %155 = vector.shape_cast %154 : vector<1x4x4x64xf32> to vector<4x4x64xf32>
    %c8_108 = arith.constant 8 : index
    %c0_109 = arith.constant 0 : index
    %156 = vector.load %arg4[%c8_108, %c0_109] : memref<9x64xf32, #tpu.memory_space<vmem>>, vector<1x64xf32>
    %157 = vector.shape_cast %156 : vector<1x64xf32> to vector<64xf32>
    %158 = vector.shape_cast %157 : vector<64xf32> to vector<1x1x64xf32>
    %159 = vector.broadcast %158 : vector<1x1x64xf32> to vector<4x4x64xf32>
    %160 = arith.mulf %155, %159 : vector<4x4x64xf32>
    %cst_110 = arith.constant dense<0.000000e+00> : vector<4x4xf32>
    %161 = vector.multi_reduction <add>, %160, %cst_110 [2] : vector<4x4x64xf32> to vector<4x4xf32>
    %162 = arith.addf %153, %161 : vector<4x4xf32>
    %c0_111 = arith.constant 0 : index
    %c0_112 = arith.constant 0 : index
    %c0_113 = arith.constant 0 : index
    %c0_114 = arith.constant 0 : index
    %163 = vector.load %arg6[%c0_111, %c0_112, %c0_113, %c0_114] : memref<1x4x4x4xf32, #tpu.memory_space<vmem>>, vector<1x1x4x4xf32>
    %164 = vector.shape_cast %163 : vector<1x1x4x4xf32> to vector<4x4xf32>
    %165 = vector.shape_cast %162 : vector<4x4xf32> to vector<1x1x4x4xf32>
    tpu.vector_store %arg6[%c0_111, %c0_112, %c0_113, %c0_114], %165 {strides = array<i32>} : memref<1x4x4x4xf32, #tpu.memory_space<vmem>>, vector<1x1x4x4xf32>,
    %cst_115 = arith.constant 0.000000e+00 : f32
    %166 = vector.broadcast %cst_115 : f32 to vector<4x4xf32>
    %167 = vector.broadcast %78 : f32 to vector<4x4xf32>
    %168 = arith.addf %166, %167 : vector<4x4xf32>
    %c2_116 = arith.constant 2 : index
    %c0_117 = arith.constant 0 : index
    %c1_118 = arith.constant 1 : index
    %c0_119 = arith.constant 0 : index
    %169 = vector.load %arg7[%c2_116, %c0_117, %c1_118, %c0_119] : memref<4x6x6x64xf32, #tpu.memory_space<vmem>>, vector<1x4x4x64xf32>
    %170 = vector.shape_cast %169 : vector<1x4x4x64xf32> to vector<4x4x64xf32>
    %c0_120 = arith.constant 0 : index
    %c0_121 = arith.constant 0 : index
    %171 = vector.load %arg4[%c0_120, %c0_121] : memref<9x64xf32, #tpu.memory_space<vmem>>, vector<1x64xf32>
    %172 = vector.shape_cast %171 : vector<1x64xf32> to vector<64xf32>
    %173 = vector.shape_cast %172 : vector<64xf32> to vector<1x1x64xf32>
    %174 = vector.broadcast %173 : vector<1x1x64xf32> to vector<4x4x64xf32>
    %175 = arith.mulf %170, %174 : vector<4x4x64xf32>
    %cst_122 = arith.constant dense<0.000000e+00> : vector<4x4xf32>
    %176 = vector.multi_reduction <add>, %175, %cst_122 [2] : vector<4x4x64xf32> to vector<4x4xf32>
    %177 = arith.addf %168, %176 : vector<4x4xf32>
    %c3_123 = arith.constant 3 : index
    %c0_124 = arith.constant 0 : index
    %c1_125 = arith.constant 1 : index
    %c0_126 = arith.constant 0 : index
    %178 = vector.load %arg7[%c3_123, %c0_124, %c1_125, %c0_126] : memref<4x6x6x64xf32, #tpu.memory_space<vmem>>, vector<1x4x4x64xf32>
    %179 = vector.shape_cast %178 : vector<1x4x4x64xf32> to vector<4x4x64xf32>
    %c1_127 = arith.constant 1 : index
    %c0_128 = arith.constant 0 : index
    %180 = vector.load %arg4[%c1_127, %c0_128] : memref<9x64xf32, #tpu.memory_space<vmem>>, vector<1x64xf32>
    %181 = vector.shape_cast %180 : vector<1x64xf32> to vector<64xf32>
    %182 = vector.shape_cast %181 : vector<64xf32> to vector<1x1x64xf32>
    %183 = vector.broadcast %182 : vector<1x1x64xf32> to vector<4x4x64xf32>
    %184 = arith.mulf %179, %183 : vector<4x4x64xf32>
    %cst_129 = arith.constant dense<0.000000e+00> : vector<4x4xf32>
    %185 = vector.multi_reduction <add>, %184, %cst_129 [2] : vector<4x4x64xf32> to vector<4x4xf32>
    %186 = arith.addf %177, %185 : vector<4x4xf32>
    %c2_130 = arith.constant 2 : index
    %c0_131 = arith.constant 0 : index
    %c2_132 = arith.constant 2 : index
    %c0_133 = arith.constant 0 : index
    %187 = vector.load %arg7[%c2_130, %c0_131, %c2_132, %c0_133] : memref<4x6x6x64xf32, #tpu.memory_space<vmem>>, vector<1x4x4x64xf32>
    %188 = vector.shape_cast %187 : vector<1x4x4x64xf32> to vector<4x4x64xf32>
    %c2_134 = arith.constant 2 : index
    %c0_135 = arith.constant 0 : index
    %189 = vector.load %arg4[%c2_134, %c0_135] : memref<9x64xf32, #tpu.memory_space<vmem>>, vector<1x64xf32>
    %190 = vector.shape_cast %189 : vector<1x64xf32> to vector<64xf32>
    %191 = vector.shape_cast %190 : vector<64xf32> to vector<1x1x64xf32>
    %192 = vector.broadcast %191 : vector<1x1x64xf32> to vector<4x4x64xf32>
    %193 = arith.mulf %188, %192 : vector<4x4x64xf32>
    %cst_136 = arith.constant dense<0.000000e+00> : vector<4x4xf32>
    %194 = vector.multi_reduction <add>, %193, %cst_136 [2] : vector<4x4x64xf32> to vector<4x4xf32>
    %195 = arith.addf %186, %194 : vector<4x4xf32>
    %c0_137 = arith.constant 0 : index
    %c1_138 = arith.constant 1 : index
    %c1_139 = arith.constant 1 : index
    %c0_140 = arith.constant 0 : index
    %196 = vector.load %arg7[%c0_137, %c1_138, %c1_139, %c0_140] : memref<4x6x6x64xf32, #tpu.memory_space<vmem>>, vector<1x4x4x64xf32>
    %197 = vector.shape_cast %196 : vector<1x4x4x64xf32> to vector<4x4x64xf32>
    %c3_141 = arith.constant 3 : index
    %c0_142 = arith.constant 0 : index
    %198 = vector.load %arg4[%c3_141, %c0_142] : memref<9x64xf32, #tpu.memory_space<vmem>>, vector<1x64xf32>
    %199 = vector.shape_cast %198 : vector<1x64xf32> to vector<64xf32>
    %200 = vector.shape_cast %199 : vector<64xf32> to vector<1x1x64xf32>
    %201 = vector.broadcast %200 : vector<1x1x64xf32> to vector<4x4x64xf32>
    %202 = arith.mulf %197, %201 : vector<4x4x64xf32>
    %cst_143 = arith.constant dense<0.000000e+00> : vector<4x4xf32>
    %203 = vector.multi_reduction <add>, %202, %cst_143 [2] : vector<4x4x64xf32> to vector<4x4xf32>
    %204 = arith.addf %195, %203 : vector<4x4xf32>
    %c1_144 = arith.constant 1 : index
    %c1_145 = arith.constant 1 : index
    %c1_146 = arith.constant 1 : index
    %c0_147 = arith.constant 0 : index
    %205 = vector.load %arg7[%c1_144, %c1_145, %c1_146, %c0_147] : memref<4x6x6x64xf32, #tpu.memory_space<vmem>>, vector<1x4x4x64xf32>
    %206 = vector.shape_cast %205 : vector<1x4x4x64xf32> to vector<4x4x64xf32>
    %c4_148 = arith.constant 4 : index
    %c0_149 = arith.constant 0 : index
    %207 = vector.load %arg4[%c4_148, %c0_149] : memref<9x64xf32, #tpu.memory_space<vmem>>, vector<1x64xf32>
    %208 = vector.shape_cast %207 : vector<1x64xf32> to vector<64xf32>
    %209 = vector.shape_cast %208 : vector<64xf32> to vector<1x1x64xf32>
    %210 = vector.broadcast %209 : vector<1x1x64xf32> to vector<4x4x64xf32>
    %211 = arith.mulf %206, %210 : vector<4x4x64xf32>
    %cst_150 = arith.constant dense<0.000000e+00> : vector<4x4xf32>
    %212 = vector.multi_reduction <add>, %211, %cst_150 [2] : vector<4x4x64xf32> to vector<4x4xf32>
    %213 = arith.addf %204, %212 : vector<4x4xf32>
    %c0_151 = arith.constant 0 : index
    %c1_152 = arith.constant 1 : index
    %c2_153 = arith.constant 2 : index
    %c0_154 = arith.constant 0 : index
    %214 = vector.load %arg7[%c0_151, %c1_152, %c2_153, %c0_154] : memref<4x6x6x64xf32, #tpu.memory_space<vmem>>, vector<1x4x4x64xf32>
    %215 = vector.shape_cast %214 : vector<1x4x4x64xf32> to vector<4x4x64xf32>
    %c5_155 = arith.constant 5 : index
    %c0_156 = arith.constant 0 : index
    %216 = vector.load %arg4[%c5_155, %c0_156] : memref<9x64xf32, #tpu.memory_space<vmem>>, vector<1x64xf32>
    %217 = vector.shape_cast %216 : vector<1x64xf32> to vector<64xf32>
    %218 = vector.shape_cast %217 : vector<64xf32> to vector<1x1x64xf32>
    %219 = vector.broadcast %218 : vector<1x1x64xf32> to vector<4x4x64xf32>
    %220 = arith.mulf %215, %219 : vector<4x4x64xf32>
    %cst_157 = arith.constant dense<0.000000e+00> : vector<4x4xf32>
    %221 = vector.multi_reduction <add>, %220, %cst_157 [2] : vector<4x4x64xf32> to vector<4x4xf32>
    %222 = arith.addf %213, %221 : vector<4x4xf32>
    %c2_158 = arith.constant 2 : index
    %c1_159 = arith.constant 1 : index
    %c1_160 = arith.constant 1 : index
    %c0_161 = arith.constant 0 : index
    %223 = vector.load %arg7[%c2_158, %c1_159, %c1_160, %c0_161] : memref<4x6x6x64xf32, #tpu.memory_space<vmem>>, vector<1x4x4x64xf32>
    %224 = vector.shape_cast %223 : vector<1x4x4x64xf32> to vector<4x4x64xf32>
    %c6_162 = arith.constant 6 : index
    %c0_163 = arith.constant 0 : index
    %225 = vector.load %arg4[%c6_162, %c0_163] : memref<9x64xf32, #tpu.memory_space<vmem>>, vector<1x64xf32>
    %226 = vector.shape_cast %225 : vector<1x64xf32> to vector<64xf32>
    %227 = vector.shape_cast %226 : vector<64xf32> to vector<1x1x64xf32>
    %228 = vector.broadcast %227 : vector<1x1x64xf32> to vector<4x4x64xf32>
    %229 = arith.mulf %224, %228 : vector<4x4x64xf32>
    %cst_164 = arith.constant dense<0.000000e+00> : vector<4x4xf32>
    %230 = vector.multi_reduction <add>, %229, %cst_164 [2] : vector<4x4x64xf32> to vector<4x4xf32>
    %231 = arith.addf %222, %230 : vector<4x4xf32>
    %c3_165 = arith.constant 3 : index
    %c1_166 = arith.constant 1 : index
    %c1_167 = arith.constant 1 : index
    %c0_168 = arith.constant 0 : index
    %232 = vector.load %arg7[%c3_165, %c1_166, %c1_167, %c0_168] : memref<4x6x6x64xf32, #tpu.memory_space<vmem>>, vector<1x4x4x64xf32>
    %233 = vector.shape_cast %232 : vector<1x4x4x64xf32> to vector<4x4x64xf32>
    %c7_169 = arith.constant 7 : index
    %c0_170 = arith.constant 0 : index
    %234 = vector.load %arg4[%c7_169, %c0_170] : memref<9x64xf32, #tpu.memory_space<vmem>>, vector<1x64xf32>
    %235 = vector.shape_cast %234 : vector<1x64xf32> to vector<64xf32>
    %236 = vector.shape_cast %235 : vector<64xf32> to vector<1x1x64xf32>
    %237 = vector.broadcast %236 : vector<1x1x64xf32> to vector<4x4x64xf32>
    %238 = arith.mulf %233, %237 : vector<4x4x64xf32>
    %cst_171 = arith.constant dense<0.000000e+00> : vector<4x4xf32>
    %239 = vector.multi_reduction <add>, %238, %cst_171 [2] : vector<4x4x64xf32> to vector<4x4xf32>
    %240 = arith.addf %231, %239 : vector<4x4xf32>
    %c2_172 = arith.constant 2 : index
    %c1_173 = arith.constant 1 : index
    %c2_174 = arith.constant 2 : index
    %c0_175 = arith.constant 0 : index
    %241 = vector.load %arg7[%c2_172, %c1_173, %c2_174, %c0_175] : memref<4x6x6x64xf32, #tpu.memory_space<vmem>>, vector<1x4x4x64xf32>
    %242 = vector.shape_cast %241 : vector<1x4x4x64xf32> to vector<4x4x64xf32>
    %c8_176 = arith.constant 8 : index
    %c0_177 = arith.constant 0 : index
    %243 = vector.load %arg4[%c8_176, %c0_177] : memref<9x64xf32, #tpu.memory_space<vmem>>, vector<1x64xf32>
    %244 = vector.shape_cast %243 : vector<1x64xf32> to vector<64xf32>
    %245 = vector.shape_cast %244 : vector<64xf32> to vector<1x1x64xf32>
    %246 = vector.broadcast %245 : vector<1x1x64xf32> to vector<4x4x64xf32>
    %247 = arith.mulf %242, %246 : vector<4x4x64xf32>
    %cst_178 = arith.constant dense<0.000000e+00> : vector<4x4xf32>
    %248 = vector.multi_reduction <add>, %247, %cst_178 [2] : vector<4x4x64xf32> to vector<4x4xf32>
    %249 = arith.addf %240, %248 : vector<4x4xf32>
    %c0_179 = arith.constant 0 : index
    %c1_180 = arith.constant 1 : index
    %c0_181 = arith.constant 0 : index
    %c0_182 = arith.constant 0 : index
    %250 = vector.load %arg6[%c0_179, %c1_180, %c0_181, %c0_182] : memref<1x4x4x4xf32, #tpu.memory_space<vmem>>, vector<1x1x4x4xf32>
    %251 = vector.shape_cast %250 : vector<1x1x4x4xf32> to vector<4x4xf32>
    %252 = vector.shape_cast %249 : vector<4x4xf32> to vector<1x1x4x4xf32>
    tpu.vector_store %arg6[%c0_179, %c1_180, %c0_181, %c0_182], %252 {strides = array<i32>} : memref<1x4x4x4xf32, #tpu.memory_space<vmem>>, vector<1x1x4x4xf32>,
    %cst_183 = arith.constant 0.000000e+00 : f32
    %253 = vector.broadcast %cst_183 : f32 to vector<4x4xf32>
    %254 = vector.broadcast %78 : f32 to vector<4x4xf32>
    %255 = arith.addf %253, %254 : vector<4x4xf32>
    %c1_184 = arith.constant 1 : index
    %c1_185 = arith.constant 1 : index
    %c0_186 = arith.constant 0 : index
    %c0_187 = arith.constant 0 : index
    %256 = vector.load %arg7[%c1_184, %c1_185, %c0_186, %c0_187] : memref<4x6x6x64xf32, #tpu.memory_space<vmem>>, vector<1x4x4x64xf32>
    %257 = vector.shape_cast %256 : vector<1x4x4x64xf32> to vector<4x4x64xf32>
    %c0_188 = arith.constant 0 : index
    %c0_189 = arith.constant 0 : index
    %258 = vector.load %arg4[%c0_188, %c0_189] : memref<9x64xf32, #tpu.memory_space<vmem>>, vector<1x64xf32>
    %259 = vector.shape_cast %258 : vector<1x64xf32> to vector<64xf32>
    %260 = vector.shape_cast %259 : vector<64xf32> to vector<1x1x64xf32>
    %261 = vector.broadcast %260 : vector<1x1x64xf32> to vector<4x4x64xf32>
    %262 = arith.mulf %257, %261 : vector<4x4x64xf32>
    %cst_190 = arith.constant dense<0.000000e+00> : vector<4x4xf32>
    %263 = vector.multi_reduction <add>, %262, %cst_190 [2] : vector<4x4x64xf32> to vector<4x4xf32>
    %264 = arith.addf %255, %263 : vector<4x4xf32>
    %c0_191 = arith.constant 0 : index
    %c1_192 = arith.constant 1 : index
    %c1_193 = arith.constant 1 : index
    %c0_194 = arith.constant 0 : index
    %265 = vector.load %arg7[%c0_191, %c1_192, %c1_193, %c0_194] : memref<4x6x6x64xf32, #tpu.memory_space<vmem>>, vector<1x4x4x64xf32>
    %266 = vector.shape_cast %265 : vector<1x4x4x64xf32> to vector<4x4x64xf32>
    %c1_195 = arith.constant 1 : index
    %c0_196 = arith.constant 0 : index
    %267 = vector.load %arg4[%c1_195, %c0_196] : memref<9x64xf32, #tpu.memory_space<vmem>>, vector<1x64xf32>
    %268 = vector.shape_cast %267 : vector<1x64xf32> to vector<64xf32>
    %269 = vector.shape_cast %268 : vector<64xf32> to vector<1x1x64xf32>
    %270 = vector.broadcast %269 : vector<1x1x64xf32> to vector<4x4x64xf32>
    %271 = arith.mulf %266, %270 : vector<4x4x64xf32>
    %cst_197 = arith.constant dense<0.000000e+00> : vector<4x4xf32>
    %272 = vector.multi_reduction <add>, %271, %cst_197 [2] : vector<4x4x64xf32> to vector<4x4xf32>
    %273 = arith.addf %264, %272 : vector<4x4xf32>
    %c1_198 = arith.constant 1 : index
    %c1_199 = arith.constant 1 : index
    %c1_200 = arith.constant 1 : index
    %c0_201 = arith.constant 0 : index
    %274 = vector.load %arg7[%c1_198, %c1_199, %c1_200, %c0_201] : memref<4x6x6x64xf32, #tpu.memory_space<vmem>>, vector<1x4x4x64xf32>
    %275 = vector.shape_cast %274 : vector<1x4x4x64xf32> to vector<4x4x64xf32>
    %c2_202 = arith.constant 2 : index
    %c0_203 = arith.constant 0 : index
    %276 = vector.load %arg4[%c2_202, %c0_203] : memref<9x64xf32, #tpu.memory_space<vmem>>, vector<1x64xf32>
    %277 = vector.shape_cast %276 : vector<1x64xf32> to vector<64xf32>
    %278 = vector.shape_cast %277 : vector<64xf32> to vector<1x1x64xf32>
    %279 = vector.broadcast %278 : vector<1x1x64xf32> to vector<4x4x64xf32>
    %280 = arith.mulf %275, %279 : vector<4x4x64xf32>
    %cst_204 = arith.constant dense<0.000000e+00> : vector<4x4xf32>
    %281 = vector.multi_reduction <add>, %280, %cst_204 [2] : vector<4x4x64xf32> to vector<4x4xf32>
    %282 = arith.addf %273, %281 : vector<4x4xf32>
    %c3_205 = arith.constant 3 : index
    %c1_206 = arith.constant 1 : index
    %c0_207 = arith.constant 0 : index
    %c0_208 = arith.constant 0 : index
    %283 = vector.load %arg7[%c3_205, %c1_206, %c0_207, %c0_208] : memref<4x6x6x64xf32, #tpu.memory_space<vmem>>, vector<1x4x4x64xf32>
    %284 = vector.shape_cast %283 : vector<1x4x4x64xf32> to vector<4x4x64xf32>
    %c3_209 = arith.constant 3 : index
    %c0_210 = arith.constant 0 : index
    %285 = vector.load %arg4[%c3_209, %c0_210] : memref<9x64xf32, #tpu.memory_space<vmem>>, vector<1x64xf32>
    %286 = vector.shape_cast %285 : vector<1x64xf32> to vector<64xf32>
    %287 = vector.shape_cast %286 : vector<64xf32> to vector<1x1x64xf32>
    %288 = vector.broadcast %287 : vector<1x1x64xf32> to vector<4x4x64xf32>
    %289 = arith.mulf %284, %288 : vector<4x4x64xf32>
    %cst_211 = arith.constant dense<0.000000e+00> : vector<4x4xf32>
    %290 = vector.multi_reduction <add>, %289, %cst_211 [2] : vector<4x4x64xf32> to vector<4x4xf32>
    %291 = arith.addf %282, %290 : vector<4x4xf32>
    %c2_212 = arith.constant 2 : index
    %c1_213 = arith.constant 1 : index
    %c1_214 = arith.constant 1 : index
    %c0_215 = arith.constant 0 : index
    %292 = vector.load %arg7[%c2_212, %c1_213, %c1_214, %c0_215] : memref<4x6x6x64xf32, #tpu.memory_space<vmem>>, vector<1x4x4x64xf32>
    %293 = vector.shape_cast %292 : vector<1x4x4x64xf32> to vector<4x4x64xf32>
    %c4_216 = arith.constant 4 : index
    %c0_217 = arith.constant 0 : index
    %294 = vector.load %arg4[%c4_216, %c0_217] : memref<9x64xf32, #tpu.memory_space<vmem>>, vector<1x64xf32>
    %295 = vector.shape_cast %294 : vector<1x64xf32> to vector<64xf32>
    %296 = vector.shape_cast %295 : vector<64xf32> to vector<1x1x64xf32>
    %297 = vector.broadcast %296 : vector<1x1x64xf32> to vector<4x4x64xf32>
    %298 = arith.mulf %293, %297 : vector<4x4x64xf32>
    %cst_218 = arith.constant dense<0.000000e+00> : vector<4x4xf32>
    %299 = vector.multi_reduction <add>, %298, %cst_218 [2] : vector<4x4x64xf32> to vector<4x4xf32>
    %300 = arith.addf %291, %299 : vector<4x4xf32>
    %c3_219 = arith.constant 3 : index
    %c1_220 = arith.constant 1 : index
    %c1_221 = arith.constant 1 : index
    %c0_222 = arith.constant 0 : index
    %301 = vector.load %arg7[%c3_219, %c1_220, %c1_221, %c0_222] : memref<4x6x6x64xf32, #tpu.memory_space<vmem>>, vector<1x4x4x64xf32>
    %302 = vector.shape_cast %301 : vector<1x4x4x64xf32> to vector<4x4x64xf32>
    %c5_223 = arith.constant 5 : index
    %c0_224 = arith.constant 0 : index
    %303 = vector.load %arg4[%c5_223, %c0_224] : memref<9x64xf32, #tpu.memory_space<vmem>>, vector<1x64xf32>
    %304 = vector.shape_cast %303 : vector<1x64xf32> to vector<64xf32>
    %305 = vector.shape_cast %304 : vector<64xf32> to vector<1x1x64xf32>
    %306 = vector.broadcast %305 : vector<1x1x64xf32> to vector<4x4x64xf32>
    %307 = arith.mulf %302, %306 : vector<4x4x64xf32>
    %cst_225 = arith.constant dense<0.000000e+00> : vector<4x4xf32>
    %308 = vector.multi_reduction <add>, %307, %cst_225 [2] : vector<4x4x64xf32> to vector<4x4xf32>
    %309 = arith.addf %300, %308 : vector<4x4xf32>
    %c1_226 = arith.constant 1 : index
    %c2_227 = arith.constant 2 : index
    %c0_228 = arith.constant 0 : index
    %c0_229 = arith.constant 0 : index
    %310 = vector.load %arg7[%c1_226, %c2_227, %c0_228, %c0_229] : memref<4x6x6x64xf32, #tpu.memory_space<vmem>>, vector<1x4x4x64xf32>
    %311 = vector.shape_cast %310 : vector<1x4x4x64xf32> to vector<4x4x64xf32>
    %c6_230 = arith.constant 6 : index
    %c0_231 = arith.constant 0 : index
    %312 = vector.load %arg4[%c6_230, %c0_231] : memref<9x64xf32, #tpu.memory_space<vmem>>, vector<1x64xf32>
    %313 = vector.shape_cast %312 : vector<1x64xf32> to vector<64xf32>
    %314 = vector.shape_cast %313 : vector<64xf32> to vector<1x1x64xf32>
    %315 = vector.broadcast %314 : vector<1x1x64xf32> to vector<4x4x64xf32>
    %316 = arith.mulf %311, %315 : vector<4x4x64xf32>
    %cst_232 = arith.constant dense<0.000000e+00> : vector<4x4xf32>
    %317 = vector.multi_reduction <add>, %316, %cst_232 [2] : vector<4x4x64xf32> to vector<4x4xf32>
    %318 = arith.addf %309, %317 : vector<4x4xf32>
    %c0_233 = arith.constant 0 : index
    %c2_234 = arith.constant 2 : index
    %c1_235 = arith.constant 1 : index
    %c0_236 = arith.constant 0 : index
    %319 = vector.load %arg7[%c0_233, %c2_234, %c1_235, %c0_236] : memref<4x6x6x64xf32, #tpu.memory_space<vmem>>, vector<1x4x4x64xf32>
    %320 = vector.shape_cast %319 : vector<1x4x4x64xf32> to vector<4x4x64xf32>
    %c7_237 = arith.constant 7 : index
    %c0_238 = arith.constant 0 : index
    %321 = vector.load %arg4[%c7_237, %c0_238] : memref<9x64xf32, #tpu.memory_space<vmem>>, vector<1x64xf32>
    %322 = vector.shape_cast %321 : vector<1x64xf32> to vector<64xf32>
    %323 = vector.shape_cast %322 : vector<64xf32> to vector<1x1x64xf32>
    %324 = vector.broadcast %323 : vector<1x1x64xf32> to vector<4x4x64xf32>
    %325 = arith.mulf %320, %324 : vector<4x4x64xf32>
    %cst_239 = arith.constant dense<0.000000e+00> : vector<4x4xf32>
    %326 = vector.multi_reduction <add>, %325, %cst_239 [2] : vector<4x4x64xf32> to vector<4x4xf32>
    %327 = arith.addf %318, %326 : vector<4x4xf32>
    %c1_240 = arith.constant 1 : index
    %c2_241 = arith.constant 2 : index
    %c1_242 = arith.constant 1 : index
    %c0_243 = arith.constant 0 : index
    %328 = vector.load %arg7[%c1_240, %c2_241, %c1_242, %c0_243] : memref<4x6x6x64xf32, #tpu.memory_space<vmem>>, vector<1x4x4x64xf32>
    %329 = vector.shape_cast %328 : vector<1x4x4x64xf32> to vector<4x4x64xf32>
    %c8_244 = arith.constant 8 : index
    %c0_245 = arith.constant 0 : index
    %330 = vector.load %arg4[%c8_244, %c0_245] : memref<9x64xf32, #tpu.memory_space<vmem>>, vector<1x64xf32>
    %331 = vector.shape_cast %330 : vector<1x64xf32> to vector<64xf32>
    %332 = vector.shape_cast %331 : vector<64xf32> to vector<1x1x64xf32>
    %333 = vector.broadcast %332 : vector<1x1x64xf32> to vector<4x4x64xf32>
    %334 = arith.mulf %329, %333 : vector<4x4x64xf32>
    %cst_246 = arith.constant dense<0.000000e+00> : vector<4x4xf32>
    %335 = vector.multi_reduction <add>, %334, %cst_246 [2] : vector<4x4x64xf32> to vector<4x4xf32>
    %336 = arith.addf %327, %335 : vector<4x4xf32>
    %c0_247 = arith.constant 0 : index
    %c2_248 = arith.constant 2 : index
    %c0_249 = arith.constant 0 : index
    %c0_250 = arith.constant 0 : index
    %337 = vector.load %arg6[%c0_247, %c2_248, %c0_249, %c0_250] : memref<1x4x4x4xf32, #tpu.memory_space<vmem>>, vector<1x1x4x4xf32>
    %338 = vector.shape_cast %337 : vector<1x1x4x4xf32> to vector<4x4xf32>
    %339 = vector.shape_cast %336 : vector<4x4xf32> to vector<1x1x4x4xf32>
    tpu.vector_store %arg6[%c0_247, %c2_248, %c0_249, %c0_250], %339 {strides = array<i32>} : memref<1x4x4x4xf32, #tpu.memory_space<vmem>>, vector<1x1x4x4xf32>,
    %cst_251 = arith.constant 0.000000e+00 : f32
    %340 = vector.broadcast %cst_251 : f32 to vector<4x4xf32>
    %341 = vector.broadcast %78 : f32 to vector<4x4xf32>
    %342 = arith.addf %340, %341 : vector<4x4xf32>
    %c0_252 = arith.constant 0 : index
    %c1_253 = arith.constant 1 : index
    %c1_254 = arith.constant 1 : index
    %c0_255 = arith.constant 0 : index
    %343 = vector.load %arg7[%c0_252, %c1_253, %c1_254, %c0_255] : memref<4x6x6x64xf32, #tpu.memory_space<vmem>>, vector<1x4x4x64xf32>
    %344 = vector.shape_cast %343 : vector<1x4x4x64xf32> to vector<4x4x64xf32>
    %c0_256 = arith.constant 0 : index
    %c0_257 = arith.constant 0 : index
    %345 = vector.load %arg4[%c0_256, %c0_257] : memref<9x64xf32, #tpu.memory_space<vmem>>, vector<1x64xf32>
    %346 = vector.shape_cast %345 : vector<1x64xf32> to vector<64xf32>
    %347 = vector.shape_cast %346 : vector<64xf32> to vector<1x1x64xf32>
    %348 = vector.broadcast %347 : vector<1x1x64xf32> to vector<4x4x64xf32>
    %349 = arith.mulf %344, %348 : vector<4x4x64xf32>
    %cst_258 = arith.constant dense<0.000000e+00> : vector<4x4xf32>
    %350 = vector.multi_reduction <add>, %349, %cst_258 [2] : vector<4x4x64xf32> to vector<4x4xf32>
    %351 = arith.addf %342, %350 : vector<4x4xf32>
    %c1_259 = arith.constant 1 : index
    %c1_260 = arith.constant 1 : index
    %c1_261 = arith.constant 1 : index
    %c0_262 = arith.constant 0 : index
    %352 = vector.load %arg7[%c1_259, %c1_260, %c1_261, %c0_262] : memref<4x6x6x64xf32, #tpu.memory_space<vmem>>, vector<1x4x4x64xf32>
    %353 = vector.shape_cast %352 : vector<1x4x4x64xf32> to vector<4x4x64xf32>
    %c1_263 = arith.constant 1 : index
    %c0_264 = arith.constant 0 : index
    %354 = vector.load %arg4[%c1_263, %c0_264] : memref<9x64xf32, #tpu.memory_space<vmem>>, vector<1x64xf32>
    %355 = vector.shape_cast %354 : vector<1x64xf32> to vector<64xf32>
    %356 = vector.shape_cast %355 : vector<64xf32> to vector<1x1x64xf32>
    %357 = vector.broadcast %356 : vector<1x1x64xf32> to vector<4x4x64xf32>
    %358 = arith.mulf %353, %357 : vector<4x4x64xf32>
    %cst_265 = arith.constant dense<0.000000e+00> : vector<4x4xf32>
    %359 = vector.multi_reduction <add>, %358, %cst_265 [2] : vector<4x4x64xf32> to vector<4x4xf32>
    %360 = arith.addf %351, %359 : vector<4x4xf32>
    %c0_266 = arith.constant 0 : index
    %c1_267 = arith.constant 1 : index
    %c2_268 = arith.constant 2 : index
    %c0_269 = arith.constant 0 : index
    %361 = vector.load %arg7[%c0_266, %c1_267, %c2_268, %c0_269] : memref<4x6x6x64xf32, #tpu.memory_space<vmem>>, vector<1x4x4x64xf32>
    %362 = vector.shape_cast %361 : vector<1x4x4x64xf32> to vector<4x4x64xf32>
    %c2_270 = arith.constant 2 : index
    %c0_271 = arith.constant 0 : index
    %363 = vector.load %arg4[%c2_270, %c0_271] : memref<9x64xf32, #tpu.memory_space<vmem>>, vector<1x64xf32>
    %364 = vector.shape_cast %363 : vector<1x64xf32> to vector<64xf32>
    %365 = vector.shape_cast %364 : vector<64xf32> to vector<1x1x64xf32>
    %366 = vector.broadcast %365 : vector<1x1x64xf32> to vector<4x4x64xf32>
    %367 = arith.mulf %362, %366 : vector<4x4x64xf32>
    %cst_272 = arith.constant dense<0.000000e+00> : vector<4x4xf32>
    %368 = vector.multi_reduction <add>, %367, %cst_272 [2] : vector<4x4x64xf32> to vector<4x4xf32>
    %369 = arith.addf %360, %368 : vector<4x4xf32>
    %c2_273 = arith.constant 2 : index
    %c1_274 = arith.constant 1 : index
    %c1_275 = arith.constant 1 : index
    %c0_276 = arith.constant 0 : index
    %370 = vector.load %arg7[%c2_273, %c1_274, %c1_275, %c0_276] : memref<4x6x6x64xf32, #tpu.memory_space<vmem>>, vector<1x4x4x64xf32>
    %371 = vector.shape_cast %370 : vector<1x4x4x64xf32> to vector<4x4x64xf32>
    %c3_277 = arith.constant 3 : index
    %c0_278 = arith.constant 0 : index
    %372 = vector.load %arg4[%c3_277, %c0_278] : memref<9x64xf32, #tpu.memory_space<vmem>>, vector<1x64xf32>
    %373 = vector.shape_cast %372 : vector<1x64xf32> to vector<64xf32>
    %374 = vector.shape_cast %373 : vector<64xf32> to vector<1x1x64xf32>
    %375 = vector.broadcast %374 : vector<1x1x64xf32> to vector<4x4x64xf32>
    %376 = arith.mulf %371, %375 : vector<4x4x64xf32>
    %cst_279 = arith.constant dense<0.000000e+00> : vector<4x4xf32>
    %377 = vector.multi_reduction <add>, %376, %cst_279 [2] : vector<4x4x64xf32> to vector<4x4xf32>
    %378 = arith.addf %369, %377 : vector<4x4xf32>
    %c3_280 = arith.constant 3 : index
    %c1_281 = arith.constant 1 : index
    %c1_282 = arith.constant 1 : index
    %c0_283 = arith.constant 0 : index
    %379 = vector.load %arg7[%c3_280, %c1_281, %c1_282, %c0_283] : memref<4x6x6x64xf32, #tpu.memory_space<vmem>>, vector<1x4x4x64xf32>
    %380 = vector.shape_cast %379 : vector<1x4x4x64xf32> to vector<4x4x64xf32>
    %c4_284 = arith.constant 4 : index
    %c0_285 = arith.constant 0 : index
    %381 = vector.load %arg4[%c4_284, %c0_285] : memref<9x64xf32, #tpu.memory_space<vmem>>, vector<1x64xf32>
    %382 = vector.shape_cast %381 : vector<1x64xf32> to vector<64xf32>
    %383 = vector.shape_cast %382 : vector<64xf32> to vector<1x1x64xf32>
    %384 = vector.broadcast %383 : vector<1x1x64xf32> to vector<4x4x64xf32>
    %385 = arith.mulf %380, %384 : vector<4x4x64xf32>
    %cst_286 = arith.constant dense<0.000000e+00> : vector<4x4xf32>
    %386 = vector.multi_reduction <add>, %385, %cst_286 [2] : vector<4x4x64xf32> to vector<4x4xf32>
    %387 = arith.addf %378, %386 : vector<4x4xf32>
    %c2_287 = arith.constant 2 : index
    %c1_288 = arith.constant 1 : index
    %c2_289 = arith.constant 2 : index
    %c0_290 = arith.constant 0 : index
    %388 = vector.load %arg7[%c2_287, %c1_288, %c2_289, %c0_290] : memref<4x6x6x64xf32, #tpu.memory_space<vmem>>, vector<1x4x4x64xf32>
    %389 = vector.shape_cast %388 : vector<1x4x4x64xf32> to vector<4x4x64xf32>
    %c5_291 = arith.constant 5 : index
    %c0_292 = arith.constant 0 : index
    %390 = vector.load %arg4[%c5_291, %c0_292] : memref<9x64xf32, #tpu.memory_space<vmem>>, vector<1x64xf32>
    %391 = vector.shape_cast %390 : vector<1x64xf32> to vector<64xf32>
    %392 = vector.shape_cast %391 : vector<64xf32> to vector<1x1x64xf32>
    %393 = vector.broadcast %392 : vector<1x1x64xf32> to vector<4x4x64xf32>
    %394 = arith.mulf %389, %393 : vector<4x4x64xf32>
    %cst_293 = arith.constant dense<0.000000e+00> : vector<4x4xf32>
    %395 = vector.multi_reduction <add>, %394, %cst_293 [2] : vector<4x4x64xf32> to vector<4x4xf32>
    %396 = arith.addf %387, %395 : vector<4x4xf32>
    %c0_294 = arith.constant 0 : index
    %c2_295 = arith.constant 2 : index
    %c1_296 = arith.constant 1 : index
    %c0_297 = arith.constant 0 : index
    %397 = vector.load %arg7[%c0_294, %c2_295, %c1_296, %c0_297] : memref<4x6x6x64xf32, #tpu.memory_space<vmem>>, vector<1x4x4x64xf32>
    %398 = vector.shape_cast %397 : vector<1x4x4x64xf32> to vector<4x4x64xf32>
    %c6_298 = arith.constant 6 : index
    %c0_299 = arith.constant 0 : index
    %399 = vector.load %arg4[%c6_298, %c0_299] : memref<9x64xf32, #tpu.memory_space<vmem>>, vector<1x64xf32>
    %400 = vector.shape_cast %399 : vector<1x64xf32> to vector<64xf32>
    %401 = vector.shape_cast %400 : vector<64xf32> to vector<1x1x64xf32>
    %402 = vector.broadcast %401 : vector<1x1x64xf32> to vector<4x4x64xf32>
    %403 = arith.mulf %398, %402 : vector<4x4x64xf32>
    %cst_300 = arith.constant dense<0.000000e+00> : vector<4x4xf32>
    %404 = vector.multi_reduction <add>, %403, %cst_300 [2] : vector<4x4x64xf32> to vector<4x4xf32>
    %405 = arith.addf %396, %404 : vector<4x4xf32>
    %c1_301 = arith.constant 1 : index
    %c2_302 = arith.constant 2 : index
    %c1_303 = arith.constant 1 : index
    %c0_304 = arith.constant 0 : index
    %406 = vector.load %arg7[%c1_301, %c2_302, %c1_303, %c0_304] : memref<4x6x6x64xf32, #tpu.memory_space<vmem>>, vector<1x4x4x64xf32>
    %407 = vector.shape_cast %406 : vector<1x4x4x64xf32> to vector<4x4x64xf32>
    %c7_305 = arith.constant 7 : index
    %c0_306 = arith.constant 0 : index
    %408 = vector.load %arg4[%c7_305, %c0_306] : memref<9x64xf32, #tpu.memory_space<vmem>>, vector<1x64xf32>
    %409 = vector.shape_cast %408 : vector<1x64xf32> to vector<64xf32>
    %410 = vector.shape_cast %409 : vector<64xf32> to vector<1x1x64xf32>
    %411 = vector.broadcast %410 : vector<1x1x64xf32> to vector<4x4x64xf32>
    %412 = arith.mulf %407, %411 : vector<4x4x64xf32>
    %cst_307 = arith.constant dense<0.000000e+00> : vector<4x4xf32>
    %413 = vector.multi_reduction <add>, %412, %cst_307 [2] : vector<4x4x64xf32> to vector<4x4xf32>
    %414 = arith.addf %405, %413 : vector<4x4xf32>
    %c0_308 = arith.constant 0 : index
    %c2_309 = arith.constant 2 : index
    %c2_310 = arith.constant 2 : index
    %c0_311 = arith.constant 0 : index
    %415 = vector.load %arg7[%c0_308, %c2_309, %c2_310, %c0_311] : memref<4x6x6x64xf32, #tpu.memory_space<vmem>>, vector<1x4x4x64xf32>
    %416 = vector.shape_cast %415 : vector<1x4x4x64xf32> to vector<4x4x64xf32>
    %c8_312 = arith.constant 8 : index
    %c0_313 = arith.constant 0 : index
    %417 = vector.load %arg4[%c8_312, %c0_313] : memref<9x64xf32, #tpu.memory_space<vmem>>, vector<1x64xf32>
    %418 = vector.shape_cast %417 : vector<1x64xf32> to vector<64xf32>
    %419 = vector.shape_cast %418 : vector<64xf32> to vector<1x1x64xf32>
    %420 = vector.broadcast %419 : vector<1x1x64xf32> to vector<4x4x64xf32>
    %421 = arith.mulf %416, %420 : vector<4x4x64xf32>
    %cst_314 = arith.constant dense<0.000000e+00> : vector<4x4xf32>
    %422 = vector.multi_reduction <add>, %421, %cst_314 [2] : vector<4x4x64xf32> to vector<4x4xf32>
    %423 = arith.addf %414, %422 : vector<4x4xf32>
    %c0_315 = arith.constant 0 : index
    %c3_316 = arith.constant 3 : index
    %c0_317 = arith.constant 0 : index
    %c0_318 = arith.constant 0 : index
    %424 = vector.load %arg6[%c0_315, %c3_316, %c0_317, %c0_318] : memref<1x4x4x4xf32, #tpu.memory_space<vmem>>, vector<1x1x4x4xf32>
    %425 = vector.shape_cast %424 : vector<1x1x4x4xf32> to vector<4x4xf32>
    %426 = vector.shape_cast %423 : vector<4x4xf32> to vector<1x1x4x4xf32>
    tpu.vector_store %arg6[%c0_315, %c3_316, %c0_317, %c0_318], %426 {strides = array<i32>} : memref<1x4x4x4xf32, #tpu.memory_space<vmem>>, vector<1x1x4x4xf32>,
    return
  }
  func.func @transform_0(%arg0: i32) -> (i32, i32, i32, i32) {
    %c0_i32 = arith.constant 0 : i32
    %c0_i32_0 = arith.constant 0 : i32
    %c0_i32_1 = arith.constant 0 : i32
    %c0_i32_2 = arith.constant 0 : i32
    return %arg0, %c0_i32, %c0_i32_0, %c0_i32_1 : i32, i32, i32, i32
  }
  func.func @transform_1(%arg0: i32) -> (i32, i32, i32) {
    %c0_i32 = arith.constant 0 : i32
    %c0_i32_0 = arith.constant 0 : i32
    %c0_i32_1 = arith.constant 0 : i32
    %c0_i32_2 = arith.constant 0 : i32
    return %c0_i32, %c0_i32_0, %c0_i32_1 : i32, i32, i32
  }
  func.func @transform_2(%arg0: i32) -> (i32, i32) {
    %c0_i32 = arith.constant 0 : i32
    %c0_i32_0 = arith.constant 0 : i32
    %c0_i32_1 = arith.constant 0 : i32
    return %c0_i32, %c0_i32_0 : i32, i32
  }
  func.func @transform_3(%arg0: i32) -> (i32, i32) {
    %c0_i32 = arith.constant 0 : i32
    %c0_i32_0 = arith.constant 0 : i32
    %c0_i32_1 = arith.constant 0 : i32
    return %c0_i32, %c0_i32_0 : i32, i32
  }
  func.func @transform_4(%arg0: i32) -> i32 {
    %c0_i32 = arith.constant 0 : i32
    %c0_i32_0 = arith.constant 0 : i32
    return %c0_i32 : i32
  }
  func.func @transform_5(%arg0: i32) -> (i32, i32, i32, i32) {
    %c0_i32 = arith.constant 0 : i32
    %c0_i32_0 = arith.constant 0 : i32
    %c0_i32_1 = arith.constant 0 : i32
    %c0_i32_2 = arith.constant 0 : i32
    return %arg0, %c0_i32, %c0_i32_0, %c0_i32_1 : i32, i32, i32, i32
  }
}

</mosaic_0001>

<bundles_post_ra>
// kernel: generator_forward.4
= control target key start
LH: loop header
LB: loop body
LE: loop exit
PB: predicated region body
PF: predicated region fallthrough
CT: control target
= control target key end

     0   :  { %9 = vsyncpa [#allocation3], 0  ;;  %s1380_s0 = inlined_call_operand.hbm [shape: f32[4,32], index: 0, kind: input, shape index: {}]   ;;  %s1381_s1 = inlined_call_operand.hbm [shape: bf16[32,1024], index: 1, kind: input, shape index: {}]   ;;  %s1382_s2 = inlined_call_operand.hbm [shape: f32[1,1024], index: 2, kind: input, shape index: {}]   ;;  %s1383_s3 = inlined_call_operand.hbm [shape: f32[1,1024], index: 3, kind: input, shape index: {}]   ;;  %s1384_s4 = inlined_call_operand.vmem [shape: bf16[4,1024], index: 4, kind: output, shape index: {}]  }
   0x1   :  { %10 = vsyncpa [#allocation5], 0 }
   0x2   :  { %12 = vsyncpa [#allocation5 + $0x1], 0 }
   0x3   :  { %13 = vsyncpa [#allocation8], 0 }
   0x4   :  { %15 = vsyncpa [#allocation8 + $0x1], 0  ;;  %s1125_s15 = smov 0   ;;  %s1127_s16 = smov 0  }
   0x5   :  { %s1129_s17 = smov 0   ;;  %s1131_s18 = smov 0  }
   0x6 LB: > { %s1146_s19 = sadd.s32 1, %s1088_s18   ;;  %s49_s20 = sadd.s32 1, %s1084_s17  ;;  %s1088_s18 = sphi %s1131_s18, %s1407_s18   ;;  %s1084_s17 = sphi %s1129_s17, %s1406_s17   ;;  %s1080_s16 = sphi %s1127_s16, %s1405_s16   ;;  %s1076_s15 = sphi %s1125_s15, %s1404_s15  }
   0x7   : > { %s46_s21 = ssub.s32 %s1088_s18, %s1146_s19  ;;  %p56_p0 = scmp.ne.s32.totalorder %s1084_s17, %s1080_s16 }
   0x8   : > { %p47_p1 = scmp.eq.s32.totalorder %s46_s21, 0  ;;  %p57_p2 = scmp.eq.s32.totalorder %s1088_s18, 0 }
   0x9   : > { %p867_p3 = scmp.lt.s32.totalorder %s1088_s18, 2  ;;  %s175_s23 = sand.u32 1, %s1088_s18  }
   0xa   : > { %s1156_s22 = scalar_select %p47_p1, %s1084_s17, %s49_s20  }
   0xb   : > { %p58_p4 = por %p57_p2, %p56_p0  ;;  %s1160_s24 = sand.u32 1, %s1084_s17  }
   0xc   : > { %s809_s25 = sshll.u32 %s1160_s24, 6  ;;  %s839_s26 = sshll.u32 %s1088_s18, 8 }
   0xd   : > { %s1167_s29 = scalar_lea.hbm %s1381_s1, %s839_s26  ;;  %s179_s30 = scalar_lea.vmem [#allocation4], %s809_s25 }
   0xe   : > { %s186_s5 = sshll.u32 %s179_s30, 4  ;;  %p1169_p5 = pnand %p867_p3, %p58_p4  ;;  %s1173_s5 = int_to_ptr.vmem [resolvable:$true] %s186_s5 }
   0xf   : > { %s1175_s7 = scalar_lea.sflag [#allocation5], %s175_s23  ;;  %s928_s8 = scalar_lea.hbm %s1167_s29, 1024 }
  0x10   : > { %s1392_s6 = scalar_select %p1169_p5, 1, 0 }
  0x11   : > { %p929_p6 = scmp.ne.s32.totalorder %s1167_s29, %s928_s8  ;;  %p1181_p7 = pneg %p1169_p5 }
  0x12   : > { %s933_s12 = scalar_lea.hbm %s1381_s1, 2048  ;;  %p934_p10 = scmp.lt.u32.totalorder %s1167_s29, %s1381_s1 }
  0x13   : > { %s1393_s9 = scalar_select %p1181_p7, 1, 0 }
  0x14   : > { %p931_p8 = pnand %p1181_p7, %p929_p6  ;;  %p935_p11 = scmp.lt.u32.totalorder %s933_s12, %s928_s8 }
  0x15   : > { %p937_p13 = scmp.lt.u32.totalorder %s928_s8, %s1167_s29 }
  0x16   : > { %p932_p9 = pneg %p931_p8  ;;  %p936_p12 = por %p935_p11, %p934_p10 }
  0x18   : > { %p938_p0 = por %p937_p13, %p936_p12 }
  0x1a   : > { %p939_p1 = pnand %p938_p0, %p932_p9 }
  0x1c   : > { %942 = shalt.err (!%p939_p1)
}
  0x1d   : > { %s943_s20 = scalar_lea.vmem %s1173_s5, 1024  ;;  %s1090_s21 = smov [#allocation4]  }
  0x1e   : > { %p944_p2 = scmp.ne.s32.totalorder %s1173_s5, %s943_s20  ;;  %s948_s23 = sshll.u32 %s1090_s21, 4  ;;  %s949_s23 = int_to_ptr.vmem [resolvable:$false] %s948_s23 }
  0x1f   : > { %s950_s25 = scalar_lea.vmem %s949_s23, 2048  ;;  %p951_p6 = scmp.lt.s32.totalorder %s1173_s5, %s949_s23 }
  0x20   : > { %p946_p3 = pnand %p944_p2, %p1181_p7  ;;  %p952_p8 = scmp.lt.s32.totalorder %s950_s25, %s943_s20 }
  0x22   : > { %p947_p4 = pneg %p946_p3  ;;  %p953_p10 = por %p952_p8, %p951_p6 }
  0x24   : > { %p954_p11 = pnand %p953_p10, %p947_p4 }
  0x26   : > { %957 = shalt.err (!%p954_p11)
}
  0x27   : > { %s1091_s26 = smov 512   ;;  %s1092_s27 = smov 256  }
  0x28   : > { %s1093_s28 = smov 16   ;;  %s1206_s30 = sadd.s32 4294967295, %s1088_s18  }
  0x29   : > { %859 = dma.hbm_to_vmem [thread:$0]  (!%p1169_p5), %s1167_s29, 1024, %s1173_s5, %s1175_s7, %s1091_s26, %s1092_s27, %s1093_s28  }
  0x2a   : > { %p62_p9 = scmp.ne.s32.totalorder %s1080_s16, %s1076_s15  ;;  %p1385_p12 = scmp.eq.s32.totalorder %s1206_s30, 0 }
  0x2b   : > { %p806_p13 = scmp.ge.s32.totalorder %s1088_s18, 1  ;;  %p151_p0 = scmp.lt.s32.totalorder %s1088_s18, 3 }
  0x2c   : > { %p1215_p1 = por %p1385_p12, %p62_p9  ;;  %s1094_s29 = smov [#allocation2]  }
  0x2d   : > { %p1219_p2 = pnand %p806_p13, %p151_p0  ;;  %s164_s5 = sshll.u32 %s1094_s29, 4  ;;  %s165_s5 = int_to_ptr.vmem [resolvable:$true] %s164_s5 }
  0x2e   : > { %s1394_s8 = scalar_select %p1215_p1, 1, 0 }
  0x2f   : > { %s1395_s10 = scalar_select %p1219_p2, 1, 0 }
  0x30   : > { %s812_s11 = sshll.u32 %s1160_s24, 2  ;;  %p852_p3 = pneg %p1219_p2 }
  0x31   : > { %s840_s15 = sshll.u32 %s1088_s18, 6  ;;  %s200_s21 = scalar_lea.vmem [#allocation6], %s812_s11 }
  0x32   : > { %p1229_p4 = pnand %p852_p3, %p1385_p12  ;;  %s1238_s20 = scalar_lea.hbm %s1382_s2, %s840_s15 }
  0x33   : > { %s208_s23 = sshll.u32 %s200_s21, 4  ;;  %s958_s27 = scalar_lea.hbm %s1380_s0, 64  ;;  %s1242_s23 = int_to_ptr.vmem [resolvable:$true] %s208_s23 }
  0x34   : > { %p959_p6 = scmp.ne.s32.totalorder %s1380_s0, %s958_s27  ;;  %p960_p8 = pneg %p1229_p4 }
  0x35   : > { %p965_p9 = scmp.lt.u32.totalorder %s958_s27, %s1380_s0 }
  0x36   : > { %p961_p10 = pnand %p960_p8, %p959_p6 }
  0x38   : > { %p962_p11 = pneg %p961_p10 }
  0x3a   : > { %p967_p13 = pnand %p965_p9, %p962_p11 }
  0x3c   : > { %970 = shalt.err (!%p967_p13)
}
  0x3d   : > { %s971_s21 = scalar_lea.vmem %s165_s5, 64  ;;  %p979_p1 = scmp.lt.s32.totalorder %s165_s5, %s165_s5 }
  0x3e   : > { %p972_p0 = scmp.ne.s32.totalorder %s165_s5, %s971_s21  ;;  %p980_p2 = scmp.lt.s32.totalorder %s971_s21, %s971_s21 }
  0x40   : > { %p974_p3 = pnand %p972_p0, %p960_p8  ;;  %p981_p5 = por %p980_p2, %p979_p1 }
  0x42   : > { %p975_p12 = pneg %p974_p3 }
  0x44   : > { %p982_p7 = pnand %p981_p5, %p975_p12 }
  0x46   : > { %985 = shalt.err (!%p982_p7)
}
  0x47   : > { %855 = dma.hbm_to_vmem [thread:$0]  (!%p1229_p4), %s1380_s0, 64, %s165_s5, [#allocation3]  }
  0x48   : > { %s986_s27 = scalar_lea.hbm %s1238_s20, 64  ;;  %p1397_p8 = scmp.ne.s32.totalorder %s1393_s9, 0 }
  0x49   : > { %p987_p6 = scmp.ne.s32.totalorder %s1238_s20, %s986_s27  ;;  %s991_s13 = scalar_lea.hbm %s1382_s2, 128 }
  0x4a   : > { %p992_p5 = scmp.lt.u32.totalorder %s1238_s20, %s1382_s2  ;;  %p993_p7 = scmp.lt.u32.totalorder %s991_s13, %s986_s27 }
  0x4b   : > { %p989_p10 = pnand %p987_p6, %p1397_p8  ;;  %p995_p1 = scmp.lt.u32.totalorder %s986_s27, %s1238_s20 }
  0x4c   : > { %p994_p12 = por %p993_p7, %p992_p5 }
  0x4d   : > { %p990_p11 = pneg %p989_p10 }
  0x4e   : > { %p996_p2 = por %p995_p1, %p994_p12 }
  0x50   : > { %p997_p9 = pnand %p996_p2, %p990_p11 }
  0x52   : > { %1000 = shalt.err (!%p997_p9)
}
  0x53   : > { %s1001_s5 = scalar_lea.vmem %s1242_s23, 64  ;;  %s1095_s21 = smov [#allocation6]  }
  0x54   : > { %p1002_p4 = scmp.ne.s32.totalorder %s1242_s23, %s1001_s5  ;;  %s1006_s25 = sshll.u32 %s1095_s21, 4  ;;  %s1007_s25 = int_to_ptr.vmem [resolvable:$false] %s1006_s25 }
  0x55   : > { %s1008_s26 = scalar_lea.vmem %s1007_s25, 128  ;;  %p1009_p3 = scmp.lt.s32.totalorder %s1242_s23, %s1007_s25 }
  0x56   : > { %p1004_p13 = pnand %p1002_p4, %p1397_p8  ;;  %p1010_p6 = scmp.lt.s32.totalorder %s1008_s26, %s1001_s5 }
  0x58   : > { %p1005_p0 = pneg %p1004_p13  ;;  %p1011_p10 = por %p1010_p6, %p1009_p3 }
  0x5a   : > { %p1012_p5 = pnand %p1011_p10, %p1005_p0 }
  0x5c   : > { %1015 = shalt.err (!%p1012_p5)
}
  0x5d   : > { %p1398_p11 = scmp.ne.s32.totalorder %s1392_s6, 0  ;;  %s1287_s29 = scalar_lea.hbm %s1383_s3, %s840_s15 }
  0x5e   : > { %s219_s13 = scalar_lea.vmem [#allocation7], %s812_s11  ;;  %s216_s12 = scalar_lea.sflag [#allocation8], %s1160_s24 }
  0x5f   : > { %862 = dma.hbm_to_vmem [thread:$0]  (!%p1398_p11), %s1238_s20, 64, %s1242_s23, %s1175_s7  }
  0x60   : > { %s227_s14 = sshll.u32 %s219_s13, 4  ;;  %s1016_s5 = scalar_lea.hbm %s1287_s29, 64  ;;  %s228_s14 = int_to_ptr.vmem [resolvable:$true] %s227_s14 }
  0x61   : > { %p1017_p7 = scmp.ne.s32.totalorder %s1287_s29, %s1016_s5  ;;  %s1021_s20 = scalar_lea.hbm %s1383_s3, 128 }
  0x62   : > { %p1022_p2 = scmp.lt.u32.totalorder %s1287_s29, %s1383_s3  ;;  %p1023_p9 = scmp.lt.u32.totalorder %s1021_s20, %s1016_s5 }
  0x63   : > { %p1019_p12 = pnand %p1017_p7, %p1397_p8  ;;  %p1025_p13 = scmp.lt.u32.totalorder %s1016_s5, %s1287_s29 }
  0x64   : > { %p1024_p4 = por %p1023_p9, %p1022_p2 }
  0x65   : > { %p1020_p1 = pneg %p1019_p12 }
  0x66   : > { %p1026_p0 = por %p1025_p13, %p1024_p4 }
  0x68   : > { %p1027_p3 = pnand %p1026_p0, %p1020_p1 }
  0x6a   : > { %1030 = shalt.err (!%p1027_p3)
}
  0x6b   : > { %s1031_s24 = scalar_lea.vmem %s228_s14, 64  ;;  %s1096_s11 = smov [#allocation7]  }
  0x6c   : > { %p1032_p6 = scmp.ne.s32.totalorder %s228_s14, %s1031_s24  ;;  %s1036_s21 = sshll.u32 %s1096_s11, 4  ;;  %s1037_s21 = int_to_ptr.vmem [resolvable:$false] %s1036_s21 }
  0x6d   : > { %s1038_s25 = scalar_lea.vmem %s1037_s21, 128  ;;  %p1039_p7 = scmp.lt.s32.totalorder %s228_s14, %s1037_s21 }
  0x6e   : > { %p1034_p10 = pnand %p1032_p6, %p1397_p8  ;;  %p1040_p12 = scmp.lt.s32.totalorder %s1038_s25, %s1031_s24 }
  0x70   : > { %p1035_p5 = pneg %p1034_p10  ;;  %p1041_p11 = por %p1040_p12, %p1039_p7 }
  0x72   : > { %p1042_p2 = pnand %p1041_p11, %p1035_p5 }
  0x74   : > { %1045 = shalt.err (!%p1042_p2)
}
  0x75   : > { %p1399_p9 = scmp.ne.s32.totalorder %s1392_s6, 0  ;;  %p1400_p1 = scmp.ne.s32.totalorder %s1395_s10, 0 }
  0x76   : > { %p1401_p4 = scmp.eq.s32.totalorder (!%p1400_p1), %s1206_s30, 0 }
  0x77   : > { %865 = dma.hbm_to_vmem [thread:$0]  (!%p1399_p9), %s1287_s29, 64, %s228_s14, %s216_s12  }
  0x78   : > { %236 = sbr.rel (%p1400_p1) target bundleno = 434 (0x1b2), region = 36 }
  0x7f   : > { %1063 = dma.done.wait (%p1401_p4), [#allocation3], 64   ;;  %p1402_p8 = pmov %p1401_p4 }
  0x80   : > { %s242_s9 = sand.u32 1, %s1206_s30   ;;  %s244_s26 = sand.u32 1, %s1080_s16  }
  0x81   : > { %1065 = vsyncadd (%p1402_p8), [#allocation3], 4294967232  ;;  %s820_s27 = sshll.u32 %s244_s26, 6  ;;  %s243_s28 = scalar_lea.sflag [#allocation5], %s242_s9 }
  0x82   : > { %s246_s13 = scalar_lea.vmem [#allocation4], %s820_s27  ;;  %p1403_p11 = scmp.ne.s32.totalorder %s1394_s8, 0 }
  0x84   : > { %1067 = dma.done.wait (%p1403_p11), %s243_s28, 1088  }
  0x85   : > { %1069 = vsyncadd (%p1403_p11), %s243_s28, 4294966208  ;;  %s821_s6 = sshll.u32 %s244_s26, 2  ;;  %s261_s29 = scalar_lea.sflag [#allocation8], %s244_s26 }
  0x86   : > { %s1321_s10 = scalar_lea.vmem [#allocation6], %s821_s6  ;;  %s1323_s14 = scalar_lea.vmem [#allocation7], %s821_s6 }
  0x87   : > { %1071 = dma.done.wait (%p1403_p11), %s261_s29, 64  }
  0x88   : > { %1073 = vsyncadd (%p1403_p11), %s261_s29, 4294967232  ;;  %v1097_v0 = vmov 0   ;;  %v908_v1 = vld [vmem:[%s246_s13 + $0x4] ss:$16 sps:$4 sm:$0xff]   ;;  %v910_v2 = vld [vmem:[%s246_s13 + $0xc] ss:$16 sps:$4 sm:$0xff]  }
  0x89   : > { %395 = vmatprep.mubr.bf16.mxu0 %v1097_v0  ;;  %436 = vmatprep.mubr.bf16.mxu1 %v1097_v0  ;;  %v912_v3 = vld [vmem:[%s246_s13] ss:$16 sps:$4 sm:$0xff]   ;;  %v913_v4 = vld [vmem:[%s246_s13 + $0x8] ss:$16 sps:$4 sm:$0xff]   ;;  %v914_v5 = vld [vmem:[%s246_s13 + $0x24] ss:$16 sps:$4 sm:$0xff]  }
  0x8a   : > { %363 = vmatprep.subr.bf16.mxu0 %v908_v1  ;;  %404 = vmatprep.subr.bf16.mxu1 %v910_v2  ;;  %v916_v6 = vld [vmem:[%s246_s13 + $0x2c] ss:$16 sps:$4 sm:$0xff]   ;;  %v918_v7 = vld [vmem:[%s246_s13 + $0x20] ss:$16 sps:$4 sm:$0xff]   ;;  %v919_v8 = vld [vmem:[%s246_s13 + $0x28] ss:$16 sps:$4 sm:$0xff]  }
  0x8b   : > { %364 = vmatpush1.bf16.msra.mxu0 %v912_v3  ;;  %405 = vmatpush1.bf16.msra.mxu1 %v913_v4  ;;  %v309_v9 = vld [vmem:[#allocation2] sm:$0xf]  ;;  %vm359_vm0 = vcmask 261120   ;;  %vm445_vm1 = vcmask 1043456   ;;  %s823_s8 = sshll.u32 %s1206_s30, 2 }
  0x8c   : > { %365 = vmatprep.subr.bf16.mxu0 %v914_v5  ;;  %406 = vmatprep.subr.bf16.mxu1 %v916_v6  ;;  %v310_v10 = vpack.c.bf16 %v309_v9, %v309_v9  ;;  %p303_p13 = scmp.lt.s32.totalorder %s823_s8, 7 }
  0x8e   : > { %s1409_s8 = smov (!%p303_p13, %s823_s8), 7 }
  0x8f   : > { %366 = vmatpush1.bf16.msra.mxu0 %v918_v7  ;;  %407 = vmatpush1.bf16.msra.mxu1 %v919_v8  ;;  %s824_s30 = sshll.u32 %s1409_s8, 1 }
  0x90   : > { %s306_s18 = scalar_lea.vmem %s1384_s4, %s824_s30 }
  0x92   : > { %833 = vmatmul.mubr.msk.bf16.vlgmr.msra.gmra.mrb[0].mxu0 %vm359_vm0, %v310_v10  ;;  %834 = vmatmul.mubr.msk.bf16.vlgmr.msra.gmra.mrb[0].mxu1 %vm359_vm0, %v310_v10 }
 0x165   : > { %v1329_v11 = vpop.f32.mrb[0].mxu0  ;;  %v1331_v12 = vpop.f32.mrb[0].mxu1 }
 0x166   : > { %v446_v13 = vsel %vm445_vm1, %v1329_v11, 0.0  ;;  %v479_v14 = vmul.f32 %v1329_v11, %v1329_v11  ;;  %v460_v15 = vsel %vm445_vm1, %v1331_v12, 0.0  ;;  %v481_v16 = vmul.f32 %v1331_v12, %v1331_v12  ;;  %v1341_v17 = vpop.f32.mrb[1].mxu0  ;;  %v1343_v18 = vpop.f32.mrb[1].mxu1 }
 0x167   : > { %v447_v19 = vrot.slane %v446_v13, 4  ;;  %v461_v20 = vrot.slane %v460_v15, 4  ;;  %v453_v21 = vsel %vm445_vm1, %v1341_v17, 0.0  ;;  %v480_v22 = vmul.f32 %v1341_v17, %v1341_v17  ;;  %v401_v23 = vpop.f32.mrb[2].mxu0  ;;  %v442_v24 = vpop.f32.mrb[2].mxu1 }
 0x168   : > { %v483_v25 = vsel %vm445_vm1, %v479_v14, 0.0  ;;  %v497_v26 = vsel %vm445_vm1, %v481_v16, 0.0  ;;  %v454_v27 = vrot.slane %v453_v21, 4  ;;  %v467_v28 = vsel %vm445_vm1, %v1343_v18, 0.0  ;;  %v402_v29 = vpop.f32.mrb[3].mxu0  ;;  %v443_v30 = vpop.f32.mrb[3].mxu1 }
 0x169   : > { %v448_v31 = vadd.f32 %v447_v19, %v446_v13  ;;  %v484_v32 = vrot.slane %v483_v25, 4  ;;  %v462_v33 = vadd.f32 %v461_v20, %v460_v15  ;;  %v498_v34 = vrot.slane %v497_v26, 4 }
 0x16a   : > { %v455_v35 = vadd.f32 %v454_v27, %v453_v21  ;;  %v490_v36 = vsel %vm445_vm1, %v480_v22, 0.0  ;;  %v468_v37 = vrot.slane %v467_v28, 4  ;;  %v482_v38 = vmul.f32 %v1343_v18, %v1343_v18 }
 0x16b   : > { %v449_v39 = vrot.slane %v448_v31, 2  ;;  %v485_v40 = vadd.f32 %v484_v32, %v483_v25  ;;  %v463_v41 = vrot.slane %v462_v33, 2  ;;  %v499_v42 = vadd.f32 %v498_v34, %v497_v26 }
 0x16c   : > { %v456_v43 = vrot.slane %v455_v35, 2  ;;  %v491_v44 = vrot.slane %v490_v36, 4  ;;  %v469_v45 = vadd.f32 %v468_v37, %v467_v28  ;;  %v504_v46 = vsel %vm445_vm1, %v482_v38, 0.0 }
 0x16d   : > { %v450_v47 = vadd.f32 %v449_v39, %v448_v31  ;;  %v486_v48 = vrot.slane %v485_v40, 2  ;;  %v464_v49 = vadd.f32 %v463_v41, %v462_v33  ;;  %v500_v50 = vrot.slane %v499_v42, 2 }
 0x16e   : > { %v457_v51 = vadd.f32 %v456_v43, %v455_v35  ;;  %v492_v52 = vadd.f32 %v491_v44, %v490_v36  ;;  %v470_v53 = vrot.slane %v469_v45, 2  ;;  %v505_v54 = vrot.slane %v504_v46, 4 }
 0x16f   : > { %v451_v55 = vrot.slane %v450_v47, 1  ;;  %v487_v56 = vadd.f32 %v486_v48, %v485_v40  ;;  %v465_v57 = vrot.slane %v464_v49, 1  ;;  %v501_v58 = vadd.f32 %v500_v50, %v499_v42 }
 0x170   : > { %v458_v59 = vrot.slane %v457_v51, 1  ;;  %v493_v60 = vrot.slane %v492_v52, 2  ;;  %v471_v61 = vadd.f32 %v470_v53, %v469_v45  ;;  %v506_v62 = vadd.f32 %v505_v54, %v504_v46 }
 0x171   : > { %v452_v63 = vadd.f32 %v451_v55, %v450_v47  ;;  %v488_v0 = vrot.slane %v487_v56, 1  ;;  %v466_v1 = vadd.f32 %v465_v57, %v464_v49  ;;  %v502_v2 = vrot.slane %v501_v58, 1 }
 0x172   : > { %v459_v3 = vadd.f32 %v458_v59, %v457_v51  ;;  %v494_v4 = vadd.f32 %v493_v60, %v492_v52  ;;  %v472_v5 = vrot.slane %v471_v61, 1  ;;  %v507_v6 = vrot.slane %v506_v62, 2 }
 0x173   : > { %v475_v7 = vmul.f32 0.25, %v452_v63  ;;  %v489_v8 = vadd.f32 %v488_v0, %v487_v56  ;;  %v477_v9 = vmul.f32 0.25, %v466_v1  ;;  %v503_v10 = vadd.f32 %v502_v2, %v501_v58  ;;  %v527_v58 = vld [vmem:[%s1321_s10] sm:$0xf] }
 0x174   : > { %v476_v13 = vmul.f32 0.25, %v459_v3  ;;  %v495_v14 = vrot.slane %v494_v4, 1  ;;  %v473_v15 = vadd.f32 %v472_v5, %v471_v61  ;;  %v508_v16 = vadd.f32 %v507_v6, %v506_v62 }
 0x175   : > { %v511_v19 = vmul.f32 0.25, %v489_v8  ;;  %v515_v20 = vmul.f32 %v475_v7, %v475_v7  ;;  %v513_v21 = vmul.f32 0.25, %v503_v10  ;;  %v517_v22 = vmul.f32 %v477_v9, %v477_v9 }
 0x176   : > { %v496_v23 = vadd.f32 %v495_v14, %v494_v4  ;;  %v516_v24 = vmul.f32 %v476_v13, %v476_v13  ;;  %v478_v25 = vmul.f32 0.25, %v473_v15  ;;  %v509_v26 = vrot.slane %v508_v16, 1 }
 0x177   : > { %v519_v27 = vsub.f32 %v511_v19, %v515_v20  ;;  %v521_v28 = vsub.f32 %v513_v21, %v517_v22  ;;  %v1098_v43 = vmov 1966171168   ;;  %v545_v45 = vlaneseq }
 0x178   : > { %v512_v29 = vmul.f32 0.25, %v496_v23  ;;  %v510_v30 = vadd.f32 %v509_v26, %v508_v16  ;;  %v518_v31 = vmul.f32 %v478_v25, %v478_v25  ;;  %v543_v44 = vunpack.c.l.s4 %v1098_v43  ;;  %v566_v26 = vld [vmem:[%s1323_s14] sm:$0xf] }
 0x179   : > { %v523_v32 = vmax.f32 %v519_v27, 0.0  ;;  %v525_v33 = vmax.f32 %v521_v28, 0.0  ;;  %v546_v47 = vshrl.u32 %v545_v45, 7  ;;  %v1099_v27 = vmov 1983009808  }
 0x17a   : > { %v520_v34 = vsub.f32 %v512_v29, %v516_v24  ;;  %v514_v35 = vmul.f32 0.25, %v510_v30  ;;  %v544_v46 = vunpack.c.0.s8 %v543_v44 }
 0x17b   : > { %v528_v36 = vadd.f32 1e-05, %v523_v32  ;;  %v530_v37 = vadd.f32 1e-05, %v525_v33  ;;  %v570_v59 = vsub.s32 0, %v546_v47  ;;  %v574_v61 = vsub.s32 1, %v546_v47 }
 0x17c   : > { %v524_v38 = vmax.f32 %v520_v34, 0.0  ;;  %v522_v39 = vsub.f32 %v514_v35, %v518_v31  ;;  %v547_v50 = vsub.s32 %v544_v46, %v546_v47  ;;  %v578_v62 = vsub.s32 2, %v546_v47 }
 0x17d   : > { %920 = vrsqrt.f32 %v528_v36  ;;  %v582_v63 = vsub.s32 3, %v546_v47 }
 0x17e   : > { %v529_v40 = vadd.f32 1e-05, %v524_v38  ;;  %v526_v41 = vmax.f32 %v522_v39, 0.0  ;;  %922 = vrsqrt.f32 %v530_v37 }
 0x180   : > { %924 = vrsqrt.f32 %v529_v40  ;;  %v531_v42 = vadd.f32 1e-05, %v526_v41 }
 0x182   : > { %926 = vrsqrt.f32 %v531_v42 }
 0x187   : > { %v921_v48 = vpop.eup %920 }
 0x188   : > { %v923_v49 = vpop.eup %922 }
 0x18a   : > { %v925_v51 = vpop.eup %924 }
 0x18b   : > { %v540_v52 = vcombine.low %v921_v48, %v925_v51 }
 0x18c   : > { %v927_v53 = vpop.eup %926 }
 0x18d   : > { %v541_v54 = vcombine.low %v923_v49, %v927_v53  ;;  %v548_v55 = vrot.slane %v540_v52, %v547_v50 }
 0x18f   : > { %v555_v56 = vrot.slane %v541_v54, %v547_v50 }
 0x191   : > { %v556_v57 = vcombine.low %v548_v55, %v555_v56 }
 0x193   : > { %v563_v60 = vrot.slane %v556_v57, %v547_v50 }
 0x195   : > { %v565_v0 = vmul.f32 %v563_v60, %v527_v58 }
 0x197   : > { %v571_v1 = vrot.slane %v565_v0, %v570_v59  ;;  %v575_v2 = vrot.slane %v565_v0, %v574_v61  ;;  %v579_v3 = vrot.slane %v565_v0, %v578_v62  ;;  %v583_v4 = vrot.slane %v565_v0, %v582_v63 }
 0x199   : > { %v588_v5 = vmul.f32 %v571_v1, %v475_v7  ;;  %v589_v6 = vmul.f32 %v575_v2, %v476_v13  ;;  %v590_v8 = vmul.f32 %v579_v3, %v477_v9  ;;  %v591_v10 = vmul.f32 %v583_v4, %v478_v25 }
 0x19a   : > { %v622_v14 = vmul.f32 %v571_v1, %v1329_v11  ;;  %v623_v15 = vmul.f32 %v575_v2, %v1341_v17  ;;  %v624_v16 = vmul.f32 %v579_v3, %v1331_v12  ;;  %v625_v19 = vmul.f32 %v583_v4, %v1343_v18 }
 0x19b   : > { %v596_v20 = vcombine.low %v588_v5, %v589_v6  ;;  %v597_v21 = vcombine.low %v590_v8, %v591_v10  ;;  %v666_v7 = vunpack.c.l.s4 %v1099_v27 }
 0x19d   : > { %v604_v22 = vrot.slane %v596_v20, %v547_v50  ;;  %v611_v23 = vrot.slane %v597_v21, %v547_v50  ;;  %v667_v25 = vunpack.c.0.s8 %v666_v7 }
 0x19f   : > { %v612_v24 = vcombine.low %v604_v22, %v611_v23  ;;  %v670_v32 = vsub.s32 %v667_v25, %v546_v47 }
 0x1a1   : > { %v619_v13 = vrot.slane %v612_v24, %v547_v50 }
 0x1a3   : > { %v621_v9 = vsub.f32 %v566_v26, %v619_v13 }
 0x1a5   : > { %v630_v11 = vrot.slane %v621_v9, %v570_v59  ;;  %v634_v28 = vrot.slane %v621_v9, %v574_v61  ;;  %v638_v17 = vrot.slane %v621_v9, %v578_v62  ;;  %v642_v29 = vrot.slane %v621_v9, %v582_v63 }
 0x1a7   : > { %v647_v12 = vadd.f32 %v630_v11, %v622_v14  ;;  %v648_v18 = vadd.f32 %v634_v28, %v623_v15  ;;  %v649_v30 = vadd.f32 %v638_v17, %v624_v16  ;;  %v650_v31 = vadd.f32 %v642_v29, %v625_v19 }
 0x1a9   : > { %v651_v33 = vmax.f32 %v647_v12, 0.0  ;;  %v652_v34 = vmax.f32 %v648_v18, 0.0  ;;  %v653_v35 = vmax.f32 %v649_v30, 0.0  ;;  %v654_v36 = vmax.f32 %v650_v31, 0.0 }
 0x1ab   : > { %v835_v37 = vpack.c.bf16 %v652_v34, %v651_v33  ;;  %v836_v38 = vpack.c.bf16 %v654_v36, %v653_v35 }
 0x1ad   : > { %v671_v39 = vrot.slane %v835_v37, %v670_v32  ;;  %v678_v40 = vrot.slane %v836_v38, %v670_v32 }
 0x1af   : > { %v679_v41 = vcombine.low %v671_v39, %v678_v40 }
 0x1b1   : > { %681 = vst [vmem:[%s306_s18] sm:$0xff] %v679_v41 }
 0x1b2 PF: > { %p18_p0 = scmp.ge.s32.totalorder %s1146_s19, 4   ;;  %s1404_s15 = smov %s1080_s16 }
 0x1b3   : > { %s1405_s16 = smov %s1084_s17  ;;  %s1406_s17 = smov %s1156_s22 }
 0x1b4   : > { %s1407_s18 = smov %s1146_s19  ;;  %20 = sbr.rel (!%p18_p0) target bundleno = 6 (0x6), region = 105 }
 0x1bb   :  { %704 = vsyncpa [#allocation3], 1 }
 0x1bc   :  { %706 = vsyncpa [#allocation3 + $0x1], 1 }
 0x1bd   :  { %707 = vsyncpa [#allocation5], 1 }
 0x1be   :  { %709 = vsyncpa [#allocation5 + $0x1], 1 }
 0x1bf   :  { %710 = vsyncpa [#allocation8], 1 }
 0x1c0   :  { %712 = vsyncpa [#allocation8 + $0x1], 1 }

// kernel: generator_forward.5
= control target key start
LH: loop header
LB: loop body
LE: loop exit
PB: predicated region body
PF: predicated region fallthrough
CT: control target
= control target key end

     0   :  { %9 = vsyncpa [#allocation3], 0  ;;  %s4007_s0 = inlined_call_operand.vmem [shape: bf16[4,1024], index: 0, kind: input, shape index: {}]   ;;  %s4008_s1 = inlined_call_operand.hbm [shape: bf16[1024,2048], index: 1, kind: input, shape index: {}]   ;;  %s4009_s2 = inlined_call_operand.hbm [shape: f32[1,2048], index: 2, kind: input, shape index: {}]   ;;  %s4010_s3 = inlined_call_operand.hbm [shape: f32[1,2048], index: 3, kind: input, shape index: {}]   ;;  %s4011_s4 = inlined_call_operand.vmem [shape: bf16[4,2048], index: 4, kind: output, shape index: {}]  }
   0x1   :  { %11 = vsyncpa [#allocation3 + $0x1], 0 }
   0x2   :  { %12 = vsyncpa [#allocation5], 0 }
   0x3   :  { %14 = vsyncpa [#allocation5 + $0x1], 0  ;;  %s3469_s15 = smov 0   ;;  %s3471_s16 = smov 0  }
   0x4   :  { %s3473_s17 = smov 0   ;;  %s3475_s18 = smov 0  }
   0x5 LB: > { %s3488_s19 = sadd.s32 4294967295, %s3434_s18   ;;  %s3491_s20 = sadd.s32 1, %s3434_s18   ;;  %s3434_s18 = sphi %s3475_s18, %s4024_s18   ;;  %s3430_s17 = sphi %s3473_s17, %s4023_s17   ;;  %s3426_s16 = sphi %s3471_s16, %s4022_s16   ;;  %s3422_s15 = sphi %s3469_s15, %s4021_s15  }
   0x6   : > { %s45_s21 = ssub.s32 %s3434_s18, %s3491_s20  ;;  %s48_s22 = sadd.s32 1, %s3430_s17 }
   0x7   : > { %p46_p0 = scmp.eq.s32.totalorder %s45_s21, 0  ;;  %p55_p1 = scmp.ne.s32.totalorder %s3430_s17, %s3426_s16 }
   0x8   : > { %p56_p2 = scmp.eq.s32.totalorder %s3434_s18, 0  ;;  %p61_p3 = scmp.ne.s32.totalorder %s3426_s16, %s3422_s15 }
   0x9   : > { %s3501_s23 = scalar_select %p46_p0, %s3430_s17, %s48_s22  }
   0xa   : > { %p57_p4 = por %p56_p2, %p55_p1  ;;  %p62_p5 = scmp.eq.s32.totalorder %s3488_s19, 0 }
   0xb   : > { %p2874_p6 = scmp.lt.s32.totalorder %s3434_s18, 4  ;;  %s3510_s25 = sand.u32 1, %s3430_s17  }
   0xc   : > { %p3505_p7 = por %p62_p5, %p61_p3  ;;  %s2556_s26 = sshll.u32 %s3510_s25, 11 }
   0xd   : > { %p3513_p8 = pnand %p2874_p6, %p57_p4  ;;  %s170_s28 = scalar_lea.vmem [#allocation2], %s2556_s26 }
   0xe   : > { %s4014_s24 = scalar_select %p3505_p7, 1, 0 }
   0xf   : > { %s4015_s27 = scalar_select %p3513_p8, 1, 0 }
  0x10   : > { %s177_s29 = sshll.u32 %s170_s28, 4  ;;  %s187_s30 = sand.u32 1, %s3434_s18   ;;  %s3518_s29 = int_to_ptr.vmem [resolvable:$true] %s177_s29 }
  0x11   : > { %s2559_s5 = sshll.u32 %s3510_s25, 2  ;;  %s2832_s6 = sshll.u32 %s3434_s18, 6 }
  0x12   : > { %s3527_s9 = scalar_lea.hbm %s4009_s2, %s2832_s6  ;;  %s191_s10 = scalar_lea.vmem [#allocation4], %s2559_s5 }
  0x13   : > { %s199_s11 = sshll.u32 %s191_s10, 4  ;;  %s3533_s12 = scalar_lea.sflag [#allocation5], %s187_s30  ;;  %s3531_s11 = int_to_ptr.vmem [resolvable:$true] %s199_s11 }
  0x14   : > { %s3306_s13 = scalar_lea.hbm %s3527_s9, 64  ;;  %p3539_p10 = pneg %p3513_p8 }
  0x15   : > { %p3307_p9 = scmp.ne.s32.totalorder %s3527_s9, %s3306_s13  ;;  %s3311_s22 = scalar_lea.hbm %s4009_s2, 256 }
  0x16   : > { %p3312_p13 = scmp.lt.u32.totalorder %s3527_s9, %s4009_s2  ;;  %p3313_p0 = scmp.lt.u32.totalorder %s3311_s22, %s3306_s13 }
  0x17   : > { %p3309_p11 = pnand %p3539_p10, %p3307_p9  ;;  %p3315_p2 = scmp.lt.u32.totalorder %s3306_s13, %s3527_s9 }
  0x18   : > { %p3314_p1 = por %p3313_p0, %p3312_p13 }
  0x19   : > { %p3310_p12 = pneg %p3309_p11 }
  0x1a   : > { %p3316_p3 = por %p3315_p2, %p3314_p1 }
  0x1c   : > { %p3317_p4 = pnand %p3316_p3, %p3310_p12 }
  0x1e   : > { %3320 = shalt.err (!%p3317_p4)
}
  0x1f   : > { %s3321_s30 = scalar_lea.vmem %s3531_s11, 64  ;;  %s3436_s7 = smov [#allocation4]  }
  0x20   : > { %p3322_p5 = scmp.ne.s32.totalorder %s3531_s11, %s3321_s30  ;;  %s3326_s8 = sshll.u32 %s3436_s7, 4  ;;  %s3327_s8 = int_to_ptr.vmem [resolvable:$false] %s3326_s8 }
  0x21   : > { %s3328_s10 = scalar_lea.vmem %s3327_s8, 128  ;;  %p3329_p11 = scmp.lt.s32.totalorder %s3531_s11, %s3327_s8 }
  0x22   : > { %p3324_p6 = pnand %p3322_p5, %p3539_p10  ;;  %p3330_p7 = scmp.lt.s32.totalorder %s3328_s10, %s3321_s30 }
  0x24   : > { %p3325_p9 = pneg %p3324_p6  ;;  %p3331_p13 = por %p3330_p7, %p3329_p11 }
  0x26   : > { %p3332_p0 = pnand %p3331_p13, %p3325_p9 }
  0x28   : > { %3335 = shalt.err (!%p3332_p0)
}
  0x29   : > { %2870 = dma.hbm_to_vmem [thread:$0]  (!%p3513_p8), %s3527_s9, 64, %s3531_s11, %s3533_s12  }
  0x2a   : > { %s3568_s21 = scalar_lea.hbm %s4010_s3, %s2832_s6  ;;  %p2565_p7 = scmp.ge.s32.totalorder %s3434_s18, 1 }
  0x2b   : > { %p223_p12 = scmp.lt.s32.totalorder %s3434_s18, 5  ;;  %s2831_s22 = sshll.u32 %s3434_s18, 8 }
  0x2c   : > { %s3576_s30 = scalar_lea.hbm %s4008_s1, %s2831_s22  ;;  %s3584_s11 = scalar_lea.vmem [#allocation6], %s2559_s5 }
  0x2d   : > { %p3578_p1 = pnand %p2565_p7, %p223_p12  ;;  %s218_s6 = sshll.u32 %s3584_s11, 4  ;;  %s219_s6 = int_to_ptr.vmem [resolvable:$true] %s218_s6 }
  0x2e   : > { %s167_s7 = scalar_lea.sflag [#allocation3], %s3510_s25  ;;  %s3336_s18 = scalar_lea.hbm %s3576_s30, 32768 }
  0x2f   : > { %s4017_s9 = scalar_select %p3578_p1, 1, 0 }
  0x30   : > { %p3337_p2 = scmp.ne.s32.totalorder %s3576_s30, %s3336_s18  ;;  %s3341_s13 = scalar_lea.hbm %s4008_s1, 131072 }
  0x31   : > { %p3342_p5 = scmp.lt.u32.totalorder %s3576_s30, %s4008_s1  ;;  %p3343_p6 = scmp.lt.u32.totalorder %s3341_s13, %s3336_s18 }
  0x32   : > { %p3339_p3 = pnand %p3337_p2, %p3539_p10  ;;  %p3345_p11 = scmp.lt.u32.totalorder %s3336_s18, %s3576_s30 }
  0x33   : > { %p3344_p9 = por %p3343_p6, %p3342_p5 }
  0x34   : > { %p3340_p4 = pneg %p3339_p3 }
  0x35   : > { %p3346_p13 = por %p3345_p11, %p3344_p9 }
  0x37   : > { %p3347_p0 = pnand %p3346_p13, %p3340_p4 }
  0x39   : > { %3350 = shalt.err (!%p3347_p0)
}
  0x3a   : > { %s3351_s5 = scalar_lea.vmem %s3518_s29, 32768  ;;  %s3437_s26 = smov [#allocation2]  }
  0x3b   : > { %p3352_p7 = scmp.ne.s32.totalorder %s3518_s29, %s3351_s5  ;;  %s3356_s28 = sshll.u32 %s3437_s26, 4  ;;  %s3357_s28 = int_to_ptr.vmem [resolvable:$false] %s3356_s28 }
  0x3c   : > { %s3358_s8 = scalar_lea.vmem %s3357_s28, 65536  ;;  %p3359_p3 = scmp.lt.s32.totalorder %s3518_s29, %s3357_s28 }
  0x3d   : > { %p3354_p12 = pnand %p3352_p7, %p3539_p10  ;;  %p3360_p1 = scmp.lt.s32.totalorder %s3358_s8, %s3351_s5 }
  0x3f   : > { %p3355_p2 = pneg %p3354_p12  ;;  %p3361_p5 = por %p3360_p1, %p3359_p3 }
  0x41   : > { %p3362_p6 = pnand %p3361_p5, %p3355_p2 }
  0x43   : > { %3365 = shalt.err (!%p3362_p6)
}
  0x44   : > { %s3438_s18 = smov 1024   ;;  %s3439_s10 = smov 256  }
  0x45   : > { %s3440_s13 = smov 16   ;;  %s3366_s15 = scalar_lea.hbm %s3568_s21, 64 }
  0x46   : > { %2867 = dma.hbm_to_vmem [thread:$0]  (!%p3513_p8), %s3576_s30, 32768, %s3518_s29, %s167_s7, %s3438_s18, %s3439_s10, %s3440_s13  }
  0x47   : > { %p3367_p1 = scmp.ne.s32.totalorder %s3568_s21, %s3366_s15  ;;  %s3371_s26 = scalar_lea.hbm %s4010_s3, 256 }
  0x48   : > { %p3372_p11 = scmp.lt.u32.totalorder %s3568_s21, %s4010_s3  ;;  %p3373_p13 = scmp.lt.u32.totalorder %s3371_s26, %s3366_s15 }
  0x49   : > { %p3369_p4 = pnand %p3367_p1, %p3539_p10  ;;  %p3375_p7 = scmp.lt.u32.totalorder %s3366_s15, %s3568_s21 }
  0x4a   : > { %p3374_p0 = por %p3373_p13, %p3372_p11 }
  0x4b   : > { %p3370_p9 = pneg %p3369_p4 }
  0x4c   : > { %p3376_p12 = por %p3375_p7, %p3374_p0 }
  0x4e   : > { %p3377_p2 = pnand %p3376_p12, %p3370_p9 }
  0x50   : > { %3380 = shalt.err (!%p3377_p2)
}
  0x51   : > { %s3381_s25 = scalar_lea.vmem %s219_s6, 64  ;;  %s3441_s29 = smov [#allocation6]  }
  0x52   : > { %p3382_p3 = scmp.ne.s32.totalorder %s219_s6, %s3381_s25  ;;  %s3386_s30 = sshll.u32 %s3441_s29, 4  ;;  %s3387_s30 = int_to_ptr.vmem [resolvable:$false] %s3386_s30 }
  0x53   : > { %s3388_s11 = scalar_lea.vmem %s3387_s30, 128  ;;  %p3389_p1 = scmp.lt.s32.totalorder %s219_s6, %s3387_s30 }
  0x54   : > { %p3384_p5 = pnand %p3382_p3, %p3539_p10  ;;  %p3390_p4 = scmp.lt.s32.totalorder %s3388_s11, %s3381_s25 }
  0x56   : > { %p3385_p6 = pneg %p3384_p5  ;;  %p3391_p8 = por %p3390_p4, %p3389_p1 }
  0x58   : > { %p3392_p11 = pnand %p3391_p8, %p3385_p6 }
  0x5a   : > { %3395 = shalt.err (!%p3392_p11)
}
  0x5b   : > { %p4018_p13 = scmp.ne.s32.totalorder %s4015_s27, 0  ;;  %p4019_p9 = scmp.ne.s32.totalorder %s4017_s9, 0 }
  0x5c   : > { %s3634_s14 = sand.u32 (!%p4019_p9), 1, %s3426_s16   ;;  %p4020_p8 = scmp.ne.s32.totalorder (!%p4019_p9), %s4014_s24, 0 }
  0x5d   : > { %2873 = dma.hbm_to_vmem [thread:$0]  (!%p4018_p13), %s3568_s21, 64, %s219_s6, %s3533_s12  }
  0x5e   : > { %227 = sbr.rel (%p4019_p9) target bundleno = 650 (0x28a), region = 36  ;;  %s2566_s7 = sshll.u32 (!%p4019_p9), %s3634_s14, 11 }
  0x5f   : > { %s230_s18 = scalar_lea.sflag (!%p4019_p9), [#allocation3], %s3634_s14  ;;  %s3638_s10 = scalar_lea.vmem (!%p4019_p9), [#allocation2], %s2566_s7 }
  0x65   : > { %3413 = dma.done.wait (%p4020_p8), %s230_s18, 32768  }
  0x66   : > { %3415 = vsyncadd (%p4020_p8), %s230_s18, 4294934528  ;;  %s238_s27 = sand.u32 1, %s3488_s19   ;;  %s2567_s12 = sshll.u32 %s3634_s14, 2 }
  0x67   : > { %s239_s21 = scalar_lea.sflag [#allocation5], %s238_s27  ;;  %s3648_s9 = scalar_lea.vmem [#allocation4], %s2567_s12 }
  0x68   : > { %3417 = dma.done.wait (%p4020_p8), %s239_s21, 128  }
  0x69   : > { %3419 = vsyncadd (%p4020_p8), %s239_s21, 4294967168  ;;  %v2912_v0 = vld [vmem:[%s3638_s10 + $0x4] ss:$16 sps:$4 sm:$0xff]   ;;  %v2914_v1 = vld [vmem:[%s3638_s10 + $0xc] ss:$16 sps:$4 sm:$0xff]   ;;  %v559_v38 = vlaneseq  ;;  %vm2205_vm0 = vcmask 1043456  }
  0x6a   : > { %1877 = vmatprep.subr.bf16.mxu0 %v2912_v0  ;;  %v2916_v2 = vld [vmem:[%s3638_s10] ss:$16 sps:$4 sm:$0xff]   ;;  %v2917_v3 = vld [vmem:[%s3638_s10 + $0x8] ss:$16 sps:$4 sm:$0xff]   ;;  %2041 = vmatprep.subr.bf16.mxu1 %v2914_v1  ;;  %v2918_v4 = vld [vmem:[%s3638_s10 + $0x24] ss:$16 sps:$4 sm:$0xff]  }
  0x6b   : > { %1878 = vmatpush1.bf16.msra.mxu0 %v2916_v2  ;;  %2042 = vmatpush1.bf16.msra.mxu1 %v2917_v3  ;;  %v2920_v5 = vld [vmem:[%s3638_s10 + $0x2c] ss:$16 sps:$4 sm:$0xff]   ;;  %v2922_v6 = vld [vmem:[%s3638_s10 + $0x20] ss:$16 sps:$4 sm:$0xff]   ;;  %v2923_v7 = vld [vmem:[%s3638_s10 + $0x28] ss:$16 sps:$4 sm:$0xff]  }
  0x6c   : > { %1879 = vmatprep.subr.bf16.mxu0 %v2918_v4  ;;  %2043 = vmatprep.subr.bf16.mxu1 %v2920_v5  ;;  %v2924_v8 = vld [vmem:[%s3638_s10 + $0x44] ss:$16 sps:$4 sm:$0xff]   ;;  %v2926_v9 = vld [vmem:[%s3638_s10 + $0x4c] ss:$16 sps:$4 sm:$0xff]   ;;  %v2928_v10 = vld [vmem:[%s3638_s10 + $0x40] ss:$16 sps:$4 sm:$0xff]  }
  0x6d   : > { %v2929_v11 = vld [vmem:[%s3638_s10 + $0x48] ss:$16 sps:$4 sm:$0xff]   ;;  %v2930_v12 = vld [vmem:[%s3638_s10 + $0x64] ss:$16 sps:$4 sm:$0xff]   ;;  %v2932_v13 = vld [vmem:[%s3638_s10 + $0x6c] ss:$16 sps:$4 sm:$0xff]  }
  0x6e   : > { %v2934_v14 = vld [vmem:[%s3638_s10 + $0x60] ss:$16 sps:$4 sm:$0xff]   ;;  %v2935_v15 = vld [vmem:[%s3638_s10 + $0x68] ss:$16 sps:$4 sm:$0xff]   ;;  %v2936_v16 = vld [vmem:[%s3638_s10 + $0x84] ss:$16 sps:$4 sm:$0xff]  }
  0x6f   : > { %1880 = vmatpush1.bf16.msra.mxu0 %v2922_v6  ;;  %2044 = vmatpush1.bf16.msra.mxu1 %v2923_v7  ;;  %v2938_v17 = vld [vmem:[%s3638_s10 + $0x8c] ss:$16 sps:$4 sm:$0xff]   ;;  %v2940_v18 = vld [vmem:[%s3638_s10 + $0x80] ss:$16 sps:$4 sm:$0xff]   ;;  %v2941_v19 = vld [vmem:[%s3638_s10 + $0x88] ss:$16 sps:$4 sm:$0xff]  }
  0x70   : > { %1881 = vmatprep.subr.bf16.mxu0 %v2924_v8  ;;  %2045 = vmatprep.subr.bf16.mxu1 %v2926_v9  ;;  %v2942_v20 = vld [vmem:[%s3638_s10 + $0xa4] ss:$16 sps:$4 sm:$0xff]   ;;  %v2944_v21 = vld [vmem:[%s3638_s10 + $0xac] ss:$16 sps:$4 sm:$0xff]   ;;  %v2946_v22 = vld [vmem:[%s3638_s10 + $0xa0] ss:$16 sps:$4 sm:$0xff]  }
  0x71   : > { %v2947_v23 = vld [vmem:[%s3638_s10 + $0xa8] ss:$16 sps:$4 sm:$0xff]   ;;  %v2948_v24 = vld [vmem:[%s3638_s10 + $0xc4] ss:$16 sps:$4 sm:$0xff]   ;;  %v2950_v25 = vld [vmem:[%s3638_s10 + $0xcc] ss:$16 sps:$4 sm:$0xff]  }
  0x72   : > { %v2952_v26 = vld [vmem:[%s3638_s10 + $0xc0] ss:$16 sps:$4 sm:$0xff]   ;;  %v2953_v27 = vld [vmem:[%s3638_s10 + $0xc8] ss:$16 sps:$4 sm:$0xff]   ;;  %v2954_v28 = vld [vmem:[%s3638_s10 + $0xe4] ss:$16 sps:$4 sm:$0xff]  }
  0x73   : > { %1882 = vmatpush1.bf16.msra.mxu0 %v2928_v10  ;;  %2046 = vmatpush1.bf16.msra.mxu1 %v2929_v11  ;;  %v2956_v29 = vld [vmem:[%s3638_s10 + $0xec] ss:$16 sps:$4 sm:$0xff]   ;;  %v2958_v30 = vld [vmem:[%s3638_s10 + $0xe0] ss:$16 sps:$4 sm:$0xff]   ;;  %v2959_v31 = vld [vmem:[%s3638_s10 + $0xe8] ss:$16 sps:$4 sm:$0xff]  }
  0x74   : > { %1883 = vmatprep.subr.bf16.mxu0 %v2930_v12  ;;  %2047 = vmatprep.subr.bf16.mxu1 %v2932_v13  ;;  %v2960_v32 = vld [vmem:[%s3638_s10 + $0x104] ss:$16 sps:$4 sm:$0xff]   ;;  %v2962_v33 = vld [vmem:[%s3638_s10 + $0x10c] ss:$16 sps:$4 sm:$0xff]   ;;  %v2964_v34 = vld [vmem:[%s3638_s10 + $0x100] ss:$16 sps:$4 sm:$0xff]  }
  0x75   : > { %v2965_v35 = vld [vmem:[%s3638_s10 + $0x108] ss:$16 sps:$4 sm:$0xff]   ;;  %v3442_v36 = vmov 1983009808   ;;  %v2966_v39 = vld [vmem:[%s3638_s10 + $0x124] ss:$16 sps:$4 sm:$0xff]  }
  0x76   : > { %v557_v37 = vunpack.c.l.s4 %v3442_v36  ;;  %v2968_v40 = vld [vmem:[%s3638_s10 + $0x12c] ss:$16 sps:$4 sm:$0xff]   ;;  %v2970_v41 = vld [vmem:[%s3638_s10 + $0x120] ss:$16 sps:$4 sm:$0xff]   ;;  %v3693_v43 = vshrl.u32 %v559_v38, 7  ;;  %s2569_s22 = sshll.u32 %s3488_s19, 2 }
  0x77   : > { %1884 = vmatpush1.bf16.msra.mxu0 %v2934_v14  ;;  %2048 = vmatpush1.bf16.msra.mxu1 %v2935_v15  ;;  %v2971_v44 = vld [vmem:[%s3638_s10 + $0x128] ss:$16 sps:$4 sm:$0xff]   ;;  %v2972_v45 = vld [vmem:[%s3638_s10 + $0x144] ss:$16 sps:$4 sm:$0xff]   ;;  %v2974_v46 = vld [vmem:[%s3638_s10 + $0x14c] ss:$16 sps:$4 sm:$0xff]  }
  0x78   : > { %1885 = vmatprep.subr.bf16.mxu0 %v2936_v16  ;;  %2049 = vmatprep.subr.bf16.mxu1 %v2938_v17  ;;  %v558_v42 = vunpack.c.0.s8 %v557_v37  ;;  %v2976_v47 = vld [vmem:[%s3638_s10 + $0x140] ss:$16 sps:$4 sm:$0xff]   ;;  %v2977_v48 = vld [vmem:[%s3638_s10 + $0x148] ss:$16 sps:$4 sm:$0xff]   ;;  %v2978_v50 = vld [vmem:[%s3638_s10 + $0x164] ss:$16 sps:$4 sm:$0xff]  }
  0x79   : > { %v2980_v51 = vld [vmem:[%s3638_s10 + $0x16c] ss:$16 sps:$4 sm:$0xff]   ;;  %v295_v52 = vld [vmem:[%s4007_s0] sm:$0xff]  ;;  %v2983_v55 = vld [vmem:[%s3638_s10 + $0x168] ss:$16 sps:$4 sm:$0xff]   ;;  %s251_s5 = scalar_lea.vmem [#allocation6], %s2567_s12 }
  0x7a   : > { %v3701_v49 = vsub.s32 %v558_v42, %v3693_v43  ;;  %v2982_v53 = vld [vmem:[%s3638_s10 + $0x160] ss:$16 sps:$4 sm:$0xff]   ;;  %v2984_v56 = vld [vmem:[%s3638_s10 + $0x184] ss:$16 sps:$4 sm:$0xff]   ;;  %v2986_v57 = vld [vmem:[%s3638_s10 + $0x18c] ss:$16 sps:$4 sm:$0xff]   ;;  %v555_v7 = vcombine.high %v295_v52, %v295_v52 }
  0x7b   : > { %1886 = vmatpush1.bf16.msra.mxu0 %v2940_v18  ;;  %2050 = vmatpush1.bf16.msra.mxu1 %v2941_v19  ;;  %v2988_v59 = vld [vmem:[%s3638_s10 + $0x180] ss:$16 sps:$4 sm:$0xff]   ;;  %v2989_v60 = vld [vmem:[%s3638_s10 + $0x188] ss:$16 sps:$4 sm:$0xff]   ;;  %v2990_v61 = vld [vmem:[%s3638_s10 + $0x1a4] ss:$16 sps:$4 sm:$0xff]  }
  0x7c   : > { %1887 = vmatprep.subr.bf16.mxu0 %v2942_v20  ;;  %2051 = vmatprep.subr.bf16.mxu1 %v2944_v21  ;;  %v562_v54 = vrot.slane %v295_v52, %v3701_v49  ;;  %v2992_v62 = vld [vmem:[%s3638_s10 + $0x1ac] ss:$16 sps:$4 sm:$0xff]   ;;  %v2994_v63 = vld [vmem:[%s3638_s10 + $0x1a0] ss:$16 sps:$4 sm:$0xff]   ;;  %v2995_v0 = vld [vmem:[%s3638_s10 + $0x1a8] ss:$16 sps:$4 sm:$0xff]   ;;  %v3730_v12 = vrot.slane %v555_v7, %v3701_v49 }
  0x7d   : > { %v2996_v1 = vld [vmem:[%s3638_s10 + $0x1c4] ss:$16 sps:$4 sm:$0xff]   ;;  %v2998_v2 = vld [vmem:[%s3638_s10 + $0x1cc] ss:$16 sps:$4 sm:$0xff]   ;;  %v3000_v3 = vld [vmem:[%s3638_s10 + $0x1c0] ss:$16 sps:$4 sm:$0xff]  }
  0x7e   : > { %v570_v58 = vcombine.high %v562_v54, %v562_v54  ;;  %v3001_v4 = vld [vmem:[%s3638_s10 + $0x1c8] ss:$16 sps:$4 sm:$0xff]   ;;  %v3002_v5 = vld [vmem:[%s3638_s10 + $0x1e4] ss:$16 sps:$4 sm:$0xff]   ;;  %v3004_v6 = vld [vmem:[%s3638_s10 + $0x1ec] ss:$16 sps:$4 sm:$0xff]   ;;  %v571_v17 = vcombine.high %v3730_v12, %v3730_v12 }
  0x7f   : > { %1888 = vmatpush1.bf16.msra.mxu0 %v2946_v22  ;;  %2052 = vmatpush1.bf16.msra.mxu1 %v2947_v23  ;;  %v3006_v8 = vld [vmem:[%s3638_s10 + $0x1e0] ss:$16 sps:$4 sm:$0xff]   ;;  %v3007_v9 = vld [vmem:[%s3638_s10 + $0x1e8] ss:$16 sps:$4 sm:$0xff]   ;;  %v3011_v10 = vld [vmem:[%s3638_s10 + $0x204] ss:$16 sps:$4 sm:$0xff]  }
  0x80   : > { %1889 = vmatprep.subr.bf16.mxu0 %v2948_v24  ;;  %2053 = vmatprep.subr.bf16.mxu1 %v2950_v25  ;;  %v3014_v11 = vld [vmem:[%s3638_s10 + $0x20c] ss:$16 sps:$4 sm:$0xff]   ;;  %v3009_v13 = vld [vmem:[%s3638_s10 + $0x200] ss:$16 sps:$4 sm:$0xff]   ;;  %v3012_v14 = vld [vmem:[%s3638_s10 + $0x208] ss:$16 sps:$4 sm:$0xff]  }
  0x81   : > { %1909 = vmatprep.mubr.bf16.mxu0 %v570_v58  ;;  %2073 = vmatprep.mubr.bf16.mxu1 %v570_v58  ;;  %v3017_v15 = vld [vmem:[%s3638_s10 + $0x224] ss:$16 sps:$4 sm:$0xff]   ;;  %v3020_v16 = vld [vmem:[%s3638_s10 + $0x22c] ss:$16 sps:$4 sm:$0xff]   ;;  %v3015_v18 = vld [vmem:[%s3638_s10 + $0x220] ss:$16 sps:$4 sm:$0xff]  }
  0x82   : > { %v3018_v19 = vld [vmem:[%s3638_s10 + $0x228] ss:$16 sps:$4 sm:$0xff]   ;;  %v3023_v20 = vld [vmem:[%s3638_s10 + $0x244] ss:$16 sps:$4 sm:$0xff]   ;;  %v3026_v21 = vld [vmem:[%s3638_s10 + $0x24c] ss:$16 sps:$4 sm:$0xff]  }
  0x83   : > { %1890 = vmatpush1.bf16.msra.mxu0 %v2952_v26  ;;  %2054 = vmatpush1.bf16.msra.mxu1 %v2953_v27  ;;  %v3021_v22 = vld [vmem:[%s3638_s10 + $0x240] ss:$16 sps:$4 sm:$0xff]   ;;  %v3024_v23 = vld [vmem:[%s3638_s10 + $0x248] ss:$16 sps:$4 sm:$0xff]   ;;  %v3029_v24 = vld [vmem:[%s3638_s10 + $0x264] ss:$16 sps:$4 sm:$0xff]  }
  0x84   : > { %1891 = vmatprep.subr.bf16.mxu0 %v2954_v28  ;;  %2055 = vmatprep.subr.bf16.mxu1 %v2956_v29  ;;  %v3032_v25 = vld [vmem:[%s3638_s10 + $0x26c] ss:$16 sps:$4 sm:$0xff]   ;;  %v3027_v26 = vld [vmem:[%s3638_s10 + $0x260] ss:$16 sps:$4 sm:$0xff]   ;;  %v3030_v27 = vld [vmem:[%s3638_s10 + $0x268] ss:$16 sps:$4 sm:$0xff]  }
  0x85   : > { %v3035_v28 = vld [vmem:[%s3638_s10 + $0x284] ss:$16 sps:$4 sm:$0xff]   ;;  %v3038_v29 = vld [vmem:[%s3638_s10 + $0x28c] ss:$16 sps:$4 sm:$0xff]   ;;  %v3045_v38 = vld [vmem:[%s3638_s10 + $0x2c0] ss:$16 sps:$4 sm:$0xff]  }
  0x86   : > { %v3047_v36 = vld [vmem:[%s3638_s10 + $0x2c4] ss:$16 sps:$4 sm:$0xff]   ;;  %v3050_v37 = vld [vmem:[%s3638_s10 + $0x2cc] ss:$16 sps:$4 sm:$0xff]   ;;  %v3051_v42 = vld [vmem:[%s3638_s10 + $0x2e0] ss:$16 sps:$4 sm:$0xff]  }
  0x87   : > { %1892 = vmatpush1.bf16.msra.mxu0 %v2958_v30  ;;  %2056 = vmatpush1.bf16.msra.mxu1 %v2959_v31  ;;  %v3033_v30 = vld [vmem:[%s3638_s10 + $0x280] ss:$16 sps:$4 sm:$0xff]   ;;  %v3036_v31 = vld [vmem:[%s3638_s10 + $0x288] ss:$16 sps:$4 sm:$0xff]   ;;  %v3077_v58 = vld [vmem:[%s3638_s10 + $0x364] ss:$16 sps:$4 sm:$0xff]  }
  0x88   : > { %1893 = vmatprep.subr.bf16.mxu0 %v2960_v32  ;;  %2057 = vmatprep.subr.bf16.mxu1 %v2962_v33  ;;  %v3041_v32 = vld [vmem:[%s3638_s10 + $0x2a4] ss:$16 sps:$4 sm:$0xff]   ;;  %v3044_v33 = vld [vmem:[%s3638_s10 + $0x2ac] ss:$16 sps:$4 sm:$0xff]   ;;  %v3063_v52 = vld [vmem:[%s3638_s10 + $0x320] ss:$16 sps:$4 sm:$0xff]  }
  0x89   : > { %v3098_v7 = vld [vmem:[%s3638_s10 + $0x3cc] ss:$16 sps:$4 sm:$0xff]   ;;  %p290_p10 = scmp.lt.s32.totalorder %s2569_s22, 15 }
  0x8b   : > { %1894 = vmatpush1.bf16.msra.mxu0 %v2964_v34  ;;  %2058 = vmatpush1.bf16.msra.mxu1 %v2965_v35  ;;  %v3039_v34 = vld [vmem:[%s3638_s10 + $0x2a0] ss:$16 sps:$4 sm:$0xff]   ;;  %v3042_v35 = vld [vmem:[%s3638_s10 + $0x2a8] ss:$16 sps:$4 sm:$0xff]   ;;  %s4026_s22 = smov (!%p290_p10, %s2569_s22), 15 }
  0x8c   : > { %1895 = vmatprep.subr.bf16.mxu0 %v2966_v39  ;;  %2059 = vmatprep.subr.bf16.mxu1 %v2968_v40  ;;  %v3048_v39 = vld [vmem:[%s3638_s10 + $0x2c8] ss:$16 sps:$4 sm:$0xff]   ;;  %v3053_v40 = vld [vmem:[%s3638_s10 + $0x2e4] ss:$16 sps:$4 sm:$0xff]   ;;  %s2570_s19 = sshll.u32 %s4026_s22, 1 }
  0x8d   : > { %s293_s8 = scalar_lea.vmem %s4011_s4, %s2570_s19 }
  0x8f   : > { %1896 = vmatpush1.bf16.msra.mxu0 %v2970_v41  ;;  %2060 = vmatpush1.bf16.msra.mxu1 %v2971_v44  ;;  %v3056_v41 = vld [vmem:[%s3638_s10 + $0x2ec] ss:$16 sps:$4 sm:$0xff]   ;;  %v3054_v44 = vld [vmem:[%s3638_s10 + $0x2e8] ss:$16 sps:$4 sm:$0xff]  }
  0x90   : > { %1897 = vmatprep.subr.bf16.mxu0 %v2972_v45  ;;  %2061 = vmatprep.subr.bf16.mxu1 %v2974_v46  ;;  %v3059_v45 = vld [vmem:[%s3638_s10 + $0x304] ss:$16 sps:$4 sm:$0xff]   ;;  %v3062_v46 = vld [vmem:[%s3638_s10 + $0x30c] ss:$16 sps:$4 sm:$0xff]  }
  0x93   : > { %1898 = vmatpush1.bf16.msra.mxu0 %v2976_v47  ;;  %2062 = vmatpush1.bf16.msra.mxu1 %v2977_v48  ;;  %v3057_v47 = vld [vmem:[%s3638_s10 + $0x300] ss:$16 sps:$4 sm:$0xff]   ;;  %v3060_v48 = vld [vmem:[%s3638_s10 + $0x308] ss:$16 sps:$4 sm:$0xff]  }
  0x94   : > { %1899 = vmatprep.subr.bf16.mxu0 %v2978_v50  ;;  %2063 = vmatprep.subr.bf16.mxu1 %v2980_v51  ;;  %v3065_v50 = vld [vmem:[%s3638_s10 + $0x324] ss:$16 sps:$4 sm:$0xff]   ;;  %v3068_v51 = vld [vmem:[%s3638_s10 + $0x32c] ss:$16 sps:$4 sm:$0xff]  }
  0x97   : > { %1900 = vmatpush1.bf16.msra.mxu0 %v2982_v53  ;;  %2064 = vmatpush1.bf16.msra.mxu1 %v2983_v55  ;;  %v3066_v53 = vld [vmem:[%s3638_s10 + $0x328] ss:$16 sps:$4 sm:$0xff]   ;;  %v3074_v55 = vld [vmem:[%s3638_s10 + $0x34c] ss:$16 sps:$4 sm:$0xff]  }
  0x98   : > { %1901 = vmatprep.subr.bf16.mxu0 %v2984_v56  ;;  %2065 = vmatprep.subr.bf16.mxu1 %v2986_v57  ;;  %v3069_v56 = vld [vmem:[%s3638_s10 + $0x340] ss:$16 sps:$4 sm:$0xff]   ;;  %v3072_v57 = vld [vmem:[%s3638_s10 + $0x348] ss:$16 sps:$4 sm:$0xff]  }
  0x9b   : > { %1902 = vmatpush1.bf16.msra.mxu0 %v2988_v59  ;;  %2066 = vmatpush1.bf16.msra.mxu1 %v2989_v60  ;;  %v3080_v59 = vld [vmem:[%s3638_s10 + $0x36c] ss:$16 sps:$4 sm:$0xff]   ;;  %v3075_v60 = vld [vmem:[%s3638_s10 + $0x360] ss:$16 sps:$4 sm:$0xff]  }
  0x9c   : > { %1903 = vmatprep.subr.bf16.mxu0 %v2990_v61  ;;  %2067 = vmatprep.subr.bf16.mxu1 %v2992_v62  ;;  %v3078_v61 = vld [vmem:[%s3638_s10 + $0x368] ss:$16 sps:$4 sm:$0xff]   ;;  %v3083_v62 = vld [vmem:[%s3638_s10 + $0x384] ss:$16 sps:$4 sm:$0xff]  }
  0x9f   : > { %1904 = vmatpush1.bf16.msra.mxu0 %v2994_v63  ;;  %2068 = vmatpush1.bf16.msra.mxu1 %v2995_v0  ;;  %v3086_v63 = vld [vmem:[%s3638_s10 + $0x38c] ss:$16 sps:$4 sm:$0xff]   ;;  %v3081_v0 = vld [vmem:[%s3638_s10 + $0x380] ss:$16 sps:$4 sm:$0xff]  }
  0xa0   : > { %1905 = vmatprep.subr.bf16.mxu0 %v2996_v1  ;;  %2069 = vmatprep.subr.bf16.mxu1 %v2998_v2  ;;  %v3084_v1 = vld [vmem:[%s3638_s10 + $0x388] ss:$16 sps:$4 sm:$0xff]   ;;  %v3089_v2 = vld [vmem:[%s3638_s10 + $0x3a4] ss:$16 sps:$4 sm:$0xff]  }
  0xa3   : > { %1906 = vmatpush1.bf16.msra.mxu0 %v3000_v3  ;;  %2070 = vmatpush1.bf16.msra.mxu1 %v3001_v4  ;;  %v3092_v3 = vld [vmem:[%s3638_s10 + $0x3ac] ss:$16 sps:$4 sm:$0xff]   ;;  %v3087_v4 = vld [vmem:[%s3638_s10 + $0x3a0] ss:$16 sps:$4 sm:$0xff]  }
  0xa4   : > { %1907 = vmatprep.subr.bf16.mxu0 %v3002_v5  ;;  %2071 = vmatprep.subr.bf16.mxu1 %v3004_v6  ;;  %v3090_v5 = vld [vmem:[%s3638_s10 + $0x3a8] ss:$16 sps:$4 sm:$0xff]   ;;  %v3095_v6 = vld [vmem:[%s3638_s10 + $0x3c4] ss:$16 sps:$4 sm:$0xff]  }
  0xa7   : > { %1908 = vmatpush1.bf16.msra.mxu0 %v3006_v8  ;;  %2072 = vmatpush1.bf16.msra.mxu1 %v3007_v9  ;;  %v3093_v8 = vld [vmem:[%s3638_s10 + $0x3c0] ss:$16 sps:$4 sm:$0xff]   ;;  %v3096_v9 = vld [vmem:[%s3638_s10 + $0x3c8] ss:$16 sps:$4 sm:$0xff]  }
  0xa8   : > { %1918 = vmatprep.subr.bf16.mxu0 %v3011_v10  ;;  %2082 = vmatprep.subr.bf16.mxu1 %v3014_v11  ;;  %v3101_v10 = vld [vmem:[%s3638_s10 + $0x3e4] ss:$16 sps:$4 sm:$0xff]   ;;  %v3104_v11 = vld [vmem:[%s3638_s10 + $0x3ec] ss:$16 sps:$4 sm:$0xff]  }
  0xaa   : > { %1910 = vmatmul.mubr.bf16.vlgmr.msra.gmra.mrb[0].mxu0 %v562_v54  ;;  %2074 = vmatmul.mubr.bf16.vlgmr.msra.gmra.mrb[0].mxu1 %v562_v54  ;;  %v3071_v54 = vld [vmem:[%s3638_s10 + $0x344] ss:$16 sps:$4 sm:$0xff]  }
  0xab   : > { %1919 = vmatpush1.bf16.msra.mxu0 %v3009_v13  ;;  %2083 = vmatpush1.bf16.msra.mxu1 %v3012_v14  ;;  %v3099_v13 = vld [vmem:[%s3638_s10 + $0x3e0] ss:$16 sps:$4 sm:$0xff]   ;;  %v3102_v14 = vld [vmem:[%s3638_s10 + $0x3e8] ss:$16 sps:$4 sm:$0xff]  }
  0xac   : > { %1920 = vmatprep.subr.bf16.mxu0 %v3017_v15  ;;  %2084 = vmatprep.subr.bf16.mxu1 %v3020_v16  ;;  %v3107_v15 = vld [vmem:[%s3638_s10 + $0x404] ss:$16 sps:$4 sm:$0xff]   ;;  %v3110_v16 = vld [vmem:[%s3638_s10 + $0x40c] ss:$16 sps:$4 sm:$0xff]  }
  0xad   : > { %1950 = vmatprep.mubr.bf16.mxu0 %v571_v17  ;;  %2114 = vmatprep.mubr.bf16.mxu1 %v571_v17  ;;  %v3105_v17 = vld [vmem:[%s3638_s10 + $0x400] ss:$16 sps:$4 sm:$0xff]  }
  0xaf   : > { %1921 = vmatpush1.bf16.msra.mxu0 %v3015_v18  ;;  %2085 = vmatpush1.bf16.msra.mxu1 %v3018_v19  ;;  %v3108_v18 = vld [vmem:[%s3638_s10 + $0x408] ss:$16 sps:$4 sm:$0xff]  }
  0xb0   : > { %1922 = vmatprep.subr.bf16.mxu0 %v3023_v20  ;;  %2086 = vmatprep.subr.bf16.mxu1 %v3026_v21  ;;  %v3803_v19 = vld [vmem:[%s4007_s0 + $0x8] sm:$0xff]  ;;  %v3113_v20 = vld [vmem:[%s3638_s10 + $0x424] ss:$16 sps:$4 sm:$0xff]  }
  0xb1   : > { %v3116_v21 = vld [vmem:[%s3638_s10 + $0x42c] ss:$16 sps:$4 sm:$0xff]  }
  0xb3   : > { %1923 = vmatpush1.bf16.msra.mxu0 %v3021_v22  ;;  %2087 = vmatpush1.bf16.msra.mxu1 %v3024_v23  ;;  %v3809_v22 = vrot.slane %v3803_v19, %v3701_v49 }
  0xb4   : > { %1924 = vmatprep.subr.bf16.mxu0 %v3029_v24  ;;  %2088 = vmatprep.subr.bf16.mxu1 %v3032_v25  ;;  %v3111_v24 = vld [vmem:[%s3638_s10 + $0x420] ss:$16 sps:$4 sm:$0xff]   ;;  %v3114_v25 = vld [vmem:[%s3638_s10 + $0x428] ss:$16 sps:$4 sm:$0xff]  }
  0xb5   : > { %v587_v23 = vcombine.high %v3809_v22, %v3809_v22 }
  0xb7   : > { %1925 = vmatpush1.bf16.msra.mxu0 %v3027_v26  ;;  %2089 = vmatpush1.bf16.msra.mxu1 %v3030_v27  ;;  %v3119_v26 = vld [vmem:[%s3638_s10 + $0x444] ss:$16 sps:$4 sm:$0xff]   ;;  %v3122_v27 = vld [vmem:[%s3638_s10 + $0x44c] ss:$16 sps:$4 sm:$0xff]  }
  0xb8   : > { %1926 = vmatprep.subr.bf16.mxu0 %v3035_v28  ;;  %2090 = vmatprep.subr.bf16.mxu1 %v3038_v29  ;;  %v3120_v28 = vld [vmem:[%s3638_s10 + $0x448] ss:$16 sps:$4 sm:$0xff]   ;;  %v3125_v29 = vld [vmem:[%s3638_s10 + $0x464] ss:$16 sps:$4 sm:$0xff]  }
  0xbb   : > { %1927 = vmatpush1.bf16.msra.mxu0 %v3033_v30  ;;  %2091 = vmatpush1.bf16.msra.mxu1 %v3036_v31  ;;  %v3128_v30 = vld [vmem:[%s3638_s10 + $0x46c] ss:$16 sps:$4 sm:$0xff]   ;;  %v3123_v31 = vld [vmem:[%s3638_s10 + $0x460] ss:$16 sps:$4 sm:$0xff]  }
  0xbc   : > { %1928 = vmatprep.subr.bf16.mxu0 %v3041_v32  ;;  %2092 = vmatprep.subr.bf16.mxu1 %v3044_v33  ;;  %v3126_v32 = vld [vmem:[%s3638_s10 + $0x468] ss:$16 sps:$4 sm:$0xff]   ;;  %v3131_v33 = vld [vmem:[%s3638_s10 + $0x484] ss:$16 sps:$4 sm:$0xff]  }
  0xbf   : > { %1929 = vmatpush1.bf16.msra.mxu0 %v3039_v34  ;;  %2093 = vmatpush1.bf16.msra.mxu1 %v3042_v35  ;;  %v3134_v34 = vld [vmem:[%s3638_s10 + $0x48c] ss:$16 sps:$4 sm:$0xff]   ;;  %v3129_v35 = vld [vmem:[%s3638_s10 + $0x480] ss:$16 sps:$4 sm:$0xff]  }
  0xc0   : > { %1930 = vmatprep.subr.bf16.mxu0 %v3047_v36  ;;  %2094 = vmatprep.subr.bf16.mxu1 %v3050_v37  ;;  %v3132_v36 = vld [vmem:[%s3638_s10 + $0x488] ss:$16 sps:$4 sm:$0xff]   ;;  %v3137_v37 = vld [vmem:[%s3638_s10 + $0x4a4] ss:$16 sps:$4 sm:$0xff]  }
  0xc3   : > { %1931 = vmatpush1.bf16.msra.mxu0 %v3045_v38  ;;  %2095 = vmatpush1.bf16.msra.mxu1 %v3048_v39  ;;  %v3140_v38 = vld [vmem:[%s3638_s10 + $0x4ac] ss:$16 sps:$4 sm:$0xff]   ;;  %v3135_v39 = vld [vmem:[%s3638_s10 + $0x4a0] ss:$16 sps:$4 sm:$0xff]  }
  0xc4   : > { %1932 = vmatprep.subr.bf16.mxu0 %v3053_v40  ;;  %2096 = vmatprep.subr.bf16.mxu1 %v3056_v41  ;;  %v3138_v40 = vld [vmem:[%s3638_s10 + $0x4a8] ss:$16 sps:$4 sm:$0xff]   ;;  %v3143_v41 = vld [vmem:[%s3638_s10 + $0x4c4] ss:$16 sps:$4 sm:$0xff]  }
  0xc7   : > { %1933 = vmatpush1.bf16.msra.mxu0 %v3051_v42  ;;  %2097 = vmatpush1.bf16.msra.mxu1 %v3054_v44  ;;  %v3146_v42 = vld [vmem:[%s3638_s10 + $0x4cc] ss:$16 sps:$4 sm:$0xff]   ;;  %v3141_v44 = vld [vmem:[%s3638_s10 + $0x4c0] ss:$16 sps:$4 sm:$0xff]  }
  0xc8   : > { %1934 = vmatprep.subr.bf16.mxu0 %v3059_v45  ;;  %2098 = vmatprep.subr.bf16.mxu1 %v3062_v46  ;;  %v3144_v45 = vld [vmem:[%s3638_s10 + $0x4c8] ss:$16 sps:$4 sm:$0xff]   ;;  %v3149_v46 = vld [vmem:[%s3638_s10 + $0x4e4] ss:$16 sps:$4 sm:$0xff]  }
  0xcb   : > { %1935 = vmatpush1.bf16.msra.mxu0 %v3057_v47  ;;  %2099 = vmatpush1.bf16.msra.mxu1 %v3060_v48  ;;  %v3152_v47 = vld [vmem:[%s3638_s10 + $0x4ec] ss:$16 sps:$4 sm:$0xff]   ;;  %v3147_v48 = vld [vmem:[%s3638_s10 + $0x4e0] ss:$16 sps:$4 sm:$0xff]  }
  0xcc   : > { %1936 = vmatprep.subr.bf16.mxu0 %v3065_v50  ;;  %2100 = vmatprep.subr.bf16.mxu1 %v3068_v51  ;;  %v3150_v50 = vld [vmem:[%s3638_s10 + $0x4e8] ss:$16 sps:$4 sm:$0xff]   ;;  %v3155_v51 = vld [vmem:[%s3638_s10 + $0x504] ss:$16 sps:$4 sm:$0xff]  }
  0xcf   : > { %1937 = vmatpush1.bf16.msra.mxu0 %v3063_v52  ;;  %2101 = vmatpush1.bf16.msra.mxu1 %v3066_v53  ;;  %v3158_v52 = vld [vmem:[%s3638_s10 + $0x50c] ss:$16 sps:$4 sm:$0xff]   ;;  %v3153_v53 = vld [vmem:[%s3638_s10 + $0x500] ss:$16 sps:$4 sm:$0xff]  }
  0xd0   : > { %1938 = vmatprep.subr.bf16.mxu0 %v3071_v54  ;;  %2102 = vmatprep.subr.bf16.mxu1 %v3074_v55  ;;  %v3156_v54 = vld [vmem:[%s3638_s10 + $0x508] ss:$16 sps:$4 sm:$0xff]   ;;  %v3161_v55 = vld [vmem:[%s3638_s10 + $0x524] ss:$16 sps:$4 sm:$0xff]  }
  0xd3   : > { %1939 = vmatpush1.bf16.msra.mxu0 %v3069_v56  ;;  %2103 = vmatpush1.bf16.msra.mxu1 %v3072_v57  ;;  %v3164_v56 = vld [vmem:[%s3638_s10 + $0x52c] ss:$16 sps:$4 sm:$0xff]   ;;  %v3159_v57 = vld [vmem:[%s3638_s10 + $0x520] ss:$16 sps:$4 sm:$0xff]  }
  0xd4   : > { %1940 = vmatprep.subr.bf16.mxu0 %v3077_v58  ;;  %2104 = vmatprep.subr.bf16.mxu1 %v3080_v59  ;;  %v3162_v58 = vld [vmem:[%s3638_s10 + $0x528] ss:$16 sps:$4 sm:$0xff]   ;;  %v3167_v59 = vld [vmem:[%s3638_s10 + $0x544] ss:$16 sps:$4 sm:$0xff]  }
  0xd7   : > { %1941 = vmatpush1.bf16.msra.mxu0 %v3075_v60  ;;  %2105 = vmatpush1.bf16.msra.mxu1 %v3078_v61  ;;  %v3170_v60 = vld [vmem:[%s3638_s10 + $0x54c] ss:$16 sps:$4 sm:$0xff]   ;;  %v3165_v61 = vld [vmem:[%s3638_s10 + $0x540] ss:$16 sps:$4 sm:$0xff]  }
  0xd8   : > { %1942 = vmatprep.subr.bf16.mxu0 %v3083_v62  ;;  %2106 = vmatprep.subr.bf16.mxu1 %v3086_v63  ;;  %v3168_v62 = vld [vmem:[%s3638_s10 + $0x548] ss:$16 sps:$4 sm:$0xff]   ;;  %v3173_v63 = vld [vmem:[%s3638_s10 + $0x564] ss:$16 sps:$4 sm:$0xff]  }
  0xdb   : > { %1943 = vmatpush1.bf16.msra.mxu0 %v3081_v0  ;;  %2107 = vmatpush1.bf16.msra.mxu1 %v3084_v1  ;;  %v3176_v0 = vld [vmem:[%s3638_s10 + $0x56c] ss:$16 sps:$4 sm:$0xff]   ;;  %v3171_v1 = vld [vmem:[%s3638_s10 + $0x560] ss:$16 sps:$4 sm:$0xff]  }
  0xdc   : > { %1944 = vmatprep.subr.bf16.mxu0 %v3089_v2  ;;  %2108 = vmatprep.subr.bf16.mxu1 %v3092_v3  ;;  %v3174_v2 = vld [vmem:[%s3638_s10 + $0x568] ss:$16 sps:$4 sm:$0xff]   ;;  %v3179_v3 = vld [vmem:[%s3638_s10 + $0x584] ss:$16 sps:$4 sm:$0xff]  }
  0xdf   : > { %1945 = vmatpush1.bf16.msra.mxu0 %v3087_v4  ;;  %2109 = vmatpush1.bf16.msra.mxu1 %v3090_v5  ;;  %v3182_v4 = vld [vmem:[%s3638_s10 + $0x58c] ss:$16 sps:$4 sm:$0xff]   ;;  %v3177_v5 = vld [vmem:[%s3638_s10 + $0x580] ss:$16 sps:$4 sm:$0xff]  }
  0xe0   : > { %1946 = vmatprep.subr.bf16.mxu0 %v3095_v6  ;;  %2110 = vmatprep.subr.bf16.mxu1 %v3098_v7  ;;  %v3180_v6 = vld [vmem:[%s3638_s10 + $0x588] ss:$16 sps:$4 sm:$0xff]   ;;  %v3185_v7 = vld [vmem:[%s3638_s10 + $0x5a4] ss:$16 sps:$4 sm:$0xff]  }
  0xe3   : > { %1947 = vmatpush1.bf16.msra.mxu0 %v3093_v8  ;;  %2111 = vmatpush1.bf16.msra.mxu1 %v3096_v9  ;;  %v3188_v8 = vld [vmem:[%s3638_s10 + $0x5ac] ss:$16 sps:$4 sm:$0xff]   ;;  %v3183_v9 = vld [vmem:[%s3638_s10 + $0x5a0] ss:$16 sps:$4 sm:$0xff]  }
  0xe4   : > { %1948 = vmatprep.subr.bf16.mxu0 %v3101_v10  ;;  %2112 = vmatprep.subr.bf16.mxu1 %v3104_v11  ;;  %v3186_v10 = vld [vmem:[%s3638_s10 + $0x5a8] ss:$16 sps:$4 sm:$0xff]   ;;  %v3191_v11 = vld [vmem:[%s3638_s10 + $0x5c4] ss:$16 sps:$4 sm:$0xff]  }
  0xe7   : > { %1949 = vmatpush1.bf16.msra.mxu0 %v3099_v13  ;;  %2113 = vmatpush1.bf16.msra.mxu1 %v3102_v14  ;;  %v3194_v13 = vld [vmem:[%s3638_s10 + $0x5cc] ss:$16 sps:$4 sm:$0xff]   ;;  %v3189_v14 = vld [vmem:[%s3638_s10 + $0x5c0] ss:$16 sps:$4 sm:$0xff]  }
  0xe8   : > { %1959 = vmatprep.subr.bf16.mxu0 %v3107_v15  ;;  %2123 = vmatprep.subr.bf16.mxu1 %v3110_v16  ;;  %v3192_v15 = vld [vmem:[%s3638_s10 + $0x5c8] ss:$16 sps:$4 sm:$0xff]   ;;  %v3197_v16 = vld [vmem:[%s3638_s10 + $0x5e4] ss:$16 sps:$4 sm:$0xff]  }
  0xea   : > { %1951 = vmatmul.mubr.bf16.vlgmr.msra.gmra.mrb[0].mxu0 %v3730_v12  ;;  %2115 = vmatmul.mubr.bf16.vlgmr.msra.gmra.mrb[0].mxu1 %v3730_v12  ;;  %v3117_v12 = vld [vmem:[%s3638_s10 + $0x440] ss:$16 sps:$4 sm:$0xff]  }
  0xeb   : > { %1960 = vmatpush1.bf16.msra.mxu0 %v3105_v17  ;;  %2124 = vmatpush1.bf16.msra.mxu1 %v3108_v18  ;;  %v3200_v17 = vld [vmem:[%s3638_s10 + $0x5ec] ss:$16 sps:$4 sm:$0xff]   ;;  %v572_v18 = vcombine.high %v3803_v19, %v3803_v19  ;;  %v3204_v19 = vld [vmem:[%s3638_s10 + $0x608] ss:$16 sps:$4 sm:$0xff]  }
  0xec   : > { %1961 = vmatprep.subr.bf16.mxu0 %v3113_v20  ;;  %2125 = vmatprep.subr.bf16.mxu1 %v3116_v21  ;;  %v3195_v20 = vld [vmem:[%s3638_s10 + $0x5e0] ss:$16 sps:$4 sm:$0xff]   ;;  %v3198_v21 = vld [vmem:[%s3638_s10 + $0x5e8] ss:$16 sps:$4 sm:$0xff]  }
  0xed   : > { %1991 = vmatprep.mubr.bf16.mxu0 %v587_v23  ;;  %2155 = vmatprep.mubr.bf16.mxu1 %v587_v23  ;;  %v3203_v23 = vld [vmem:[%s3638_s10 + $0x604] ss:$16 sps:$4 sm:$0xff]  }
  0xef   : > { %1962 = vmatpush1.bf16.msra.mxu0 %v3111_v24  ;;  %2126 = vmatpush1.bf16.msra.mxu1 %v3114_v25  ;;  %v3206_v24 = vld [vmem:[%s3638_s10 + $0x60c] ss:$16 sps:$4 sm:$0xff]   ;;  %v3878_v25 = vrot.slane %v572_v18, %v3701_v49 }
  0xf0   : > { %1963 = vmatprep.subr.bf16.mxu0 %v3119_v26  ;;  %2127 = vmatprep.subr.bf16.mxu1 %v3122_v27  ;;  %v3201_v26 = vld [vmem:[%s3638_s10 + $0x600] ss:$16 sps:$4 sm:$0xff]   ;;  %v3209_v27 = vld [vmem:[%s3638_s10 + $0x624] ss:$16 sps:$4 sm:$0xff]   ;;  %v3290_v18 = vld [vmem:[%s3638_s10 + $0x7cc] ss:$16 sps:$4 sm:$0xff]  }
  0xf3   : > { %1964 = vmatpush1.bf16.msra.mxu0 %v3117_v12  ;;  %2128 = vmatpush1.bf16.msra.mxu1 %v3120_v28  ;;  %v3212_v12 = vld [vmem:[%s3638_s10 + $0x62c] ss:$16 sps:$4 sm:$0xff]   ;;  %v588_v28 = vcombine.high %v3878_v25, %v3878_v25 }
  0xf4   : > { %1965 = vmatprep.subr.bf16.mxu0 %v3125_v29  ;;  %2129 = vmatprep.subr.bf16.mxu1 %v3128_v30  ;;  %v3207_v29 = vld [vmem:[%s3638_s10 + $0x620] ss:$16 sps:$4 sm:$0xff]   ;;  %v3210_v30 = vld [vmem:[%s3638_s10 + $0x628] ss:$16 sps:$4 sm:$0xff]  }
  0xf7   : > { %1966 = vmatpush1.bf16.msra.mxu0 %v3123_v31  ;;  %2130 = vmatpush1.bf16.msra.mxu1 %v3126_v32  ;;  %v3215_v31 = vld [vmem:[%s3638_s10 + $0x644] ss:$16 sps:$4 sm:$0xff]   ;;  %v3218_v32 = vld [vmem:[%s3638_s10 + $0x64c] ss:$16 sps:$4 sm:$0xff]  }
  0xf8   : > { %1967 = vmatprep.subr.bf16.mxu0 %v3131_v33  ;;  %2131 = vmatprep.subr.bf16.mxu1 %v3134_v34  ;;  %v3213_v33 = vld [vmem:[%s3638_s10 + $0x640] ss:$16 sps:$4 sm:$0xff]   ;;  %v3221_v34 = vld [vmem:[%s3638_s10 + $0x664] ss:$16 sps:$4 sm:$0xff]  }
  0xfb   : > { %1968 = vmatpush1.bf16.msra.mxu0 %v3129_v35  ;;  %2132 = vmatpush1.bf16.msra.mxu1 %v3132_v36  ;;  %v3224_v35 = vld [vmem:[%s3638_s10 + $0x66c] ss:$16 sps:$4 sm:$0xff]   ;;  %v3219_v36 = vld [vmem:[%s3638_s10 + $0x660] ss:$16 sps:$4 sm:$0xff]  }
  0xfc   : > { %1969 = vmatprep.subr.bf16.mxu0 %v3137_v37  ;;  %2133 = vmatprep.subr.bf16.mxu1 %v3140_v38  ;;  %v3222_v37 = vld [vmem:[%s3638_s10 + $0x668] ss:$16 sps:$4 sm:$0xff]   ;;  %v3227_v38 = vld [vmem:[%s3638_s10 + $0x684] ss:$16 sps:$4 sm:$0xff]  }
  0xff   : > { %1970 = vmatpush1.bf16.msra.mxu0 %v3135_v39  ;;  %2134 = vmatpush1.bf16.msra.mxu1 %v3138_v40  ;;  %v3230_v39 = vld [vmem:[%s3638_s10 + $0x68c] ss:$16 sps:$4 sm:$0xff]   ;;  %v3225_v40 = vld [vmem:[%s3638_s10 + $0x680] ss:$16 sps:$4 sm:$0xff]  }
 0x100   : > { %1971 = vmatprep.subr.bf16.mxu0 %v3143_v41  ;;  %2135 = vmatprep.subr.bf16.mxu1 %v3146_v42  ;;  %v3228_v41 = vld [vmem:[%s3638_s10 + $0x688] ss:$16 sps:$4 sm:$0xff]   ;;  %v3233_v42 = vld [vmem:[%s3638_s10 + $0x6a4] ss:$16 sps:$4 sm:$0xff]  }
 0x103   : > { %1972 = vmatpush1.bf16.msra.mxu0 %v3141_v44  ;;  %2136 = vmatpush1.bf16.msra.mxu1 %v3144_v45  ;;  %v3236_v44 = vld [vmem:[%s3638_s10 + $0x6ac] ss:$16 sps:$4 sm:$0xff]   ;;  %v3231_v45 = vld [vmem:[%s3638_s10 + $0x6a0] ss:$16 sps:$4 sm:$0xff]  }
 0x104   : > { %1973 = vmatprep.subr.bf16.mxu0 %v3149_v46  ;;  %2137 = vmatprep.subr.bf16.mxu1 %v3152_v47  ;;  %v3234_v46 = vld [vmem:[%s3638_s10 + $0x6a8] ss:$16 sps:$4 sm:$0xff]   ;;  %v3239_v47 = vld [vmem:[%s3638_s10 + $0x6c4] ss:$16 sps:$4 sm:$0xff]  }
 0x107   : > { %1974 = vmatpush1.bf16.msra.mxu0 %v3147_v48  ;;  %2138 = vmatpush1.bf16.msra.mxu1 %v3150_v50  ;;  %v3242_v48 = vld [vmem:[%s3638_s10 + $0x6cc] ss:$16 sps:$4 sm:$0xff]   ;;  %v3237_v50 = vld [vmem:[%s3638_s10 + $0x6c0] ss:$16 sps:$4 sm:$0xff]  }
 0x108   : > { %1975 = vmatprep.subr.bf16.mxu0 %v3155_v51  ;;  %2139 = vmatprep.subr.bf16.mxu1 %v3158_v52  ;;  %v3240_v51 = vld [vmem:[%s3638_s10 + $0x6c8] ss:$16 sps:$4 sm:$0xff]   ;;  %v3245_v52 = vld [vmem:[%s3638_s10 + $0x6e4] ss:$16 sps:$4 sm:$0xff]  }
 0x10b   : > { %1976 = vmatpush1.bf16.msra.mxu0 %v3153_v53  ;;  %2140 = vmatpush1.bf16.msra.mxu1 %v3156_v54  ;;  %v3248_v53 = vld [vmem:[%s3638_s10 + $0x6ec] ss:$16 sps:$4 sm:$0xff]   ;;  %v3243_v54 = vld [vmem:[%s3638_s10 + $0x6e0] ss:$16 sps:$4 sm:$0xff]  }
 0x10c   : > { %1977 = vmatprep.subr.bf16.mxu0 %v3161_v55  ;;  %2141 = vmatprep.subr.bf16.mxu1 %v3164_v56  ;;  %v3246_v55 = vld [vmem:[%s3638_s10 + $0x6e8] ss:$16 sps:$4 sm:$0xff]   ;;  %v3251_v56 = vld [vmem:[%s3638_s10 + $0x704] ss:$16 sps:$4 sm:$0xff]  }
 0x10f   : > { %1978 = vmatpush1.bf16.msra.mxu0 %v3159_v57  ;;  %2142 = vmatpush1.bf16.msra.mxu1 %v3162_v58  ;;  %v3254_v57 = vld [vmem:[%s3638_s10 + $0x70c] ss:$16 sps:$4 sm:$0xff]   ;;  %v3249_v58 = vld [vmem:[%s3638_s10 + $0x700] ss:$16 sps:$4 sm:$0xff]  }
 0x110   : > { %1979 = vmatprep.subr.bf16.mxu0 %v3167_v59  ;;  %2143 = vmatprep.subr.bf16.mxu1 %v3170_v60  ;;  %v3252_v59 = vld [vmem:[%s3638_s10 + $0x708] ss:$16 sps:$4 sm:$0xff]   ;;  %v3257_v60 = vld [vmem:[%s3638_s10 + $0x724] ss:$16 sps:$4 sm:$0xff]  }
 0x113   : > { %1980 = vmatpush1.bf16.msra.mxu0 %v3165_v61  ;;  %2144 = vmatpush1.bf16.msra.mxu1 %v3168_v62  ;;  %v3260_v61 = vld [vmem:[%s3638_s10 + $0x72c] ss:$16 sps:$4 sm:$0xff]   ;;  %v3255_v62 = vld [vmem:[%s3638_s10 + $0x720] ss:$16 sps:$4 sm:$0xff]  }
 0x114   : > { %1981 = vmatprep.subr.bf16.mxu0 %v3173_v63  ;;  %2145 = vmatprep.subr.bf16.mxu1 %v3176_v0  ;;  %v3258_v63 = vld [vmem:[%s3638_s10 + $0x728] ss:$16 sps:$4 sm:$0xff]   ;;  %v3263_v0 = vld [vmem:[%s3638_s10 + $0x744] ss:$16 sps:$4 sm:$0xff]  }
 0x117   : > { %1982 = vmatpush1.bf16.msra.mxu0 %v3171_v1  ;;  %2146 = vmatpush1.bf16.msra.mxu1 %v3174_v2  ;;  %v3266_v1 = vld [vmem:[%s3638_s10 + $0x74c] ss:$16 sps:$4 sm:$0xff]   ;;  %v3261_v2 = vld [vmem:[%s3638_s10 + $0x740] ss:$16 sps:$4 sm:$0xff]  }
 0x118   : > { %1983 = vmatprep.subr.bf16.mxu0 %v3179_v3  ;;  %2147 = vmatprep.subr.bf16.mxu1 %v3182_v4  ;;  %v3264_v3 = vld [vmem:[%s3638_s10 + $0x748] ss:$16 sps:$4 sm:$0xff]   ;;  %v3269_v4 = vld [vmem:[%s3638_s10 + $0x764] ss:$16 sps:$4 sm:$0xff]  }
 0x11b   : > { %1984 = vmatpush1.bf16.msra.mxu0 %v3177_v5  ;;  %2148 = vmatpush1.bf16.msra.mxu1 %v3180_v6  ;;  %v3272_v5 = vld [vmem:[%s3638_s10 + $0x76c] ss:$16 sps:$4 sm:$0xff]   ;;  %v3267_v6 = vld [vmem:[%s3638_s10 + $0x760] ss:$16 sps:$4 sm:$0xff]  }
 0x11c   : > { %1985 = vmatprep.subr.bf16.mxu0 %v3185_v7  ;;  %2149 = vmatprep.subr.bf16.mxu1 %v3188_v8  ;;  %v3270_v7 = vld [vmem:[%s3638_s10 + $0x768] ss:$16 sps:$4 sm:$0xff]   ;;  %v3275_v8 = vld [vmem:[%s3638_s10 + $0x784] ss:$16 sps:$4 sm:$0xff]  }
 0x11f   : > { %1986 = vmatpush1.bf16.msra.mxu0 %v3183_v9  ;;  %2150 = vmatpush1.bf16.msra.mxu1 %v3186_v10  ;;  %v3278_v9 = vld [vmem:[%s3638_s10 + $0x78c] ss:$16 sps:$4 sm:$0xff]   ;;  %v3273_v10 = vld [vmem:[%s3638_s10 + $0x780] ss:$16 sps:$4 sm:$0xff]  }
 0x120   : > { %1987 = vmatprep.subr.bf16.mxu0 %v3191_v11  ;;  %2151 = vmatprep.subr.bf16.mxu1 %v3194_v13  ;;  %v3276_v11 = vld [vmem:[%s3638_s10 + $0x788] ss:$16 sps:$4 sm:$0xff]   ;;  %v3281_v13 = vld [vmem:[%s3638_s10 + $0x7a4] ss:$16 sps:$4 sm:$0xff]  }
 0x123   : > { %1988 = vmatpush1.bf16.msra.mxu0 %v3189_v14  ;;  %2152 = vmatpush1.bf16.msra.mxu1 %v3192_v15  ;;  %v3284_v14 = vld [vmem:[%s3638_s10 + $0x7ac] ss:$16 sps:$4 sm:$0xff]   ;;  %v3279_v15 = vld [vmem:[%s3638_s10 + $0x7a0] ss:$16 sps:$4 sm:$0xff]  }
 0x124   : > { %1989 = vmatprep.subr.bf16.mxu0 %v3197_v16  ;;  %2153 = vmatprep.subr.bf16.mxu1 %v3200_v17  ;;  %v3282_v16 = vld [vmem:[%s3638_s10 + $0x7a8] ss:$16 sps:$4 sm:$0xff]   ;;  %v3287_v17 = vld [vmem:[%s3638_s10 + $0x7c4] ss:$16 sps:$4 sm:$0xff]  }
 0x127   : > { %1990 = vmatpush1.bf16.msra.mxu0 %v3195_v20  ;;  %2154 = vmatpush1.bf16.msra.mxu1 %v3198_v21  ;;  %v3285_v20 = vld [vmem:[%s3638_s10 + $0x7c0] ss:$16 sps:$4 sm:$0xff]   ;;  %v3288_v21 = vld [vmem:[%s3638_s10 + $0x7c8] ss:$16 sps:$4 sm:$0xff]  }
 0x128   : > { %2000 = vmatprep.subr.bf16.mxu0 %v3203_v23  ;;  %2164 = vmatprep.subr.bf16.mxu1 %v3206_v24  ;;  %v3293_v23 = vld [vmem:[%s3638_s10 + $0x7e4] ss:$16 sps:$4 sm:$0xff]   ;;  %v3296_v24 = vld [vmem:[%s3638_s10 + $0x7ec] ss:$16 sps:$4 sm:$0xff]  }
 0x12a   : > { %1992 = vmatmul.mubr.bf16.vlgmr.msra.gmra.mrb[0].mxu0 %v3809_v22  ;;  %2156 = vmatmul.mubr.bf16.vlgmr.msra.gmra.mrb[0].mxu1 %v3809_v22  ;;  %v3216_v22 = vld [vmem:[%s3638_s10 + $0x648] ss:$16 sps:$4 sm:$0xff]  }
 0x12b   : > { %2001 = vmatpush1.bf16.msra.mxu0 %v3201_v26  ;;  %2165 = vmatpush1.bf16.msra.mxu1 %v3204_v19  ;;  %v3291_v26 = vld [vmem:[%s3638_s10 + $0x7e0] ss:$16 sps:$4 sm:$0xff]   ;;  %v3294_v19 = vld [vmem:[%s3638_s10 + $0x7e8] ss:$16 sps:$4 sm:$0xff]  }
 0x12c   : > { %2002 = vmatprep.subr.bf16.mxu0 %v3209_v27  ;;  %2166 = vmatprep.subr.bf16.mxu1 %v3212_v12 }
 0x12d   : > { %2032 = vmatprep.mubr.bf16.mxu0 %v588_v28  ;;  %2196 = vmatprep.mubr.bf16.mxu1 %v588_v28 }
 0x12f   : > { %2003 = vmatpush1.bf16.msra.mxu0 %v3207_v29  ;;  %2167 = vmatpush1.bf16.msra.mxu1 %v3210_v30 }
 0x130   : > { %2004 = vmatprep.subr.bf16.mxu0 %v3215_v31  ;;  %2168 = vmatprep.subr.bf16.mxu1 %v3218_v32 }
 0x133   : > { %2005 = vmatpush1.bf16.msra.mxu0 %v3213_v33  ;;  %2169 = vmatpush1.bf16.msra.mxu1 %v3216_v22 }
 0x134   : > { %2006 = vmatprep.subr.bf16.mxu0 %v3221_v34  ;;  %2170 = vmatprep.subr.bf16.mxu1 %v3224_v35 }
 0x137   : > { %2007 = vmatpush1.bf16.msra.mxu0 %v3219_v36  ;;  %2171 = vmatpush1.bf16.msra.mxu1 %v3222_v37 }
 0x138   : > { %2008 = vmatprep.subr.bf16.mxu0 %v3227_v38  ;;  %2172 = vmatprep.subr.bf16.mxu1 %v3230_v39 }
 0x13b   : > { %2009 = vmatpush1.bf16.msra.mxu0 %v3225_v40  ;;  %2173 = vmatpush1.bf16.msra.mxu1 %v3228_v41 }
 0x13c   : > { %2010 = vmatprep.subr.bf16.mxu0 %v3233_v42  ;;  %2174 = vmatprep.subr.bf16.mxu1 %v3236_v44 }
 0x13f   : > { %2011 = vmatpush1.bf16.msra.mxu0 %v3231_v45  ;;  %2175 = vmatpush1.bf16.msra.mxu1 %v3234_v46 }
 0x140   : > { %2012 = vmatprep.subr.bf16.mxu0 %v3239_v47  ;;  %2176 = vmatprep.subr.bf16.mxu1 %v3242_v48 }
 0x143   : > { %2013 = vmatpush1.bf16.msra.mxu0 %v3237_v50  ;;  %2177 = vmatpush1.bf16.msra.mxu1 %v3240_v51 }
 0x144   : > { %2014 = vmatprep.subr.bf16.mxu0 %v3245_v52  ;;  %2178 = vmatprep.subr.bf16.mxu1 %v3248_v53 }
 0x147   : > { %2015 = vmatpush1.bf16.msra.mxu0 %v3243_v54  ;;  %2179 = vmatpush1.bf16.msra.mxu1 %v3246_v55 }
 0x148   : > { %2016 = vmatprep.subr.bf16.mxu0 %v3251_v56  ;;  %2180 = vmatprep.subr.bf16.mxu1 %v3254_v57 }
 0x14b   : > { %2017 = vmatpush1.bf16.msra.mxu0 %v3249_v58  ;;  %2181 = vmatpush1.bf16.msra.mxu1 %v3252_v59 }
 0x14c   : > { %2018 = vmatprep.subr.bf16.mxu0 %v3257_v60  ;;  %2182 = vmatprep.subr.bf16.mxu1 %v3260_v61 }
 0x14f   : > { %2019 = vmatpush1.bf16.msra.mxu0 %v3255_v62  ;;  %2183 = vmatpush1.bf16.msra.mxu1 %v3258_v63 }
 0x150   : > { %2020 = vmatprep.subr.bf16.mxu0 %v3263_v0  ;;  %2184 = vmatprep.subr.bf16.mxu1 %v3266_v1 }
 0x153   : > { %2021 = vmatpush1.bf16.msra.mxu0 %v3261_v2  ;;  %2185 = vmatpush1.bf16.msra.mxu1 %v3264_v3 }
 0x154   : > { %2022 = vmatprep.subr.bf16.mxu0 %v3269_v4  ;;  %2186 = vmatprep.subr.bf16.mxu1 %v3272_v5 }
 0x157   : > { %2023 = vmatpush1.bf16.msra.mxu0 %v3267_v6  ;;  %2187 = vmatpush1.bf16.msra.mxu1 %v3270_v7 }
 0x158   : > { %2024 = vmatprep.subr.bf16.mxu0 %v3275_v8  ;;  %2188 = vmatprep.subr.bf16.mxu1 %v3278_v9 }
 0x15b   : > { %2025 = vmatpush1.bf16.msra.mxu0 %v3273_v10  ;;  %2189 = vmatpush1.bf16.msra.mxu1 %v3276_v11 }
 0x15c   : > { %2026 = vmatprep.subr.bf16.mxu0 %v3281_v13  ;;  %2190 = vmatprep.subr.bf16.mxu1 %v3284_v14 }
 0x15f   : > { %2027 = vmatpush1.bf16.msra.mxu0 %v3279_v15  ;;  %2191 = vmatpush1.bf16.msra.mxu1 %v3282_v16 }
 0x160   : > { %2028 = vmatprep.subr.bf16.mxu0 %v3287_v17  ;;  %2192 = vmatprep.subr.bf16.mxu1 %v3290_v18 }
 0x163   : > { %2029 = vmatpush1.bf16.msra.mxu0 %v3285_v20  ;;  %2193 = vmatpush1.bf16.msra.mxu1 %v3288_v21 }
 0x164   : > { %2030 = vmatprep.subr.bf16.mxu0 %v3293_v23  ;;  %2194 = vmatprep.subr.bf16.mxu1 %v3296_v24 }
 0x167   : > { %2031 = vmatpush1.bf16.msra.mxu0 %v3291_v26  ;;  %2195 = vmatpush1.bf16.msra.mxu1 %v3294_v19 }
 0x16a   : > { %2033 = vmatmul.mubr.bf16.vlgmr.msra.gmra.mrb[0].mxu0 %v3878_v25  ;;  %2197 = vmatmul.mubr.bf16.vlgmr.msra.gmra.mrb[0].mxu1 %v3878_v25 }
 0x23d   : > { %v3948_v27 = vpop.f32.mrb[0].mxu0  ;;  %v3950_v12 = vpop.f32.mrb[0].mxu1 }
 0x23e   : > { %v2206_v28 = vsel %vm2205_vm0, %v3948_v27, 0.0  ;;  %v2239_v29 = vmul.f32 %v3948_v27, %v3948_v27  ;;  %v2220_v30 = vsel %vm2205_vm0, %v3950_v12, 0.0  ;;  %v2241_v31 = vmul.f32 %v3950_v12, %v3950_v12  ;;  %v3960_v32 = vpop.f32.mrb[1].mxu0  ;;  %v3962_v25 = vpop.f32.mrb[1].mxu1 }
 0x23f   : > { %v2207_v33 = vrot.slane %v2206_v28, 4  ;;  %v2221_v22 = vrot.slane %v2220_v30, 4  ;;  %v2213_v34 = vsel %vm2205_vm0, %v3960_v32, 0.0  ;;  %v2240_v35 = vmul.f32 %v3960_v32, %v3960_v32  ;;  %v2038_v36 = vpop.f32.mrb[2].mxu0  ;;  %v2202_v37 = vpop.f32.mrb[2].mxu1 }
 0x240   : > { %v2243_v38 = vsel %vm2205_vm0, %v2239_v29, 0.0  ;;  %v2257_v39 = vsel %vm2205_vm0, %v2241_v31, 0.0  ;;  %v2214_v40 = vrot.slane %v2213_v34, 4  ;;  %v2227_v41 = vsel %vm2205_vm0, %v3962_v25, 0.0  ;;  %v2039_v42 = vpop.f32.mrb[3].mxu0  ;;  %v2203_v44 = vpop.f32.mrb[3].mxu1 }
 0x241   : > { %v2208_v45 = vadd.f32 %v2207_v33, %v2206_v28  ;;  %v2244_v46 = vrot.slane %v2243_v38, 4  ;;  %v2222_v47 = vadd.f32 %v2221_v22, %v2220_v30  ;;  %v2258_v48 = vrot.slane %v2257_v39, 4 }
 0x242   : > { %v2215_v50 = vadd.f32 %v2214_v40, %v2213_v34  ;;  %v2250_v51 = vsel %vm2205_vm0, %v2240_v35, 0.0  ;;  %v2228_v52 = vrot.slane %v2227_v41, 4  ;;  %v2242_v53 = vmul.f32 %v3962_v25, %v3962_v25 }
 0x243   : > { %v2209_v54 = vrot.slane %v2208_v45, 2  ;;  %v2245_v55 = vadd.f32 %v2244_v46, %v2243_v38  ;;  %v2223_v56 = vrot.slane %v2222_v47, 2  ;;  %v2259_v57 = vadd.f32 %v2258_v48, %v2257_v39 }
 0x244   : > { %v2216_v58 = vrot.slane %v2215_v50, 2  ;;  %v2251_v59 = vrot.slane %v2250_v51, 4  ;;  %v2229_v60 = vadd.f32 %v2228_v52, %v2227_v41  ;;  %v2264_v61 = vsel %vm2205_vm0, %v2242_v53, 0.0 }
 0x245   : > { %v2210_v62 = vadd.f32 %v2209_v54, %v2208_v45  ;;  %v2246_v63 = vrot.slane %v2245_v55, 2  ;;  %v2224_v0 = vadd.f32 %v2223_v56, %v2222_v47  ;;  %v2260_v1 = vrot.slane %v2259_v57, 2 }
 0x246   : > { %v2217_v2 = vadd.f32 %v2216_v58, %v2215_v50  ;;  %v2252_v3 = vadd.f32 %v2251_v59, %v2250_v51  ;;  %v2230_v4 = vrot.slane %v2229_v60, 2  ;;  %v2265_v5 = vrot.slane %v2264_v61, 4 }
 0x247   : > { %v2211_v6 = vrot.slane %v2210_v62, 1  ;;  %v2247_v7 = vadd.f32 %v2246_v63, %v2245_v55  ;;  %v2225_v8 = vrot.slane %v2224_v0, 1  ;;  %v2261_v9 = vadd.f32 %v2260_v1, %v2259_v57 }
 0x248   : > { %v2218_v10 = vrot.slane %v2217_v2, 1  ;;  %v2253_v11 = vrot.slane %v2252_v3, 2  ;;  %v2231_v13 = vadd.f32 %v2230_v4, %v2229_v60  ;;  %v2266_v14 = vadd.f32 %v2265_v5, %v2264_v61 }
 0x249   : > { %v2212_v15 = vadd.f32 %v2211_v6, %v2210_v62  ;;  %v2248_v16 = vrot.slane %v2247_v7, 1  ;;  %v2226_v17 = vadd.f32 %v2225_v8, %v2224_v0  ;;  %v2262_v18 = vrot.slane %v2261_v9, 1 }
 0x24a   : > { %v2219_v20 = vadd.f32 %v2218_v10, %v2217_v2  ;;  %v2254_v21 = vadd.f32 %v2253_v11, %v2252_v3  ;;  %v2232_v23 = vrot.slane %v2231_v13, 1  ;;  %v2267_v24 = vrot.slane %v2266_v14, 2 }
 0x24b   : > { %v2235_v26 = vmul.f32 0.25, %v2212_v15  ;;  %v2249_v19 = vadd.f32 %v2248_v16, %v2247_v7  ;;  %v2237_v28 = vmul.f32 0.25, %v2226_v17  ;;  %v2263_v29 = vadd.f32 %v2262_v18, %v2261_v9  ;;  %v2287_v9 = vld [vmem:[%s3648_s9] sm:$0xf] }
 0x24c   : > { %v2236_v30 = vmul.f32 0.25, %v2219_v20  ;;  %v2255_v31 = vrot.slane %v2254_v21, 1  ;;  %v2233_v33 = vadd.f32 %v2232_v23, %v2231_v13  ;;  %v2268_v22 = vadd.f32 %v2267_v24, %v2266_v14 }
 0x24d   : > { %v2271_v34 = vmul.f32 0.25, %v2249_v19  ;;  %v2275_v35 = vmul.f32 %v2235_v26, %v2235_v26  ;;  %v2273_v36 = vmul.f32 0.25, %v2263_v29  ;;  %v2277_v37 = vmul.f32 %v2237_v28, %v2237_v28 }
 0x24e   : > { %v2256_v38 = vadd.f32 %v2255_v31, %v2254_v21  ;;  %v2276_v39 = vmul.f32 %v2236_v30, %v2236_v30  ;;  %v2238_v40 = vmul.f32 0.25, %v2233_v33  ;;  %v2269_v41 = vrot.slane %v2268_v22, 1 }
 0x24f   : > { %v2279_v42 = vsub.f32 %v2271_v34, %v2275_v35  ;;  %v2281_v44 = vsub.f32 %v2273_v36, %v2277_v37  ;;  %v3443_v60 = vmov 1966171168   ;;  %v2330_v10 = vsub.s32 0, %v3693_v43 }
 0x250   : > { %v2272_v45 = vmul.f32 0.25, %v2256_v38  ;;  %v2270_v46 = vadd.f32 %v2269_v41, %v2268_v22  ;;  %v2278_v47 = vmul.f32 %v2238_v40, %v2238_v40  ;;  %v2303_v61 = vunpack.c.l.s4 %v3443_v60 }
 0x251   : > { %v2283_v48 = vmax.f32 %v2279_v42, 0.0  ;;  %v2285_v50 = vmax.f32 %v2281_v44, 0.0  ;;  %v2334_v13 = vsub.s32 1, %v3693_v43  ;;  %v2338_v14 = vsub.s32 2, %v3693_v43 }
 0x252   : > { %v2280_v51 = vsub.f32 %v2272_v45, %v2276_v39  ;;  %v2274_v52 = vmul.f32 0.25, %v2270_v46  ;;  %v2304_v62 = vunpack.c.0.s8 %v2303_v61  ;;  %v2342_v15 = vsub.s32 3, %v3693_v43 }
 0x253   : > { %v2288_v53 = vadd.f32 1e-05, %v2283_v48  ;;  %v2290_v54 = vadd.f32 1e-05, %v2285_v50 }
 0x254   : > { %v2284_v55 = vmax.f32 %v2280_v51, 0.0  ;;  %v2282_v56 = vsub.f32 %v2274_v52, %v2278_v47  ;;  %v2307_v1 = vsub.s32 %v2304_v62, %v3693_v43 }
 0x255   : > { %3298 = vrsqrt.f32 %v2288_v53 }
 0x256   : > { %v2289_v57 = vadd.f32 1e-05, %v2284_v55  ;;  %v2286_v58 = vmax.f32 %v2282_v56, 0.0  ;;  %3300 = vrsqrt.f32 %v2290_v54 }
 0x258   : > { %3302 = vrsqrt.f32 %v2289_v57  ;;  %v2291_v59 = vadd.f32 1e-05, %v2286_v58 }
 0x25a   : > { %3304 = vrsqrt.f32 %v2291_v59 }
 0x25f   : > { %v3299_v63 = vpop.eup %3298 }
 0x260   : > { %v3301_v0 = vpop.eup %3300 }
 0x262   : > { %v3303_v2 = vpop.eup %3302 }
 0x263   : > { %v2300_v3 = vcombine.low %v3299_v63, %v3303_v2 }
 0x264   : > { %v3305_v4 = vpop.eup %3304 }
 0x265   : > { %v2301_v5 = vcombine.low %v3301_v0, %v3305_v4  ;;  %v2308_v6 = vrot.slane %v2300_v3, %v2307_v1 }
 0x267   : > { %v2315_v7 = vrot.slane %v2301_v5, %v2307_v1 }
 0x269   : > { %v2316_v8 = vcombine.low %v2308_v6, %v2315_v7 }
 0x26b   : > { %v2323_v11 = vrot.slane %v2316_v8, %v2307_v1 }
 0x26d   : > { %v2325_v16 = vmul.f32 %v2323_v11, %v2287_v9 }
 0x26f   : > { %v2331_v17 = vrot.slane %v2325_v16, %v2330_v10  ;;  %v2335_v18 = vrot.slane %v2325_v16, %v2334_v13  ;;  %v2339_v20 = vrot.slane %v2325_v16, %v2338_v14  ;;  %v2343_v21 = vrot.slane %v2325_v16, %v2342_v15 }
 0x271   : > { %v2348_v23 = vmul.f32 %v2331_v17, %v2235_v26  ;;  %v2349_v24 = vmul.f32 %v2335_v18, %v2236_v30  ;;  %v2350_v19 = vmul.f32 %v2339_v20, %v2237_v28  ;;  %v2351_v29 = vmul.f32 %v2343_v21, %v2238_v40  ;;  %v2326_v26 = vld [vmem:[%s251_s5] sm:$0xf] }
 0x272   : > { %v2382_v31 = vmul.f32 %v2331_v17, %v3948_v27  ;;  %v2383_v33 = vmul.f32 %v2335_v18, %v3960_v32  ;;  %v2384_v22 = vmul.f32 %v2339_v20, %v3950_v12  ;;  %v2385_v34 = vmul.f32 %v2343_v21, %v3962_v25 }
 0x273   : > { %v2356_v43 = vcombine.low %v2348_v23, %v2349_v24  ;;  %v2357_v35 = vcombine.low %v2350_v19, %v2351_v29 }
 0x275   : > { %v2364_v36 = vrot.slane %v2356_v43, %v2307_v1  ;;  %v2371_v37 = vrot.slane %v2357_v35, %v2307_v1 }
 0x277   : > { %v2372_v38 = vcombine.low %v2364_v36, %v2371_v37 }
 0x279   : > { %v2379_v30 = vrot.slane %v2372_v38, %v2307_v1 }
 0x27b   : > { %v2381_v28 = vsub.f32 %v2326_v26, %v2379_v30 }
 0x27d   : > { %v2390_v39 = vrot.slane %v2381_v28, %v2330_v10  ;;  %v2394_v27 = vrot.slane %v2381_v28, %v2334_v13  ;;  %v2398_v40 = vrot.slane %v2381_v28, %v2338_v14  ;;  %v2402_v32 = vrot.slane %v2381_v28, %v2342_v15 }
 0x27f   : > { %v2407_v12 = vadd.f32 %v2390_v39, %v2382_v31  ;;  %v2408_v41 = vadd.f32 %v2394_v27, %v2383_v33  ;;  %v2409_v25 = vadd.f32 %v2398_v40, %v2384_v22  ;;  %v2410_v42 = vadd.f32 %v2402_v32, %v2385_v34 }
 0x281   : > { %v2411_v44 = vmax.f32 %v2407_v12, 0.0  ;;  %v2412_v45 = vmax.f32 %v2408_v41, 0.0  ;;  %v2413_v46 = vmax.f32 %v2409_v25, 0.0  ;;  %v2414_v47 = vmax.f32 %v2410_v42, 0.0 }
 0x283   : > { %v2827_v48 = vpack.c.bf16 %v2412_v45, %v2411_v44  ;;  %v2828_v50 = vpack.c.bf16 %v2414_v47, %v2413_v46 }
 0x285   : > { %v2431_v51 = vrot.slane %v2827_v48, %v3701_v49  ;;  %v2438_v52 = vrot.slane %v2828_v50, %v3701_v49 }
 0x287   : > { %v2439_v53 = vcombine.low %v2431_v51, %v2438_v52 }
 0x289   : > { %2441 = vst [vmem:[%s293_s8] sm:$0xff] %v2439_v53 }
 0x28a PF: > { %p17_p0 = scmp.ge.s32.totalorder %s3491_s20, 6   ;;  %s4021_s15 = smov %s3426_s16 }
 0x28b   : > { %s4022_s16 = smov %s3430_s17  ;;  %s4023_s17 = smov %s3501_s23 }
 0x28c   : > { %s4024_s18 = smov %s3491_s20  ;;  %19 = sbr.rel (!%p17_p0) target bundleno = 5 (0x5), region = 100 }
 0x293   :  { %2464 = vsyncpa [#allocation3], 1 }
 0x294   :  { %2466 = vsyncpa [#allocation3 + $0x1], 1 }
 0x295   :  { %2467 = vsyncpa [#allocation5], 1 }
 0x296   :  { %2469 = vsyncpa [#allocation5 + $0x1], 1 }

// kernel: generator_forward.7
= control target key start
LH: loop header
LB: loop body
LE: loop exit
PB: predicated region body
PF: predicated region fallthrough
CT: control target
= control target key end

     0   :  { %s1737_s20 = smov 0   ;;  %s2453_s0 = inlined_call_operand.vmem [shape: f32[4,16,4,64], index: 0, kind: input, shape index: {}]   ;;  %s2454_s1 = inlined_call_operand.vmem [shape: f32[4,2,64], index: 1, kind: input, shape index: {}]   ;;  %s2455_s2 = inlined_call_operand.vmem [shape: f32[2,64], index: 2, kind: input, shape index: {}]   ;;  %s2456_s3 = inlined_call_operand.vmem [shape: f32[9,64], index: 3, kind: input, shape index: {}]   ;;  %s2457_s4 = inlined_call_operand.<no memory space> [shape: f32[1], index: 4, kind: input, shape index: {}]   ;;  %s2458_s5 = inlined_call_operand.vmem [shape: f32[4,4,4,4], index: 5, kind: output, shape index: {}]  }
   0x1   :  { %10 = sst [smem:[#allocation3]] %s2457_s4 }
   0x2 LB: > { %s1619_s21 = sadd.s32 4294967295, %s1701_s20   ;;  %p1623_p0 = scmp.ge.s32.totalorder %s1701_s20, 1  ;;  %s1701_s20 = sphi %s1737_s20, %s16_s20  }
   0x3   : > { %p188_p1 = scmp.lt.s32.totalorder %s1701_s20, 5 }
   0x5   : > { %p189_p2 = pnand %p1623_p0, %p188_p1 }
   0x6   : > { %vm287_vm0 = vcmask (!%p189_p2), 521216   ;;  %v1703_v0 = vmov (!%p189_p2), 0.0   ;;  %v226_v1 = vld [vmem:[%s2454_s1] sm:$0x1] (!%p189_p2)  ;;  %v227_v2 = vld [vmem:[%s2454_s1 + $0x2] sm:$0x1] (!%p189_p2)  ;;  %v316_v53 = vlaneseq (!%p189_p2) }
   0x7   : > { %192 = sbr.rel (%p189_p2) target bundleno = 509 (0x1fd), region = 40  ;;  %306 = vst.msk [vmem:[#allocation2 + $0x90] sm:$0x3f] (!%p189_p2), %vm287_vm0, %v1703_v0  ;;  %289 = vst.msk [vmem:[#allocation2 + $0x8] sm:$0x3f] (!%p189_p2), %vm287_vm0, %v1703_v0  ;;  %vm235_vm1 = vcmask (!%p189_p2), 1041409  }
   0x8   : > { %290 = vst.msk [vmem:[#allocation2 + $0x10] sm:$0x3f] (!%p189_p2), %vm287_vm0, %v1703_v0  ;;  %291 = vst.msk [vmem:[#allocation2 + $0x18] sm:$0x3f] (!%p189_p2), %vm287_vm0, %v1703_v0  ;;  %v228_v3 = vld [vmem:[%s2454_s1 + $0x4] sm:$0x1] (!%p189_p2) }
   0x9   : > { %292 = vst.msk [vmem:[#allocation2 + $0x20] sm:$0x3f] (!%p189_p2), %vm287_vm0, %v1703_v0  ;;  %293 = vst.msk [vmem:[#allocation2 + $0x28] sm:$0x3f] (!%p189_p2), %vm287_vm0, %v1703_v0  ;;  %v229_v4 = vld [vmem:[%s2454_s1 + $0x6] sm:$0x1] (!%p189_p2) }
   0xa   : > { %295 = vst.msk [vmem:[#allocation2 + $0x38] sm:$0x3f] (!%p189_p2), %vm287_vm0, %v1703_v0  ;;  %296 = vst.msk [vmem:[#allocation2 + $0x40] sm:$0x3f] (!%p189_p2), %vm287_vm0, %v1703_v0  ;;  %v234_v5 = vrot.slane (!%p189_p2), %v227_v2, 7  ;;  %v237_v6 = vrot.slane (!%p189_p2), %v228_v3, 6 }
   0xb   : > { %297 = vst.msk [vmem:[#allocation2 + $0x48] sm:$0x3f] (!%p189_p2), %vm287_vm0, %v1703_v0  ;;  %298 = vst.msk [vmem:[#allocation2 + $0x50] sm:$0x3f] (!%p189_p2), %vm287_vm0, %v1703_v0  ;;  %vm238_vm2 = vcmask (!%p189_p2), 1042434   ;;  %v240_v7 = vrot.slane (!%p189_p2), %v229_v4, 5 }
   0xc   : > { %299 = vst.msk [vmem:[#allocation2 + $0x58] sm:$0x3f] (!%p189_p2), %vm287_vm0, %v1703_v0  ;;  %300 = vst.msk [vmem:[#allocation2 + $0x60] sm:$0x3f] (!%p189_p2), %vm287_vm0, %v1703_v0  ;;  %vm241_vm3 = vcmask (!%p189_p2), 1043459   ;;  %vm244_vm4 = vcmask (!%p189_p2), 519168   ;;  %v236_v10 = vsel (!%p189_p2), %vm235_vm1, %v234_v5, %v226_v1 }
   0xd   : > { %301 = vst.msk [vmem:[#allocation2 + $0x68] sm:$0x3f] (!%p189_p2), %vm287_vm0, %v1703_v0  ;;  %302 = vst.msk [vmem:[#allocation2 + $0x70] sm:$0x3f] (!%p189_p2), %vm287_vm0, %v1703_v0  ;;  %v252_v8 = vld [vmem:[%s2454_s1 + $0x1] sm:$0x1] (!%p189_p2)  ;;  %v239_v16 = vsel (!%p189_p2), %vm238_vm2, %v237_v6, %v236_v10 }
   0xe   : > { %303 = vst.msk [vmem:[#allocation2 + $0x78] sm:$0x3f] %vm287_vm0, %v1703_v0  ;;  %304 = vst.msk [vmem:[#allocation2 + $0x80] sm:$0x3f] %vm287_vm0, %v1703_v0  ;;  %v253_v9 = vld [vmem:[%s2454_s1 + $0x3] sm:$0x1]  ;;  %v242_v19 = vsel %vm241_vm3, %v240_v7, %v239_v16 }
   0xf   : > { %307 = vst.msk [vmem:[#allocation2 + $0x98] sm:$0x3f] %vm287_vm0, %v1703_v0  ;;  %308 = vst.msk [vmem:[#allocation2 + $0xa0] sm:$0x3f] %vm287_vm0, %v1703_v0  ;;  %v254_v11 = vld [vmem:[%s2454_s1 + $0x5] sm:$0x1] }
  0x10   : > { %309 = vst.msk [vmem:[#allocation2 + $0xa8] sm:$0x3f] %vm287_vm0, %v1703_v0  ;;  %310 = vst.msk [vmem:[#allocation2 + $0xb0] sm:$0x3f] %vm287_vm0, %v1703_v0  ;;  %v255_v12 = vld [vmem:[%s2454_s1 + $0x7] sm:$0x1] }
  0x11   : > { %v260_v13 = vrot.slane %v253_v9, 7  ;;  %v1793_v14 = vld [vmem:[%s2456_s3] ss:$0 sm:$0xff]  ;;  %v1798_v15 = vld [vmem:[%s2456_s3 + $0x1] ss:$0 sm:$0xff]  ;;  %v262_v17 = vrot.slane %v254_v11, 6 }
  0x12   : > { %v264_v18 = vrot.slane %v255_v12, 5  ;;  %v411_v21 = vld [vmem:[#allocation2 + $0x90] sm:$0xf]  ;;  %v245_v26 = vsel %vm244_vm4, %v242_v19, 0.0  ;;  %v1810_v28 = vld [vmem:[%s2456_s3 + $0x2] ss:$0 sm:$0xff] }
  0x13   : > { %v261_v20 = vsel %vm235_vm1, %v260_v13, %v252_v8  ;;  %v441_v22 = vld [vmem:[#allocation2 + $0x61] sm:$0xf]  ;;  %v420_v24 = vmul.f32 %v1793_v14, %v411_v21  ;;  %v470_v27 = vld [vmem:[#allocation2 + $0x91] sm:$0xf]  ;;  %v246_v29 = vrot.slane %v245_v26, 4  ;;  %p216_p3 = scmp.lt.s32.totalorder %s1619_s21, 3 }
  0x14   : > { %v263_v23 = vsel %vm238_vm2, %v262_v17, %v261_v20  ;;  %v450_v25 = vmul.f32 %v1798_v15, %v441_v22  ;;  %v479_v36 = vmul.f32 %v1810_v28, %v470_v27  ;;  %v1826_v54 = vshrl.u32 %v316_v53, 7  ;;  %v280_v55 = vld [vmem:[%s2455_s2] sm:$0x1]  ;;  %v284_v59 = vld [vmem:[%s2455_s2 + $0x1] sm:$0x1]  ;;  %s407_s14 = sld [smem:[#allocation3]] }
  0x15   : > { %v265_v30 = vsel %vm241_vm3, %v264_v18, %v263_v23  ;;  %v424_v31 = vsel %vm244_vm4, %v420_v24, 0.0  ;;  %v247_v33 = vadd.f32 %v246_v29, %v245_v26  ;;  %s2460_s21 = smov (!%p216_p3, %s1619_s21), 3  ;;  %vm699_vm5 = vcmask 27648  }
  0x16   : > { %v267_v32 = vsel %vm244_vm4, %v265_v30, 0.0  ;;  %425 = vadd.xlane.f32.xlu0 %v424_v31  ;;  %v454_v35 = vsel %vm244_vm4, %v450_v25, 0.0  ;;  %v483_v41 = vsel %vm244_vm4, %v479_v36, 0.0  ;;  %s1681_s18 = sshll.u32 %s2460_s21, 6  ;;  %v318_v56 = vsub.s32 0, %v1826_v54  ;;  %s1682_s26 = sshll.u32 %s2460_s21, 4 }
  0x17   : > { %v268_v34 = vrot.slane %v267_v32, 4  ;;  %v248_v37 = vrot.slane %v247_v33, 2  ;;  %s1831_s22 = scalar_lea.vmem %s2453_s0, %s1681_s18  ;;  %s2241_s29 = scalar_lea.vmem %s2458_s5, %s1682_s26 }
  0x18   : > { %v1637_v60 = vld [vmem:[%s1831_s22 + $0x34] sm:$0xf]  ;;  %v1636_v61 = vld [vmem:[%s1831_s22 + $0x30] sm:$0xf]  ;;  %v1638_v62 = vld [vmem:[%s1831_s22 + $0x38] sm:$0xf] }
  0x19   : > { %v269_v38 = vadd.f32 %v268_v34, %v267_v32  ;;  %v249_v39 = vadd.f32 %v248_v37, %v247_v33  ;;  %v1633_v63 = vld [vmem:[%s1831_s22 + $0x24] sm:$0xf]  ;;  %v1632_v0 = vld [vmem:[%s1831_s22 + $0x20] sm:$0xf]  ;;  %v1634_v3 = vld [vmem:[%s1831_s22 + $0x28] sm:$0xf] }
  0x1a   : > { %455 = vadd.xlane.f32.xlu0 %v454_v35  ;;  %v1628_v4 = vld [vmem:[%s1831_s22 + $0x10] sm:$0xf]  ;;  %v1630_v5 = vld [vmem:[%s1831_s22 + $0x18] sm:$0xf]  ;;  %v312_v6 = vld [vmem:[%s1831_s22] sm:$0xf] }
  0x1b   : > { %v270_v40 = vrot.slane %v269_v38, 2  ;;  %v250_v42 = vrot.slane %v249_v39, 1  ;;  %v1629_v7 = vld [vmem:[%s1831_s22 + $0x14] sm:$0xf]  ;;  %v314_v8 = vld [vmem:[%s1831_s22 + $0x8] sm:$0xf] }
  0x1c   : > { %v1631_v13 = vld [vmem:[%s1831_s22 + $0x1c] sm:$0xf]  ;;  %v313_v16 = vld [vmem:[%s1831_s22 + $0x4] sm:$0xf]  ;;  %v315_v17 = vld [vmem:[%s1831_s22 + $0xc] sm:$0xf] }
  0x1d   : > { %v271_v43 = vadd.f32 %v270_v40, %v269_v38  ;;  %v251_v44 = vadd.f32 %v250_v42, %v249_v39  ;;  %v1639_v39 = vld [vmem:[%s1831_s22 + $0x3c] sm:$0xf] }
  0x1e   : > { %484 = vadd.xlane.f32.xlu0 %v483_v41 }
  0x1f   : > { %v272_v45 = vrot.slane %v271_v43, 1  ;;  %v275_v47 = vmul.f32 0.00390625, %v251_v44  ;;  %v1635_v44 = vld [vmem:[%s1831_s22 + $0x2c] sm:$0xf] }
  0x21   : > { %v273_v46 = vadd.f32 %v272_v45, %v271_v43  ;;  %v277_v49 = vmul.f32 %v275_v47, %v275_v47 }
  0x23   : > { %v276_v48 = vmul.f32 0.00390625, %v273_v46 }
  0x25   : > { %v278_v50 = vsub.f32 %v276_v48, %v277_v49 }
  0x27   : > { %v279_v51 = vmax.f32 %v278_v50, 0.0 }
  0x29   : > { %v281_v52 = vadd.f32 1e-05, %v279_v51 }
  0x2b   : > { %1692 = vrsqrt.f32 %v281_v52 }
  0x35   : > { %v1693_v57 = vpop.eup %1692 }
  0x36   : > { %v283_v58 = vmul.f32 %v1693_v57, %v280_v55 }
  0x38   : > { %v285_v1 = vmul.f32 %v283_v58, %v275_v47  ;;  %v319_v2 = vrot.slane %v283_v58, %v318_v56 }
  0x3a   : > { %v286_v9 = vsub.f32 %v284_v59, %v285_v1  ;;  %v391_v10 = vmul.f32 %v1637_v60, %v319_v2  ;;  %v390_v11 = vmul.f32 %v1636_v61, %v319_v2  ;;  %v392_v12 = vmul.f32 %v1638_v62, %v319_v2 }
  0x3b   : > { %v369_v18 = vmul.f32 %v1633_v63, %v319_v2  ;;  %v368_v19 = vmul.f32 %v1632_v0, %v319_v2  ;;  %v370_v20 = vmul.f32 %v1634_v3, %v319_v2  ;;  %v346_v21 = vmul.f32 %v1628_v4, %v319_v2 }
  0x3c   : > { %v327_v22 = vrot.slane %v286_v9, %v318_v56  ;;  %v348_v23 = vmul.f32 %v1630_v5, %v319_v2  ;;  %v320_v24 = vmul.f32 %v319_v2, %v312_v6  ;;  %v347_v25 = vmul.f32 %v1629_v7, %v319_v2 }
  0x3d   : > { %v322_v26 = vmul.f32 %v319_v2, %v314_v8  ;;  %v349_v27 = vmul.f32 %v1631_v13, %v319_v2  ;;  %v321_v29 = vmul.f32 %v319_v2, %v313_v16  ;;  %v323_v30 = vmul.f32 %v319_v2, %v315_v17 }
  0x3e   : > { %v395_v31 = vadd.f32 %v391_v10, %v327_v22  ;;  %v394_v32 = vadd.f32 %v390_v11, %v327_v22  ;;  %v396_v33 = vadd.f32 %v392_v12, %v327_v22  ;;  %v373_v34 = vadd.f32 %v369_v18, %v327_v22 }
  0x3f   : > { %v372_v35 = vadd.f32 %v368_v19, %v327_v22  ;;  %v374_v36 = vadd.f32 %v370_v20, %v327_v22  ;;  %v350_v37 = vadd.f32 %v346_v21, %v327_v22  ;;  %v352_v38 = vadd.f32 %v348_v23, %v327_v22 }
  0x40   : > { %v399_v40 = vmax.f32 %v395_v31, 0.0  ;;  %v398_v41 = vmax.f32 %v394_v32, 0.0  ;;  %v400_v42 = vmax.f32 %v396_v33, 0.0  ;;  %v377_v43 = vmax.f32 %v373_v34, 0.0 }
  0x41   : > { %v376_v45 = vmax.f32 %v372_v35, 0.0  ;;  %v378_v46 = vmax.f32 %v374_v36, 0.0  ;;  %v354_v47 = vmax.f32 %v350_v37, 0.0  ;;  %v356_v48 = vmax.f32 %v352_v38, 0.0 }
  0x42   : > { %404 = vst.msk [vmem:[#allocation2 + $0xa1] sm:$0xf] %vm244_vm4, %v399_v40  ;;  %403 = vst.msk [vmem:[#allocation2 + $0x99] sm:$0xf] %vm244_vm4, %v398_v41  ;;  %v328_v49 = vadd.f32 %v327_v22, %v320_v24  ;;  %v351_v50 = vadd.f32 %v347_v25, %v327_v22  ;;  %v330_v51 = vadd.f32 %v327_v22, %v322_v26  ;;  %v1885_v25 = vld [vmem:[%s2456_s3 + $0x3] ss:$0 sm:$0xff] }
  0x43   : > { %405 = vst.msk [vmem:[#allocation2 + $0xa9] sm:$0xf] %vm244_vm4, %v400_v42  ;;  %382 = vst.msk [vmem:[#allocation2 + $0x71] sm:$0xf] %vm244_vm4, %v377_v43  ;;  %v353_v52 = vadd.f32 %v349_v27, %v327_v22  ;;  %v329_v55 = vadd.f32 %v327_v22, %v321_v29  ;;  %v331_v56 = vadd.f32 %v327_v22, %v323_v30 }
  0x44   : > { %381 = vst.msk [vmem:[#allocation2 + $0x69] sm:$0xf] %vm244_vm4, %v376_v45  ;;  %383 = vst.msk [vmem:[#allocation2 + $0x79] sm:$0xf] %vm244_vm4, %v378_v46  ;;  %v393_v57 = vmul.f32 %v1639_v39, %v319_v2  ;;  %v371_v58 = vmul.f32 %v1635_v44, %v319_v2  ;;  %v332_v59 = vmax.f32 %v328_v49, 0.0  ;;  %v355_v60 = vmax.f32 %v351_v50, 0.0 }
  0x45   : > { %359 = vst.msk [vmem:[#allocation2 + $0x39] sm:$0xf] %vm244_vm4, %v354_v47  ;;  %361 = vst.msk [vmem:[#allocation2 + $0x49] sm:$0xf] %vm244_vm4, %v356_v48  ;;  %v334_v61 = vmax.f32 %v330_v51, 0.0  ;;  %v357_v62 = vmax.f32 %v353_v52, 0.0 }
  0x46   : > { %v333_v63 = vmax.f32 %v329_v55, 0.0  ;;  %v335_v0 = vmax.f32 %v331_v56, 0.0  ;;  %v397_v1 = vadd.f32 %v393_v57, %v327_v22  ;;  %v375_v3 = vadd.f32 %v371_v58, %v327_v22  ;;  %337 = vst.msk [vmem:[#allocation2 + $0x9] sm:$0xf] %vm244_vm4, %v332_v59  ;;  %360 = vst.msk [vmem:[#allocation2 + $0x41] sm:$0xf] %vm244_vm4, %v355_v60 }
  0x47   : > { %339 = vst.msk [vmem:[#allocation2 + $0x19] sm:$0xf] %vm244_vm4, %v334_v61  ;;  %362 = vst.msk [vmem:[#allocation2 + $0x51] sm:$0xf] %vm244_vm4, %v357_v62  ;;  %v1898_v39 = vld [vmem:[%s2456_s3 + $0x4] ss:$0 sm:$0xff] }
  0x48   : > { %338 = vst.msk [vmem:[#allocation2 + $0x11] sm:$0xf] %vm244_vm4, %v333_v63  ;;  %340 = vst.msk [vmem:[#allocation2 + $0x21] sm:$0xf] %vm244_vm4, %v335_v0  ;;  %v401_v2 = vmax.f32 %v397_v1, 0.0  ;;  %v379_v4 = vmax.f32 %v375_v3, 0.0 }
  0x49   : > { %v413_v5 = vld [vmem:[#allocation2 + $0xa0] sm:$0xf]  ;;  %v412_v6 = vld [vmem:[#allocation2 + $0x98] sm:$0xf]  ;;  %v1911_v52 = vld [vmem:[%s2456_s3 + $0x5] ss:$0 sm:$0xff] }
  0x4a   : > { %v414_v7 = vld [vmem:[#allocation2 + $0xa8] sm:$0xf]  ;;  %406 = vst.msk [vmem:[#allocation2 + $0xb1] sm:$0xf] %vm244_vm4, %v401_v2  ;;  %384 = vst.msk [vmem:[#allocation2 + $0x81] sm:$0xf] %vm244_vm4, %v379_v4  ;;  %v422_v8 = vmul.f32 %v1793_v14, %v413_v5  ;;  %v421_v9 = vmul.f32 %v1793_v14, %v412_v6 }
  0x4b   : > { %v423_v10 = vmul.f32 %v1793_v14, %v414_v7  ;;  %v443_v11 = vld [vmem:[#allocation2 + $0x71] sm:$0xf]  ;;  %v472_v13 = vld [vmem:[#allocation2 + $0xa1] sm:$0xf]  ;;  %v442_v16 = vld [vmem:[#allocation2 + $0x69] sm:$0xf] }
  0x4c   : > { %v452_v12 = vmul.f32 %v1798_v15, %v443_v11  ;;  %v430_v17 = vsel %vm244_vm4, %v422_v8, 0.0  ;;  %v427_v18 = vsel %vm244_vm4, %v421_v9, 0.0  ;;  %v481_v21 = vmul.f32 %v1810_v28, %v472_v13  ;;  %v444_v23 = vld [vmem:[#allocation2 + $0x79] sm:$0xf]  ;;  %v501_v32 = vld [vmem:[#allocation2 + $0x48] sm:$0xf] }
  0x4d   : > { %431 = vadd.xlane.f32.xlu1 %v430_v17  ;;  %428 = vadd.xlane.f32.xlu0 %v427_v18  ;;  %v433_v19 = vsel %vm244_vm4, %v423_v10, 0.0  ;;  %v451_v22 = vmul.f32 %v1798_v15, %v442_v16  ;;  %v499_v24 = vld [vmem:[#allocation2 + $0x38] sm:$0xf]  ;;  %v453_v29 = vmul.f32 %v1798_v15, %v444_v23  ;;  %v510_v36 = vmul.f32 %v1885_v25, %v501_v32  ;;  %v473_v37 = vld [vmem:[#allocation2 + $0xa9] sm:$0xf] }
  0x4e   : > { %v460_v20 = vsel %vm244_vm4, %v452_v12, 0.0  ;;  %v489_v26 = vsel %vm244_vm4, %v481_v21, 0.0  ;;  %v508_v30 = vmul.f32 %v1885_v25, %v499_v24  ;;  %v471_v31 = vld [vmem:[#allocation2 + $0x99] sm:$0xf]  ;;  %v528_v38 = vld [vmem:[#allocation2 + $0x9] sm:$0xf]  ;;  %v482_v42 = vmul.f32 %v1810_v28, %v473_v37 }
  0x4f   : > { %v457_v27 = vsel %vm244_vm4, %v451_v22, 0.0  ;;  %v463_v33 = vsel %vm244_vm4, %v453_v29, 0.0  ;;  %v480_v35 = vmul.f32 %v1810_v28, %v471_v31  ;;  %v518_v41 = vsel %vm244_vm4, %v510_v36, 0.0  ;;  %v500_v44 = vld [vmem:[#allocation2 + $0x40] sm:$0xf] }
  0x50   : > { %v512_v34 = vsel %vm244_vm4, %v508_v30, 0.0  ;;  %v537_v43 = vmul.f32 %v1898_v39, %v528_v38  ;;  %v530_v45 = vld [vmem:[#allocation2 + $0x19] sm:$0xf]  ;;  %v492_v46 = vsel %vm244_vm4, %v482_v42, 0.0  ;;  %v509_v48 = vmul.f32 %v1885_v25, %v500_v44  ;;  %v502_v50 = vld [vmem:[#allocation2 + $0x50] sm:$0xf] }
  0x51   : > { %434 = vadd.xlane.f32.xlu1 %v433_v19  ;;  %461 = vadd.xlane.f32.xlu0 %v460_v20  ;;  %v486_v40 = vsel %vm244_vm4, %v480_v35, 0.0  ;;  %v539_v49 = vmul.f32 %v1898_v39, %v530_v45  ;;  %v557_v51 = vld [vmem:[#allocation2 + $0x39] sm:$0xf]  ;;  %v511_v57 = vmul.f32 %v1885_v25, %v502_v50  ;;  %v529_v59 = vld [vmem:[#allocation2 + $0x11] sm:$0xf] }
  0x52   : > { %v541_v47 = vsel %vm244_vm4, %v537_v43, 0.0  ;;  %v515_v55 = vsel %vm244_vm4, %v509_v48, 0.0  ;;  %v566_v58 = vmul.f32 %v1911_v52, %v557_v51  ;;  %v559_v60 = vld [vmem:[#allocation2 + $0x49] sm:$0xf]  ;;  %v538_v63 = vmul.f32 %v1898_v39, %v529_v59  ;;  %v531_v1 = vld [vmem:[#allocation2 + $0x21] sm:$0xf] }
  0x53   : > { %v547_v56 = vsel %vm244_vm4, %v539_v49, 0.0  ;;  %v521_v61 = vsel %vm244_vm4, %v511_v57, 0.0  ;;  %v568_v0 = vmul.f32 %v1911_v52, %v559_v60  ;;  %v586_v3 = vld [vmem:[#allocation2 + $0x98] sm:$0xf]  ;;  %v1924_v2 = vld [vmem:[%s2456_s3 + $0x6] ss:$0 sm:$0xff]  ;;  %v540_v6 = vmul.f32 %v1898_v39, %v531_v1 }
  0x54   : > { %v570_v62 = vsel %vm244_vm4, %v566_v58, 0.0  ;;  %v544_v4 = vsel %vm244_vm4, %v538_v63, 0.0  ;;  %v595_v7 = vmul.f32 %v1924_v2, %v586_v3  ;;  %v558_v8 = vld [vmem:[#allocation2 + $0x41] sm:$0xf]  ;;  %v588_v9 = vld [vmem:[#allocation2 + $0xa8] sm:$0xf] }
  0x55   : > { %490 = vadd.xlane.f32.xlu0 %v489_v26  ;;  %458 = vadd.xlane.f32.xlu1 %v457_v27  ;;  %v576_v5 = vsel %vm244_vm4, %v568_v0, 0.0  ;;  %v550_v10 = vsel %vm244_vm4, %v540_v6, 0.0  ;;  %v567_v12 = vmul.f32 %v1911_v52, %v558_v8  ;;  %v597_v13 = vmul.f32 %v1924_v2, %v588_v9  ;;  %v560_v16 = vld [vmem:[#allocation2 + $0x51] sm:$0xf]  ;;  %v615_v17 = vld [vmem:[#allocation2 + $0x69] sm:$0xf] }
  0x56   : > { %v599_v11 = vsel %vm244_vm4, %v595_v7, 0.0  ;;  %v1937_v18 = vld [vmem:[%s2456_s3 + $0x7] ss:$0 sm:$0xff]  ;;  %v569_v21 = vmul.f32 %v1911_v52, %v560_v16  ;;  %v587_v23 = vld [vmem:[#allocation2 + $0xa0] sm:$0xf] }
  0x57   : > { %v573_v19 = vsel %vm244_vm4, %v567_v12, 0.0  ;;  %v605_v20 = vsel %vm244_vm4, %v597_v13, 0.0  ;;  %v624_v22 = vmul.f32 %v1937_v18, %v615_v17  ;;  %v617_v24 = vld [vmem:[#allocation2 + $0x79] sm:$0xf]  ;;  %v596_v29 = vmul.f32 %v1924_v2, %v587_v23  ;;  %v589_v31 = vld [vmem:[#allocation2 + $0xb0] sm:$0xf] }
  0x58   : > { %v579_v26 = vsel %vm244_vm4, %v569_v21, 0.0  ;;  %v626_v30 = vmul.f32 %v1937_v18, %v617_v24  ;;  %v644_v32 = vld [vmem:[#allocation2 + $0x99] sm:$0xf]  ;;  %v598_v36 = vmul.f32 %v1924_v2, %v589_v31  ;;  %v616_v38 = vld [vmem:[#allocation2 + $0x71] sm:$0xf] }
  0x59   : > { %464 = vadd.xlane.f32.xlu1 %v463_v33  ;;  %513 = vadd.xlane.f32.xlu0 %v512_v34  ;;  %v628_v27 = vsel %vm244_vm4, %v624_v22, 0.0  ;;  %v1950_v33 = vld [vmem:[%s2456_s3 + $0x8] ss:$0 sm:$0xff]  ;;  %v602_v34 = vsel %vm244_vm4, %v596_v29, 0.0  ;;  %v625_v43 = vmul.f32 %v1937_v18, %v616_v38  ;;  %v618_v45 = vld [vmem:[#allocation2 + $0x81] sm:$0xf] }
  0x5a   : > { %v634_v35 = vsel %vm244_vm4, %v626_v30, 0.0  ;;  %v653_v37 = vmul.f32 %v1950_v33, %v644_v32  ;;  %v627_v49 = vmul.f32 %v1937_v18, %v618_v45  ;;  %v645_v51 = vld [vmem:[#allocation2 + $0xa1] sm:$0xf]  ;;  %v647_v60 = vld [vmem:[#allocation2 + $0xb1] sm:$0xf] }
  0x5b   : > { %v654_v58 = vmul.f32 %v1950_v33, %v645_v51  ;;  %v656_v0 = vmul.f32 %v1950_v33, %v647_v60  ;;  %v702_v3 = vld [vmem:[#allocation2 + $0x69] sm:$0xf]  ;;  %v704_v9 = vld [vmem:[#allocation2 + $0x79] sm:$0xf] }
  0x5c   : > { %v657_v42 = vsel %vm244_vm4, %v653_v37, 0.0  ;;  %v711_v7 = vmul.f32 %v1793_v14, %v702_v3  ;;  %v713_v13 = vmul.f32 %v1793_v14, %v704_v9  ;;  %v731_v17 = vld [vmem:[#allocation2 + $0x99] sm:$0xf]  ;;  %v733_v24 = vld [vmem:[#allocation2 + $0xa9] sm:$0xf] }
  0x5d   : > { %487 = vadd.xlane.f32.xlu1 %v486_v40  ;;  %519 = vadd.xlane.f32.xlu0 %v518_v41  ;;  %v646_v40 = vld [vmem:[#allocation2 + $0xa9] sm:$0xf]  ;;  %v608_v41 = vsel %vm244_vm4, %v598_v36, 0.0  ;;  %v740_v22 = vmul.f32 %v1798_v15, %v731_v17  ;;  %v742_v30 = vmul.f32 %v1798_v15, %v733_v24 }
  0x5e   : > { %v655_v44 = vmul.f32 %v1950_v33, %v646_v40  ;;  %v760_v32 = vld [vmem:[#allocation2 + $0x6a] sm:$0xf]  ;;  %v762_v40 = vld [vmem:[#allocation2 + $0x7a] sm:$0xf] }
  0x5f   : > { %v769_v37 = vmul.f32 %v1810_v28, %v760_v32 }
  0x60   : > { %v663_v48 = vsel %vm244_vm4, %v655_v44, 0.0  ;;  %v771_v44 = vmul.f32 %v1810_v28, %v762_v40 }
  0x61   : > { %493 = vadd.xlane.f32.xlu1 %v492_v46  ;;  %542 = vadd.xlane.f32.xlu0 %v541_v47  ;;  %v701_v46 = vld [vmem:[#allocation2 + $0x61] sm:$0xf]  ;;  %v631_v47 = vsel %vm244_vm4, %v625_v43, 0.0 }
  0x62   : > { %v710_v50 = vmul.f32 %v1793_v14, %v701_v46  ;;  %v789_v46 = vld [vmem:[#allocation2 + $0x11] sm:$0xf] }
  0x64   : > { %v714_v57 = vsel %vm244_vm4, %v710_v50, 0.0  ;;  %v798_v50 = vmul.f32 %v1885_v25, %v789_v46 }
  0x65   : > { %516 = vadd.xlane.f32.xlu1 %v515_v55  ;;  %548 = vadd.xlane.f32.xlu0 %v547_v56  ;;  %v703_v55 = vld [vmem:[#allocation2 + $0x71] sm:$0xf]  ;;  %v637_v56 = vsel %vm244_vm4, %v627_v49, 0.0 }
  0x66   : > { %v712_v59 = vmul.f32 %v1793_v14, %v703_v55  ;;  %v791_v55 = vld [vmem:[#allocation2 + $0x21] sm:$0xf] }
  0x68   : > { %v720_v63 = vsel %vm244_vm4, %v712_v59, 0.0  ;;  %v800_v59 = vmul.f32 %v1885_v25, %v791_v55 }
  0x69   : > { %522 = vadd.xlane.f32.xlu1 %v521_v61  ;;  %571 = vadd.xlane.f32.xlu0 %v570_v62  ;;  %v730_v61 = vld [vmem:[#allocation2 + $0x91] sm:$0xf]  ;;  %v660_v62 = vsel %vm244_vm4, %v654_v58, 0.0 }
  0x6a   : > { %v739_v1 = vmul.f32 %v1798_v15, %v730_v61  ;;  %v818_v61 = vld [vmem:[#allocation2 + $0x41] sm:$0xf] }
  0x6c   : > { %v743_v6 = vsel %vm244_vm4, %v739_v1, 0.0  ;;  %v827_v1 = vmul.f32 %v1898_v39, %v818_v61 }
  0x6d   : > { %545 = vadd.xlane.f32.xlu1 %v544_v4  ;;  %577 = vadd.xlane.f32.xlu0 %v576_v5  ;;  %v732_v4 = vld [vmem:[#allocation2 + $0xa1] sm:$0xf]  ;;  %v666_v5 = vsel %vm244_vm4, %v656_v0, 0.0 }
  0x6e   : > { %v741_v8 = vmul.f32 %v1798_v15, %v732_v4  ;;  %v820_v4 = vld [vmem:[#allocation2 + $0x51] sm:$0xf] }
  0x70   : > { %v749_v12 = vsel %vm244_vm4, %v741_v8, 0.0  ;;  %v829_v8 = vmul.f32 %v1898_v39, %v820_v4 }
  0x71   : > { %551 = vadd.xlane.f32.xlu1 %v550_v10  ;;  %600 = vadd.xlane.f32.xlu0 %v599_v11  ;;  %v759_v10 = vld [vmem:[#allocation2 + $0x62] sm:$0xf]  ;;  %v717_v11 = vsel %vm244_vm4, %v711_v7, 0.0 }
  0x72   : > { %v768_v16 = vmul.f32 %v1810_v28, %v759_v10  ;;  %v847_v10 = vld [vmem:[#allocation2 + $0x12] sm:$0xf] }
  0x74   : > { %v772_v21 = vsel %vm244_vm4, %v768_v16, 0.0  ;;  %v856_v16 = vmul.f32 %v1911_v52, %v847_v10 }
  0x75   : > { %574 = vadd.xlane.f32.xlu1 %v573_v19  ;;  %606 = vadd.xlane.f32.xlu0 %v605_v20  ;;  %v761_v19 = vld [vmem:[#allocation2 + $0x72] sm:$0xf]  ;;  %v723_v20 = vsel %vm244_vm4, %v713_v13, 0.0 }
  0x76   : > { %v770_v23 = vmul.f32 %v1810_v28, %v761_v19  ;;  %v849_v19 = vld [vmem:[#allocation2 + $0x22] sm:$0xf] }
  0x78   : > { %v778_v29 = vsel %vm244_vm4, %v770_v23, 0.0  ;;  %v858_v23 = vmul.f32 %v1911_v52, %v849_v19 }
  0x79   : > { %580 = vadd.xlane.f32.xlu1 %v579_v26  ;;  %629 = vadd.xlane.f32.xlu0 %v628_v27  ;;  %v788_v26 = vld [vmem:[#allocation2 + $0x9] sm:$0xf]  ;;  %v746_v27 = vsel %vm244_vm4, %v740_v22, 0.0 }
  0x7a   : > { %v797_v31 = vmul.f32 %v1885_v25, %v788_v26  ;;  %v876_v26 = vld [vmem:[#allocation2 + $0x71] sm:$0xf] }
  0x7c   : > { %v801_v36 = vsel %vm244_vm4, %v797_v31, 0.0  ;;  %v885_v31 = vmul.f32 %v1924_v2, %v876_v26 }
  0x7d   : > { %603 = vadd.xlane.f32.xlu1 %v602_v34  ;;  %635 = vadd.xlane.f32.xlu0 %v634_v35  ;;  %v790_v34 = vld [vmem:[#allocation2 + $0x19] sm:$0xf]  ;;  %v752_v35 = vsel %vm244_vm4, %v742_v30, 0.0 }
  0x7e   : > { %v799_v38 = vmul.f32 %v1885_v25, %v790_v34  ;;  %v878_v34 = vld [vmem:[#allocation2 + $0x81] sm:$0xf] }
  0x80   : > { %v807_v43 = vsel %vm244_vm4, %v799_v38, 0.0  ;;  %v887_v38 = vmul.f32 %v1924_v2, %v878_v34  ;;  %v1020_v34 = vld [vmem:[#allocation2 + $0x21] sm:$0xf] }
  0x81   : > { %609 = vadd.xlane.f32.xlu1 %v608_v41  ;;  %658 = vadd.xlane.f32.xlu0 %v657_v42  ;;  %v817_v41 = vld [vmem:[#allocation2 + $0x39] sm:$0xf]  ;;  %v775_v42 = vsel %vm244_vm4, %v769_v37, 0.0 }
  0x82   : > { %v826_v45 = vmul.f32 %v1898_v39, %v817_v41  ;;  %v905_v41 = vld [vmem:[#allocation2 + $0xa1] sm:$0xf] }
  0x84   : > { %v830_v49 = vsel %vm244_vm4, %v826_v45, 0.0  ;;  %v914_v45 = vmul.f32 %v1937_v18, %v905_v41 }
  0x85   : > { %632 = vadd.xlane.f32.xlu1 %v631_v47  ;;  %664 = vadd.xlane.f32.xlu0 %v663_v48  ;;  %v819_v47 = vld [vmem:[#allocation2 + $0x49] sm:$0xf]  ;;  %v781_v48 = vsel %vm244_vm4, %v771_v44, 0.0 }
  0x86   : > { %v828_v51 = vmul.f32 %v1898_v39, %v819_v47  ;;  %v907_v47 = vld [vmem:[#allocation2 + $0xb1] sm:$0xf] }
  0x87   : > { %v916_v55 = vmul.f32 %v1937_v18, %v907_v47 }
  0x88   : > { %v836_v58 = vsel %vm244_vm4, %v828_v51, 0.0 }
  0x89   : > { %638 = vadd.xlane.f32.xlu1 %v637_v56  ;;  %715 = vadd.xlane.f32.xlu0 %v714_v57  ;;  %v846_v56 = vld [vmem:[#allocation2 + $0xa] sm:$0xf]  ;;  %v804_v57 = vsel %vm244_vm4, %v798_v50, 0.0  ;;  %v920_v50 = vsel %vm244_vm4, %v914_v45, 0.0 }
  0x8a   : > { %v855_v60 = vmul.f32 %v1911_v52, %v846_v56 }
  0x8c   : > { %v859_v0 = vsel %vm244_vm4, %v855_v60, 0.0 }
  0x8d   : > { %661 = vadd.xlane.f32.xlu1 %v660_v62  ;;  %721 = vadd.xlane.f32.xlu0 %v720_v63  ;;  %v848_v62 = vld [vmem:[#allocation2 + $0x1a] sm:$0xf]  ;;  %v810_v63 = vsel %vm244_vm4, %v800_v59, 0.0  ;;  %v926_v59 = vsel %vm244_vm4, %v916_v55, 0.0 }
  0x8e   : > { %v857_v3 = vmul.f32 %v1911_v52, %v848_v62 }
  0x90   : > { %v865_v7 = vsel %vm244_vm4, %v857_v3, 0.0 }
  0x91   : > { %667 = vadd.xlane.f32.xlu1 %v666_v5  ;;  %744 = vadd.xlane.f32.xlu0 %v743_v6  ;;  %v875_v5 = vld [vmem:[#allocation2 + $0x69] sm:$0xf]  ;;  %v833_v6 = vsel %vm244_vm4, %v827_v1, 0.0 }
  0x92   : > { %v884_v9 = vmul.f32 %v1924_v2, %v875_v5  ;;  %v1017_v1 = vld [vmem:[#allocation2 + $0x9] sm:$0xf] }
  0x93   : > { %v1026_v5 = vmul.f32 %v1798_v15, %v1017_v1 }
  0x94   : > { %v888_v13 = vsel %vm244_vm4, %v884_v9, 0.0 }
  0x95   : > { %718 = vadd.xlane.f32.xlu1 %v717_v11  ;;  %750 = vadd.xlane.f32.xlu0 %v749_v12  ;;  %v877_v11 = vld [vmem:[#allocation2 + $0x79] sm:$0xf]  ;;  %v839_v12 = vsel %vm244_vm4, %v829_v8, 0.0  ;;  %v1030_v10 = vsel %vm244_vm4, %v1026_v5, 0.0 }
  0x96   : > { %v886_v17 = vmul.f32 %v1924_v2, %v877_v11 }
  0x98   : > { %v894_v22 = vsel %vm244_vm4, %v886_v17, 0.0 }
  0x99   : > { %724 = vadd.xlane.f32.xlu1 %v723_v20  ;;  %773 = vadd.xlane.f32.xlu0 %v772_v21  ;;  %v904_v20 = vld [vmem:[#allocation2 + $0x99] sm:$0xf]  ;;  %v862_v21 = vsel %vm244_vm4, %v856_v16, 0.0 }
  0x9a   : > { %v913_v24 = vmul.f32 %v1937_v18, %v904_v20  ;;  %v1046_v16 = vld [vmem:[#allocation2 + $0x39] sm:$0xf] }
  0x9c   : > { %v917_v30 = vsel %vm244_vm4, %v913_v24, 0.0  ;;  %v1048_v24 = vld [vmem:[#allocation2 + $0x49] sm:$0xf] }
  0x9d   : > { %747 = vadd.xlane.f32.xlu1 %v746_v27  ;;  %779 = vadd.xlane.f32.xlu0 %v778_v29  ;;  %v906_v27 = vld [vmem:[#allocation2 + $0xa9] sm:$0xf]  ;;  %v868_v29 = vsel %vm244_vm4, %v858_v23, 0.0  ;;  %v1018_v23 = vld [vmem:[#allocation2 + $0x11] sm:$0xf] }
  0x9e   : > { %v915_v32 = vmul.f32 %v1937_v18, %v906_v27 }
  0xa0   : > { %v923_v37 = vsel %vm244_vm4, %v915_v32, 0.0  ;;  %v1057_v32 = vmul.f32 %v1810_v28, %v1048_v24 }
  0xa1   : > { %753 = vadd.xlane.f32.xlu1 %v752_v35  ;;  %802 = vadd.xlane.f32.xlu0 %v801_v36  ;;  %v933_v35 = vld [vmem:[#allocation2 + $0x6a] sm:$0xf]  ;;  %v891_v36 = vsel %vm244_vm4, %v885_v31, 0.0  ;;  %v1027_v31 = vmul.f32 %v1798_v15, %v1018_v23 }
  0xa2   : > { %v942_v40 = vmul.f32 %v1950_v33, %v933_v35 }
  0xa4   : > { %v946_v44 = vsel %vm244_vm4, %v942_v40, 0.0  ;;  %v1029_v40 = vmul.f32 %v1798_v15, %v1020_v34 }
  0xa5   : > { %776 = vadd.xlane.f32.xlu1 %v775_v42  ;;  %808 = vadd.xlane.f32.xlu0 %v807_v43  ;;  %v935_v42 = vld [vmem:[#allocation2 + $0x7a] sm:$0xf]  ;;  %v897_v43 = vsel %vm244_vm4, %v887_v38, 0.0  ;;  %v1065_v38 = vsel %vm244_vm4, %v1057_v32, 0.0 }
  0xa6   : > { %v944_v46 = vmul.f32 %v1950_v33, %v935_v42  ;;  %v1047_v42 = vld [vmem:[#allocation2 + $0x41] sm:$0xf] }
  0xa8   : > { %v952_v51 = vsel %vm244_vm4, %v944_v46, 0.0  ;;  %v1039_v46 = vsel %vm244_vm4, %v1029_v40, 0.0  ;;  %v1134_v40 = vld [vmem:[#allocation2 + $0xa1] sm:$0xf] }
  0xa9   : > { %782 = vadd.xlane.f32.xlu1 %v781_v48  ;;  %831 = vadd.xlane.f32.xlu0 %v830_v49  ;;  %v988_v48 = vld [vmem:[#allocation2 + $0x38] sm:$0xf]  ;;  %v2032_v49 = vpop.xlane.xlu0 %425 }
  0xaa   : > { %v997_v56 = vmul.f32 %v1793_v14, %v988_v48  ;;  %v1056_v48 = vmul.f32 %v1810_v28, %v1047_v42  ;;  %v1669_v42 = vld [vmem:[%s2456_s3] ss:$0 sm:$0xff] }
  0xac   : > { %v1001_v60 = vsel %vm244_vm4, %v997_v56, 0.0 }
  0xad   : > { %805 = vadd.xlane.f32.xlu1 %v804_v57  ;;  %837 = vadd.xlane.f32.xlu0 %v836_v58  ;;  %v934_v57 = vld [vmem:[#allocation2 + $0x72] sm:$0xf]  ;;  %v990_v58 = vld [vmem:[#allocation2 + $0x48] sm:$0xf]  ;;  %v2040_v61 = vpop.xlane.xlu0 %455 }
  0xae   : > { %v943_v62 = vmul.f32 %v1950_v33, %v934_v57  ;;  %v1062_v57 = vsel %vm244_vm4, %v1056_v48, 0.0 }
  0xb0   : > { %v949_v18 = vsel %vm244_vm4, %v943_v62, 0.0  ;;  %v1076_v62 = vld [vmem:[#allocation2 + $0xa0] sm:$0xf] }
  0xb1   : > { %811 = vadd.xlane.f32.xlu1 %v810_v63  ;;  %860 = vadd.xlane.f32.xlu0 %v859_v0  ;;  %v999_v63 = vmul.f32 %v1793_v14, %v990_v58  ;;  %v936_v0 = vld [vmem:[#allocation2 + $0x82] sm:$0xf]  ;;  %v2048_v8 = vpop.xlane.xlu0 %484 }
  0xb2   : > { %v945_v4 = vmul.f32 %v1950_v33, %v936_v0 }
  0xb3   : > { %v1007_v3 = vsel %vm244_vm4, %v999_v63, 0.0  ;;  %v1106_v63 = vld [vmem:[#allocation2 + $0x79] sm:$0xf] }
  0xb4   : > { %v955_v9 = vsel %vm244_vm4, %v945_v4, 0.0  ;;  %v1085_v4 = vmul.f32 %v1885_v25, %v1076_v62  ;;  %v1115_v5 = vmul.f32 %v1898_v39, %v1106_v63 }
  0xb5   : > { %834 = vadd.xlane.f32.xlu1 %v833_v6  ;;  %866 = vadd.xlane.f32.xlu0 %v865_v7  ;;  %v989_v6 = vld [vmem:[#allocation2 + $0x40] sm:$0xf]  ;;  %v1019_v7 = vld [vmem:[#allocation2 + $0x19] sm:$0xf] }
  0xb6   : > { %v998_v11 = vmul.f32 %v1793_v14, %v989_v6  ;;  %v1078_v6 = vld [vmem:[#allocation2 + $0xb0] sm:$0xf] }
  0xb8   : > { %v1004_v19 = vsel %vm244_vm4, %v998_v11, 0.0  ;;  %v1123_v11 = vsel %vm244_vm4, %v1115_v5, 0.0  ;;  %v1670_v5 = vld [vmem:[%s2456_s3 + $0x1] ss:$0 sm:$0xff] }
  0xb9   : > { %840 = vadd.xlane.f32.xlu1 %v839_v12  ;;  %889 = vadd.xlane.f32.xlu0 %v888_v13  ;;  %v1028_v12 = vmul.f32 %v1798_v15, %v1019_v7  ;;  %v991_v13 = vld [vmem:[#allocation2 + $0x50] sm:$0xf]  ;;  %v1104_v15 = vld [vmem:[#allocation2 + $0x69] sm:$0xf] }
  0xbb   : > { %v1036_v20 = vsel %vm244_vm4, %v1028_v12, 0.0  ;;  %v1087_v12 = vmul.f32 %v1885_v25, %v1078_v6 }
  0xbd   : > { %863 = vadd.xlane.f32.xlu1 %v862_v21  ;;  %895 = vadd.xlane.f32.xlu0 %v894_v22  ;;  %v1000_v21 = vmul.f32 %v1793_v14, %v991_v13  ;;  %v1055_v22 = vmul.f32 %v1810_v28, %v1046_v16  ;;  %v1075_v14 = vld [vmem:[#allocation2 + $0x98] sm:$0xf]  ;;  %v1105_v16 = vld [vmem:[#allocation2 + $0x71] sm:$0xf] }
  0xbe   : > { %v1084_v41 = vmul.f32 %v1885_v25, %v1075_v14  ;;  %v1114_v24 = vmul.f32 %v1898_v39, %v1105_v16  ;;  %v1279_v16 = vld [vmem:[#allocation2 + $0x19] sm:$0xf] }
  0xc0   : > { %v1088_v47 = vsel %vm244_vm4, %v1084_v41, 0.0  ;;  %v1120_v34 = vsel %vm244_vm4, %v1114_v24, 0.0  ;;  %v1278_v41 = vld [vmem:[#allocation2 + $0x11] sm:$0xf] }
  0xc1   : > { %869 = vadd.xlane.f32.xlu1 %v868_v29  ;;  %918 = vadd.xlane.f32.xlu0 %v917_v30  ;;  %v1010_v29 = vsel %vm244_vm4, %v1000_v21, 0.0  ;;  %v1059_v30 = vsel %vm244_vm4, %v1055_v22, 0.0  ;;  %v1097_v22 = vsel %vm244_vm4, %v1087_v12, 0.0 }
  0xc5   : > { %892 = vadd.xlane.f32.xlu1 %v891_v36  ;;  %924 = vadd.xlane.f32.xlu0 %v923_v37  ;;  %v1033_v37 = vsel %vm244_vm4, %v1027_v31, 0.0 }
  0xc9   : > { %898 = vadd.xlane.f32.xlu1 %v897_v43  ;;  %947 = vadd.xlane.f32.xlu0 %v946_v44  ;;  %v1077_v43 = vld [vmem:[#allocation2 + $0xa8] sm:$0xf] }
  0xcd   : > { %921 = vadd.xlane.f32.xlu1 %v920_v50  ;;  %953 = vadd.xlane.f32.xlu0 %v952_v51  ;;  %v1086_v50 = vmul.f32 %v1885_v25, %v1077_v43  ;;  %v1049_v51 = vld [vmem:[#allocation2 + $0x51] sm:$0xf]  ;;  %v1163_v25 = vld [vmem:[#allocation2 + $0x40] sm:$0xf] }
  0xcf   : > { %v1094_v58 = vsel %vm244_vm4, %v1086_v50, 0.0  ;;  %v1287_v50 = vmul.f32 %v1669_v42, %v1278_v41 }
  0xd1   : > { %927 = vadd.xlane.f32.xlu1 %v926_v59  ;;  %1002 = vadd.xlane.f32.xlu0 %v1001_v60  ;;  %v1058_v59 = vmul.f32 %v1810_v28, %v1049_v51  ;;  %v1113_v60 = vmul.f32 %v1898_v39, %v1104_v15  ;;  %v1133_v28 = vld [vmem:[#allocation2 + $0x99] sm:$0xf]  ;;  %v1136_v51 = vld [vmem:[#allocation2 + $0xb1] sm:$0xf]  ;;  %v1280_v15 = vld [vmem:[#allocation2 + $0x21] sm:$0xf] }
  0xd2   : > { %v1142_v13 = vmul.f32 %v1911_v52, %v1133_v28  ;;  %v1293_v62 = vsel %vm244_vm4, %v1287_v50, 0.0  ;;  %v1145_v63 = vmul.f32 %v1911_v52, %v1136_v51 }
  0xd4   : > { %v1146_v23 = vsel %vm244_vm4, %v1142_v13, 0.0 }
  0xd5   : > { %950 = vadd.xlane.f32.xlu1 %v949_v18  ;;  %1008 = vadd.xlane.f32.xlu0 %v1007_v3  ;;  %v1068_v18 = vsel %vm244_vm4, %v1058_v59, 0.0  ;;  %v1117_v3 = vsel %vm244_vm4, %v1113_v60, 0.0 }
  0xd9   : > { %956 = vadd.xlane.f32.xlu1 %v955_v9  ;;  %1031 = vadd.xlane.f32.xlu0 %v1030_v10  ;;  %v1091_v10 = vsel %vm244_vm4, %v1085_v4, 0.0  ;;  %v1307_v4 = vld [vmem:[#allocation2 + $0x41] sm:$0xf] }
  0xda   : > { %v2054_v33 = vpop.xlane.xlu1 %431  ;;  %v2056_v17 = vpop.xlane.xlu0 %428  ;;  %v1316_v13 = vmul.f32 %v1670_v5, %v1307_v4  ;;  %v1335_v4 = vld [vmem:[#allocation2 + $0xa] sm:$0xf] }
  0xdd   : > { %1005 = vadd.xlane.f32.xlu1 %v1004_v19  ;;  %1037 = vadd.xlane.f32.xlu0 %v1036_v20  ;;  %v1135_v19 = vld [vmem:[#allocation2 + $0xa9] sm:$0xf] }
  0xde   : > { %v2062_v26 = vpop.xlane.xlu1 %434  ;;  %v2064_v27 = vpop.xlane.xlu0 %461 }
  0xe1   : > { %1011 = vadd.xlane.f32.xlu1 %v1010_v29  ;;  %1060 = vadd.xlane.f32.xlu0 %v1059_v30  ;;  %v1144_v29 = vmul.f32 %v1911_v52, %v1135_v19  ;;  %v1107_v30 = vld [vmem:[#allocation2 + $0x81] sm:$0xf]  ;;  %v1309_v19 = vld [vmem:[#allocation2 + $0x51] sm:$0xf] }
  0xe2   : > { %v2070_v35 = vpop.xlane.xlu0 %490  ;;  %v2072_v36 = vpop.xlane.xlu1 %458 }
  0xe3   : > { %v1152_v14 = vsel %vm244_vm4, %v1144_v29, 0.0 }
  0xe5   : > { %1034 = vadd.xlane.f32.xlu1 %v1033_v37  ;;  %1066 = vadd.xlane.f32.xlu0 %v1065_v38  ;;  %v1116_v37 = vmul.f32 %v1898_v39, %v1107_v30  ;;  %v1172_v38 = vmul.f32 %v1924_v2, %v1163_v25  ;;  %v1143_v39 = vmul.f32 %v1911_v52, %v1134_v40  ;;  %v1322_v30 = vsel %vm244_vm4, %v1316_v13, 0.0 }
  0xe6   : > { %v2078_v44 = vpop.xlane.xlu1 %464  ;;  %v2080_v45 = vpop.xlane.xlu0 %513  ;;  %v1288_v25 = vmul.f32 %v1669_v42, %v1279_v16  ;;  %v678_v13 = vand.u32 127, %v316_v53 }
  0xe7   : > { %v1176_v48 = vsel %vm244_vm4, %v1172_v38, 0.0  ;;  %v1149_v60 = vsel %vm244_vm4, %v1143_v39, 0.0 }
  0xe8   : > { %v1296_v39 = vsel %vm244_vm4, %v1288_v25, 0.0 }
  0xe9   : > { %1040 = vadd.xlane.f32.xlu1 %v1039_v46  ;;  %1089 = vadd.xlane.f32.xlu0 %v1088_v47  ;;  %v1126_v47 = vsel %vm244_vm4, %v1116_v37, 0.0  ;;  %v1336_v37 = vld [vmem:[#allocation2 + $0x12] sm:$0xf] }
  0xea   : > { %v2086_v55 = vpop.xlane.xlu1 %487  ;;  %v2088_v56 = vpop.xlane.xlu0 %519 }
  0xed   : > { %1063 = vadd.xlane.f32.xlu1 %v1062_v57  ;;  %1095 = vadd.xlane.f32.xlu0 %v1094_v58  ;;  %v2136_v57 = vstv %s407_s14 }
  0xee   : > { %v2094_v0 = vpop.xlane.xlu1 %493  ;;  %v2096_v1 = vpop.xlane.xlu0 %542  ;;  %v436_v6 = vadd.f32 %v2032_v49, %v2136_v57 }
  0xf1   : > { %1069 = vadd.xlane.f32.xlu1 %v1068_v18  ;;  %1118 = vadd.xlane.f32.xlu0 %v1117_v3  ;;  %v1289_v18 = vmul.f32 %v1669_v42, %v1280_v15  ;;  %v1277_v3 = vld [vmem:[#allocation2 + $0x9] sm:$0xf] }
  0xf2   : > { %v2102_v7 = vpop.xlane.xlu1 %516  ;;  %v2104_v9 = vpop.xlane.xlu0 %548  ;;  %v1286_v12 = vmul.f32 %v1669_v42, %v1277_v3  ;;  %v1308_v15 = vld [vmem:[#allocation2 + $0x49] sm:$0xf] }
  0xf3   : > { %v1299_v52 = vsel %vm244_vm4, %v1289_v18, 0.0 }
  0xf4   : > { %v1290_v29 = vsel %vm244_vm4, %v1286_v12, 0.0  ;;  %v2196_v12 = vld [vmem:[%s2456_s3 + $0x3] ss:$0 sm:$0xff] }
  0xf5   : > { %1092 = vadd.xlane.f32.xlu1 %v1091_v10  ;;  %1124 = vadd.xlane.f32.xlu0 %v1123_v11  ;;  %v1155_v11 = vsel %vm244_vm4, %v1145_v63, 0.0 }
  0xf6   : > { %v2110_v20 = vpop.xlane.xlu1 %522  ;;  %v2112_v21 = vpop.xlane.xlu0 %571 }
  0xf9   : > { %1098 = vadd.xlane.f32.xlu1 %v1097_v22  ;;  %1147 = vadd.xlane.f32.xlu0 %v1146_v23  ;;  %v466_v22 = vadd.f32 %v2040_v61, %v436_v6  ;;  %v437_v23 = vadd.f32 %v2056_v17, %v2136_v57  ;;  %v2166_v61 = vld [vmem:[%s2456_s3 + $0x2] ss:$0 sm:$0xff]  ;;  %v438_v17 = vadd.f32 %v2054_v33, %v2136_v57 }
  0xfa   : > { %v2118_v31 = vpop.xlane.xlu1 %545  ;;  %v2120_v32 = vpop.xlane.xlu0 %577  ;;  %v1345_v51 = vmul.f32 %v2166_v61, %v1336_v37  ;;  %v439_v33 = vadd.f32 %v2062_v26, %v2136_v57 }
  0xfb   : > { %v495_v38 = vadd.f32 %v2048_v8, %v466_v22  ;;  %v467_v40 = vadd.f32 %v2072_v36, %v437_v23  ;;  %v468_v42 = vadd.f32 %v2064_v27, %v438_v17 }
  0xfd   : > { %1121 = vadd.xlane.f32.xlu1 %v1120_v34  ;;  %1153 = vadd.xlane.f32.xlu0 %v1152_v14  ;;  %v1318_v34 = vmul.f32 %v1670_v5, %v1309_v19  ;;  %v1306_v14 = vld [vmem:[#allocation2 + $0x39] sm:$0xf]  ;;  %v524_v8 = vadd.f32 %v2080_v45, %v495_v38  ;;  %v496_v36 = vadd.f32 %v2086_v55, %v467_v40  ;;  %v1351_v55 = vsel %vm244_vm4, %v1345_v51, 0.0  ;;  %v1364_v38 = vld [vmem:[#allocation2 + $0x69] sm:$0xf] }
  0xfe   : > { %v2129_v43 = vpop.xlane.xlu1 %551  ;;  %v2131_v46 = vpop.xlane.xlu0 %600  ;;  %v1315_v41 = vmul.f32 %v1670_v5, %v1306_v14  ;;  %v497_v27 = vadd.f32 %v2070_v35, %v468_v42  ;;  %v1394_v42 = vld [vmem:[#allocation2 + $0xa1] sm:$0xf] }
  0xff   : > { %v1328_v50 = vsel %vm244_vm4, %v1318_v34, 0.0  ;;  %v553_v63 = vadd.f32 %v2096_v1, %v524_v8  ;;  %v525_v18 = vadd.f32 %v2102_v7, %v496_v36 }
 0x100   : > { %v1319_v3 = vsel %vm244_vm4, %v1315_v41, 0.0  ;;  %v526_v26 = vadd.f32 %v2088_v56, %v497_v27 }
 0x101   : > { %1127 = vadd.xlane.f32.xlu1 %v1126_v47  ;;  %1177 = vadd.xlane.f32.xlu0 %v1176_v48  ;;  %v582_v1 = vadd.f32 %v2112_v21, %v553_v63  ;;  %v554_v7 = vadd.f32 %v2118_v31, %v525_v18  ;;  %v1396_v63 = vld [vmem:[#allocation2 + $0xb1] sm:$0xf] }
 0x102   : > { %v2138_v58 = vpop.xlane.xlu1 %574  ;;  %v2140_v59 = vpop.xlane.xlu0 %606  ;;  %v555_v56 = vadd.f32 %v2104_v9, %v526_v26 }
 0x103   : > { %v583_v21 = vadd.f32 %v2138_v58, %v554_v7  ;;  %v1367_v58 = vld [vmem:[#allocation2 + $0x81] sm:$0xf]  ;;  %v1423_v7 = vld [vmem:[#allocation2 + $0x72] sm:$0xf] }
 0x104   : > { %v584_v31 = vadd.f32 %v2120_v32, %v555_v56  ;;  %v2214_v32 = vsub.s32 %v678_v13, %v1826_v54  ;;  %v1376_v40 = vmul.f32 %v2196_v12, %v1367_v58  ;;  %v2274_v58 = vld [vmem:[%s2456_s3 + $0x6] ss:$0 sm:$0xff] }
 0x105   : > { %1150 = vadd.xlane.f32.xlu1 %v1149_v60  ;;  %1294 = vadd.xlane.f32.xlu0 %v1293_v62  ;;  %v1338_v60 = vld [vmem:[#allocation2 + $0x22] sm:$0xf]  ;;  %v469_v62 = vadd.f32 %v2078_v44, %v439_v33 }
 0x106   : > { %v2150_v28 = vpop.xlane.xlu1 %580  ;;  %v2152_v10 = vpop.xlane.xlu0 %629  ;;  %v1347_v35 = vmul.f32 %v2166_v61, %v1338_v60  ;;  %v613_v25 = vadd.f32 %v2140_v59, %v584_v31  ;;  %v1386_v36 = vsel %vm244_vm4, %v1376_v40, 0.0  ;;  %v1164_v31 = vld [vmem:[#allocation2 + $0x48] sm:$0xf] }
 0x107   : > { %v498_v44 = vadd.f32 %v2094_v0, %v469_v62  ;;  %v611_v0 = vadd.f32 %v2131_v46, %v582_v1  ;;  %v1366_v62 = vld [vmem:[#allocation2 + $0x79] sm:$0xf] }
 0x108   : > { %v1357_v9 = vsel %vm244_vm4, %v1347_v35, 0.0  ;;  %v1393_v1 = vld [vmem:[#allocation2 + $0x99] sm:$0xf] }
 0x109   : > { %1156 = vadd.xlane.f32.xlu1 %v1155_v11  ;;  %1300 = vadd.xlane.f32.xlu0 %v1299_v52  ;;  %v1317_v11 = vmul.f32 %v1670_v5, %v1308_v15  ;;  %v1365_v52 = vld [vmem:[#allocation2 + $0x71] sm:$0xf]  ;;  %v1344_v5 = vmul.f32 %v2166_v61, %v1335_v4  ;;  %v527_v16 = vadd.f32 %v2110_v20, %v498_v44 }
 0x10a   : > { %v604_v49 = vpop.xlane.xlu1 %603  ;;  %v2159_v24 = vpop.xlane.xlu0 %635  ;;  %v1374_v53 = vmul.f32 %v2196_v12, %v1365_v52  ;;  %v640_v20 = vadd.f32 %v2152_v10, %v611_v0  ;;  %v1674_v52 = vld [vmem:[%s2456_s3 + $0x5] ss:$0 sm:$0xff] }
 0x10b   : > { %v1325_v23 = vsel %vm244_vm4, %v1317_v11, 0.0  ;;  %v612_v46 = vadd.f32 %v604_v49, %v583_v21  ;;  %v1348_v17 = vsel %vm244_vm4, %v1344_v5, 0.0  ;;  %v1375_v11 = vmul.f32 %v2196_v12, %v1366_v62  ;;  %v1395_v21 = vld [vmem:[#allocation2 + $0xa9] sm:$0xf] }
 0x10c   : > { %v1380_v59 = vsel %vm244_vm4, %v1374_v53, 0.0  ;;  %v1432_v0 = vmul.f32 %v1674_v52, %v1423_v7 }
 0x10d   : > { %1291 = vadd.xlane.f32.xlu1 %v1290_v29  ;;  %1323 = vadd.xlane.f32.xlu0 %v1322_v30  ;;  %v556_v29 = vadd.f32 %v2129_v43, %v527_v16  ;;  %v1337_v30 = vld [vmem:[#allocation2 + $0x1a] sm:$0xf]  ;;  %v642_v43 = vadd.f32 %v2159_v24, %v613_v25  ;;  %v1373_v24 = vmul.f32 %v2196_v12, %v1364_v38  ;;  %v1383_v5 = vsel %vm244_vm4, %v1375_v11, 0.0 }
 0x10e   : > { %v2173_v47 = vpop.xlane.xlu1 %609  ;;  %v659_v48 = vpop.xlane.xlu0 %658  ;;  %v1346_v54 = vmul.f32 %v2166_v61, %v1337_v30  ;;  %v1438_v53 = vsel %vm244_vm4, %v1432_v0, 0.0  ;;  %v1451_v30 = vld [vmem:[#allocation2 + $0x11] sm:$0xf]  ;;  %v1424_v38 = vld [vmem:[#allocation2 + $0x7a] sm:$0xf] }
 0x10f   : > { %v585_v34 = vadd.f32 %v2150_v28, %v556_v29  ;;  %v669_v14 = vadd.f32 %v659_v48, %v640_v20  ;;  %v1673_v48 = vld [vmem:[%s2456_s3 + $0x4] ss:$0 sm:$0xff]  ;;  %v1377_v4 = vsel %vm244_vm4, %v1373_v24, 0.0  ;;  %v1173_v20 = vmul.f32 %v1924_v2, %v1164_v31 }
 0x110   : > { %v1403_v15 = vmul.f32 %v1673_v48, %v1394_v42  ;;  %v1405_v35 = vmul.f32 %v1673_v48, %v1396_v63  ;;  %v1402_v16 = vmul.f32 %v1673_v48, %v1393_v1  ;;  %v1404_v29 = vmul.f32 %v1673_v48, %v1395_v21  ;;  %v1425_v48 = vld [vmem:[#allocation2 + $0x82] sm:$0xf] }
 0x111   : > { %1297 = vadd.xlane.f32.xlu1 %v1296_v39  ;;  %1329 = vadd.xlane.f32.xlu0 %v1328_v50  ;;  %v614_v28 = vadd.f32 %v2173_v47, %v585_v34  ;;  %v682_v50 = vrot.slane %v669_v14, %v2214_v32  ;;  %v1354_v47 = vsel %vm244_vm4, %v1346_v54, 0.0  ;;  %v1460_v2 = vmul.f32 %v2274_v58, %v1451_v30 }
 0x112   : > { %v633_v45 = vpop.xlane.xlu1 %632  ;;  %v665_v6 = vpop.xlane.xlu0 %664  ;;  %v1415_v12 = vsel %vm244_vm4, %v1405_v35, 0.0  ;;  %v1412_v14 = vsel %vm244_vm4, %v1404_v29, 0.0  ;;  %v1454_v29 = vld [vmem:[#allocation2 + $0x29] sm:$0xf] }
 0x113   : > { %v641_v37 = vadd.f32 %v633_v45, %v612_v46  ;;  %v671_v39 = vadd.f32 %v665_v6, %v642_v43  ;;  %v1422_v46 = vld [vmem:[#allocation2 + $0x6a] sm:$0xf]  ;;  %v1165_v43 = vld [vmem:[#allocation2 + $0x50] sm:$0xf]  ;;  %v1464_v40 = vsel %vm244_vm4, %v1460_v2, 0.0 }
 0x115   : > { %1320 = vadd.xlane.f32.xlu1 %v1319_v3  ;;  %1352 = vadd.xlane.f32.xlu0 %v1351_v55  ;;  %v690_v18 = vrot.slane %v671_v39, %v2214_v32  ;;  %v1409_v55 = vsel %vm244_vm4, %v1403_v15, 0.0  ;;  %v1166_v39 = vld [vmem:[#allocation2 + $0x58] sm:$0xf] }
 0x116   : > { %v639_v19 = vpop.xlane.xlu1 %638  ;;  %v2205_v22 = vpop.xlane.xlu0 %715  ;;  %v1194_v15 = vld [vmem:[#allocation2 + $0x19] sm:$0xf] }
 0x117   : > { %v643_v51 = vadd.f32 %v639_v19, %v614_v28  ;;  %v1433_v28 = vmul.f32 %v1674_v52, %v1424_v38  ;;  %v1481_v38 = vld [vmem:[#allocation2 + $0x49] sm:$0xf] }
 0x119   : > { %1326 = vadd.xlane.f32.xlu1 %v1325_v23  ;;  %1358 = vadd.xlane.f32.xlu0 %v1357_v9  ;;  %v1406_v9 = vsel %vm244_vm4, %v1402_v16, 0.0 }
 0x11a   : > { %v662_v10 = vpop.xlane.xlu1 %661  ;;  %v2219_v49 = vpop.xlane.xlu0 %721 }
 0x11b   : > { %v670_v41 = vadd.f32 %v662_v10, %v641_v37  ;;  %v1179_v37 = vsel %vm244_vm4, %v1173_v20, 0.0  ;;  %v1196_v20 = vld [vmem:[#allocation2 + $0x29] sm:$0xf] }
 0x11d   : > { %v686_v33 = vrot.slane %v670_v41, %v2214_v32  ;;  %1349 = vadd.xlane.f32.xlu1 %v1348_v17  ;;  %1381 = vadd.xlane.f32.xlu0 %v1380_v59  ;;  %v1431_v17 = vmul.f32 %v1674_v52, %v1422_v46  ;;  %v1694_v41 = vld [vmem:[%s2456_s3 + $0x6] ss:$0 sm:$0xff] }
 0x11e   : > { %v668_v61 = vpop.xlane.xlu1 %667  ;;  %v2232_v8 = vpop.xlane.xlu0 %744  ;;  %v1174_v42 = vmul.f32 %v1694_v41, %v1165_v43  ;;  %v1223_v43 = vld [vmem:[#allocation2 + $0x49] sm:$0xf] }
 0x11f   : > { %v695_v60 = vsel %vm235_vm1, %v686_v33, %v682_v50  ;;  %v672_v27 = vadd.f32 %v668_v61, %v643_v51  ;;  %v1435_v54 = vsel %vm244_vm4, %v1431_v17, 0.0  ;;  %v1441_v51 = vsel %vm244_vm4, %v1433_v28, 0.0 }
 0x120   : > { %v696_v26 = vsel %vm238_vm2, %v690_v18, %v695_v60  ;;  %v1182_v33 = vsel %vm244_vm4, %v1174_v42, 0.0  ;;  %v1434_v61 = vmul.f32 %v1674_v52, %v1425_v48  ;;  %v2301_v60 = vld [vmem:[%s2456_s3 + $0x7] ss:$0 sm:$0xff]  ;;  %v1463_v17 = vmul.f32 %v2274_v58, %v1454_v29 }
 0x121   : > { %v694_v3 = vrot.slane %v672_v27, %v2214_v32  ;;  %1355 = vadd.xlane.f32.xlu1 %v1354_v47  ;;  %1387 = vadd.xlane.f32.xlu0 %v1386_v36  ;;  %v1175_v47 = vmul.f32 %v1694_v41, %v1166_v39  ;;  %v1452_v36 = vld [vmem:[#allocation2 + $0x19] sm:$0xf]  ;;  %v1205_v2 = vmul.f32 %v2301_v60, %v1196_v20  ;;  %v1482_v39 = vld [vmem:[#allocation2 + $0x51] sm:$0xf] }
 0x122   : > { %v2246_v45 = vpop.xlane.xlu1 %718  ;;  %v2248_v6 = vpop.xlane.xlu0 %750  ;;  %v1444_v63 = vsel %vm244_vm4, %v1434_v61, 0.0  ;;  %v1473_v41 = vsel %vm244_vm4, %v1463_v17, 0.0 }
 0x123   : > { %v697_v44 = vsel %vm241_vm3, %v694_v3, %v696_v26  ;;  %v1185_v18 = vsel %vm244_vm4, %v1175_v47, 0.0  ;;  %v1461_v3 = vmul.f32 %v2274_v58, %v1452_v36  ;;  %v1453_v26 = vld [vmem:[#allocation2 + $0x21] sm:$0xf]  ;;  %v1215_v42 = vsel %vm244_vm4, %v1205_v2, 0.0 }
 0x124   : > { %700 = vst.msk [vmem:[%s2241_s29] sm:$0xf] %vm699_vm5, %v697_v44  ;;  %v1462_v7 = vmul.f32 %v2274_v58, %v1453_v26  ;;  %v1490_v58 = vmul.f32 %v2301_v60, %v1481_v38  ;;  %v728_v26 = vadd.f32 %v2219_v49, %v2136_v57 }
 0x125   : > { %1378 = vadd.xlane.f32.xlu1 %v1377_v4  ;;  %1410 = vadd.xlane.f32.xlu0 %v1409_v55  ;;  %v1203_v4 = vmul.f32 %v2301_v60, %v1194_v15  ;;  %v1480_v55 = vld [vmem:[#allocation2 + $0x41] sm:$0xf]  ;;  %v1467_v44 = vsel %vm244_vm4, %v1461_v3, 0.0 }
 0x126   : > { %v2258_v56 = vpop.xlane.xlu1 %724  ;;  %v2260_v13 = vpop.xlane.xlu0 %773  ;;  %v1489_v52 = vmul.f32 %v2301_v60, %v1480_v55  ;;  %v1470_v21 = vsel %vm244_vm4, %v1462_v7, 0.0  ;;  %v1496_v36 = vsel %vm244_vm4, %v1490_v58, 0.0  ;;  %v1222_v3 = vld [vmem:[#allocation2 + $0x41] sm:$0xf]  ;;  %v757_v49 = vadd.f32 %v2248_v6, %v728_v26 }
 0x127   : > { %v1209_v1 = vsel %vm244_vm4, %v1203_v4, 0.0  ;;  %v1224_v4 = vld [vmem:[#allocation2 + $0x51] sm:$0xf]  ;;  %v729_v17 = vadd.f32 %v2258_v56, %v2136_v57 }
 0x128   : > { %v1493_v31 = vsel %vm244_vm4, %v1489_v52, 0.0 }
 0x129   : > { %1384 = vadd.xlane.f32.xlu1 %v1383_v5  ;;  %1416 = vadd.xlane.f32.xlu0 %v1415_v12  ;;  %v1193_v5 = vld [vmem:[#allocation2 + $0x11] sm:$0xf]  ;;  %v1195_v12 = vld [vmem:[#allocation2 + $0x21] sm:$0xf] }
 0x12a   : > { %v2264_v19 = vpop.xlane.xlu1 %747  ;;  %v2266_v23 = vpop.xlane.xlu0 %779 }
 0x12b   : > { %v786_v2 = vadd.f32 %v2266_v23, %v757_v49 }
 0x12d   : > { %1407 = vadd.xlane.f32.xlu1 %v1406_v9  ;;  %1439 = vadd.xlane.f32.xlu0 %v1438_v53  ;;  %v1202_v9 = vmul.f32 %v2301_v60, %v1193_v5  ;;  %v1204_v53 = vmul.f32 %v2301_v60, %v1195_v12  ;;  %v727_v12 = vadd.f32 %v2246_v45, %v2136_v57 }
 0x12e   : > { %v2276_v25 = vpop.xlane.xlu1 %753  ;;  %v2278_v34 = vpop.xlane.xlu0 %802 }
 0x12f   : > { %v758_v38 = vadd.f32 %v2276_v25, %v729_v17 }
 0x131   : > { %1413 = vadd.xlane.f32.xlu1 %v1412_v14  ;;  %1180 = vadd.xlane.f32.xlu0 %v1179_v37  ;;  %v1206_v14 = vsel %vm244_vm4, %v1202_v9, 0.0  ;;  %v1212_v37 = vsel %vm244_vm4, %v1204_v53, 0.0  ;;  %v756_v9 = vadd.f32 %v2264_v19, %v727_v12  ;;  %v1510_v19 = vld [vmem:[#allocation2 + $0x1a] sm:$0xf] }
 0x132   : > { %v2283_v10 = vpop.xlane.xlu1 %776  ;;  %v2285_v59 = vpop.xlane.xlu0 %808 }
 0x135   : > { %1436 = vadd.xlane.f32.xlu1 %v1435_v54  ;;  %1465 = vadd.xlane.f32.xlu0 %v1464_v40  ;;  %v2338_v54 = vld [vmem:[%s2456_s3 + $0x8] ss:$0 sm:$0xff] }
 0x136   : > { %v2292_v24 = vpop.xlane.xlu1 %782  ;;  %v2294_v50 = vpop.xlane.xlu0 %831  ;;  %v1232_v48 = vmul.f32 %v2338_v54, %v1223_v43  ;;  %v1231_v52 = vmul.f32 %v2338_v54, %v1222_v3  ;;  %v1233_v5 = vmul.f32 %v2338_v54, %v1224_v4 }
 0x137   : > { %v787_v23 = vadd.f32 %v2292_v24, %v758_v38 }
 0x138   : > { %v1238_v15 = vsel %vm244_vm4, %v1232_v48, 0.0  ;;  %v1235_v20 = vsel %vm244_vm4, %v1231_v52, 0.0  ;;  %v1511_v48 = vld [vmem:[#allocation2 + $0x22] sm:$0xf] }
 0x139   : > { %1442 = vadd.xlane.f32.xlu1 %v1441_v51  ;;  %1183 = vadd.xlane.f32.xlu0 %v1182_v33  ;;  %v1509_v51 = vld [vmem:[#allocation2 + $0x12] sm:$0xf]  ;;  %v726_v33 = vadd.f32 %v2205_v22, %v2136_v57 }
 0x13a   : > { %v2303_v27 = vpop.xlane.xlu1 %805  ;;  %v2305_v62 = vpop.xlane.xlu0 %837 }
 0x13b   : > { %v755_v22 = vadd.f32 %v2232_v8, %v726_v33 }
 0x13d   : > { %1445 = vadd.xlane.f32.xlu1 %v1444_v63  ;;  %1186 = vadd.xlane.f32.xlu0 %v1185_v18  ;;  %v1491_v63 = vmul.f32 %v2301_v60, %v1482_v39  ;;  %v1518_v18 = vmul.f32 %v2338_v54, %v1509_v51  ;;  %v784_v8 = vadd.f32 %v2260_v13, %v755_v22 }
 0x13e   : > { %v2311_v11 = vpop.xlane.xlu1 %811  ;;  %v2313_v35 = vpop.xlane.xlu0 %860  ;;  %v785_v13 = vadd.f32 %v2283_v10, %v756_v9  ;;  %v1519_v10 = vmul.f32 %v2338_v54, %v1510_v19 }
 0x13f   : > { %v1522_v7 = vsel %vm244_vm4, %v1518_v18, 0.0  ;;  %v813_v6 = vadd.f32 %v2278_v34, %v784_v8  ;;  %v816_v39 = vadd.f32 %v2311_v11, %v787_v23  ;;  %v1512_v11 = vld [vmem:[#allocation2 + $0x2a] sm:$0xf] }
 0x140   : > { %v1525_v24 = vsel %vm244_vm4, %v1519_v10, 0.0 }
 0x141   : > { %1468 = vadd.xlane.f32.xlu1 %v1467_v44  ;;  %1210 = vadd.xlane.f32.xlu0 %v1209_v1  ;;  %v1499_v1 = vsel %vm244_vm4, %v1491_v63, 0.0  ;;  %v842_v43 = vadd.f32 %v2294_v50, %v813_v6 }
 0x142   : > { %v2319_v16 = vpop.xlane.xlu1 %834  ;;  %v2321_v0 = vpop.xlane.xlu0 %866 }
 0x143   : > { %v871_v25 = vadd.f32 %v2313_v35, %v842_v43  ;;  %v1520_v35 = vmul.f32 %v2338_v54, %v1511_v48 }
 0x145   : > { %1471 = vadd.xlane.f32.xlu1 %v1470_v21  ;;  %1494 = vadd.xlane.f32.xlu0 %v1493_v31  ;;  %v1483_v21 = vld [vmem:[#allocation2 + $0x59] sm:$0xf]  ;;  %v1528_v22 = vsel %vm244_vm4, %v1520_v35, 0.0 }
 0x146   : > { %v2327_v46 = vpop.xlane.xlu1 %840  ;;  %v2329_v30 = vpop.xlane.xlu0 %889  ;;  %v1225_v31 = vld [vmem:[#allocation2 + $0x59] sm:$0xf] }
 0x147   : > { %v1234_v45 = vmul.f32 %v2338_v54, %v1225_v31 }
 0x149   : > { %1207 = vadd.xlane.f32.xlu1 %v1206_v14  ;;  %1213 = vadd.xlane.f32.xlu0 %v1212_v37  ;;  %v1241_v14 = vsel %vm244_vm4, %v1233_v5, 0.0  ;;  %v1492_v37 = vmul.f32 %v2301_v60, %v1483_v21  ;;  %v815_v60 = vadd.f32 %v2285_v59, %v786_v2  ;;  %v1244_v34 = vsel %vm244_vm4, %v1234_v45, 0.0 }
 0x14a   : > { %v2340_v40 = vpop.xlane.xlu1 %863  ;;  %v2342_v28 = vpop.xlane.xlu0 %895  ;;  %v900_v59 = vadd.f32 %v2329_v30, %v871_v25 }
 0x14b   : > { %v1502_v56 = vsel %vm244_vm4, %v1492_v37, 0.0 }
 0x14d   : > { %1474 = vadd.xlane.f32.xlu1 %v1473_v41  ;;  %1216 = vadd.xlane.f32.xlu0 %v1215_v42  ;;  %v814_v41 = vadd.f32 %v2303_v27, %v785_v13  ;;  %v844_v27 = vadd.f32 %v2305_v62, %v815_v60 }
 0x14e   : > { %v2350_v61 = vpop.xlane.xlu1 %869  ;;  %v2352_v47 = vpop.xlane.xlu0 %918 }
 0x14f   : > { %v843_v50 = vadd.f32 %v2319_v16, %v814_v41  ;;  %v873_v33 = vadd.f32 %v2321_v0, %v844_v27  ;;  %v845_v16 = vadd.f32 %v2327_v46, %v816_v39  ;;  %v929_v62 = vadd.f32 %v2352_v47, %v900_v59 }
 0x151   : > { %1497 = vadd.xlane.f32.xlu1 %v1496_v36  ;;  %1239 = vadd.xlane.f32.xlu0 %v1238_v15  ;;  %v872_v51 = vadd.f32 %v2340_v40, %v843_v50  ;;  %v902_v30 = vadd.f32 %v2342_v28, %v873_v33  ;;  %v874_v40 = vadd.f32 %v2350_v61, %v845_v16 }
 0x152   : > { %v893_v55 = vpop.xlane.xlu1 %892  ;;  %v925_v44 = vpop.xlane.xlu0 %924 }
 0x153   : > { %v901_v63 = vadd.f32 %v893_v55, %v872_v51  ;;  %v931_v0 = vadd.f32 %v925_v44, %v902_v30 }
 0x155   : > { %1500 = vadd.xlane.f32.xlu1 %v1499_v1  ;;  %1523 = vadd.xlane.f32.xlu0 %v1522_v7  ;;  %v1521_v1 = vmul.f32 %v2338_v54, %v1512_v11 }
 0x156   : > { %v899_v53 = vpop.xlane.xlu1 %898  ;;  %v948_v29 = vpop.xlane.xlu0 %947 }
 0x157   : > { %v958_v18 = vadd.f32 %v948_v29, %v929_v62  ;;  %v903_v7 = vadd.f32 %v899_v53, %v874_v40  ;;  %v1531_v12 = vsel %vm244_vm4, %v1521_v1, 0.0 }
 0x159   : > { %1236 = vadd.xlane.f32.xlu1 %v1235_v20  ;;  %1242 = vadd.xlane.f32.xlu0 %v1241_v14  ;;  %v969_v52 = vrot.slane %v958_v18, %v2214_v32 }
 0x15a   : > { %v922_v42 = vpop.xlane.xlu1 %921  ;;  %v954_v58 = vpop.xlane.xlu0 %953 }
 0x15b   : > { %v930_v3 = vadd.f32 %v922_v42, %v901_v63  ;;  %v960_v55 = vadd.f32 %v954_v58, %v931_v0 }
 0x15d   : > { %1503 = vadd.xlane.f32.xlu1 %v1502_v56  ;;  %1245 = vadd.xlane.f32.xlu0 %v1244_v34  ;;  %v977_v8 = vrot.slane %v960_v55, %v2214_v32 }
 0x15e   : > { %v928_v36 = vpop.xlane.xlu1 %927  ;;  %v1003_v15 = vpop.xlane.xlu0 %1002 }
 0x15f   : > { %v1013_v46 = vadd.f32 %v1003_v15, %v2136_v57  ;;  %v932_v28 = vadd.f32 %v928_v36, %v903_v7 }
 0x161   : > { %1526 = vadd.xlane.f32.xlu1 %v1525_v24 }
 0x162   : > { %v951_v4 = vpop.xlane.xlu1 %950  ;;  %v1009_v26 = vpop.xlane.xlu0 %1008 }
 0x163   : > { %v959_v47 = vadd.f32 %v951_v4, %v930_v3  ;;  %v1015_v54 = vadd.f32 %v1009_v26, %v2136_v57 }
 0x165   : > { %v973_v61 = vrot.slane %v959_v47, %v2214_v32  ;;  %1529 = vadd.xlane.f32.xlu1 %v1528_v22 }
 0x166   : > { %v957_v5 = vpop.xlane.xlu1 %956  ;;  %v1032_v44 = vpop.xlane.xlu0 %1031 }
 0x167   : > { %v982_v21 = vsel %vm235_vm1, %v973_v61, %v969_v52  ;;  %v961_v31 = vadd.f32 %v957_v5, %v932_v28  ;;  %v1042_v49 = vadd.f32 %v1032_v44, %v1013_v46 }
 0x168   : > { %v983_v53 = vsel %vm238_vm2, %v977_v8, %v982_v21 }
 0x169   : > { %v981_v9 = vrot.slane %v961_v31, %v2214_v32  ;;  %1532 = vadd.xlane.f32.xlu1 %v1531_v12 }
 0x16a   : > { %v1006_v29 = vpop.xlane.xlu1 %1005  ;;  %v1038_v20 = vpop.xlane.xlu0 %1037 }
 0x16b   : > { %v984_v14 = vsel %vm241_vm3, %v981_v9, %v983_v53  ;;  %v1044_v37 = vadd.f32 %v1038_v20, %v1015_v54  ;;  %v1014_v13 = vadd.f32 %v1006_v29, %v2136_v57 }
 0x16c   : > { %1658 = vst.msk [vmem:[%s2241_s29 + $0x4] sm:$0xf] %vm699_vm5, %v984_v14 }
 0x16e   : > { %v1012_v45 = vpop.xlane.xlu1 %1011  ;;  %v1061_v17 = vpop.xlane.xlu0 %1060 }
 0x16f   : > { %v1071_v6 = vadd.f32 %v1061_v17, %v1042_v49  ;;  %v1016_v41 = vadd.f32 %v1012_v45, %v2136_v57 }
 0x172   : > { %v1035_v19 = vpop.xlane.xlu1 %1034  ;;  %v1067_v2 = vpop.xlane.xlu0 %1066 }
 0x173   : > { %v1043_v38 = vadd.f32 %v1035_v19, %v1014_v13  ;;  %v1073_v43 = vadd.f32 %v1067_v2, %v1044_v37 }
 0x176   : > { %v1041_v60 = vpop.xlane.xlu1 %1040  ;;  %v1090_v42 = vpop.xlane.xlu0 %1089 }
 0x177   : > { %v1045_v58 = vadd.f32 %v1041_v60, %v1016_v41  ;;  %v1100_v56 = vadd.f32 %v1090_v42, %v1071_v6 }
 0x17a   : > { %v1064_v34 = vpop.xlane.xlu1 %1063  ;;  %v1096_v10 = vpop.xlane.xlu0 %1095 }
 0x17b   : > { %v1072_v23 = vadd.f32 %v1064_v34, %v1043_v38  ;;  %v1102_v25 = vadd.f32 %v1096_v10, %v1073_v43 }
 0x17e   : > { %v1070_v50 = vpop.xlane.xlu1 %1069  ;;  %v1119_v48 = vpop.xlane.xlu0 %1118 }
 0x17f   : > { %v1074_v27 = vadd.f32 %v1070_v50, %v1045_v58  ;;  %v1129_v39 = vadd.f32 %v1119_v48, %v1100_v56 }
 0x182   : > { %v1093_v59 = vpop.xlane.xlu1 %1092  ;;  %v1125_v51 = vpop.xlane.xlu0 %1124 }
 0x183   : > { %v1101_v33 = vadd.f32 %v1093_v59, %v1072_v23  ;;  %v1131_v36 = vadd.f32 %v1125_v51, %v1102_v25 }
 0x186   : > { %v1099_v15 = vpop.xlane.xlu1 %1098  ;;  %v1148_v24 = vpop.xlane.xlu0 %1147 }
 0x187   : > { %v1103_v35 = vadd.f32 %v1099_v15, %v1074_v27  ;;  %v1158_v16 = vadd.f32 %v1148_v24, %v1129_v39 }
 0x18a   : > { %v1122_v62 = vpop.xlane.xlu1 %1121  ;;  %v1154_v63 = vpop.xlane.xlu0 %1153 }
 0x18b   : > { %v1130_v11 = vadd.f32 %v1122_v62, %v1101_v33  ;;  %v2416_v30 = vadd.f32 %v1154_v63, %v1131_v36 }
 0x18e   : > { %v1128_v40 = vpop.xlane.xlu1 %1127  ;;  %v1178_v18 = vpop.xlane.xlu0 %1177 }
 0x18f   : > { %v1132_v3 = vadd.f32 %v1128_v40, %v1103_v35  ;;  %v2418_v0 = vadd.f32 %v1178_v18, %v1158_v16 }
 0x192   : > { %v1151_v4 = vpop.xlane.xlu1 %1150  ;;  %v1295_v26 = vpop.xlane.xlu0 %1294 }
 0x193   : > { %v1159_v22 = vadd.f32 %v1151_v4, %v1130_v11  ;;  %v1303_v46 = vadd.f32 %v1295_v26, %v2136_v57 }
 0x196   : > { %v1157_v1 = vpop.xlane.xlu1 %1156  ;;  %v1301_v7 = vpop.xlane.xlu0 %1300 }
 0x197   : > { %v2421_v47 = vadd.f32 %v1157_v1, %v1132_v3  ;;  %v1305_v28 = vadd.f32 %v1301_v7, %v2136_v57 }
 0x19a   : > { %v1292_v55 = vpop.xlane.xlu1 %1291  ;;  %v1324_v52 = vpop.xlane.xlu0 %1323 }
 0x19b   : > { %v1332_v61 = vadd.f32 %v1324_v52, %v1303_v46  ;;  %v1302_v21 = vadd.f32 %v1292_v55, %v2136_v57 }
 0x19e   : > { %v1298_v5 = vpop.xlane.xlu1 %1297  ;;  %v1330_v44 = vpop.xlane.xlu0 %1329 }
 0x19f   : > { %v1334_v12 = vadd.f32 %v1330_v44, %v1305_v28  ;;  %v1304_v9 = vadd.f32 %v1298_v5, %v2136_v57 }
 0x1a2   : > { %v1321_v54 = vpop.xlane.xlu1 %1320  ;;  %v1353_v31 = vpop.xlane.xlu0 %1352 }
 0x1a3   : > { %v1331_v49 = vadd.f32 %v1321_v54, %v1302_v21  ;;  %v1361_v8 = vadd.f32 %v1353_v31, %v1332_v61 }
 0x1a6   : > { %v1327_v53 = vpop.xlane.xlu1 %1326  ;;  %v1359_v29 = vpop.xlane.xlu0 %1358 }
 0x1a7   : > { %v1333_v20 = vadd.f32 %v1327_v53, %v1304_v9  ;;  %v2426_v14 = vadd.f32 %v1359_v29, %v1334_v12 }
 0x1aa   : > { %v1350_v37 = vpop.xlane.xlu1 %1349  ;;  %v1382_v45 = vpop.xlane.xlu0 %1381 }
 0x1ab   : > { %v1390_v17 = vadd.f32 %v1382_v45, %v1361_v8  ;;  %v1360_v15 = vadd.f32 %v1350_v37, %v1331_v49 }
 0x1ae   : > { %v1356_v6 = vpop.xlane.xlu1 %1355  ;;  %v1388_v13 = vpop.xlane.xlu0 %1387 }
 0x1af   : > { %v1362_v46 = vadd.f32 %v1356_v6, %v1333_v20  ;;  %v1392_v37 = vadd.f32 %v1388_v13, %v2426_v14 }
 0x1b2   : > { %v1379_v19 = vpop.xlane.xlu1 %1378  ;;  %v1411_v2 = vpop.xlane.xlu0 %1410 }
 0x1b3   : > { %v1389_v16 = vadd.f32 %v1379_v19, %v1360_v15  ;;  %v1419_v55 = vadd.f32 %v1411_v2, %v1390_v17 }
 0x1b6   : > { %v1385_v38 = vpop.xlane.xlu1 %1384  ;;  %v1417_v43 = vpop.xlane.xlu0 %1416 }
 0x1ba   : > { %v1408_v41 = vpop.xlane.xlu1 %1407  ;;  %v1440_v60 = vpop.xlane.xlu0 %1439 }
 0x1bb   : > { %v1418_v63 = vadd.f32 %v1408_v41, %v1389_v16  ;;  %v1448_v12 = vadd.f32 %v1440_v60, %v1419_v55  ;;  %v1421_v41 = vadd.f32 %v1417_v43, %v1392_v37 }
 0x1be   : > { %v1414_v42 = vpop.xlane.xlu1 %1413  ;;  %v1181_v58 = vpop.xlane.xlu0 %1180 }
 0x1bf   : > { %v1189_v62 = vadd.f32 %v1181_v58, %v1159_v22  ;;  %v1391_v22 = vadd.f32 %v1385_v38, %v1362_v46 }
 0x1c1   : > { %v1420_v49 = vadd.f32 %v1414_v42, %v1391_v22 }
 0x1c2   : > { %v1437_v56 = vpop.xlane.xlu1 %1436  ;;  %v1466_v57 = vpop.xlane.xlu0 %1465 }
 0x1c3   : > { %v1447_v4 = vadd.f32 %v1437_v56, %v1418_v63 }
 0x1c5   : > { %v1476_v21 = vadd.f32 %v1466_v57, %v1447_v4 }
 0x1c6   : > { %v1443_v34 = vpop.xlane.xlu1 %1442  ;;  %v1184_v10 = vpop.xlane.xlu0 %1183 }
 0x1c7   : > { %v1190_v18 = vadd.f32 %v1184_v10, %v2416_v30  ;;  %v1449_v17 = vadd.f32 %v1443_v34, %v1420_v49 }
 0x1ca   : > { %v1446_v23 = vpop.xlane.xlu1 %1445  ;;  %v1187_v25 = vpop.xlane.xlu0 %1186 }
 0x1cb   : > { %v1191_v61 = vadd.f32 %v1187_v25, %v2421_v47  ;;  %v1450_v56 = vadd.f32 %v1446_v23, %v1421_v41 }
 0x1ce   : > { %v1469_v50 = vpop.xlane.xlu1 %1468  ;;  %v1211_v48 = vpop.xlane.xlu0 %1210 }
 0x1cf   : > { %v1219_v3 = vadd.f32 %v1211_v48, %v1189_v62  ;;  %v1477_v53 = vadd.f32 %v1469_v50, %v1448_v12 }
 0x1d2   : > { %v1472_v27 = vpop.xlane.xlu1 %1471  ;;  %v1495_v39 = vpop.xlane.xlu0 %1494 }
 0x1d3   : > { %v1505_v29 = vadd.f32 %v1495_v39, %v1476_v21  ;;  %v1478_v60 = vadd.f32 %v1472_v27, %v1449_v17 }
 0x1d6   : > { %v1208_v59 = vpop.xlane.xlu1 %1207  ;;  %v1214_v51 = vpop.xlane.xlu0 %1213 }
 0x1d7   : > { %v1218_v26 = vadd.f32 %v1208_v59, %v2418_v0  ;;  %v1220_v1 = vadd.f32 %v1214_v51, %v1190_v18 }
 0x1da   : > { %v1475_v33 = vpop.xlane.xlu1 %1474  ;;  %v1217_v36 = vpop.xlane.xlu0 %1216 }
 0x1db   : > { %v1221_v54 = vadd.f32 %v1217_v36, %v1191_v61  ;;  %v1479_v10 = vadd.f32 %v1475_v33, %v1450_v56 }
 0x1de   : > { %v1498_v24 = vpop.xlane.xlu1 %1497  ;;  %v1240_v35 = vpop.xlane.xlu0 %1239 }
 0x1df   : > { %v1248_v7 = vadd.f32 %v1240_v35, %v1219_v3  ;;  %v1506_v6 = vadd.f32 %v1498_v24, %v1477_v53 }
 0x1e1   : > { %v1262_v30 = vrot.slane %v1248_v7, %v2214_v32 }
 0x1e2   : > { %v1501_v11 = vpop.xlane.xlu1 %1500  ;;  %v1524_v40 = vpop.xlane.xlu0 %1523 }
 0x1e3   : > { %v1534_v19 = vadd.f32 %v1524_v40, %v1505_v29  ;;  %v1507_v57 = vadd.f32 %v1501_v11, %v1478_v60 }
 0x1e5   : > { %v1545_v14 = vrot.slane %v1534_v19, %v2214_v32 }
 0x1e6   : > { %v1237_v52 = vpop.xlane.xlu1 %1236  ;;  %v1243_v28 = vpop.xlane.xlu0 %1242 }
 0x1e7   : > { %v1247_v5 = vadd.f32 %v1237_v52, %v1218_v26  ;;  %v1249_v44 = vadd.f32 %v1243_v28, %v1220_v1 }
 0x1e9   : > { %v1258_v31 = vrot.slane %v1247_v5, %v2214_v32  ;;  %v1266_v0 = vrot.slane %v1249_v44, %v2214_v32 }
 0x1ea   : > { %v1504_v8 = vpop.xlane.xlu1 %1503  ;;  %v1246_v9 = vpop.xlane.xlu0 %1245 }
 0x1eb   : > { %v1271_v47 = vsel %vm235_vm1, %v1262_v30, %v1258_v31  ;;  %v1250_v20 = vadd.f32 %v1246_v9, %v1221_v54  ;;  %v1508_v48 = vadd.f32 %v1504_v8, %v1479_v10 }
 0x1ec   : > { %v1272_v45 = vsel %vm238_vm2, %v1266_v0, %v1271_v47 }
 0x1ed   : > { %v1270_v2 = vrot.slane %v1250_v20, %v2214_v32 }
 0x1ee   : > { %v1527_v38 = vpop.xlane.xlu1 %1526 }
 0x1ef   : > { %v1273_v42 = vsel %vm241_vm3, %v1270_v2, %v1272_v45  ;;  %v1535_v58 = vadd.f32 %v1527_v38, %v1506_v6 }
 0x1f0   : > { %1668 = vst.msk [vmem:[%s2241_s29 + $0x8] sm:$0xf] %vm699_vm5, %v1273_v42 }
 0x1f1   : > { %v1549_v13 = vrot.slane %v1535_v58, %v2214_v32 }
 0x1f2   : > { %v1530_v34 = vpop.xlane.xlu1 %1529 }
 0x1f3   : > { %v1558_v25 = vsel %vm235_vm1, %v1549_v13, %v1545_v14  ;;  %v1536_v50 = vadd.f32 %v1530_v34, %v1507_v57 }
 0x1f5   : > { %v1553_v43 = vrot.slane %v1536_v50, %v2214_v32 }
 0x1f6   : > { %v1533_v27 = vpop.xlane.xlu1 %1532 }
 0x1f7   : > { %v1559_v39 = vsel %vm238_vm2, %v1553_v43, %v1558_v25  ;;  %v1537_v59 = vadd.f32 %v1533_v27, %v1508_v48 }
 0x1f9   : > { %v1557_v51 = vrot.slane %v1537_v59, %v2214_v32 }
 0x1fb   : > { %v1560_v23 = vsel %vm241_vm3, %v1557_v51, %v1559_v39 }
 0x1fc   : > { %1678 = vst.msk [vmem:[%s2241_s29 + $0xc] sm:$0xf] %vm699_vm5, %v1560_v23 }
 0x1fd PF: > { %s16_s20 = sadd.s32 1, %s1701_s20  }
 0x1fe   : > { %p13_p4 = scmp.ge.s32.totalorder %s16_s20, 6  }
 0x200   :  { %15 = sbr.rel (!%p13_p4) target bundleno = 2 (0x2), region = 84 }

// kernel: generator_forward.6
= control target key start
LH: loop header
LB: loop body
LE: loop exit
PB: predicated region body
PF: predicated region fallthrough
CT: control target
= control target key end

     0   :  { %s4695_s12 = smov 0   ;;  %s5471_s0 = inlined_call_operand.vmem [shape: bf16[4,4,4,128], index: 0, kind: input, shape index: {}]   ;;  %s5472_s1 = inlined_call_operand.vmem [shape: bf16[4,4,128,64], index: 1, kind: input, shape index: {}]   ;;  %s5473_s2 = inlined_call_operand.vmem [shape: f32[4,16,4,64], index: 2, kind: output, shape index: {0}]   ;;  %s5474_s3 = inlined_call_operand.vmem [shape: f32[4,2,64], index: 3, kind: output, shape index: {1}]  }
   0x1 LB: > { %s3533_s13 = sadd.s32 4294967295, %s4669_s12   ;;  %p3537_p0 = scmp.ge.s32.totalorder %s4669_s12, 1  ;;  %s4669_s12 = sphi %s4695_s12, %s14_s12  }
   0x2   : > { %p140_p1 = scmp.lt.s32.totalorder %s4669_s12, 5 }
   0x4   : > { %p141_p2 = pnand %p3537_p0, %p140_p1 }
   0x5   : > { %v4519_v0 = vld [vmem:[%s5472_s1 + $0x40] sm:$0xff] (!%p141_p2)   ;;  %v4671_v1 = vmov (!%p141_p2), 0.0   ;;  %v4521_v3 = vld [vmem:[%s5472_s1 + $0x48] sm:$0xff] (!%p141_p2)   ;;  %vm4672_vm0 = vmmov (!%p141_p2), 0   ;;  %p4716_p3 = scmp.lt.s32.totalorder (!%p141_p2), %s3533_s13, 3  ;;  %v4673_v5 = vmov (!%p141_p2), 0   ;;  %v422_v38 = vlaneseq (!%p141_p2) }
   0x6   : > { %144 = sbr.rel (%p141_p2) target bundleno = 513 (0x201), region = 28  ;;  %4139 = vmatprep.subr.bf16.mxu0 (!%p141_p2), %v4671_v1  ;;  %4219 = vmatprep.subr.bf16.mxu1 (!%p141_p2), %v4671_v1  ;;  %v4520_v2 = vld [vmem:[%s5472_s1 + $0x140] sm:$0xff] (!%p141_p2)   ;;  %v4522_v4 = vld [vmem:[%s5472_s1 + $0x148] sm:$0xff] (!%p141_p2)   ;;  %184 = vst [vmem:[#allocation2 + $0x4] sm:$0x7] (!%p141_p2), %v4673_v5  ;;  %v4523_v6 = vld [vmem:[%s5472_s1 + $0x50] sm:$0xff] (!%p141_p2)  }
   0x7   : > { %4140 = vmatpush3.bf16.msra.mxu0 (!%p141_p2), %v4519_v0  ;;  %4155 = vmatprep.mubr.msk.bf16.mxu0 (!%p141_p2), %vm4672_vm0, %v4671_v1  ;;  %185 = vst [vmem:[#allocation2 + $0x8] sm:$0x7] (!%p141_p2), %v4673_v5  ;;  %186 = vst [vmem:[#allocation2 + $0xc] sm:$0x7] (!%p141_p2), %v4673_v5  ;;  %v4524_v7 = vld [vmem:[%s5472_s1 + $0x150] sm:$0xff] (!%p141_p2)   ;;  %v4525_v8 = vld [vmem:[%s5472_s1 + $0x58] sm:$0xff] (!%p141_p2)  }
   0x8   : > { %4220 = vmatpush3.bf16.msra.mxu1 (!%p141_p2), %v4520_v2  ;;  %4141 = vmatprep.subr.bf16.mxu0 (!%p141_p2), %v4671_v1  ;;  %187 = vst [vmem:[#allocation2 + $0x10] sm:$0x7] (!%p141_p2), %v4673_v5  ;;  %183 = vst [vmem:[#allocation2] sm:$0x7] (!%p141_p2), %v4673_v5  ;;  %v4526_v9 = vld [vmem:[%s5472_s1 + $0x158] sm:$0xff] (!%p141_p2)   ;;  %v4527_v10 = vld [vmem:[%s5472_s1 + $0x60] sm:$0xff] (!%p141_p2)  }
   0x9   : > { %4221 = vmatprep.subr.bf16.mxu1 (!%p141_p2), %v4671_v1  ;;  %188 = vst [vmem:[#allocation2 + $0x14] sm:$0x7] (!%p141_p2), %v4673_v5  ;;  %4235 = vmatprep.mubr.msk.bf16.mxu1 (!%p141_p2), %vm4672_vm0, %v4671_v1  ;;  %v4528_v11 = vld [vmem:[%s5472_s1 + $0x160] sm:$0xff] (!%p141_p2)   ;;  %vm258_vm1 = vcmask (!%p141_p2), 1042432   ;;  %v4529_v12 = vld [vmem:[%s5472_s1 + $0x68] sm:$0xff] (!%p141_p2)   ;;  %v4531_v30 = vld [vmem:[%s5472_s1 + $0x70] sm:$0xff] (!%p141_p2)  }
   0xa   : > { %vm259_vm2 = vsmask.f32 (!%p141_p2), 2306  ;;  %v4530_v14 = vld [vmem:[%s5472_s1 + $0x168] sm:$0xff] (!%p141_p2)   ;;  %v4532_v34 = vld [vmem:[%s5472_s1 + $0x170] sm:$0xff] (!%p141_p2)   ;;  %v4674_v42 = vmov (!%p141_p2), 1983009808  }
   0xb   : > { %4142 = vmatpush3.bf16.msra.mxu0 (!%p141_p2), %v4521_v3  ;;  %vm4769_vm3 = vmand (!%p141_p2), %vm258_vm1, %vm259_vm2  ;;  %v420_v43 = vunpack.c.l.s4 (!%p141_p2), %v4674_v42  ;;  %v4533_v47 = vld [vmem:[%s5472_s1 + $0x78] sm:$0xff] (!%p141_p2)   ;;  %v423_v51 = vshrl.u32 (!%p141_p2), %v422_v38, 7  ;;  %vm313_vm4 = vsmask.f32 (!%p141_p2), 1280  ;;  %vm314_vm5 = vsmask.f32 (!%p141_p2), 3336 }
   0xc   : > { %4222 = vmatpush3.bf16.msra.mxu1 (!%p141_p2), %v4522_v4  ;;  %4143 = vmatprep.subr.bf16.mxu0 (!%p141_p2), %v4671_v1  ;;  %v4534_v48 = vld [vmem:[%s5472_s1 + $0x178] sm:$0xff] (!%p141_p2)   ;;  %vm316_vm6 = vsmask.f32 (!%p141_p2), 5392  ;;  %vm318_vm7 = vsmask.f32 (!%p141_p2), 7448  ;;  %vm315_vm8 = vmor (!%p141_p2), %vm313_vm4, %vm314_vm5  ;;  %v4541_v38 = vld [vmem:[%s5472_s1 + $0x10] sm:$0xff] (!%p141_p2)  }
   0xd   : > { %s5485_s13 = smov (!%p4716_p3, %s3533_s13), 3  ;;  %4223 = vmatprep.subr.bf16.mxu1 %v4671_v1  ;;  %v261_v29 = vld [vmem:[#allocation2 + $0x4] sm:$0x7]  ;;  %v421_v50 = vunpack.c.0.s8 %v420_v43  ;;  %vm317_vm9 = vmor %vm315_vm8, %vm316_vm6  ;;  %vm1061_vm11 = vcmask 1040384   ;;  %vm1062_vm12 = vcmask 1042434   ;;  %vm1064_vm14 = vcmask 1044484  }
   0xe   : > { %s3993_s29 = sshll.u32 %s5485_s13, 3  ;;  %v264_v33 = vld [vmem:[#allocation2 + $0x8] sm:$0x7]  ;;  %v267_v37 = vld [vmem:[#allocation2 + $0xc] sm:$0x7]  ;;  %vm4807_vm10 = vmor %vm317_vm9, %vm318_vm7  ;;  %vm1066_vm1 = vcmask 1046534  }
   0xf   : > { %4144 = vmatpush3.bf16.msra.mxu0 %v4523_v6  ;;  %s172_s7 = scalar_lea.vmem %s5471_s0, %s3993_s29  ;;  %v270_v41 = vld [vmem:[#allocation2 + $0x10] sm:$0x7]  ;;  %v4797_v52 = vsub.s32 %v421_v50, %v423_v51  ;;  %v4540_v50 = vld [vmem:[%s5472_s1 + $0x108] sm:$0xff]   ;;  %vm1063_vm13 = vmor %vm1061_vm11, %vm1062_vm12  ;;  %s3994_s25 = sshll.u32 %s5485_s13, 6  ;;  %vm3444_vm4 = vcmask 516096  }
  0x10   : > { %4224 = vmatpush3.bf16.msra.mxu1 %v4524_v7  ;;  %4145 = vmatprep.subr.bf16.mxu0 %v4671_v1  ;;  %v3543_v13 = vld.sshfl [vmem:[%s172_s7] sm:$0x3 pattern:$0x76325410]  ;;  %v4547_v51 = vld [vmem:[%s5472_s1 + $0x28] sm:$0xff]   ;;  %vm4871_vm15 = vmor %vm1063_vm13, %vm1064_vm14  ;;  %s5414_s28 = scalar_lea.vmem %s5473_s2, %s3994_s25  ;;  %s3542_s29 = sshll.u32 %s5485_s13, 1 }
  0x11   : > { %4225 = vmatprep.subr.bf16.mxu1 %v4671_v1  ;;  %v3544_v15 = vld.sshfl [vmem:[%s172_s7 + $0x2] sm:$0x3 pattern:$0x76325410]  ;;  %v226_v16 = vshrl.u32 %v3543_v13, 16  ;;  %v229_v17 = vshll.u32 %v3543_v13, 16  ;;  %vm4888_vm2 = vmor %vm4871_vm15, %vm1066_vm1  ;;  %s181_s5 = scalar_lea.vmem %s5474_s3, %s3542_s29 }
  0x12   : > { %v3545_v18 = vld.sshfl [vmem:[%s172_s7 + $0x4] sm:$0x3 pattern:$0x76325410]  ;;  %v233_v19 = vshrl.u32 %v3544_v15, 16  ;;  %v236_v20 = vshll.u32 %v3544_v15, 16 }
  0x13   : > { %4146 = vmatpush3.bf16.msra.mxu0 %v4525_v8  ;;  %v3546_v21 = vld.sshfl [vmem:[%s172_s7 + $0x6] sm:$0x3 pattern:$0x76325410]  ;;  %v228_v22 = vrot.slane %v226_v16, 7  ;;  %v240_v23 = vshrl.u32 %v3545_v18, 16 }
  0x14   : > { %4226 = vmatpush3.bf16.msra.mxu1 %v4526_v9  ;;  %4147 = vmatprep.subr.bf16.mxu0 %v4671_v1  ;;  %v235_v24 = vrot.slane %v233_v19, 7  ;;  %v243_v25 = vshll.u32 %v3545_v18, 16  ;;  %v247_v26 = vshrl.u32 %v3546_v21, 16  ;;  %v250_v27 = vshll.u32 %v3546_v21, 16  ;;  %v4537_v7 = vld [vmem:[%s5472_s1] sm:$0xff]   ;;  %v4628_v16 = vld [vmem:[%s5472_s1 + $0x398] sm:$0xff]  }
  0x15   : > { %4227 = vmatprep.subr.bf16.mxu1 %v4671_v1  ;;  %v231_v31 = vor.u32 %v229_v17, %v228_v22  ;;  %v242_v32 = vrot.slane %v240_v23, 7 }
  0x16   : > { %v238_v35 = vor.u32 %v236_v20, %v235_v24  ;;  %v249_v36 = vrot.slane %v247_v26, 7 }
  0x17   : > { %4148 = vmatpush3.bf16.msra.mxu0 %v4527_v10  ;;  %v245_v39 = vor.u32 %v243_v25, %v242_v32  ;;  %v262_v40 = vsel %vm4769_vm3, %v231_v31, %v261_v29 }
  0x18   : > { %4228 = vmatpush3.bf16.msra.mxu1 %v4528_v11  ;;  %4149 = vmatprep.subr.bf16.mxu0 %v4671_v1  ;;  %v252_v44 = vor.u32 %v250_v27, %v249_v36  ;;  %263 = vst [vmem:[#allocation2 + $0x4] sm:$0x7] %v262_v40  ;;  %v265_v45 = vsel %vm4769_vm3, %v238_v35, %v264_v33  ;;  %v4539_v27 = vld [vmem:[%s5472_s1 + $0x8] sm:$0xff]  }
  0x19   : > { %4229 = vmatprep.subr.bf16.mxu1 %v4671_v1  ;;  %266 = vst [vmem:[#allocation2 + $0x8] sm:$0x7] %v265_v45  ;;  %v268_v46 = vsel %vm4769_vm3, %v245_v39, %v267_v37  ;;  %v4543_v45 = vld [vmem:[%s5472_s1 + $0x18] sm:$0xff]  }
  0x1a   : > { %269 = vst [vmem:[#allocation2 + $0xc] sm:$0x7] %v268_v46  ;;  %v271_v49 = vsel %vm4769_vm3, %v252_v44, %v270_v41  ;;  %vm998_vm3 = vcmask 523264  }
  0x1b   : > { %4150 = vmatpush3.bf16.msra.mxu0 %v4529_v12  ;;  %272 = vst [vmem:[#allocation2 + $0x10] sm:$0x7] %v271_v49  ;;  %v4545_v49 = vld [vmem:[%s5472_s1 + $0x20] sm:$0xff]  }
  0x1c   : > { %4230 = vmatpush3.bf16.msra.mxu1 %v4530_v14  ;;  %4151 = vmatprep.subr.bf16.mxu0 %v4671_v1 }
  0x1d   : > { %4231 = vmatprep.subr.bf16.mxu1 %v4671_v1 }
  0x1f   : > { %4152 = vmatpush3.bf16.msra.mxu0 %v4531_v30  ;;  %v3659_v53 = vld.sshfl [vmem:[#allocation2 + $0x4] sm:$0x13 pattern:$0x76325410] }
  0x20   : > { %4232 = vmatpush3.bf16.msra.mxu1 %v4532_v34  ;;  %4153 = vmatprep.subr.bf16.mxu0 %v4671_v1  ;;  %v4655_v54 = vld.sshfl [vmem:[#allocation2 + $0x4] sm:$0xf pattern:$0x76325410]  ;;  %v1116_v55 = vcombine.high %v3659_v53, %v3659_v53  ;;  %v1142_v56 = vshrl.u32 %v3659_v53, 16  ;;  %v1145_v57 = vshll.u32 %v3659_v53, 16 }
  0x21   : > { %4233 = vmatprep.subr.bf16.mxu1 %v4671_v1  ;;  %v3660_v58 = vld.sshfl [vmem:[#allocation2 + $0x8] sm:$0x13 pattern:$0x76325410] }
  0x22   : > { %v4656_v59 = vld.sshfl [vmem:[#allocation2 + $0xc] sm:$0xf pattern:$0x76325410]  ;;  %v1124_v60 = vcombine.high %v3660_v58, %v3660_v58  ;;  %v1144_v61 = vrot.slane %v1142_v56, 6  ;;  %v1147_v62 = vrot.slane %v1145_v57, 7 }
  0x23   : > { %4154 = vmatpush3.bf16.msra.mxu0 %v4533_v47  ;;  %v3661_v63 = vld.sshfl [vmem:[#allocation2 + $0xc] sm:$0x13 pattern:$0x76325410]  ;;  %v1151_v0 = vshll.u32 %v1116_v55, 16  ;;  %v1156_v2 = vshrl.u32 %v3660_v58, 16  ;;  %v433_v12 = vcombine.low %v4655_v54, %v4656_v59 }
  0x24   : > { %4234 = vmatpush3.bf16.msra.mxu1 %v4534_v48  ;;  %4159 = vmatprep.subr.bf16.mxu0 %v4671_v1  ;;  %v3662_v3 = vld.sshfl [vmem:[#allocation2 + $0x10] sm:$0x13 pattern:$0x76325410]  ;;  %v1132_v4 = vcombine.high %v3661_v63, %v3661_v63  ;;  %v1148_v5 = vor.u32 %v1147_v62, %v1144_v61  ;;  %v1159_v6 = vshll.u32 %v3660_v58, 16  ;;  %v1165_v11 = vshll.u32 %v1124_v60, 16 }
  0x25   : > { %4239 = vmatprep.subr.bf16.mxu1 %v4671_v1  ;;  %v1140_v8 = vcombine.high %v3662_v3, %v3662_v3  ;;  %v1153_v9 = vrot.slane %v1151_v0, 7  ;;  %v1158_v10 = vrot.slane %v1156_v2, 6  ;;  %v1170_v15 = vshrl.u32 %v3661_v63, 16  ;;  %v4538_v47 = vld [vmem:[%s5472_s1 + $0x100] sm:$0xff]   ;;  %v4542_v57 = vld [vmem:[%s5472_s1 + $0x110] sm:$0xff]   ;;  %v4544_v62 = vld [vmem:[%s5472_s1 + $0x118] sm:$0xff]  }
  0x26   : > { %v1149_v13 = vrot.slane %v1148_v5, 2  ;;  %v1161_v14 = vrot.slane %v1159_v6, 7  ;;  %v1167_v17 = vrot.slane %v1165_v11, 7  ;;  %v1173_v18 = vshll.u32 %v3661_v63, 16  ;;  %4156 = vmatmul.mubr.bf16.vlgmr.msra.gmra.mrb[0].mxu0 %v433_v12  ;;  %v4549_v58 = vld [vmem:[%s5472_s1 + $0x30] sm:$0xff]   ;;  %v4551_v2 = vld [vmem:[%s5472_s1 + $0x38] sm:$0xff]  }
  0x27   : > { %v1179_v19 = vshll.u32 %v1132_v4, 16  ;;  %v1184_v20 = vshrl.u32 %v3662_v3, 16  ;;  %v1172_v22 = vrot.slane %v1170_v15, 6  ;;  %v1187_v23 = vshll.u32 %v3662_v3, 16  ;;  %4160 = vmatpush3.bf16.msra.mxu0 %v4537_v7  ;;  %4175 = vmatprep.mubr.msk.bf16.mxu0 %vm4672_vm0, %v4671_v1  ;;  %v4546_v5 = vld [vmem:[%s5472_s1 + $0x120] sm:$0xff]   ;;  %v4548_v15 = vld [vmem:[%s5472_s1 + $0x128] sm:$0xff]  }
  0x28   : > { %v1162_v21 = vor.u32 %v1161_v14, %v1158_v10  ;;  %v1175_v24 = vrot.slane %v1173_v18, 7  ;;  %v1193_v26 = vshll.u32 %v1140_v8, 16  ;;  %v4818_v28 = vsel %vm4807_vm10, %v1149_v13, %v1153_v9  ;;  %4161 = vmatprep.subr.bf16.mxu0 %v4671_v1  ;;  %v3635_v53 = vld.sshfl [vmem:[#allocation2 + $0x4] sm:$0x12 pattern:$0x76325410] }
  0x29   : > { %v1186_v25 = vrot.slane %v1184_v20, 6  ;;  %v1189_v30 = vrot.slane %v1187_v23, 7  ;;  %v1181_v32 = vrot.slane %v1179_v19, 7  ;;  %v1036_v59 = vcombine.high %v3635_v53, %v3635_v53  ;;  %v4553_v13 = vld [vmem:[%s5472_s1 + $0x80] sm:$0xff]   ;;  %v4634_v10 = vld [vmem:[%s5472_s1 + $0x3b0] sm:$0xff]  }
  0x2a   : > { %v1163_v29 = vrot.slane %v1162_v21, 2  ;;  %v1176_v31 = vor.u32 %v1175_v24, %v1172_v22  ;;  %v1195_v33 = vrot.slane %v1193_v26, 7  ;;  %v3636_v54 = vld.sshfl [vmem:[#allocation2 + $0x8] sm:$0x12 pattern:$0x76325410] }
  0x2b   : > { %v1190_v35 = vor.u32 %v1189_v30, %v1186_v25  ;;  %4162 = vmatpush3.bf16.msra.mxu0 %v4539_v27  ;;  %v3637_v55 = vld.sshfl [vmem:[#allocation2 + $0xc] sm:$0x12 pattern:$0x76325410]  ;;  %v1044_v60 = vcombine.high %v3636_v54, %v3636_v54  ;;  %v3639_v3 = vrot.slane %v3635_v53, 9  ;;  %v3640_v4 = vrot.slane %v3636_v54, 9 }
  0x2c   : > { %v4823_v34 = vsel %vm4807_vm10, %v1163_v29, %v1167_v17  ;;  %v1177_v36 = vrot.slane %v1176_v31, 2  ;;  %4163 = vmatprep.subr.bf16.mxu0 %v4671_v1  ;;  %v3638_v56 = vld.sshfl [vmem:[#allocation2 + $0x10] sm:$0x12 pattern:$0x76325410]  ;;  %v1052_v63 = vcombine.high %v3637_v55, %v3637_v55  ;;  %v1070_v6 = vrot.slane %v1036_v59, 7 }
  0x2d   : > { %v1214_v37 = vcombine.low %v4818_v28, %v4823_v34  ;;  %v1191_v39 = vrot.slane %v1190_v35, 2  ;;  %v1060_v0 = vcombine.high %v3638_v56, %v3638_v56  ;;  %v1074_v7 = vrot.slane %v1044_v60, 7  ;;  %v3583_v14 = vld.sshfl [vmem:[#allocation2] sm:$0x13 pattern:$0x76325410] }
  0x2e   : > { %v4833_v40 = vsel %vm4807_vm10, %v1177_v36, %v1181_v32  ;;  %v3641_v8 = vrot.slane %v3637_v55, 9  ;;  %v3642_v9 = vrot.slane %v3638_v56, 9  ;;  %v1078_v11 = vrot.slane %v1052_v63, 7  ;;  %v4555_v21 = vld [vmem:[%s5472_s1 + $0x88] sm:$0xff]   ;;  %v4550_v24 = vld [vmem:[%s5472_s1 + $0x130] sm:$0xff]   ;;  %v4552_v35 = vld [vmem:[%s5472_s1 + $0x138] sm:$0xff]  }
  0x2f   : > { %v1196_v41 = vsel %vm4807_vm10, %v1191_v39, %v1195_v33  ;;  %v1724_v42 = vcombine.low %v4823_v34, %v4833_v40  ;;  %v1222_v44 = vrot.slane %v1214_v37, %v4797_v52  ;;  %4164 = vmatpush3.bf16.msra.mxu0 %v4541_v38  ;;  %v1082_v12 = vrot.slane %v1060_v0, 7  ;;  %v4557_v27 = vld [vmem:[%s5472_s1 + $0x90] sm:$0xff]   ;;  %v4559_v36 = vld [vmem:[%s5472_s1 + $0x98] sm:$0xff]  }
  0x30   : > { %v1215_v43 = vcombine.low %v4833_v40, %v1196_v41  ;;  %4165 = vmatprep.subr.bf16.mxu0 %v4671_v1  ;;  %v4902_v17 = vsel %vm4888_vm2, %v3639_v3, %v1070_v6  ;;  %v4906_v18 = vsel %vm4888_vm2, %v3640_v4, %v1074_v7  ;;  %v4910_v19 = vsel %vm4888_vm2, %v3641_v8, %v1078_v11  ;;  %v4554_v41 = vld [vmem:[%s5472_s1 + $0x180] sm:$0xff]   ;;  %v4565_v53 = vld [vmem:[%s5472_s1 + $0xb0] sm:$0xff]   ;;  %v4560_v54 = vld [vmem:[%s5472_s1 + $0x198] sm:$0xff]  }
  0x31   : > { %v1083_v20 = vsel %vm4888_vm2, %v3642_v9, %v1082_v12  ;;  %v672_v22 = vshrl.u32 %v3583_v14, 16  ;;  %v675_v23 = vshll.u32 %v3583_v14, 16  ;;  %v1321_v25 = vcombine.low %v4902_v17, %v4906_v18  ;;  %v4569_v40 = vld [vmem:[%s5472_s1 + $0xc0] sm:$0xff]   ;;  %v4573_v3 = vld [vmem:[%s5472_s1 + $0xd0] sm:$0xff]   ;;  %v4568_v6 = vld [vmem:[%s5472_s1 + $0x1b8] sm:$0xff]  }
  0x32   : > { %v1229_v46 = vrot.slane %v1215_v43, %v4797_v52  ;;  %v1322_v26 = vcombine.low %v4910_v19, %v1083_v20  ;;  %v646_v29 = vcombine.high %v3583_v14, %v3583_v14  ;;  %v4561_v43 = vld [vmem:[%s5472_s1 + $0xa0] sm:$0xff]   ;;  %v1502_v0 = vcombine.low %v4906_v18, %v4910_v19  ;;  %v4575_v7 = vld [vmem:[%s5472_s1 + $0xd8] sm:$0xff]   ;;  %v4572_v12 = vld [vmem:[%s5472_s1 + $0x1c8] sm:$0xff]  }
  0x33   : > { %4166 = vmatpush3.bf16.msra.mxu0 %v4543_v45  ;;  %v674_v30 = vrot.slane %v672_v22, 6  ;;  %v677_v31 = vrot.slane %v675_v23, 7  ;;  %v1329_v32 = vrot.slane %v1321_v25, %v4797_v52  ;;  %v4570_v9 = vld [vmem:[%s5472_s1 + $0x1c0] sm:$0xff]   ;;  %v4574_v14 = vld [vmem:[%s5472_s1 + $0x1d0] sm:$0xff]   ;;  %v4576_v23 = vld [vmem:[%s5472_s1 + $0x1d8] sm:$0xff]  }
  0x34   : > { %v1230_v48 = vcombine.low %v1222_v44, %v1229_v46  ;;  %4167 = vmatprep.subr.bf16.mxu0 %v4671_v1  ;;  %v1336_v33 = vrot.slane %v1322_v26, %v4797_v52  ;;  %v681_v38 = vshll.u32 %v646_v29, 16  ;;  %v4556_v46 = vld [vmem:[%s5472_s1 + $0x188] sm:$0xff]   ;;  %v4577_v11 = vld [vmem:[%s5472_s1 + $0xe0] sm:$0xff]   ;;  %v4581_v20 = vld [vmem:[%s5472_s1 + $0xf0] sm:$0xff]  }
  0x35   : > { %v678_v37 = vor.u32 %v677_v31, %v674_v30  ;;  %v3893_v18 = vld.sshfl [vmem:[#allocation2 + $0x10] sm:$0x13 pattern:$0x76325410]  ;;  %v4583_v26 = vld [vmem:[%s5472_s1 + $0xf8] sm:$0xff]   ;;  %v4578_v30 = vld [vmem:[%s5472_s1 + $0x1e0] sm:$0xff]  }
  0x36   : > { %4236 = vmatmul.mubr.bf16.vlgmr.msra.gmra.mrb[0].mxu1 %v1230_v48  ;;  %v1337_v39 = vcombine.low %v1329_v32, %v1336_v33  ;;  %v683_v45 = vrot.slane %v681_v38, 7  ;;  %v4658_v19 = vld.sshfl [vmem:[#allocation2 + $0x8] sm:$0xf pattern:$0x76325410]  ;;  %v2752_v25 = vshll.u32 %v3893_v18, 16  ;;  %v2711_v29 = vcombine.high %v3893_v18, %v3893_v18 }
  0x37   : > { %4240 = vmatpush3.bf16.msra.mxu1 %v4538_v47  ;;  %4255 = vmatprep.mubr.msk.bf16.mxu1 %vm4672_vm0, %v4671_v1  ;;  %v679_v44 = vrot.slane %v678_v37, 2  ;;  %v4563_v47 = vld [vmem:[%s5472_s1 + $0xa8] sm:$0xff]   ;;  %v4587_v37 = vld [vmem:[%s5472_s1 + $0x240] sm:$0xff]  }
  0x38   : > { %4241 = vmatprep.subr.bf16.mxu1 %v4671_v1  ;;  %4168 = vmatpush3.bf16.msra.mxu0 %v4545_v49  ;;  %v3695_v49 = vld.sshfl [vmem:[#allocation2] sm:$0x12 pattern:$0x76325410]  ;;  %v4580_v38 = vld [vmem:[%s5472_s1 + $0x1e8] sm:$0xff]  }
  0x39   : > { %4169 = vmatprep.subr.bf16.mxu0 %v4671_v1  ;;  %v1443_v56 = vcombine.high %v3695_v49, %v3695_v49  ;;  %v3699_v60 = vrot.slane %v3695_v49, 9 }
  0x3b   : > { %4242 = vmatpush3.bf16.msra.mxu1 %v4540_v50  ;;  %v4558_v50 = vld [vmem:[%s5472_s1 + $0x190] sm:$0xff]   ;;  %v1470_v34 = vrot.slane %v1443_v56, 7 }
  0x3c   : > { %4243 = vmatprep.subr.bf16.mxu1 %v4671_v1  ;;  %4170 = vmatpush3.bf16.msra.mxu0 %v4547_v51 }
  0x3d   : > { %4171 = vmatprep.subr.bf16.mxu0 %v4671_v1  ;;  %v1471_v61 = vsel %vm4888_vm2, %v3699_v60, %v1470_v34  ;;  %v3891_v60 = vld.sshfl [vmem:[#allocation2 + $0x8] sm:$0x13 pattern:$0x76325410] }
  0x3e   : > { %v1501_v63 = vcombine.low %v1471_v61, %v4902_v17  ;;  %v4657_v17 = vld.sshfl [vmem:[#allocation2] sm:$0xf pattern:$0x76325410]  ;;  %v2724_v61 = vshll.u32 %v3891_v60, 16 }
  0x3f   : > { %4244 = vmatpush3.bf16.msra.mxu1 %v4542_v57  ;;  %v4567_v57 = vld [vmem:[%s5472_s1 + $0xb8] sm:$0xff]   ;;  %v894_v33 = vcombine.low %v4657_v17, %v4658_v19  ;;  %v3894_v34 = vld.sshfl [vmem:[#allocation2 + $0x14] sm:$0x13 pattern:$0x76325410]  ;;  %v4596_v19 = vld [vmem:[%s5472_s1 + $0x360] sm:$0xff]  }
  0x40   : > { %4245 = vmatprep.subr.bf16.mxu1 %v4671_v1  ;;  %4172 = vmatpush3.bf16.msra.mxu0 %v4549_v58  ;;  %v4562_v58 = vld [vmem:[%s5472_s1 + $0x1a0] sm:$0xff]   ;;  %v1509_v4 = vrot.slane %v1501_v63, %v4797_v52  ;;  %v2766_v63 = vshll.u32 %v3894_v34, 16 }
  0x41   : > { %4173 = vmatprep.subr.bf16.mxu0 %v4671_v1 }
  0x43   : > { %4246 = vmatpush3.bf16.msra.mxu1 %v4544_v62  ;;  %v4571_v62 = vld [vmem:[%s5472_s1 + $0xc8] sm:$0xff]  }
  0x44   : > { %4247 = vmatprep.subr.bf16.mxu1 %v4671_v1  ;;  %4174 = vmatpush3.bf16.msra.mxu0 %v4551_v2  ;;  %v4566_v2 = vld [vmem:[%s5472_s1 + $0x1b0] sm:$0xff]  }
  0x45   : > { %4179 = vmatprep.subr.bf16.mxu0 %v4671_v1 }
  0x47   : > { %4248 = vmatpush3.bf16.msra.mxu1 %v4546_v5  ;;  %4176 = vmatmul.mubr.bf16.vlgmr.msra.gmra.mrb[0].mxu0 %v1230_v48  ;;  %v684_v48 = vsel %vm4807_vm10, %v679_v44, %v683_v45  ;;  %v1516_v5 = vrot.slane %v1502_v0, %v4797_v52  ;;  %v4589_v45 = vld [vmem:[%s5472_s1 + $0x248] sm:$0xff]  }
  0x48   : > { %4249 = vmatprep.subr.bf16.mxu1 %v4671_v1  ;;  %4180 = vmatpush3.bf16.msra.mxu0 %v4553_v13  ;;  %v744_v51 = vcombine.low %v684_v48, %v4818_v28  ;;  %v759_v28 = vrot.slane %v1724_v42, %v4797_v52  ;;  %v4564_v42 = vld [vmem:[%s5472_s1 + $0x1a8] sm:$0xff]  }
  0x49   : > { %4181 = vmatprep.subr.bf16.mxu0 %v4671_v1  ;;  %4195 = vmatprep.mubr.msk.bf16.mxu0 %vm4672_vm0, %v4671_v1  ;;  %v1517_v8 = vcombine.low %v1509_v4, %v1516_v5  ;;  %v4579_v13 = vld [vmem:[%s5472_s1 + $0xe8] sm:$0xff]   ;;  %v2695_v4 = vcombine.high %v3891_v60, %v3891_v60 }
  0x4a   : > { %v752_v55 = vrot.slane %v744_v51, %v4797_v52  ;;  %v4591_v51 = vld [vmem:[%s5472_s1 + $0x250] sm:$0xff]   ;;  %v4597_v0 = vld [vmem:[%s5472_s1 + $0x268] sm:$0xff]  }
  0x4b   : > { %4250 = vmatpush3.bf16.msra.mxu1 %v4548_v15  ;;  %v3892_v15 = vld.sshfl [vmem:[#allocation2 + $0xc] sm:$0x13 pattern:$0x76325410] }
  0x4c   : > { %4251 = vmatprep.subr.bf16.mxu1 %v4671_v1  ;;  %4182 = vmatpush3.bf16.msra.mxu0 %v4555_v21  ;;  %v4987_v59 = vcombine.low %v752_v55, %v759_v28  ;;  %v2735_v21 = vshrl.u32 %v3892_v15, 16  ;;  %v2738_v22 = vshll.u32 %v3892_v15, 16  ;;  %v4593_v28 = vld [vmem:[%s5472_s1 + $0x258] sm:$0xff]  }
  0x4d   : > { %4183 = vmatprep.subr.bf16.mxu0 %v4671_v1 }
  0x4e   : > { %v2737_v31 = vrot.slane %v2735_v21, 6  ;;  %v2740_v32 = vrot.slane %v2738_v22, 7 }
  0x4f   : > { %4252 = vmatpush3.bf16.msra.mxu1 %v4550_v24  ;;  %v2749_v24 = vshrl.u32 %v3893_v18, 16  ;;  %v4601_v18 = vld [vmem:[%s5472_s1 + $0x278] sm:$0xff]  }
  0x50   : > { %4253 = vmatprep.subr.bf16.mxu1 %v4671_v1  ;;  %4184 = vmatpush3.bf16.msra.mxu0 %v4557_v27  ;;  %v2703_v27 = vcombine.high %v3892_v15, %v3892_v15 }
  0x51   : > { %4185 = vmatprep.subr.bf16.mxu0 %v4671_v1 }
  0x53   : > { %4254 = vmatpush3.bf16.msra.mxu1 %v4552_v35  ;;  %v2751_v35 = vrot.slane %v2749_v24, 6 }
  0x54   : > { %4259 = vmatprep.subr.bf16.mxu1 %v4671_v1  ;;  %4186 = vmatpush3.bf16.msra.mxu0 %v4559_v36  ;;  %v2754_v36 = vrot.slane %v2752_v25, 7  ;;  %v4605_v25 = vld [vmem:[%s5472_s1 + $0x200] sm:$0xff]  }
  0x55   : > { %4187 = vmatprep.subr.bf16.mxu0 %v4671_v1 }
  0x56   : > { %4256 = vmatmul.mubr.bf16.vlgmr.msra.gmra.mrb[0].mxu1 %v1337_v39  ;;  %v2744_v39 = vshll.u32 %v2703_v27, 16  ;;  %v2755_v44 = vor.u32 %v2754_v36, %v2751_v35  ;;  %v4609_v35 = vld [vmem:[%s5472_s1 + $0x210] sm:$0xff]  }
  0x57   : > { %4260 = vmatpush3.bf16.msra.mxu1 %v4554_v41  ;;  %4275 = vmatprep.mubr.msk.bf16.mxu1 %vm4672_vm0, %v4671_v1  ;;  %v2758_v41 = vshll.u32 %v2711_v29, 16 }
  0x58   : > { %4261 = vmatprep.subr.bf16.mxu1 %v4671_v1  ;;  %4188 = vmatpush3.bf16.msra.mxu0 %v4561_v43  ;;  %v2741_v43 = vor.u32 %v2740_v32, %v2737_v31  ;;  %v2746_v48 = vrot.slane %v2744_v39, 7  ;;  %v2756_v49 = vrot.slane %v2755_v44, 2  ;;  %v4611_v39 = vld [vmem:[%s5472_s1 + $0x218] sm:$0xff]   ;;  %v4613_v44 = vld [vmem:[%s5472_s1 + $0x220] sm:$0xff]  }
  0x59   : > { %4189 = vmatprep.subr.bf16.mxu0 %v4671_v1 }
  0x5b   : > { %4262 = vmatpush3.bf16.msra.mxu1 %v4556_v46  ;;  %v4582_v46 = vld [vmem:[%s5472_s1 + $0x1f0] sm:$0xff]  }
  0x5c   : > { %4263 = vmatprep.subr.bf16.mxu1 %v4671_v1  ;;  %4190 = vmatpush3.bf16.msra.mxu0 %v4563_v47  ;;  %v2742_v47 = vrot.slane %v2741_v43, 2  ;;  %v4606_v43 = vld [vmem:[%s5472_s1 + $0x300] sm:$0xff]  }
  0x5d   : > { %4191 = vmatprep.subr.bf16.mxu0 %v4671_v1 }
  0x5f   : > { %4264 = vmatpush3.bf16.msra.mxu1 %v4558_v50  ;;  %v2760_v50 = vrot.slane %v2758_v41, 7 }
  0x60   : > { %4265 = vmatprep.subr.bf16.mxu1 %v4671_v1  ;;  %4192 = vmatpush3.bf16.msra.mxu0 %v4565_v53  ;;  %v4584_v53 = vld [vmem:[%s5472_s1 + $0x1f8] sm:$0xff]  }
  0x61   : > { %4193 = vmatprep.subr.bf16.mxu0 %v4671_v1  ;;  %v5097_v55 = vsel %vm4807_vm10, %v2756_v49, %v2760_v50  ;;  %v4610_v49 = vld [vmem:[%s5472_s1 + $0x310] sm:$0xff]  }
  0x62   : > { %v3869_v50 = vld.sshfl [vmem:[#allocation2 + $0x10] sm:$0x12 pattern:$0x76325410] }
  0x63   : > { %4266 = vmatpush3.bf16.msra.mxu1 %v4560_v54  ;;  %v5093_v54 = vsel %vm4807_vm10, %v2742_v47, %v2746_v48  ;;  %v3867_v47 = vld.sshfl [vmem:[#allocation2 + $0x8] sm:$0x12 pattern:$0x76325410] }
  0x64   : > { %4267 = vmatprep.subr.bf16.mxu1 %v4671_v1  ;;  %4194 = vmatpush3.bf16.msra.mxu0 %v4567_v57  ;;  %v3303_v56 = vcombine.low %v5093_v54, %v5097_v55  ;;  %v4588_v57 = vld [vmem:[%s5472_s1 + $0x340] sm:$0xff]   ;;  %v3868_v48 = vld.sshfl [vmem:[#allocation2 + $0xc] sm:$0x12 pattern:$0x76325410] }
  0x65   : > { %4199 = vmatprep.subr.bf16.mxu0 %v4671_v1 }
  0x67   : > { %4268 = vmatpush3.bf16.msra.mxu1 %v4562_v58  ;;  %4196 = vmatmul.mubr.bf16.vlgmr.msra.gmra.mrb[0].mxu0 %v4987_v59  ;;  %v4595_v58 = vld [vmem:[%s5472_s1 + $0x260] sm:$0xff]  }
  0x68   : > { %4269 = vmatprep.subr.bf16.mxu1 %v4671_v1  ;;  %4200 = vmatpush3.bf16.msra.mxu0 %v4569_v40  ;;  %v4590_v40 = vld [vmem:[%s5472_s1 + $0x348] sm:$0xff]  }
  0x69   : > { %4201 = vmatprep.subr.bf16.mxu0 %v4671_v1  ;;  %4215 = vmatprep.mubr.msk.bf16.mxu0 %vm4672_vm0, %v4671_v1 }
  0x6b   : > { %4270 = vmatpush3.bf16.msra.mxu1 %v4564_v42  ;;  %v2721_v42 = vshrl.u32 %v3891_v60, 16  ;;  %v2638_v60 = vcombine.high %v3869_v50, %v3869_v50 }
  0x6c   : > { %4271 = vmatprep.subr.bf16.mxu1 %v4671_v1  ;;  %4202 = vmatpush3.bf16.msra.mxu0 %v4571_v62  ;;  %v2763_v62 = vshrl.u32 %v3894_v34, 16 }
  0x6d   : > { %4203 = vmatprep.subr.bf16.mxu0 %v4671_v1  ;;  %v2723_v5 = vrot.slane %v2721_v42, 6  ;;  %v3871_v42 = vrot.slane %v3867_v47, 9 }
  0x6f   : > { %4272 = vmatpush3.bf16.msra.mxu1 %v4566_v2  ;;  %v4592_v2 = vld [vmem:[%s5472_s1 + $0x350] sm:$0xff]  }
  0x70   : > { %4273 = vmatprep.subr.bf16.mxu1 %v4671_v1  ;;  %4204 = vmatpush3.bf16.msra.mxu0 %v4573_v3  ;;  %v4660_v3 = vld.sshfl [vmem:[#allocation2 + $0x10] sm:$0xf pattern:$0x76325410] }
  0x71   : > { %4205 = vmatprep.subr.bf16.mxu0 %v4671_v1 }
  0x73   : > { %4274 = vmatpush3.bf16.msra.mxu1 %v4568_v6  ;;  %v2726_v6 = vrot.slane %v2724_v61, 7 }
  0x74   : > { %4279 = vmatprep.subr.bf16.mxu1 %v4671_v1  ;;  %4206 = vmatpush3.bf16.msra.mxu0 %v4575_v7  ;;  %v2719_v7 = vcombine.high %v3894_v34, %v3894_v34 }
  0x75   : > { %4207 = vmatprep.subr.bf16.mxu0 %v4671_v1 }
  0x76   : > { %4276 = vmatmul.mubr.bf16.vlgmr.msra.gmra.mrb[0].mxu1 %v1517_v8  ;;  %v2765_v8 = vrot.slane %v2763_v62, 6  ;;  %v2772_v17 = vshll.u32 %v2719_v7, 16  ;;  %v3872_v62 = vrot.slane %v3868_v48, 9 }
  0x77   : > { %4280 = vmatpush3.bf16.msra.mxu1 %v4570_v9  ;;  %4295 = vmatprep.mubr.msk.bf16.mxu1 %vm4672_vm0, %v4671_v1  ;;  %v2768_v9 = vrot.slane %v2766_v63, 7  ;;  %v3873_v63 = vrot.slane %v3869_v50, 9  ;;  %v4630_v50 = vld [vmem:[%s5472_s1 + $0x3a0] sm:$0xff]  }
  0x78   : > { %4281 = vmatprep.subr.bf16.mxu1 %v4671_v1  ;;  %4208 = vmatpush3.bf16.msra.mxu0 %v4577_v11  ;;  %v4599_v11 = vld [vmem:[%s5472_s1 + $0x270] sm:$0xff]   ;;  %v2774_v24 = vrot.slane %v2772_v17, 7 }
  0x79   : > { %4209 = vmatprep.subr.bf16.mxu0 %v4671_v1  ;;  %v2769_v15 = vor.u32 %v2768_v9, %v2765_v8  ;;  %v4616_v8 = vld [vmem:[%s5472_s1 + $0x328] sm:$0xff]  }
  0x7b   : > { %4282 = vmatpush3.bf16.msra.mxu1 %v4572_v12  ;;  %v2727_v12 = vor.u32 %v2726_v6, %v2723_v5  ;;  %v4621_v5 = vld [vmem:[%s5472_s1 + $0x280] sm:$0xff]  }
  0x7c   : > { %4283 = vmatprep.subr.bf16.mxu1 %v4671_v1  ;;  %4210 = vmatpush3.bf16.msra.mxu0 %v4579_v13  ;;  %v2730_v13 = vshll.u32 %v2695_v4, 16  ;;  %v3811_v6 = vld.sshfl [vmem:[#allocation2 + $0x4] sm:$0x13 pattern:$0x76325410] }
  0x7d   : > { %4211 = vmatprep.subr.bf16.mxu0 %v4671_v1 }
  0x7e   : > { %v2732_v21 = vrot.slane %v2730_v13, 7  ;;  %v4623_v13 = vld [vmem:[%s5472_s1 + $0x288] sm:$0xff]  }
  0x7f   : > { %4284 = vmatpush3.bf16.msra.mxu1 %v4574_v14  ;;  %v4594_v14 = vld [vmem:[%s5472_s1 + $0x358] sm:$0xff]  }
  0x80   : > { %4285 = vmatprep.subr.bf16.mxu1 %v4671_v1  ;;  %4212 = vmatpush3.bf16.msra.mxu0 %v4581_v20  ;;  %v2728_v20 = vrot.slane %v2727_v12, 2 }
  0x81   : > { %4213 = vmatprep.subr.bf16.mxu0 %v4671_v1 }
  0x82   : > { %v5154_v27 = vsel %vm4807_vm10, %v2728_v20, %v2732_v21  ;;  %v4625_v20 = vld [vmem:[%s5472_s1 + $0x290] sm:$0xff]   ;;  %v2233_v21 = vcombine.high %v3811_v6, %v3811_v6 }
  0x83   : > { %4286 = vmatpush3.bf16.msra.mxu1 %v4576_v23  ;;  %v2770_v23 = vrot.slane %v2769_v15, 2  ;;  %v2793_v31 = vcombine.low %v5154_v27, %v5093_v54  ;;  %v2262_v15 = vshll.u32 %v3811_v6, 16 }
  0x84   : > { %4287 = vmatprep.subr.bf16.mxu1 %v4671_v1  ;;  %4214 = vmatpush3.bf16.msra.mxu0 %v4583_v26  ;;  %v4598_v26 = vld [vmem:[%s5472_s1 + $0x368] sm:$0xff]  }
  0x85   : > { %4299 = vmatprep.subr.bf16.mxu0 %v4671_v1  ;;  %v2775_v29 = vsel %vm4807_vm10, %v2770_v23, %v2774_v24  ;;  %v2801_v36 = vrot.slane %v2793_v31, %v4797_v52  ;;  %v2264_v23 = vrot.slane %v2262_v15, 7  ;;  %v2268_v31 = vshll.u32 %v2233_v21, 16 }
  0x86   : > { %v2794_v32 = vcombine.low %v5097_v55, %v2775_v29  ;;  %v4627_v29 = vld [vmem:[%s5472_s1 + $0x298] sm:$0xff]   ;;  %v4637_v55 = vld [vmem:[%s5472_s1 + $0x2c0] sm:$0xff]  }
  0x87   : > { %4288 = vmatpush3.bf16.msra.mxu1 %v4578_v30  ;;  %4216 = vmatmul.mubr.bf16.vlgmr.msra.gmra.mrb[0].mxu0 %v894_v33  ;;  %v4607_v30 = vld [vmem:[%s5472_s1 + $0x208] sm:$0xff]   ;;  %v4600_v33 = vld [vmem:[%s5472_s1 + $0x370] sm:$0xff]  }
  0x88   : > { %4289 = vmatprep.subr.bf16.mxu1 %v4671_v1  ;;  %4300 = vmatpush3.bf16.msra.mxu0 %v4587_v37  ;;  %v2808_v37 = vrot.slane %v2794_v32, %v4797_v52 }
  0x89   : > { %4301 = vmatprep.subr.bf16.mxu0 %v4671_v1  ;;  %4315 = vmatprep.mubr.msk.bf16.mxu0 %vm4672_vm0, %v4671_v1 }
  0x8a   : > { %v2809_v41 = vcombine.low %v2801_v36, %v2808_v37  ;;  %v2270_v37 = vrot.slane %v2268_v31, 7 }
  0x8b   : > { %4290 = vmatpush3.bf16.msra.mxu1 %v4580_v38  ;;  %v4602_v38 = vld [vmem:[%s5472_s1 + $0x378] sm:$0xff]  }
  0x8c   : > { %4291 = vmatprep.subr.bf16.mxu1 %v4671_v1  ;;  %4302 = vmatpush3.bf16.msra.mxu0 %v4589_v45  ;;  %v4608_v45 = vld [vmem:[%s5472_s1 + $0x308] sm:$0xff]  }
  0x8d   : > { %4303 = vmatprep.subr.bf16.mxu0 %v4671_v1 }
  0x8f   : > { %4292 = vmatpush3.bf16.msra.mxu1 %v4582_v46  ;;  %v4615_v46 = vld [vmem:[%s5472_s1 + $0x228] sm:$0xff]  }
  0x90   : > { %4293 = vmatprep.subr.bf16.mxu1 %v4671_v1  ;;  %4304 = vmatpush3.bf16.msra.mxu0 %v4591_v51  ;;  %v4617_v51 = vld [vmem:[%s5472_s1 + $0x230] sm:$0xff]  }
  0x91   : > { %4305 = vmatprep.subr.bf16.mxu0 %v4671_v1 }
  0x93   : > { %4294 = vmatpush3.bf16.msra.mxu1 %v4584_v53  ;;  %v3870_v53 = vld.sshfl [vmem:[#allocation2 + $0x14] sm:$0x12 pattern:$0x76325410] }
  0x94   : > { %4379 = vmatprep.subr.bf16.mxu1 %v4671_v1  ;;  %4306 = vmatpush3.bf16.msra.mxu0 %v4593_v28  ;;  %v2622_v28 = vcombine.high %v3867_v47, %v3867_v47  ;;  %v2646_v34 = vcombine.high %v3870_v53, %v3870_v53 }
  0x95   : > { %4307 = vmatprep.subr.bf16.mxu0 %v4671_v1 }
  0x96   : > { %4296 = vmatmul.mubr.bf16.vlgmr.msra.gmra.mrb[0].mxu1 %v4987_v59  ;;  %v4659_v59 = vld.sshfl [vmem:[#allocation2 + $0x8] sm:$0xf pattern:$0x76325410]  ;;  %v2649_v61 = vrot.slane %v2622_v28, 7  ;;  %v2661_v4 = vrot.slane %v2646_v34, 7 }
  0x97   : > { %4380 = vmatpush3.bf16.msra.mxu1 %v4588_v57  ;;  %4395 = vmatprep.mubr.msk.bf16.mxu1 %vm4672_vm0, %v4671_v1  ;;  %v2020_v22 = vcombine.low %v4659_v59, %v4660_v3  ;;  %v4612_v57 = vld [vmem:[%s5472_s1 + $0x318] sm:$0xff]   ;;  %v2657_v59 = vrot.slane %v2638_v60, 7  ;;  %v3874_v3 = vrot.slane %v3870_v53, 9  ;;  %v4641_v34 = vld [vmem:[%s5472_s1 + $0x2d0] sm:$0xff]  }
  0x98   : > { %4381 = vmatprep.subr.bf16.mxu1 %v4671_v1  ;;  %4308 = vmatpush3.bf16.msra.mxu0 %v4595_v58  ;;  %v2630_v58 = vcombine.high %v3868_v48, %v3868_v48  ;;  %v5230_v7 = vsel %vm4888_vm2, %v3871_v42, %v2649_v61  ;;  %v4636_v61 = vld [vmem:[%s5472_s1 + $0x3b8] sm:$0xff]  }
  0x99   : > { %4309 = vmatprep.subr.bf16.mxu0 %v4671_v1  ;;  %v2662_v12 = vsel %vm4888_vm2, %v3874_v3, %v2661_v4  ;;  %v4642_v3 = vld [vmem:[%s5472_s1 + $0x3d0] sm:$0xff]   ;;  %v4661_v4 = vld.sshfl [vmem:[#allocation2 + $0x4] sm:$0xf pattern:$0x76325410] }
  0x9b   : > { %4382 = vmatpush3.bf16.msra.mxu1 %v4590_v40  ;;  %v4619_v40 = vld [vmem:[%s5472_s1 + $0x238] sm:$0xff]  }
  0x9c   : > { %4383 = vmatprep.subr.bf16.mxu1 %v4671_v1  ;;  %4310 = vmatpush3.bf16.msra.mxu0 %v4597_v0  ;;  %v4614_v0 = vld [vmem:[%s5472_s1 + $0x320] sm:$0xff]  }
  0x9d   : > { %4311 = vmatprep.subr.bf16.mxu0 %v4671_v1 }
  0x9f   : > { %4384 = vmatpush3.bf16.msra.mxu1 %v4592_v2  ;;  %v2653_v2 = vrot.slane %v2630_v58, 7 }
  0xa0   : > { %4385 = vmatprep.subr.bf16.mxu1 %v4671_v1  ;;  %4312 = vmatpush3.bf16.msra.mxu0 %v4599_v11  ;;  %v5241_v11 = vsel %vm4888_vm2, %v3873_v63, %v2657_v59  ;;  %v4647_v59 = vld [vmem:[%s5472_s1 + $0x2e8] sm:$0xff]  }
  0xa1   : > { %4313 = vmatprep.subr.bf16.mxu0 %v4671_v1  ;;  %v5237_v9 = vsel %vm4888_vm2, %v3872_v62, %v2653_v2  ;;  %v4643_v62 = vld [vmem:[%s5472_s1 + $0x2d8] sm:$0xff]   ;;  %v4640_v2 = vld [vmem:[%s5472_s1 + $0x3c8] sm:$0xff]  }
  0xa2   : > { %v2900_v17 = vcombine.low %v5230_v7, %v5237_v9  ;;  %v3081_v60 = vcombine.low %v5237_v9, %v5241_v11  ;;  %v4646_v9 = vld [vmem:[%s5472_s1 + $0x3e0] sm:$0xff]  }
  0xa3   : > { %4386 = vmatpush3.bf16.msra.mxu1 %v4594_v14  ;;  %v2259_v14 = vshrl.u32 %v3811_v6, 16  ;;  %v4649_v6 = vld [vmem:[%s5472_s1 + $0x2f0] sm:$0xff]  }
  0xa4   : > { %4387 = vmatprep.subr.bf16.mxu1 %v4671_v1  ;;  %4314 = vmatpush3.bf16.msra.mxu0 %v4601_v18  ;;  %v2901_v18 = vcombine.low %v5241_v11, %v2662_v12  ;;  %v2908_v24 = vrot.slane %v2900_v17, %v4797_v52  ;;  %v3095_v42 = vrot.slane %v3081_v60, %v4797_v52  ;;  %v4648_v12 = vld [vmem:[%s5472_s1 + $0x3e8] sm:$0xff]  }
  0xa5   : > { %4319 = vmatprep.subr.bf16.mxu0 %v4671_v1 }
  0xa7   : > { %4388 = vmatpush3.bf16.msra.mxu1 %v4596_v19  ;;  %4316 = vmatmul.mubr.bf16.vlgmr.msra.gmra.mrb[4].mxu0 %v2020_v22  ;;  %v4618_v19 = vld [vmem:[%s5472_s1 + $0x330] sm:$0xff]   ;;  %v2261_v22 = vrot.slane %v2259_v14, 6  ;;  %v4652_v14 = vld [vmem:[%s5472_s1 + $0x3f8] sm:$0xff]  }
  0xa8   : > { %4389 = vmatprep.subr.bf16.mxu1 %v4671_v1  ;;  %4320 = vmatpush3.bf16.msra.mxu0 %v4605_v25  ;;  %v2915_v25 = vrot.slane %v2901_v18, %v4797_v52 }
  0xa9   : > { %4321 = vmatprep.subr.bf16.mxu0 %v4671_v1  ;;  %4335 = vmatprep.mubr.msk.bf16.mxu0 %vm4672_vm0, %v4671_v1 }
  0xaa   : > { %v2916_v32 = vcombine.low %v2908_v24, %v2915_v25 }
  0xab   : > { %4390 = vmatpush3.bf16.msra.mxu1 %v4598_v26  ;;  %v4620_v26 = vld [vmem:[%s5472_s1 + $0x338] sm:$0xff]  }
  0xac   : > { %4391 = vmatprep.subr.bf16.mxu1 %v4671_v1  ;;  %4322 = vmatpush3.bf16.msra.mxu0 %v4607_v30  ;;  %v2265_v30 = vor.u32 %v2264_v23, %v2261_v22 }
  0xad   : > { %4323 = vmatprep.subr.bf16.mxu0 %v4671_v1 }
  0xae   : > { %v2266_v36 = vrot.slane %v2265_v30, 2 }
  0xaf   : > { %4392 = vmatpush3.bf16.msra.mxu1 %v4600_v33  ;;  %v4622_v33 = vld [vmem:[%s5472_s1 + $0x380] sm:$0xff]  }
  0xb0   : > { %4393 = vmatprep.subr.bf16.mxu1 %v4671_v1  ;;  %4324 = vmatpush3.bf16.msra.mxu0 %v4609_v35  ;;  %v4629_v35 = vld [vmem:[%s5472_s1 + $0x2a0] sm:$0xff]  }
  0xb1   : > { %4325 = vmatprep.subr.bf16.mxu0 %v4671_v1 }
  0xb3   : > { %4394 = vmatpush3.bf16.msra.mxu1 %v4602_v38  ;;  %v4624_v38 = vld [vmem:[%s5472_s1 + $0x388] sm:$0xff]  }
  0xb4   : > { %4399 = vmatprep.subr.bf16.mxu1 %v4671_v1  ;;  %4326 = vmatpush3.bf16.msra.mxu0 %v4611_v39  ;;  %v4631_v39 = vld [vmem:[%s5472_s1 + $0x2a8] sm:$0xff]  }
  0xb5   : > { %4327 = vmatprep.subr.bf16.mxu0 %v4671_v1 }
  0xb6   : > { %4396 = vmatmul.mubr.bf16.vlgmr.msra.gmra.mrb[4].mxu1 %v2809_v41 }
  0xb7   : > { %4400 = vmatpush3.bf16.msra.mxu1 %v4606_v43  ;;  %4415 = vmatprep.mubr.msk.bf16.mxu1 %vm4672_vm0, %v4671_v1  ;;  %v4626_v43 = vld [vmem:[%s5472_s1 + $0x390] sm:$0xff]  }
  0xb8   : > { %4401 = vmatprep.subr.bf16.mxu1 %v4671_v1  ;;  %4328 = vmatpush3.bf16.msra.mxu0 %v4613_v44 }
  0xb9   : > { %4329 = vmatprep.subr.bf16.mxu0 %v4671_v1 }
  0xbb   : > { %4402 = vmatpush3.bf16.msra.mxu1 %v4608_v45  ;;  %v4633_v45 = vld [vmem:[%s5472_s1 + $0x2b0] sm:$0xff]  }
  0xbc   : > { %4403 = vmatprep.subr.bf16.mxu1 %v4671_v1  ;;  %4330 = vmatpush3.bf16.msra.mxu0 %v4615_v46  ;;  %v3927_v46 = vld.sshfl [vmem:[#allocation2 + $0x4] sm:$0x12 pattern:$0x76325410] }
  0xbd   : > { %4331 = vmatprep.subr.bf16.mxu0 %v4671_v1  ;;  %v3022_v48 = vcombine.high %v3927_v46, %v3927_v46  ;;  %v3931_v53 = vrot.slane %v3927_v46, 9 }
  0xbf   : > { %4404 = vmatpush3.bf16.msra.mxu1 %v4610_v49  ;;  %v4635_v49 = vld [vmem:[%s5472_s1 + $0x2b8] sm:$0xff]   ;;  %v3049_v54 = vrot.slane %v3022_v48, 7 }
  0xc0   : > { %4405 = vmatprep.subr.bf16.mxu1 %v4671_v1  ;;  %4332 = vmatpush3.bf16.msra.mxu0 %v4617_v51 }
  0xc1   : > { %4333 = vmatprep.subr.bf16.mxu0 %v4671_v1  ;;  %v3050_v28 = vsel %vm4888_vm2, %v3931_v53, %v3049_v54 }
  0xc2   : > { %v3080_v58 = vcombine.low %v3050_v28, %v5230_v7  ;;  %v4644_v7 = vld [vmem:[%s5472_s1 + $0x3d8] sm:$0xff]  }
  0xc3   : > { %4406 = vmatpush3.bf16.msra.mxu1 %v4612_v57  ;;  %v4639_v57 = vld [vmem:[%s5472_s1 + $0x2c8] sm:$0xff]  }
  0xc4   : > { %4407 = vmatprep.subr.bf16.mxu1 %v4671_v1  ;;  %4334 = vmatpush3.bf16.msra.mxu0 %v4619_v40  ;;  %v3088_v40 = vrot.slane %v3080_v58, %v4797_v52 }
  0xc5   : > { %4339 = vmatprep.subr.bf16.mxu0 %v4671_v1 }
  0xc6   : > { %v3096_v63 = vcombine.low %v3088_v40, %v3095_v42 }
  0xc7   : > { %4408 = vmatpush3.bf16.msra.mxu1 %v4614_v0  ;;  %4336 = vmatmul.mubr.bf16.vlgmr.msra.gmra.mrb[4].mxu0 %v2809_v41  ;;  %v2271_v41 = vsel %vm4807_vm10, %v2266_v36, %v2270_v37  ;;  %v4645_v0 = vld [vmem:[%s5472_s1 + $0x2e0] sm:$0xff]  }
  0xc8   : > { %4409 = vmatprep.subr.bf16.mxu1 %v4671_v1  ;;  %4340 = vmatpush3.bf16.msra.mxu0 %v4621_v5  ;;  %v2331_v44 = vcombine.low %v2271_v41, %v5154_v27  ;;  %v2346_v27 = vrot.slane %v3303_v56, %v4797_v52  ;;  %v4632_v56 = vld [vmem:[%s5472_s1 + $0x3a8] sm:$0xff]  }
  0xc9   : > { %4341 = vmatprep.subr.bf16.mxu0 %v4671_v1  ;;  %4355 = vmatprep.mubr.msk.bf16.mxu0 %vm4672_vm0, %v4671_v1  ;;  %v4662_v5 = vld.sshfl [vmem:[#allocation2 + $0xc] sm:$0xf pattern:$0x76325410] }
  0xca   : > { %v2339_v47 = vrot.slane %v2331_v44, %v4797_v52  ;;  %v4638_v52 = vld [vmem:[%s5472_s1 + $0x3c0] sm:$0xff]   ;;  %v2481_v11 = vcombine.low %v4661_v4, %v4662_v5 }
  0xcb   : > { %4410 = vmatpush3.bf16.msra.mxu1 %v4616_v8  ;;  %v4651_v8 = vld [vmem:[%s5472_s1 + $0x2f8] sm:$0xff]  }
  0xcc   : > { %4411 = vmatprep.subr.bf16.mxu1 %v4671_v1  ;;  %4342 = vmatpush3.bf16.msra.mxu0 %v4623_v13  ;;  %v5318_v51 = vcombine.low %v2339_v47, %v2346_v27  ;;  %v4650_v13 = vld [vmem:[%s5472_s1 + $0x3f0] sm:$0xff]  }
  0xcd   : > { %4343 = vmatprep.subr.bf16.mxu0 %v4671_v1 }
  0xcf   : > { %4412 = vmatpush3.bf16.msra.mxu1 %v4618_v19 }
  0xd0   : > { %4413 = vmatprep.subr.bf16.mxu1 %v4671_v1  ;;  %4344 = vmatpush3.bf16.msra.mxu0 %v4625_v20 }
  0xd1   : > { %4345 = vmatprep.subr.bf16.mxu0 %v4671_v1 }
  0xd3   : > { %4414 = vmatpush3.bf16.msra.mxu1 %v4620_v26 }
  0xd4   : > { %4419 = vmatprep.subr.bf16.mxu1 %v4671_v1  ;;  %4346 = vmatpush3.bf16.msra.mxu0 %v4627_v29 }
  0xd5   : > { %4347 = vmatprep.subr.bf16.mxu0 %v4671_v1 }
  0xd6   : > { %4416 = vmatmul.mubr.bf16.vlgmr.msra.gmra.mrb[4].mxu1 %v2916_v32 }
  0xd7   : > { %4420 = vmatpush3.bf16.msra.mxu1 %v4622_v33  ;;  %4435 = vmatprep.mubr.msk.bf16.mxu1 %vm4672_vm0, %v4671_v1 }
  0xd8   : > { %4421 = vmatprep.subr.bf16.mxu1 %v4671_v1  ;;  %4348 = vmatpush3.bf16.msra.mxu0 %v4629_v35 }
  0xd9   : > { %4349 = vmatprep.subr.bf16.mxu0 %v4671_v1 }
  0xdb   : > { %4422 = vmatpush3.bf16.msra.mxu1 %v4624_v38 }
  0xdc   : > { %4423 = vmatprep.subr.bf16.mxu1 %v4671_v1  ;;  %4350 = vmatpush3.bf16.msra.mxu0 %v4631_v39 }
  0xdd   : > { %4351 = vmatprep.subr.bf16.mxu0 %v4671_v1 }
  0xdf   : > { %4424 = vmatpush3.bf16.msra.mxu1 %v4626_v43 }
  0xe0   : > { %4425 = vmatprep.subr.bf16.mxu1 %v4671_v1  ;;  %4352 = vmatpush3.bf16.msra.mxu0 %v4633_v45 }
  0xe1   : > { %4353 = vmatprep.subr.bf16.mxu0 %v4671_v1 }
  0xe3   : > { %4426 = vmatpush3.bf16.msra.mxu1 %v4628_v16 }
  0xe4   : > { %4427 = vmatprep.subr.bf16.mxu1 %v4671_v1  ;;  %4354 = vmatpush3.bf16.msra.mxu0 %v4635_v49 }
  0xe5   : > { %4359 = vmatprep.subr.bf16.mxu0 %v4671_v1 }
  0xe7   : > { %4428 = vmatpush3.bf16.msra.mxu1 %v4630_v50  ;;  %4356 = vmatmul.mubr.bf16.vlgmr.msra.gmra.mrb[4].mxu0 %v5318_v51 }
  0xe8   : > { %4429 = vmatprep.subr.bf16.mxu1 %v4671_v1  ;;  %4360 = vmatpush3.bf16.msra.mxu0 %v4637_v55 }
  0xe9   : > { %4361 = vmatprep.subr.bf16.mxu0 %v4671_v1  ;;  %4375 = vmatprep.mubr.msk.bf16.mxu0 %vm4672_vm0, %v4671_v1 }
  0xeb   : > { %4430 = vmatpush3.bf16.msra.mxu1 %v4632_v56 }
  0xec   : > { %4431 = vmatprep.subr.bf16.mxu1 %v4671_v1  ;;  %4362 = vmatpush3.bf16.msra.mxu0 %v4639_v57 }
  0xed   : > { %4363 = vmatprep.subr.bf16.mxu0 %v4671_v1 }
  0xef   : > { %4432 = vmatpush3.bf16.msra.mxu1 %v4634_v10 }
  0xf0   : > { %4433 = vmatprep.subr.bf16.mxu1 %v4671_v1  ;;  %4364 = vmatpush3.bf16.msra.mxu0 %v4641_v34 }
  0xf1   : > { %4365 = vmatprep.subr.bf16.mxu0 %v4671_v1 }
  0xf3   : > { %4434 = vmatpush3.bf16.msra.mxu1 %v4636_v61 }
  0xf4   : > { %4439 = vmatprep.subr.bf16.mxu1 %v4671_v1  ;;  %4366 = vmatpush3.bf16.msra.mxu0 %v4643_v62 }
  0xf5   : > { %4367 = vmatprep.subr.bf16.mxu0 %v4671_v1 }
  0xf6   : > { %4436 = vmatmul.mubr.bf16.vlgmr.msra.gmra.mrb[4].mxu1 %v3096_v63 }
  0xf7   : > { %4440 = vmatpush3.bf16.msra.mxu1 %v4638_v52  ;;  %4455 = vmatprep.mubr.msk.bf16.mxu1 %vm4672_vm0, %v4671_v1  ;;  %vm993_vm0 = vcmask 519168  }
  0xf8   : > { %4441 = vmatprep.subr.bf16.mxu1 %v4671_v1  ;;  %4368 = vmatpush3.bf16.msra.mxu0 %v4645_v0 }
  0xf9   : > { %4369 = vmatprep.subr.bf16.mxu0 %v4671_v1 }
  0xfb   : > { %4442 = vmatpush3.bf16.msra.mxu1 %v4640_v2 }
  0xfc   : > { %4443 = vmatprep.subr.bf16.mxu1 %v4671_v1  ;;  %4370 = vmatpush3.bf16.msra.mxu0 %v4647_v59 }
  0xfd   : > { %4371 = vmatprep.subr.bf16.mxu0 %v4671_v1 }
  0xff   : > { %4444 = vmatpush3.bf16.msra.mxu1 %v4642_v3 }
 0x100   : > { %4445 = vmatprep.subr.bf16.mxu1 %v4671_v1  ;;  %4372 = vmatpush3.bf16.msra.mxu0 %v4649_v6 }
 0x101   : > { %4373 = vmatprep.subr.bf16.mxu0 %v4671_v1 }
 0x103   : > { %4446 = vmatpush3.bf16.msra.mxu1 %v4644_v7 }
 0x104   : > { %4447 = vmatprep.subr.bf16.mxu1 %v4671_v1  ;;  %4374 = vmatpush3.bf16.msra.mxu0 %v4651_v8 }
 0x107   : > { %4448 = vmatpush3.bf16.msra.mxu1 %v4646_v9  ;;  %4376 = vmatmul.mubr.bf16.vlgmr.msra.gmra.mrb[4].mxu0 %v2481_v11 }
 0x108   : > { %4449 = vmatprep.subr.bf16.mxu1 %v4671_v1 }
 0x10b   : > { %4450 = vmatpush3.bf16.msra.mxu1 %v4648_v12 }
 0x10c   : > { %4451 = vmatprep.subr.bf16.mxu1 %v4671_v1 }
 0x10f   : > { %4452 = vmatpush3.bf16.msra.mxu1 %v4650_v13 }
 0x110   : > { %4453 = vmatprep.subr.bf16.mxu1 %v4671_v1 }
 0x113   : > { %4454 = vmatpush3.bf16.msra.mxu1 %v4652_v14 }
 0x116   : > { %4456 = vmatmul.mubr.bf16.vlgmr.msra.gmra.mrb[4].mxu1 %v5318_v51 }
 0x15a   : > { %v978_v15 = vpop.f32.mrb[0].mxu0 }
 0x15b   : > { %v989_v17 = vcombine.high %v978_v15, %v978_v15  ;;  %994 = vst.msk [vmem:[%s5414_s28] sm:$0xf] %vm993_vm0, %v978_v15  ;;  %v1009_v1 = vmul.f32 %v978_v15, %v978_v15  ;;  %v4217_v18 = vpop.f32.mrb[1].mxu0  ;;  %v999_v20 = vsel %vm998_vm3, %v978_v15, 0.0 }
 0x15c   : > { %v981_v19 = vpop.f32.mrb[2].mxu0 }
 0x15d   : > { %995 = vst.msk [vmem:[%s5414_s28 + $0x4] sm:$0xf] %vm993_vm0, %v989_v17  ;;  %v990_v21 = vcombine.high %v981_v19, %v981_v19  ;;  %996 = vst.msk [vmem:[%s5414_s28 + $0x8] sm:$0xf] %vm993_vm0, %v981_v19  ;;  %v1000_v22 = vsel %vm998_vm3, %v981_v19, 0.0  ;;  %v1010_v23 = vmul.f32 %v981_v19, %v981_v19  ;;  %v4218_v24 = vpop.f32.mrb[3].mxu0 }
 0x15e   : > { %v1001_v25 = vadd.f32 %v1000_v22, %v999_v20  ;;  %v1011_v26 = vsel %vm998_vm3, %v1009_v1, 0.0 }
 0x15f   : > { %997 = vst.msk [vmem:[%s5414_s28 + $0xc] sm:$0xf] %vm993_vm0, %v990_v21  ;;  %v1012_v29 = vsel %vm998_vm3, %v1010_v23, 0.0 }
 0x160   : > { %v1013_v30 = vadd.f32 %v1012_v29, %v1011_v26  ;;  %v1002_v31 = vrot.slane %v1001_v25, 4 }
 0x162   : > { %v1014_v32 = vrot.slane %v1013_v30, 4  ;;  %v1003_v33 = vadd.f32 %v1002_v31, %v1001_v25 }
 0x164   : > { %v1015_v38 = vadd.f32 %v1014_v32, %v1013_v30  ;;  %v1004_v47 = vrot.slane %v1003_v33, 2 }
 0x166   : > { %v1016_v50 = vrot.slane %v1015_v38, 2  ;;  %v1005_v54 = vadd.f32 %v1004_v47, %v1003_v33 }
 0x168   : > { %v1017_v28 = vadd.f32 %v1016_v50, %v1015_v38  ;;  %v1006_v60 = vrot.slane %v1005_v54, 1 }
 0x169   : > { %v1823_v35 = vpop.f32.mrb[0].mxu1 }
 0x16a   : > { %v1834_v36 = vcombine.high %v1823_v35, %v1823_v35  ;;  %3755 = vst.msk [vmem:[%s5414_s28 + $0x10] sm:$0xf] %vm993_vm0, %v1823_v35  ;;  %v4297_v37 = vpop.f32.mrb[1].mxu1  ;;  %v1853_v39 = vmul.f32 %v1823_v35, %v1823_v35  ;;  %v1843_v43 = vsel %vm998_vm3, %v1823_v35, 0.0  ;;  %v1018_v40 = vrot.slane %v1017_v28, 1 }
 0x16b   : > { %v1826_v41 = vpop.f32.mrb[2].mxu1  ;;  %v1007_v62 = vadd.f32 %v1006_v60, %v1005_v54 }
 0x16c   : > { %3756 = vst.msk [vmem:[%s5414_s28 + $0x14] sm:$0xf] %vm993_vm0, %v1834_v36  ;;  %v1835_v44 = vcombine.high %v1826_v41, %v1826_v41  ;;  %3757 = vst.msk [vmem:[%s5414_s28 + $0x18] sm:$0xf] %vm993_vm0, %v1826_v41  ;;  %v1844_v45 = vsel %vm998_vm3, %v1826_v41, 0.0  ;;  %v1854_v46 = vmul.f32 %v1826_v41, %v1826_v41  ;;  %v4298_v16 = vpop.f32.mrb[3].mxu1  ;;  %v1019_v0 = vadd.f32 %v1018_v40, %v1017_v28 }
 0x16d   : > { %v1845_v27 = vadd.f32 %v1844_v45, %v1843_v43  ;;  %v1855_v48 = vsel %vm998_vm3, %v1853_v39, 0.0 }
 0x16e   : > { %3758 = vst.msk [vmem:[%s5414_s28 + $0x1c] sm:$0xf] %vm993_vm0, %v1835_v44  ;;  %v1856_v49 = vsel %vm998_vm3, %v1854_v46, 0.0 }
 0x16f   : > { %v1846_v51 = vrot.slane %v1845_v27, 4  ;;  %v1857_v53 = vadd.f32 %v1856_v49, %v1855_v48 }
 0x171   : > { %v1847_v55 = vadd.f32 %v1846_v51, %v1845_v27  ;;  %v1858_v56 = vrot.slane %v1857_v53, 4 }
 0x173   : > { %v1848_v57 = vrot.slane %v1847_v55, 2  ;;  %v1859_v58 = vadd.f32 %v1858_v56, %v1857_v53 }
 0x175   : > { %v1849_v10 = vadd.f32 %v1848_v57, %v1847_v55  ;;  %v1860_v34 = vrot.slane %v1859_v58, 2 }
 0x177   : > { %v1850_v42 = vrot.slane %v1849_v10, 1  ;;  %v1861_v61 = vadd.f32 %v1860_v34, %v1859_v58 }
 0x179   : > { %v1851_v63 = vadd.f32 %v1850_v42, %v1849_v10  ;;  %v1862_v52 = vrot.slane %v1861_v61, 1 }
 0x17b   : > { %v1852_v2 = vadd.f32 %v1851_v63, %v1007_v62  ;;  %v1863_v59 = vadd.f32 %v1862_v52, %v1861_v61 }
 0x17d   : > { %v1864_v3 = vadd.f32 %v1863_v59, %v1019_v0 }
 0x1da   : > { %v2565_v4 = vpop.f32.mrb[4].mxu0 }
 0x1db   : > { %v2576_v5 = vcombine.high %v2565_v4, %v2565_v4  ;;  %3863 = vst.msk [vmem:[%s5414_s28 + $0x20] sm:$0xf] %vm993_vm0, %v2565_v4  ;;  %v2595_v6 = vmul.f32 %v2565_v4, %v2565_v4  ;;  %v4377_v7 = vpop.f32.mrb[5].mxu0  ;;  %v2585_v9 = vsel %vm998_vm3, %v2565_v4, 0.0 }
 0x1dc   : > { %v2568_v8 = vpop.f32.mrb[6].mxu0 }
 0x1dd   : > { %3864 = vst.msk [vmem:[%s5414_s28 + $0x24] sm:$0xf] %vm993_vm0, %v2576_v5  ;;  %v2577_v11 = vcombine.high %v2568_v8, %v2568_v8  ;;  %3865 = vst.msk [vmem:[%s5414_s28 + $0x28] sm:$0xf] %vm993_vm0, %v2568_v8  ;;  %v2586_v12 = vsel %vm998_vm3, %v2568_v8, 0.0  ;;  %v2596_v13 = vmul.f32 %v2568_v8, %v2568_v8  ;;  %v4378_v14 = vpop.f32.mrb[7].mxu0 }
 0x1de   : > { %v2587_v15 = vadd.f32 %v2586_v12, %v2585_v9  ;;  %v2597_v17 = vsel %vm998_vm3, %v2595_v6, 0.0 }
 0x1df   : > { %3866 = vst.msk [vmem:[%s5414_s28 + $0x2c] sm:$0xf] %vm993_vm0, %v2577_v11  ;;  %v2598_v1 = vsel %vm998_vm3, %v2596_v13, 0.0 }
 0x1e0   : > { %v2588_v18 = vrot.slane %v2587_v15, 4  ;;  %v2599_v19 = vadd.f32 %v2598_v1, %v2597_v17 }
 0x1e2   : > { %v2589_v20 = vadd.f32 %v2588_v18, %v2587_v15  ;;  %v2600_v21 = vrot.slane %v2599_v19, 4 }
 0x1e4   : > { %v2590_v22 = vrot.slane %v2589_v20, 2  ;;  %v2601_v23 = vadd.f32 %v2600_v21, %v2599_v19 }
 0x1e6   : > { %v2591_v24 = vadd.f32 %v2590_v22, %v2589_v20  ;;  %v2602_v25 = vrot.slane %v2601_v23, 2 }
 0x1e8   : > { %v2592_v26 = vrot.slane %v2591_v24, 1  ;;  %v2603_v29 = vadd.f32 %v2602_v25, %v2601_v23 }
 0x1e9   : > { %v3402_v30 = vpop.f32.mrb[4].mxu1 }
 0x1ea   : > { %v2593_v31 = vadd.f32 %v2592_v26, %v2591_v24  ;;  %v2604_v32 = vrot.slane %v2603_v29, 1  ;;  %v3413_v33 = vcombine.high %v3402_v30, %v3402_v30  ;;  %3987 = vst.msk [vmem:[%s5414_s28 + $0x30] sm:$0xf] %vm993_vm0, %v3402_v30  ;;  %v4457_v35 = vpop.f32.mrb[5].mxu1  ;;  %v3422_v36 = vsel %vm998_vm3, %v3402_v30, 0.0 }
 0x1eb   : > { %v3432_v37 = vmul.f32 %v3402_v30, %v3402_v30  ;;  %v3405_v38 = vpop.f32.mrb[6].mxu1 }
 0x1ec   : > { %v2594_v39 = vadd.f32 %v2593_v31, %v1852_v2  ;;  %v2605_v41 = vadd.f32 %v2604_v32, %v2603_v29  ;;  %3988 = vst.msk [vmem:[%s5414_s28 + $0x34] sm:$0xf] %vm993_vm0, %v3413_v33  ;;  %v3414_v43 = vcombine.high %v3405_v38, %v3405_v38  ;;  %3989 = vst.msk [vmem:[%s5414_s28 + $0x38] sm:$0xf] %vm993_vm0, %v3405_v38  ;;  %v3423_v44 = vsel %vm998_vm3, %v3405_v38, 0.0  ;;  %v4458_v45 = vpop.f32.mrb[7].mxu1 }
 0x1ed   : > { %v3424_v46 = vadd.f32 %v3423_v44, %v3422_v36  ;;  %v3433_v16 = vmul.f32 %v3405_v38, %v3405_v38  ;;  %v3434_v27 = vsel %vm998_vm3, %v3432_v37, 0.0 }
 0x1ee   : > { %v2606_v47 = vadd.f32 %v2605_v41, %v1864_v3  ;;  %3990 = vst.msk [vmem:[%s5414_s28 + $0x3c] sm:$0xf] %vm993_vm0, %v3414_v43 }
 0x1ef   : > { %v3425_v48 = vrot.slane %v3424_v46, 4  ;;  %v3435_v49 = vsel %vm998_vm3, %v3433_v16, 0.0 }
 0x1f0   : > { %v3436_v50 = vadd.f32 %v3435_v49, %v3434_v27 }
 0x1f1   : > { %v3426_v51 = vadd.f32 %v3425_v48, %v3424_v46 }
 0x1f2   : > { %v3437_v53 = vrot.slane %v3436_v50, 4 }
 0x1f3   : > { %v3427_v54 = vrot.slane %v3426_v51, 2 }
 0x1f4   : > { %v3438_v55 = vadd.f32 %v3437_v53, %v3436_v50 }
 0x1f5   : > { %v3428_v56 = vadd.f32 %v3427_v54, %v3426_v51 }
 0x1f6   : > { %v3439_v28 = vrot.slane %v3438_v55, 2 }
 0x1f7   : > { %v3429_v57 = vrot.slane %v3428_v56, 1 }
 0x1f8   : > { %v3440_v58 = vadd.f32 %v3439_v28, %v3438_v55 }
 0x1f9   : > { %v3430_v60 = vadd.f32 %v3429_v57, %v3428_v56 }
 0x1fa   : > { %v3441_v10 = vrot.slane %v3440_v58, 1 }
 0x1fb   : > { %v3431_v34 = vadd.f32 %v3430_v60, %v2594_v39 }
 0x1fc   : > { %v3442_v40 = vadd.f32 %v3441_v10, %v3440_v58 }
 0x1fd   : > { %3445 = vst.msk [vmem:[%s181_s5] sm:$0x1] %vm3444_vm4, %v3431_v34 }
 0x1fe   : > { %v3443_v42 = vadd.f32 %v3442_v40, %v2606_v47 }
 0x200   : > { %3446 = vst.msk [vmem:[%s181_s5 + $0x1] sm:$0x1] %vm3444_vm4, %v3443_v42 }
 0x201 PF: > { %s14_s12 = sadd.s32 1, %s4669_s12  }
 0x202   : > { %p11_p4 = scmp.ge.s32.totalorder %s14_s12, 6  }
 0x204   :  { %13 = sbr.rel (!%p11_p4) target bundleno = 1 (0x1), region = 90 }

</bundles_post_ra>
